<compile_context>
chip_gen: v7x
topology: tpu7x:2x2x1
jax: 0.10.0
libtpu: 0.0.40
codegen_flags: <defaults>
</compile_context>

<pallas_src>
import jax
import jax.numpy as jnp
from jax.experimental import pallas as pl
from jax.experimental.pallas import tpu as pltpu


_VMEM_LIMIT = 48 * 1024 * 1024  # headroom for v7x's 64 MiB physical VMEM


def _round_up(x, m):
    return ((x + m - 1) // m) * m


# ---------------------------------------------------------------------------
# Pallas kernels
# ---------------------------------------------------------------------------
def _conv_pool_kernel(x_ref, w_ref, scale_ref, bias_ref, o_ref):
    """Fused conv(matmul) + folded-BN affine + ReLU + 2x2 max-pool.

    x_ref:    (4, TM, K)  bf16  -- im2col patches, leading axis = pool-window slot
    w_ref:    (K, Cout)   bf16
    scale/bias: (1, Cout) f32   -- folded BatchNorm (inference)
    o_ref:    (TM, Cout)        -- pooled output rows
    """
    w = w_ref[...]
    scale = scale_ref[...]
    bias = bias_ref[...]

    def tap(i):
        acc = jnp.dot(x_ref[i], w, preferred_element_type=jnp.float32)
        return jnp.maximum(acc * scale + bias, 0.0)

    pooled = jnp.maximum(jnp.maximum(tap(0), tap(1)), jnp.maximum(tap(2), tap(3)))
    o_ref[...] = pooled.astype(o_ref.dtype)


def _fc_head_kernel(x_ref, w1_ref, b1_ref, w2_ref, b2_ref, o_ref):
    """Fused fc1 + ReLU + (dropout=identity, eval) + fc2."""
    h = jnp.dot(x_ref[...], w1_ref[...], preferred_element_type=jnp.float32)
    h = jnp.maximum(h + b1_ref[...], 0.0)
    # Dropout(p=0.3) is identity in eval/inference mode.
    o = jnp.dot(h.astype(w2_ref.dtype), w2_ref[...], preferred_element_type=jnp.float32)
    o_ref[...] = (o + b2_ref[...]).astype(o_ref.dtype)


# ---------------------------------------------------------------------------
# Glue: im2col (per 2x2 pool window) + layer wrappers
# ---------------------------------------------------------------------------
def _im2col_pool_patches(x):
    """x: (N,H,W,C) bf16 -> (4, N*Ho*Wo, 9*C); slot p = conv-output pixel (2ho+p//2, 2wo+p%2)."""
    N, H, W, C = x.shape
    Ho, Wo = H // 2, W // 2
    xp = jnp.pad(x, ((0, 0), (1, 1), (1, 1), (0, 0)))
    cols = []
    for kh in range(3):
        for kw in range(3):
            cols.append(xp[:, kh:kh + H, kw:kw + W, :])
    p = jnp.concatenate(cols, axis=-1)  # (N, H, W, 9*C), feature order (kh, kw, cin)
    slots = []
    for dh in range(2):
        for dw in range(2):
            slots.append(
                p[:, dh:2 * Ho:2, dw:2 * Wo:2, :].reshape(N * Ho * Wo, 9 * C)
            )
    return jnp.stack(slots, axis=0)


def conv_bn_relu_pool(x, wmat, scale, bias, *, tm=512):
    """3x3 conv (pad=1) + BN(inference) + ReLU + MaxPool(2,2), NHWC bf16 in/out."""
    N, H, W, _ = x.shape
    Ho, Wo = H // 2, W // 2
    K, Cout = wmat.shape
    patches = _im2col_pool_patches(x)           # (4, Mp, K) bf16
    Mp = N * Ho * Wo
    TM = min(tm, _round_up(Mp, 8))
    Mp_pad = _round_up(Mp, TM)
    if Mp_pad != Mp:
        patches = jnp.pad(patches, ((0, 0), (0, Mp_pad - Mp), (0, 0)))

    out = pl.pallas_call(
        _conv_pool_kernel,
        out_shape=jax.ShapeDtypeStruct((Mp_pad, Cout), jnp.bfloat16),
        grid=(Mp_pad // TM,),
        in_specs=[
            pl.BlockSpec((4, TM, K), lambda i: (0, i, 0)),
            pl.BlockSpec((K, Cout), lambda i: (0, 0)),
            pl.BlockSpec((1, Cout), lambda i: (0, 0)),
            pl.BlockSpec((1, Cout), lambda i: (0, 0)),
        ],
        out_specs=pl.BlockSpec((TM, Cout), lambda i: (i, 0)),
        compiler_params=pltpu.CompilerParams(
            dimension_semantics=("parallel",),
            vmem_limit_bytes=_VMEM_LIMIT,
        ),
    )(patches, wmat, scale, bias)
    return out[:Mp].reshape(N, Ho, Wo, Cout)


def fc_head(x, w1, b1, w2, b2, *, tm=512):
    """x: (M, 1152) bf16 -> logits (M, 10) f32, fc1+relu+fc2 fused."""
    M, K = x.shape
    H = w1.shape[1]
    O = w2.shape[1]
    TM = min(tm, _round_up(M, 8))
    M_pad = _round_up(M, TM)
    if M_pad != M:
        x = jnp.pad(x, ((0, M_pad - M), (0, 0)))

    out = pl.pallas_call(
        _fc_head_kernel,
        out_shape=jax.ShapeDtypeStruct((M_pad, O), jnp.float32),
        grid=(M_pad // TM,),
        in_specs=[
            pl.BlockSpec((TM, K), lambda i: (i, 0)),
            pl.BlockSpec((K, H), lambda i: (0, 0)),
            pl.BlockSpec((1, H), lambda i: (0, 0)),
            pl.BlockSpec((H, O), lambda i: (0, 0)),
            pl.BlockSpec((1, O), lambda i: (0, 0)),
        ],
        out_specs=pl.BlockSpec((TM, O), lambda i: (i, 0)),
        compiler_params=pltpu.CompilerParams(
            dimension_semantics=("parallel",),
            vmem_limit_bytes=_VMEM_LIMIT,
        ),
    )(x, w1, b1, w2, b2)
    return out[:M]


# ---------------------------------------------------------------------------
# Full forward
# ---------------------------------------------------------------------------
def cnn_forward(x_nchw, params):
    x = jnp.transpose(x_nchw, (0, 2, 3, 1)).astype(jnp.bfloat16)  # NCHW -> NHWC, bf16

    x = conv_bn_relu_pool(x, params["w1"], params["s1"], params["bb1"])  # (N,14,14,32)
    x = conv_bn_relu_pool(x, params["w2"], params["s2"], params["bb2"])  # (N, 7, 7,64)
    x = conv_bn_relu_pool(x, params["w3"], params["s3"], params["bb3"])  # (N, 3, 3,128)

    # Natural NHWC flatten; fc1_w rows were pre-permuted to accept this order,
    # so no runtime (0,3,1,2) transpose is needed.
    N = x.shape[0]
    x = x.reshape(N, 3 * 3 * 128)

    return fc_head(x, params["fc1_w"], params["fc1_b"],
                   params["fc2_w"], params["fc2_b"])  # (N, 10) f32


# ---------------------------------------------------------------------------
# Parameters: deterministic synthetic init (PyTorch-like), then one-time packing
# ---------------------------------------------------------------------------
def init_params(key):
    ks = jax.random.split(key, 16)

    def nrm(k, shape, s=0.05):
        return (jax.random.normal(k, shape, jnp.float32) * s).astype(jnp.float32)

    def bn(k, c):
        k1, k2, k3, k4 = jax.random.split(k, 4)
        gamma = 1.0 + nrm(k1, (c,), 0.1)
        beta = nrm(k2, (c,), 0.1)
        mean = nrm(k3, (c,), 0.1)
        var = 1.0 + jnp.abs(nrm(k4, (c,), 0.1))
        return (gamma, beta, mean, var)

    # NOTE: conv weights are HWIO; fc weights are stored as (in, out) and used as
    # x @ W.  PyTorch's nn.Linear stores (out, in) -- importing real PyTorch
    # weights would require a transpose.
    return {
        "w1": nrm(ks[0], (3, 3, 1, 32)),
        "b1": nrm(ks[1], (32,)),
        "bn1": bn(ks[2], 32),
        "w2": nrm(ks[3], (3, 3, 32, 64)),
        "b2": nrm(ks[4], (64,)),
        "bn2": bn(ks[5], 64),
        "w3": nrm(ks[6], (3, 3, 64, 128)),
        "b3": nrm(ks[7], (128,)),
        "bn3": bn(ks[8], 128),
        "fc1_w": nrm(ks[9], (128 * 3 * 3, 512), 0.02),  # rows ordered (c, h, w)
        "fc1_b": nrm(ks[10], (512,)),
        "fc2_w": nrm(ks[11], (512, 10), 0.02),
        "fc2_b": nrm(ks[12], (10,)),
    }


def prepare_params(raw, eps=1e-5):
    """One-time (outside jit): fold BN into scale/bias, cast MXU operands to bf16,
    and permute fc1 rows from PyTorch (c,h,w)-flatten to NHWC (h,w,c)-flatten."""
    def fold(w_hwio, conv_b, bn_stats):
        gamma, beta, mean, var = bn_stats
        kh, kw, cin, cout = w_hwio.shape
        scale = gamma / jnp.sqrt(var + eps)
        bias = beta + scale * (conv_b - mean)
        wmat = w_hwio.reshape(kh * kw * cin, cout).astype(jnp.bfloat16)
        return (wmat,
                scale.reshape(1, cout).astype(jnp.float32),
                bias.reshape(1, cout).astype(jnp.float32))

    w1, s1, b1 = fold(raw["w1"], raw["b1"], raw["bn1"])
    w2, s2, b2 = fold(raw["w2"], raw["b2"], raw["bn2"])
    w3, s3, b3 = fold(raw["w3"], raw["b3"], raw["bn3"])

    perm = jnp.arange(128 * 3 * 3).reshape(128, 3, 3).transpose(1, 2, 0).reshape(-1)
    fc1_w = raw["fc1_w"][perm].astype(jnp.bfloat16)

    return {
        "w1": w1, "s1": s1, "bb1": b1,
        "w2": w2, "s2": s2, "bb2": b2,
        "w3": w3, "s3": s3, "bb3": b3,
        "fc1_w": fc1_w,
        "fc1_b": raw["fc1_b"].reshape(1, -1).astype(jnp.float32),
        "fc2_w": raw["fc2_w"].astype(jnp.bfloat16),
        "fc2_b": raw["fc2_b"].reshape(1, -1).astype(jnp.float32),
    }


if __name__ == "__main__":
    key = jax.random.PRNGKey(0)
    kx, kp = jax.random.split(key)
    # fc1 (128*3*3 inputs) implies a 28x28 single-channel input (MNIST-like).
    x = jax.random.normal(kx, (2, 1, 28, 28), jnp.float32)
    params = prepare_params(init_params(kp))

    fwd = jax.jit(cnn_forward)
    out = fwd(x, params)
    jax.block_until_ready(out)
    assert out.shape == (2, 10) and out.dtype == jnp.float32
    print("KERNEL_OK")
</pallas_src>

<mosaic_0001>
module attributes {stable_mosaic.version = 11 : i64} {
  func.func @_conv_pool_kernel(%arg0: i32, %arg1: memref<4x392x9xbf16, #tpu.memory_space<vmem>>, %arg2: memref<9x32xbf16, #tpu.memory_space<vmem>>, %arg3: memref<1x32xf32, #tpu.memory_space<vmem>>, %arg4: memref<1x32xf32, #tpu.memory_space<vmem>>, %arg5: memref<392x32xbf16, #tpu.memory_space<vmem>>) attributes {dimension_semantics = [#tpu.dimension_semantics<parallel>], iteration_bounds = array<i64: 1>, scalar_prefetch = 0 : i64, scratch_operands = 0 : i64, tpu.core_type = #tpu.core_type<tc>, window_params = [{transform_indices = @transform_0, window_bounds = array<i64: 4, 392, 9>}, {pipeline_mode = #tpu.pipeline_mode<synchronous>, transform_indices = @transform_1, window_bounds = array<i64: 9, 32>}, {pipeline_mode = #tpu.pipeline_mode<synchronous>, transform_indices = @transform_2, window_bounds = array<i64: 1, 32>}, {pipeline_mode = #tpu.pipeline_mode<synchronous>, transform_indices = @transform_3, window_bounds = array<i64: 1, 32>}, {transform_indices = @transform_4, window_bounds = array<i64: 392, 32>}]} {
    %c0 = arith.constant 0 : index
    %c0_0 = arith.constant 0 : index
    %0 = vector.load %arg2[%c0, %c0_0] : memref<9x32xbf16, #tpu.memory_space<vmem>>, vector<9x32xbf16>
    %c0_1 = arith.constant 0 : index
    %c0_2 = arith.constant 0 : index
    %1 = vector.load %arg3[%c0_1, %c0_2] : memref<1x32xf32, #tpu.memory_space<vmem>>, vector<1x32xf32>
    %c0_3 = arith.constant 0 : index
    %c0_4 = arith.constant 0 : index
    %2 = vector.load %arg4[%c0_3, %c0_4] : memref<1x32xf32, #tpu.memory_space<vmem>>, vector<1x32xf32>
    %c0_5 = arith.constant 0 : index
    %c0_6 = arith.constant 0 : index
    %c0_7 = arith.constant 0 : index
    %3 = vector.load %arg1[%c0_5, %c0_6, %c0_7] : memref<4x392x9xbf16, #tpu.memory_space<vmem>>, vector<1x392x9xbf16>
    %4 = vector.shape_cast %3 : vector<1x392x9xbf16> to vector<392x9xbf16>
    %cst = arith.constant dense<0.000000e+00> : vector<392x32xf32>
    %5 = tpu.matmul %4, %0, %cst {dimension_numbers = #tpu.dot_dimension_numbers<[1], [0], [0], [1], [0, 0, 1, 1], [], []>} : vector<392x9xbf16>, vector<9x32xbf16>, vector<392x32xf32> -> vector<392x32xf32>
    %6 = vector.broadcast %1 : vector<1x32xf32> to vector<392x32xf32>
    %7 = arith.mulf %5, %6 : vector<392x32xf32>
    %8 = vector.broadcast %2 : vector<1x32xf32> to vector<392x32xf32>
    %9 = arith.addf %7, %8 : vector<392x32xf32>
    %cst_8 = arith.constant 0.000000e+00 : f32
    %10 = vector.broadcast %cst_8 : f32 to vector<392x32xf32>
    %11 = arith.maximumf %9, %10 : vector<392x32xf32>
    %c1 = arith.constant 1 : index
    %c0_9 = arith.constant 0 : index
    %c0_10 = arith.constant 0 : index
    %12 = vector.load %arg1[%c1, %c0_9, %c0_10] : memref<4x392x9xbf16, #tpu.memory_space<vmem>>, vector<1x392x9xbf16>
    %13 = vector.shape_cast %12 : vector<1x392x9xbf16> to vector<392x9xbf16>
    %cst_11 = arith.constant dense<0.000000e+00> : vector<392x32xf32>
    %14 = tpu.matmul %13, %0, %cst_11 {dimension_numbers = #tpu.dot_dimension_numbers<[1], [0], [0], [1], [0, 0, 1, 1], [], []>} : vector<392x9xbf16>, vector<9x32xbf16>, vector<392x32xf32> -> vector<392x32xf32>
    %15 = vector.broadcast %1 : vector<1x32xf32> to vector<392x32xf32>
    %16 = arith.mulf %14, %15 : vector<392x32xf32>
    %17 = vector.broadcast %2 : vector<1x32xf32> to vector<392x32xf32>
    %18 = arith.addf %16, %17 : vector<392x32xf32>
    %cst_12 = arith.constant 0.000000e+00 : f32
    %19 = vector.broadcast %cst_12 : f32 to vector<392x32xf32>
    %20 = arith.maximumf %18, %19 : vector<392x32xf32>
    %21 = arith.maximumf %11, %20 : vector<392x32xf32>
    %c2 = arith.constant 2 : index
    %c0_13 = arith.constant 0 : index
    %c0_14 = arith.constant 0 : index
    %22 = vector.load %arg1[%c2, %c0_13, %c0_14] : memref<4x392x9xbf16, #tpu.memory_space<vmem>>, vector<1x392x9xbf16>
    %23 = vector.shape_cast %22 : vector<1x392x9xbf16> to vector<392x9xbf16>
    %cst_15 = arith.constant dense<0.000000e+00> : vector<392x32xf32>
    %24 = tpu.matmul %23, %0, %cst_15 {dimension_numbers = #tpu.dot_dimension_numbers<[1], [0], [0], [1], [0, 0, 1, 1], [], []>} : vector<392x9xbf16>, vector<9x32xbf16>, vector<392x32xf32> -> vector<392x32xf32>
    %25 = vector.broadcast %1 : vector<1x32xf32> to vector<392x32xf32>
    %26 = arith.mulf %24, %25 : vector<392x32xf32>
    %27 = vector.broadcast %2 : vector<1x32xf32> to vector<392x32xf32>
    %28 = arith.addf %26, %27 : vector<392x32xf32>
    %cst_16 = arith.constant 0.000000e+00 : f32
    %29 = vector.broadcast %cst_16 : f32 to vector<392x32xf32>
    %30 = arith.maximumf %28, %29 : vector<392x32xf32>
    %c3 = arith.constant 3 : index
    %c0_17 = arith.constant 0 : index
    %c0_18 = arith.constant 0 : index
    %31 = vector.load %arg1[%c3, %c0_17, %c0_18] : memref<4x392x9xbf16, #tpu.memory_space<vmem>>, vector<1x392x9xbf16>
    %32 = vector.shape_cast %31 : vector<1x392x9xbf16> to vector<392x9xbf16>
    %cst_19 = arith.constant dense<0.000000e+00> : vector<392x32xf32>
    %33 = tpu.matmul %32, %0, %cst_19 {dimension_numbers = #tpu.dot_dimension_numbers<[1], [0], [0], [1], [0, 0, 1, 1], [], []>} : vector<392x9xbf16>, vector<9x32xbf16>, vector<392x32xf32> -> vector<392x32xf32>
    %34 = vector.broadcast %1 : vector<1x32xf32> to vector<392x32xf32>
    %35 = arith.mulf %33, %34 : vector<392x32xf32>
    %36 = vector.broadcast %2 : vector<1x32xf32> to vector<392x32xf32>
    %37 = arith.addf %35, %36 : vector<392x32xf32>
    %cst_20 = arith.constant 0.000000e+00 : f32
    %38 = vector.broadcast %cst_20 : f32 to vector<392x32xf32>
    %39 = arith.maximumf %37, %38 : vector<392x32xf32>
    %40 = arith.maximumf %30, %39 : vector<392x32xf32>
    %41 = arith.maximumf %21, %40 : vector<392x32xf32>
    %42 = arith.truncf %41 : vector<392x32xf32> to vector<392x32xbf16>
    %c0_21 = arith.constant 0 : index
    %c0_22 = arith.constant 0 : index
    %43 = vector.load %arg5[%c0_21, %c0_22] : memref<392x32xbf16, #tpu.memory_space<vmem>>, vector<392x32xbf16>
    tpu.vector_store %arg5[%c0_21, %c0_22], %42 {strides = array<i32>} : memref<392x32xbf16, #tpu.memory_space<vmem>>, vector<392x32xbf16>,
    return
  }
  func.func @transform_0(%arg0: i32) -> (i32, i32, i32) {
    %c0_i32 = arith.constant 0 : i32
    %c0_i32_0 = arith.constant 0 : i32
    %c0_i32_1 = arith.constant 0 : i32
    return %c0_i32, %arg0, %c0_i32_0 : i32, i32, i32
  }
  func.func @transform_1(%arg0: i32) -> (i32, i32) {
    %c0_i32 = arith.constant 0 : i32
    %c0_i32_0 = arith.constant 0 : i32
    %c0_i32_1 = arith.constant 0 : i32
    return %c0_i32, %c0_i32_0 : i32, i32
  }
  func.func @transform_2(%arg0: i32) -> (i32, i32) {
    %c0_i32 = arith.constant 0 : i32
    %c0_i32_0 = arith.constant 0 : i32
    %c0_i32_1 = arith.constant 0 : i32
    return %c0_i32, %c0_i32_0 : i32, i32
  }
  func.func @transform_3(%arg0: i32) -> (i32, i32) {
    %c0_i32 = arith.constant 0 : i32
    %c0_i32_0 = arith.constant 0 : i32
    %c0_i32_1 = arith.constant 0 : i32
    return %c0_i32, %c0_i32_0 : i32, i32
  }
  func.func @transform_4(%arg0: i32) -> (i32, i32) {
    %c0_i32 = arith.constant 0 : i32
    %c0_i32_0 = arith.constant 0 : i32
    return %arg0, %c0_i32 : i32, i32
  }
}

module attributes {stable_mosaic.version = 11 : i64} {
  func.func @_conv_pool_kernel(%arg0: i32, %arg1: memref<4x104x288xbf16, #tpu.memory_space<vmem>>, %arg2: memref<288x64xbf16, #tpu.memory_space<vmem>>, %arg3: memref<1x64xf32, #tpu.memory_space<vmem>>, %arg4: memref<1x64xf32, #tpu.memory_space<vmem>>, %arg5: memref<104x64xbf16, #tpu.memory_space<vmem>>) attributes {dimension_semantics = [#tpu.dimension_semantics<parallel>], iteration_bounds = array<i64: 1>, scalar_prefetch = 0 : i64, scratch_operands = 0 : i64, tpu.core_type = #tpu.core_type<tc>, window_params = [{transform_indices = @transform_0, window_bounds = array<i64: 4, 104, 288>}, {pipeline_mode = #tpu.pipeline_mode<synchronous>, transform_indices = @transform_1, window_bounds = array<i64: 288, 64>}, {pipeline_mode = #tpu.pipeline_mode<synchronous>, transform_indices = @transform_2, window_bounds = array<i64: 1, 64>}, {pipeline_mode = #tpu.pipeline_mode<synchronous>, transform_indices = @transform_3, window_bounds = array<i64: 1, 64>}, {transform_indices = @transform_4, window_bounds = array<i64: 104, 64>}]} {
    %c0 = arith.constant 0 : index
    %c0_0 = arith.constant 0 : index
    %0 = vector.load %arg2[%c0, %c0_0] : memref<288x64xbf16, #tpu.memory_space<vmem>>, vector<288x64xbf16>
    %c0_1 = arith.constant 0 : index
    %c0_2 = arith.constant 0 : index
    %1 = vector.load %arg3[%c0_1, %c0_2] : memref<1x64xf32, #tpu.memory_space<vmem>>, vector<1x64xf32>
    %c0_3 = arith.constant 0 : index
    %c0_4 = arith.constant 0 : index
    %2 = vector.load %arg4[%c0_3, %c0_4] : memref<1x64xf32, #tpu.memory_space<vmem>>, vector<1x64xf32>
    %c0_5 = arith.constant 0 : index
    %c0_6 = arith.constant 0 : index
    %c0_7 = arith.constant 0 : index
    %3 = vector.load %arg1[%c0_5, %c0_6, %c0_7] : memref<4x104x288xbf16, #tpu.memory_space<vmem>>, vector<1x104x288xbf16>
    %4 = vector.shape_cast %3 : vector<1x104x288xbf16> to vector<104x288xbf16>
    %cst = arith.constant dense<0.000000e+00> : vector<104x64xf32>
    %5 = tpu.matmul %4, %0, %cst {dimension_numbers = #tpu.dot_dimension_numbers<[1], [0], [0], [1], [0, 0, 1, 1], [], []>} : vector<104x288xbf16>, vector<288x64xbf16>, vector<104x64xf32> -> vector<104x64xf32>
    %6 = vector.broadcast %1 : vector<1x64xf32> to vector<104x64xf32>
    %7 = arith.mulf %5, %6 : vector<104x64xf32>
    %8 = vector.broadcast %2 : vector<1x64xf32> to vector<104x64xf32>
    %9 = arith.addf %7, %8 : vector<104x64xf32>
    %cst_8 = arith.constant 0.000000e+00 : f32
    %10 = vector.broadcast %cst_8 : f32 to vector<104x64xf32>
    %11 = arith.maximumf %9, %10 : vector<104x64xf32>
    %c1 = arith.constant 1 : index
    %c0_9 = arith.constant 0 : index
    %c0_10 = arith.constant 0 : index
    %12 = vector.load %arg1[%c1, %c0_9, %c0_10] : memref<4x104x288xbf16, #tpu.memory_space<vmem>>, vector<1x104x288xbf16>
    %13 = vector.shape_cast %12 : vector<1x104x288xbf16> to vector<104x288xbf16>
    %cst_11 = arith.constant dense<0.000000e+00> : vector<104x64xf32>
    %14 = tpu.matmul %13, %0, %cst_11 {dimension_numbers = #tpu.dot_dimension_numbers<[1], [0], [0], [1], [0, 0, 1, 1], [], []>} : vector<104x288xbf16>, vector<288x64xbf16>, vector<104x64xf32> -> vector<104x64xf32>
    %15 = vector.broadcast %1 : vector<1x64xf32> to vector<104x64xf32>
    %16 = arith.mulf %14, %15 : vector<104x64xf32>
    %17 = vector.broadcast %2 : vector<1x64xf32> to vector<104x64xf32>
    %18 = arith.addf %16, %17 : vector<104x64xf32>
    %cst_12 = arith.constant 0.000000e+00 : f32
    %19 = vector.broadcast %cst_12 : f32 to vector<104x64xf32>
    %20 = arith.maximumf %18, %19 : vector<104x64xf32>
    %21 = arith.maximumf %11, %20 : vector<104x64xf32>
    %c2 = arith.constant 2 : index
    %c0_13 = arith.constant 0 : index
    %c0_14 = arith.constant 0 : index
    %22 = vector.load %arg1[%c2, %c0_13, %c0_14] : memref<4x104x288xbf16, #tpu.memory_space<vmem>>, vector<1x104x288xbf16>
    %23 = vector.shape_cast %22 : vector<1x104x288xbf16> to vector<104x288xbf16>
    %cst_15 = arith.constant dense<0.000000e+00> : vector<104x64xf32>
    %24 = tpu.matmul %23, %0, %cst_15 {dimension_numbers = #tpu.dot_dimension_numbers<[1], [0], [0], [1], [0, 0, 1, 1], [], []>} : vector<104x288xbf16>, vector<288x64xbf16>, vector<104x64xf32> -> vector<104x64xf32>
    %25 = vector.broadcast %1 : vector<1x64xf32> to vector<104x64xf32>
    %26 = arith.mulf %24, %25 : vector<104x64xf32>
    %27 = vector.broadcast %2 : vector<1x64xf32> to vector<104x64xf32>
    %28 = arith.addf %26, %27 : vector<104x64xf32>
    %cst_16 = arith.constant 0.000000e+00 : f32
    %29 = vector.broadcast %cst_16 : f32 to vector<104x64xf32>
    %30 = arith.maximumf %28, %29 : vector<104x64xf32>
    %c3 = arith.constant 3 : index
    %c0_17 = arith.constant 0 : index
    %c0_18 = arith.constant 0 : index
    %31 = vector.load %arg1[%c3, %c0_17, %c0_18] : memref<4x104x288xbf16, #tpu.memory_space<vmem>>, vector<1x104x288xbf16>
    %32 = vector.shape_cast %31 : vector<1x104x288xbf16> to vector<104x288xbf16>
    %cst_19 = arith.constant dense<0.000000e+00> : vector<104x64xf32>
    %33 = tpu.matmul %32, %0, %cst_19 {dimension_numbers = #tpu.dot_dimension_numbers<[1], [0], [0], [1], [0, 0, 1, 1], [], []>} : vector<104x288xbf16>, vector<288x64xbf16>, vector<104x64xf32> -> vector<104x64xf32>
    %34 = vector.broadcast %1 : vector<1x64xf32> to vector<104x64xf32>
    %35 = arith.mulf %33, %34 : vector<104x64xf32>
    %36 = vector.broadcast %2 : vector<1x64xf32> to vector<104x64xf32>
    %37 = arith.addf %35, %36 : vector<104x64xf32>
    %cst_20 = arith.constant 0.000000e+00 : f32
    %38 = vector.broadcast %cst_20 : f32 to vector<104x64xf32>
    %39 = arith.maximumf %37, %38 : vector<104x64xf32>
    %40 = arith.maximumf %30, %39 : vector<104x64xf32>
    %41 = arith.maximumf %21, %40 : vector<104x64xf32>
    %42 = arith.truncf %41 : vector<104x64xf32> to vector<104x64xbf16>
    %c0_21 = arith.constant 0 : index
    %c0_22 = arith.constant 0 : index
    %43 = vector.load %arg5[%c0_21, %c0_22] : memref<104x64xbf16, #tpu.memory_space<vmem>>, vector<104x64xbf16>
    tpu.vector_store %arg5[%c0_21, %c0_22], %42 {strides = array<i32>} : memref<104x64xbf16, #tpu.memory_space<vmem>>, vector<104x64xbf16>,
    return
  }
  func.func @transform_0(%arg0: i32) -> (i32, i32, i32) {
    %c0_i32 = arith.constant 0 : i32
    %c0_i32_0 = arith.constant 0 : i32
    %c0_i32_1 = arith.constant 0 : i32
    return %c0_i32, %arg0, %c0_i32_0 : i32, i32, i32
  }
  func.func @transform_1(%arg0: i32) -> (i32, i32) {
    %c0_i32 = arith.constant 0 : i32
    %c0_i32_0 = arith.constant 0 : i32
    %c0_i32_1 = arith.constant 0 : i32
    return %c0_i32, %c0_i32_0 : i32, i32
  }
  func.func @transform_2(%arg0: i32) -> (i32, i32) {
    %c0_i32 = arith.constant 0 : i32
    %c0_i32_0 = arith.constant 0 : i32
    %c0_i32_1 = arith.constant 0 : i32
    return %c0_i32, %c0_i32_0 : i32, i32
  }
  func.func @transform_3(%arg0: i32) -> (i32, i32) {
    %c0_i32 = arith.constant 0 : i32
    %c0_i32_0 = arith.constant 0 : i32
    %c0_i32_1 = arith.constant 0 : i32
    return %c0_i32, %c0_i32_0 : i32, i32
  }
  func.func @transform_4(%arg0: i32) -> (i32, i32) {
    %c0_i32 = arith.constant 0 : i32
    %c0_i32_0 = arith.constant 0 : i32
    return %arg0, %c0_i32 : i32, i32
  }
}

module attributes {stable_mosaic.version = 11 : i64} {
  func.func @_conv_pool_kernel(%arg0: i32, %arg1: memref<4x24x576xbf16, #tpu.memory_space<vmem>>, %arg2: memref<576x128xbf16, #tpu.memory_space<vmem>>, %arg3: memref<1x128xf32, #tpu.memory_space<vmem>>, %arg4: memref<1x128xf32, #tpu.memory_space<vmem>>, %arg5: memref<24x128xbf16, #tpu.memory_space<vmem>>) attributes {dimension_semantics = [#tpu.dimension_semantics<parallel>], iteration_bounds = array<i64: 1>, scalar_prefetch = 0 : i64, scratch_operands = 0 : i64, tpu.core_type = #tpu.core_type<tc>, window_params = [{transform_indices = @transform_0, window_bounds = array<i64: 4, 24, 576>}, {pipeline_mode = #tpu.pipeline_mode<synchronous>, transform_indices = @transform_1, window_bounds = array<i64: 576, 128>}, {pipeline_mode = #tpu.pipeline_mode<synchronous>, transform_indices = @transform_2, window_bounds = array<i64: 1, 128>}, {pipeline_mode = #tpu.pipeline_mode<synchronous>, transform_indices = @transform_3, window_bounds = array<i64: 1, 128>}, {transform_indices = @transform_4, window_bounds = array<i64: 24, 128>}]} {
    %c0 = arith.constant 0 : index
    %c0_0 = arith.constant 0 : index
    %0 = vector.load %arg2[%c0, %c0_0] : memref<576x128xbf16, #tpu.memory_space<vmem>>, vector<576x128xbf16>
    %c0_1 = arith.constant 0 : index
    %c0_2 = arith.constant 0 : index
    %1 = vector.load %arg3[%c0_1, %c0_2] : memref<1x128xf32, #tpu.memory_space<vmem>>, vector<1x128xf32>
    %c0_3 = arith.constant 0 : index
    %c0_4 = arith.constant 0 : index
    %2 = vector.load %arg4[%c0_3, %c0_4] : memref<1x128xf32, #tpu.memory_space<vmem>>, vector<1x128xf32>
    %c0_5 = arith.constant 0 : index
    %c0_6 = arith.constant 0 : index
    %c0_7 = arith.constant 0 : index
    %3 = vector.load %arg1[%c0_5, %c0_6, %c0_7] : memref<4x24x576xbf16, #tpu.memory_space<vmem>>, vector<1x24x576xbf16>
    %4 = vector.shape_cast %3 : vector<1x24x576xbf16> to vector<24x576xbf16>
    %cst = arith.constant dense<0.000000e+00> : vector<24x128xf32>
    %5 = tpu.matmul %4, %0, %cst {dimension_numbers = #tpu.dot_dimension_numbers<[1], [0], [0], [1], [0, 0, 1, 1], [], []>} : vector<24x576xbf16>, vector<576x128xbf16>, vector<24x128xf32> -> vector<24x128xf32>
    %6 = vector.broadcast %1 : vector<1x128xf32> to vector<24x128xf32>
    %7 = arith.mulf %5, %6 : vector<24x128xf32>
    %8 = vector.broadcast %2 : vector<1x128xf32> to vector<24x128xf32>
    %9 = arith.addf %7, %8 : vector<24x128xf32>
    %cst_8 = arith.constant 0.000000e+00 : f32
    %10 = vector.broadcast %cst_8 : f32 to vector<24x128xf32>
    %11 = arith.maximumf %9, %10 : vector<24x128xf32>
    %c1 = arith.constant 1 : index
    %c0_9 = arith.constant 0 : index
    %c0_10 = arith.constant 0 : index
    %12 = vector.load %arg1[%c1, %c0_9, %c0_10] : memref<4x24x576xbf16, #tpu.memory_space<vmem>>, vector<1x24x576xbf16>
    %13 = vector.shape_cast %12 : vector<1x24x576xbf16> to vector<24x576xbf16>
    %cst_11 = arith.constant dense<0.000000e+00> : vector<24x128xf32>
    %14 = tpu.matmul %13, %0, %cst_11 {dimension_numbers = #tpu.dot_dimension_numbers<[1], [0], [0], [1], [0, 0, 1, 1], [], []>} : vector<24x576xbf16>, vector<576x128xbf16>, vector<24x128xf32> -> vector<24x128xf32>
    %15 = vector.broadcast %1 : vector<1x128xf32> to vector<24x128xf32>
    %16 = arith.mulf %14, %15 : vector<24x128xf32>
    %17 = vector.broadcast %2 : vector<1x128xf32> to vector<24x128xf32>
    %18 = arith.addf %16, %17 : vector<24x128xf32>
    %cst_12 = arith.constant 0.000000e+00 : f32
    %19 = vector.broadcast %cst_12 : f32 to vector<24x128xf32>
    %20 = arith.maximumf %18, %19 : vector<24x128xf32>
    %21 = arith.maximumf %11, %20 : vector<24x128xf32>
    %c2 = arith.constant 2 : index
    %c0_13 = arith.constant 0 : index
    %c0_14 = arith.constant 0 : index
    %22 = vector.load %arg1[%c2, %c0_13, %c0_14] : memref<4x24x576xbf16, #tpu.memory_space<vmem>>, vector<1x24x576xbf16>
    %23 = vector.shape_cast %22 : vector<1x24x576xbf16> to vector<24x576xbf16>
    %cst_15 = arith.constant dense<0.000000e+00> : vector<24x128xf32>
    %24 = tpu.matmul %23, %0, %cst_15 {dimension_numbers = #tpu.dot_dimension_numbers<[1], [0], [0], [1], [0, 0, 1, 1], [], []>} : vector<24x576xbf16>, vector<576x128xbf16>, vector<24x128xf32> -> vector<24x128xf32>
    %25 = vector.broadcast %1 : vector<1x128xf32> to vector<24x128xf32>
    %26 = arith.mulf %24, %25 : vector<24x128xf32>
    %27 = vector.broadcast %2 : vector<1x128xf32> to vector<24x128xf32>
    %28 = arith.addf %26, %27 : vector<24x128xf32>
    %cst_16 = arith.constant 0.000000e+00 : f32
    %29 = vector.broadcast %cst_16 : f32 to vector<24x128xf32>
    %30 = arith.maximumf %28, %29 : vector<24x128xf32>
    %c3 = arith.constant 3 : index
    %c0_17 = arith.constant 0 : index
    %c0_18 = arith.constant 0 : index
    %31 = vector.load %arg1[%c3, %c0_17, %c0_18] : memref<4x24x576xbf16, #tpu.memory_space<vmem>>, vector<1x24x576xbf16>
    %32 = vector.shape_cast %31 : vector<1x24x576xbf16> to vector<24x576xbf16>
    %cst_19 = arith.constant dense<0.000000e+00> : vector<24x128xf32>
    %33 = tpu.matmul %32, %0, %cst_19 {dimension_numbers = #tpu.dot_dimension_numbers<[1], [0], [0], [1], [0, 0, 1, 1], [], []>} : vector<24x576xbf16>, vector<576x128xbf16>, vector<24x128xf32> -> vector<24x128xf32>
    %34 = vector.broadcast %1 : vector<1x128xf32> to vector<24x128xf32>
    %35 = arith.mulf %33, %34 : vector<24x128xf32>
    %36 = vector.broadcast %2 : vector<1x128xf32> to vector<24x128xf32>
    %37 = arith.addf %35, %36 : vector<24x128xf32>
    %cst_20 = arith.constant 0.000000e+00 : f32
    %38 = vector.broadcast %cst_20 : f32 to vector<24x128xf32>
    %39 = arith.maximumf %37, %38 : vector<24x128xf32>
    %40 = arith.maximumf %30, %39 : vector<24x128xf32>
    %41 = arith.maximumf %21, %40 : vector<24x128xf32>
    %42 = arith.truncf %41 : vector<24x128xf32> to vector<24x128xbf16>
    %c0_21 = arith.constant 0 : index
    %c0_22 = arith.constant 0 : index
    %43 = vector.load %arg5[%c0_21, %c0_22] : memref<24x128xbf16, #tpu.memory_space<vmem>>, vector<24x128xbf16>
    tpu.vector_store %arg5[%c0_21, %c0_22], %42 {strides = array<i32>} : memref<24x128xbf16, #tpu.memory_space<vmem>>, vector<24x128xbf16>,
    return
  }
  func.func @transform_0(%arg0: i32) -> (i32, i32, i32) {
    %c0_i32 = arith.constant 0 : i32
    %c0_i32_0 = arith.constant 0 : i32
    %c0_i32_1 = arith.constant 0 : i32
    return %c0_i32, %arg0, %c0_i32_0 : i32, i32, i32
  }
  func.func @transform_1(%arg0: i32) -> (i32, i32) {
    %c0_i32 = arith.constant 0 : i32
    %c0_i32_0 = arith.constant 0 : i32
    %c0_i32_1 = arith.constant 0 : i32
    return %c0_i32, %c0_i32_0 : i32, i32
  }
  func.func @transform_2(%arg0: i32) -> (i32, i32) {
    %c0_i32 = arith.constant 0 : i32
    %c0_i32_0 = arith.constant 0 : i32
    %c0_i32_1 = arith.constant 0 : i32
    return %c0_i32, %c0_i32_0 : i32, i32
  }
  func.func @transform_3(%arg0: i32) -> (i32, i32) {
    %c0_i32 = arith.constant 0 : i32
    %c0_i32_0 = arith.constant 0 : i32
    %c0_i32_1 = arith.constant 0 : i32
    return %c0_i32, %c0_i32_0 : i32, i32
  }
  func.func @transform_4(%arg0: i32) -> (i32, i32) {
    %c0_i32 = arith.constant 0 : i32
    %c0_i32_0 = arith.constant 0 : i32
    return %arg0, %c0_i32 : i32, i32
  }
}

module attributes {stable_mosaic.version = 11 : i64} {
  func.func @_fc_head_kernel(%arg0: i32, %arg1: memref<8x1152xbf16, #tpu.memory_space<vmem>>, %arg2: memref<1152x512xbf16, #tpu.memory_space<vmem>>, %arg3: memref<1x512xf32, #tpu.memory_space<vmem>>, %arg4: memref<512x10xbf16, #tpu.memory_space<vmem>>, %arg5: memref<1x10xf32, #tpu.memory_space<vmem>>, %arg6: memref<8x10xf32, #tpu.memory_space<vmem>>) attributes {dimension_semantics = [#tpu.dimension_semantics<parallel>], iteration_bounds = array<i64: 1>, scalar_prefetch = 0 : i64, scratch_operands = 0 : i64, tpu.core_type = #tpu.core_type<tc>, window_params = [{transform_indices = @transform_0, window_bounds = array<i64: 8, 1152>}, {pipeline_mode = #tpu.pipeline_mode<synchronous>, transform_indices = @transform_1, window_bounds = array<i64: 1152, 512>}, {pipeline_mode = #tpu.pipeline_mode<synchronous>, transform_indices = @transform_2, window_bounds = array<i64: 1, 512>}, {pipeline_mode = #tpu.pipeline_mode<synchronous>, transform_indices = @transform_3, window_bounds = array<i64: 512, 10>}, {pipeline_mode = #tpu.pipeline_mode<synchronous>, transform_indices = @transform_4, window_bounds = array<i64: 1, 10>}, {transform_indices = @transform_5, window_bounds = array<i64: 8, 10>}]} {
    %c0 = arith.constant 0 : index
    %c0_0 = arith.constant 0 : index
    %0 = vector.load %arg1[%c0, %c0_0] : memref<8x1152xbf16, #tpu.memory_space<vmem>>, vector<8x1152xbf16>
    %c0_1 = arith.constant 0 : index
    %c0_2 = arith.constant 0 : index
    %1 = vector.load %arg2[%c0_1, %c0_2] : memref<1152x512xbf16, #tpu.memory_space<vmem>>, vector<1152x512xbf16>
    %cst = arith.constant dense<0.000000e+00> : vector<8x512xf32>
    %2 = tpu.matmul %0, %1, %cst {dimension_numbers = #tpu.dot_dimension_numbers<[1], [0], [0], [1], [0, 0, 1, 1], [], []>} : vector<8x1152xbf16>, vector<1152x512xbf16>, vector<8x512xf32> -> vector<8x512xf32>
    %c0_3 = arith.constant 0 : index
    %c0_4 = arith.constant 0 : index
    %3 = vector.load %arg3[%c0_3, %c0_4] : memref<1x512xf32, #tpu.memory_space<vmem>>, vector<1x512xf32>
    %4 = vector.broadcast %3 : vector<1x512xf32> to vector<8x512xf32>
    %5 = arith.addf %2, %4 : vector<8x512xf32>
    %cst_5 = arith.constant 0.000000e+00 : f32
    %6 = vector.broadcast %cst_5 : f32 to vector<8x512xf32>
    %7 = arith.maximumf %5, %6 : vector<8x512xf32>
    %8 = arith.truncf %7 : vector<8x512xf32> to vector<8x512xbf16>
    %c0_6 = arith.constant 0 : index
    %c0_7 = arith.constant 0 : index
    %9 = vector.load %arg4[%c0_6, %c0_7] : memref<512x10xbf16, #tpu.memory_space<vmem>>, vector<512x10xbf16>
    %cst_8 = arith.constant dense<0.000000e+00> : vector<8x10xf32>
    %10 = tpu.matmul %8, %9, %cst_8 {dimension_numbers = #tpu.dot_dimension_numbers<[1], [0], [0], [1], [0, 0, 1, 1], [], []>} : vector<8x512xbf16>, vector<512x10xbf16>, vector<8x10xf32> -> vector<8x10xf32>
    %c0_9 = arith.constant 0 : index
    %c0_10 = arith.constant 0 : index
    %11 = vector.load %arg5[%c0_9, %c0_10] : memref<1x10xf32, #tpu.memory_space<vmem>>, vector<1x10xf32>
    %12 = vector.broadcast %11 : vector<1x10xf32> to vector<8x10xf32>
    %13 = arith.addf %10, %12 : vector<8x10xf32>
    %c0_11 = arith.constant 0 : index
    %c0_12 = arith.constant 0 : index
    %14 = vector.load %arg6[%c0_11, %c0_12] : memref<8x10xf32, #tpu.memory_space<vmem>>, vector<8x10xf32>
    tpu.vector_store %arg6[%c0_11, %c0_12], %13 {strides = array<i32>} : memref<8x10xf32, #tpu.memory_space<vmem>>, vector<8x10xf32>,
    return
  }
  func.func @transform_0(%arg0: i32) -> (i32, i32) {
    %c0_i32 = arith.constant 0 : i32
    %c0_i32_0 = arith.constant 0 : i32
    return %arg0, %c0_i32 : i32, i32
  }
  func.func @transform_1(%arg0: i32) -> (i32, i32) {
    %c0_i32 = arith.constant 0 : i32
    %c0_i32_0 = arith.constant 0 : i32
    %c0_i32_1 = arith.constant 0 : i32
    return %c0_i32, %c0_i32_0 : i32, i32
  }
  func.func @transform_2(%arg0: i32) -> (i32, i32) {
    %c0_i32 = arith.constant 0 : i32
    %c0_i32_0 = arith.constant 0 : i32
    %c0_i32_1 = arith.constant 0 : i32
    return %c0_i32, %c0_i32_0 : i32, i32
  }
  func.func @transform_3(%arg0: i32) -> (i32, i32) {
    %c0_i32 = arith.constant 0 : i32
    %c0_i32_0 = arith.constant 0 : i32
    %c0_i32_1 = arith.constant 0 : i32
    return %c0_i32, %c0_i32_0 : i32, i32
  }
  func.func @transform_4(%arg0: i32) -> (i32, i32) {
    %c0_i32 = arith.constant 0 : i32
    %c0_i32_0 = arith.constant 0 : i32
    %c0_i32_1 = arith.constant 0 : i32
    return %c0_i32, %c0_i32_0 : i32, i32
  }
  func.func @transform_5(%arg0: i32) -> (i32, i32) {
    %c0_i32 = arith.constant 0 : i32
    %c0_i32_0 = arith.constant 0 : i32
    return %arg0, %c0_i32 : i32, i32
  }
}

</mosaic_0001>

<bundles_post_ra>
// kernel: cnn_forward.4
= control target key start
LH: loop header
LB: loop body
LE: loop exit
PB: predicated region body
PF: predicated region fallthrough
CT: control target
= control target key end

     0   :  { %vm275_vm0 = vcmask 1043456   ;;  %vm276_vm1 = vcmask 1044480   ;;  %v4020_v0 = vmov 0.0   ;;  %v4021_v2 = vmov 65535   ;;  %s5420_s1 = inlined_call_operand.vmem [shape: bf16[9,32], index: 1, kind: input, shape index: {}]   ;;  %s5421_s0 = inlined_call_operand.vmem [shape: bf16[4,392,9], index: 0, kind: input, shape index: {}]   ;;  %s5422_s2 = inlined_call_operand.vmem [shape: f32[1,32], index: 2, kind: input, shape index: {}]   ;;  %s5423_s3 = inlined_call_operand.vmem [shape: f32[1,32], index: 3, kind: input, shape index: {}]   ;;  %s5424_s4 = inlined_call_operand.vmem [shape: bf16[392,32], index: 4, kind: output, shape index: {}]  }
   0x1   :  { %3504 = vmatprep.subr.bf16.mxu0 %v4020_v0  ;;  %3606 = vmatprep.subr.bf16.mxu1 %v4020_v0  ;;  %v3915_v1 = vld [vmem:[%s5420_s1] sm:$0x1f]   ;;  %v277_v3 = vsel %vm275_vm0, 4294967295, %v4021_v2  ;;  %vm4022_vm2 = vmmov 0   ;;  %vm199_vm3 = vcmask 72704   ;;  %v3918_v8 = vld [vmem:[%s5421_s0 + $0x8] sm:$0xff]  }
   0x2   :  { %v278_v4 = vsel %vm276_vm1, %v277_v3, 0  ;;  %3506 = vmatprep.mubr.msk.bf16.mxu0 %vm4022_vm2, %v4020_v0  ;;  %3608 = vmatprep.mubr.msk.bf16.mxu1 %vm4022_vm2, %v4020_v0  ;;  %v3916_v5 = vld [vmem:[%s5421_s0] sm:$0xff]   ;;  %v3919_v9 = vld [vmem:[%s5421_s0 + $0xcc] sm:$0xff]   ;;  %v3921_v11 = vld [vmem:[%s5421_s0 + $0xd4] sm:$0xff]   ;;  %vm2898_vm4 = vcmask 257024  }
   0x3   :  { %v280_v6 = vand.u32 %v3915_v1, %v278_v4  ;;  %v3917_v7 = vld [vmem:[%s5421_s0 + $0xc4] sm:$0xff]   ;;  %v3920_v10 = vld [vmem:[%s5421_s0 + $0x10] sm:$0xff]   ;;  %v3922_v12 = vld [vmem:[%s5421_s0 + $0x18] sm:$0xff]  }
   0x4   :  { %v3923_v13 = vld [vmem:[%s5421_s0 + $0xdc] sm:$0xff]   ;;  %v3925_v15 = vld [vmem:[%s5421_s0 + $0xe4] sm:$0xff]   ;;  %v3927_v17 = vld [vmem:[%s5421_s0 + $0xec] sm:$0xff]  }
   0x5   :  { %3505 = vmatpush3.bf16.msra.mxu0 %v280_v6  ;;  %3607 = vmatpush3.bf16.msra.mxu1 %v280_v6  ;;  %v3924_v14 = vld [vmem:[%s5421_s0 + $0x20] sm:$0xff]   ;;  %v3926_v16 = vld [vmem:[%s5421_s0 + $0x28] sm:$0xff]   ;;  %v3928_v18 = vld [vmem:[%s5421_s0 + $0x30] sm:$0xff]  }
   0x6   :  { %3708 = vmatprep.subr.bf16.mxu0 %v4020_v0  ;;  %3810 = vmatprep.subr.bf16.mxu1 %v4020_v0  ;;  %v3929_v19 = vld [vmem:[%s5421_s0 + $0xf4] sm:$0xff]   ;;  %v3931_v21 = vld [vmem:[%s5421_s0 + $0xfc] sm:$0xff]   ;;  %v3933_v23 = vld [vmem:[%s5421_s0 + $0x104] sm:$0xff]  }
   0x7   :  { %v3930_v20 = vld [vmem:[%s5421_s0 + $0x38] sm:$0xff]   ;;  %v3932_v22 = vld [vmem:[%s5421_s0 + $0x40] sm:$0xff]   ;;  %v3934_v24 = vld [vmem:[%s5421_s0 + $0x48] sm:$0xff]  }
   0x8   :  { %3507 = vmatmul.mubr.msk.bf16.vlgmr.msra.gmra.mrb[0].mxu0 %vm199_vm3, %v3916_v5  ;;  %3609 = vmatmul.mubr.msk.bf16.vlgmr.msra.gmra.mrb[0].mxu1 %vm199_vm3, %v3917_v7  ;;  %v3935_v25 = vld [vmem:[%s5421_s0 + $0x10c] sm:$0xff]   ;;  %v3937_v27 = vld [vmem:[%s5421_s0 + $0x114] sm:$0xff]   ;;  %v3939_v29 = vld [vmem:[%s5421_s0 + $0x11c] sm:$0xff]  }
   0x9   :  { %3709 = vmatpush3.bf16.msra.mxu0 %v280_v6  ;;  %3811 = vmatpush3.bf16.msra.mxu1 %v280_v6  ;;  %v3936_v26 = vld [vmem:[%s5421_s0 + $0x50] sm:$0xff]   ;;  %v3938_v28 = vld [vmem:[%s5421_s0 + $0x58] sm:$0xff]   ;;  %v3940_v30 = vld [vmem:[%s5421_s0 + $0x60] sm:$0xff]  }
   0xa   :  { %3510 = vmatprep.mubr.msk.bf16.mxu0 %vm4022_vm2, %v4020_v0  ;;  %3612 = vmatprep.mubr.msk.bf16.mxu1 %vm4022_vm2, %v4020_v0  ;;  %v3941_v31 = vld [vmem:[%s5421_s0 + $0x124] sm:$0xff]   ;;  %v3943_v33 = vld [vmem:[%s5421_s0 + $0x12c] sm:$0xff]   ;;  %v3945_v35 = vld [vmem:[%s5421_s0 + $0x134] sm:$0xff]  }
   0xb   :  { %v3942_v32 = vld [vmem:[%s5421_s0 + $0x68] sm:$0xff]   ;;  %v3944_v34 = vld [vmem:[%s5421_s0 + $0x70] sm:$0xff]   ;;  %v3946_v36 = vld [vmem:[%s5421_s0 + $0x78] sm:$0xff]  }
   0xc   :  { %v3947_v37 = vld [vmem:[%s5421_s0 + $0x13c] sm:$0xff]   ;;  %v3949_v39 = vld [vmem:[%s5421_s0 + $0x144] sm:$0xff]   ;;  %v3951_v41 = vld [vmem:[%s5421_s0 + $0x14c] sm:$0xff]  }
   0xd   :  { %v3948_v38 = vld [vmem:[%s5421_s0 + $0x80] sm:$0xff]   ;;  %v3950_v40 = vld [vmem:[%s5421_s0 + $0x88] sm:$0xff]   ;;  %v3952_v42 = vld [vmem:[%s5421_s0 + $0x90] sm:$0xff]  }
   0xe   :  { %v3953_v43 = vld [vmem:[%s5421_s0 + $0x154] sm:$0xff]   ;;  %v3955_v45 = vld [vmem:[%s5421_s0 + $0x15c] sm:$0xff]   ;;  %v3957_v47 = vld [vmem:[%s5421_s0 + $0x164] sm:$0xff]  }
   0xf   :  { %v3954_v44 = vld [vmem:[%s5421_s0 + $0x98] sm:$0xff]   ;;  %v3956_v46 = vld [vmem:[%s5421_s0 + $0xa0] sm:$0xff]   ;;  %v3958_v48 = vld [vmem:[%s5421_s0 + $0xa8] sm:$0xff]  }
  0x10   :  { %3511 = vmatmul.mubr.msk.bf16.gmra.mrb[4].mxu0 %vm199_vm3, %v3918_v8  ;;  %3613 = vmatmul.mubr.msk.bf16.gmra.mrb[4].mxu1 %vm199_vm3, %v3919_v9  ;;  %v3959_v49 = vld [vmem:[%s5421_s0 + $0x16c] sm:$0xff]   ;;  %v3961_v51 = vld [vmem:[%s5421_s0 + $0x174] sm:$0xff]   ;;  %v3963_v53 = vld [vmem:[%s5421_s0 + $0x17c] sm:$0xff]  }
  0x11   :  { %3514 = vmatprep.mubr.msk.bf16.mxu0 %vm4022_vm2, %v4020_v0  ;;  %3616 = vmatprep.mubr.msk.bf16.mxu1 %vm4022_vm2, %v4020_v0  ;;  %v3960_v50 = vld [vmem:[%s5421_s0 + $0xb0] sm:$0xff]   ;;  %v3962_v52 = vld [vmem:[%s5421_s0 + $0xb8] sm:$0xff]   ;;  %v3964_v54 = vld [vmem:[%s5421_s0 + $0xc0] ss:$0 sps:$4 sm:$0xff]  }
  0x12   :  { %v3965_v55 = vld [vmem:[%s5421_s0 + $0x184] ss:$0 sps:$4 sm:$0xff]   ;;  %v3966_v56 = vld [vmem:[%s5421_s0 + $0x188] sm:$0xff]   ;;  %v3968_v58 = vld [vmem:[%s5421_s0 + $0x190] sm:$0xff]  }
  0x13   :  { %v3967_v57 = vld [vmem:[%s5421_s0 + $0x24c] sm:$0xff]   ;;  %v3969_v59 = vld [vmem:[%s5421_s0 + $0x254] sm:$0xff]   ;;  %v4382_v60 = vld [vmem:[%s5422_s2] ss:$0 sm:$0xff] }
  0x14   :  { %v4391_v61 = vld [vmem:[%s5423_s3] ss:$0 sm:$0xff]  ;;  %v3970_v5 = vld [vmem:[%s5421_s0 + $0x198] sm:$0xff]  }
  0x15   :  { %v3971_v6 = vld [vmem:[%s5421_s0 + $0x25c] sm:$0xff]  }
  0x18   :  { %3515 = vmatmul.mubr.msk.bf16.gmra.mrb[8].mxu0 %vm199_vm3, %v3920_v10  ;;  %3617 = vmatmul.mubr.msk.bf16.gmra.mrb[8].mxu1 %vm199_vm3, %v3921_v11 }
  0x19   :  { %3518 = vmatprep.mubr.msk.bf16.mxu0 %vm4022_vm2, %v4020_v0  ;;  %3620 = vmatprep.mubr.msk.bf16.mxu1 %vm4022_vm2, %v4020_v0 }
  0x20   :  { %3519 = vmatmul.mubr.msk.bf16.gmra.mrb[12].mxu0 %vm199_vm3, %v3922_v12  ;;  %3621 = vmatmul.mubr.msk.bf16.gmra.mrb[12].mxu1 %vm199_vm3, %v3923_v13 }
  0x21   :  { %3522 = vmatprep.mubr.msk.bf16.mxu0 %vm4022_vm2, %v4020_v0  ;;  %3624 = vmatprep.mubr.msk.bf16.mxu1 %vm4022_vm2, %v4020_v0 }
  0x28   :  { %3523 = vmatmul.mubr.msk.bf16.gmra.mrb[16].mxu0 %vm199_vm3, %v3924_v14  ;;  %3625 = vmatmul.mubr.msk.bf16.gmra.mrb[16].mxu1 %vm199_vm3, %v3925_v15 }
  0x29   :  { %3526 = vmatprep.mubr.msk.bf16.mxu0 %vm4022_vm2, %v4020_v0  ;;  %3628 = vmatprep.mubr.msk.bf16.mxu1 %vm4022_vm2, %v4020_v0 }
  0x30   :  { %3527 = vmatmul.mubr.msk.bf16.gmra.mrb[20].mxu0 %vm199_vm3, %v3926_v16  ;;  %3629 = vmatmul.mubr.msk.bf16.gmra.mrb[20].mxu1 %vm199_vm3, %v3927_v17 }
  0x31   :  { %3530 = vmatprep.mubr.msk.bf16.mxu0 %vm4022_vm2, %v4020_v0  ;;  %3632 = vmatprep.mubr.msk.bf16.mxu1 %vm4022_vm2, %v4020_v0 }
  0x38   :  { %3531 = vmatmul.mubr.msk.bf16.gmra.mrb[24].mxu0 %vm199_vm3, %v3928_v18  ;;  %3633 = vmatmul.mubr.msk.bf16.gmra.mrb[24].mxu1 %vm199_vm3, %v3929_v19 }
  0x39   :  { %3534 = vmatprep.mubr.msk.bf16.mxu0 %vm4022_vm2, %v4020_v0  ;;  %3636 = vmatprep.mubr.msk.bf16.mxu1 %vm4022_vm2, %v4020_v0 }
  0x40   :  { %3535 = vmatmul.mubr.msk.bf16.gmra.mrb[28].mxu0 %vm199_vm3, %v3930_v20  ;;  %3637 = vmatmul.mubr.msk.bf16.gmra.mrb[28].mxu1 %vm199_vm3, %v3931_v21 }
  0x41   :  { %3538 = vmatprep.mubr.msk.bf16.mxu0 %vm4022_vm2, %v4020_v0  ;;  %3640 = vmatprep.mubr.msk.bf16.mxu1 %vm4022_vm2, %v4020_v0 }
  0x48   :  { %3539 = vmatmul.mubr.msk.bf16.gmra.mrb[32].mxu0 %vm199_vm3, %v3932_v22  ;;  %3641 = vmatmul.mubr.msk.bf16.gmra.mrb[32].mxu1 %vm199_vm3, %v3933_v23 }
  0x49   :  { %3542 = vmatprep.mubr.msk.bf16.mxu0 %vm4022_vm2, %v4020_v0  ;;  %3644 = vmatprep.mubr.msk.bf16.mxu1 %vm4022_vm2, %v4020_v0 }
  0x50   :  { %3543 = vmatmul.mubr.msk.bf16.gmra.mrb[36].mxu0 %vm199_vm3, %v3934_v24  ;;  %3645 = vmatmul.mubr.msk.bf16.gmra.mrb[36].mxu1 %vm199_vm3, %v3935_v25 }
  0x51   :  { %3546 = vmatprep.mubr.msk.bf16.mxu0 %vm4022_vm2, %v4020_v0  ;;  %3648 = vmatprep.mubr.msk.bf16.mxu1 %vm4022_vm2, %v4020_v0 }
  0x58   :  { %3547 = vmatmul.mubr.msk.bf16.gmra.mrb[40].mxu0 %vm199_vm3, %v3936_v26  ;;  %3649 = vmatmul.mubr.msk.bf16.gmra.mrb[40].mxu1 %vm199_vm3, %v3937_v27 }
  0x59   :  { %3550 = vmatprep.mubr.msk.bf16.mxu0 %vm4022_vm2, %v4020_v0  ;;  %3652 = vmatprep.mubr.msk.bf16.mxu1 %vm4022_vm2, %v4020_v0 }
  0x60   :  { %3551 = vmatmul.mubr.msk.bf16.gmra.mrb[44].mxu0 %vm199_vm3, %v3938_v28  ;;  %3653 = vmatmul.mubr.msk.bf16.gmra.mrb[44].mxu1 %vm199_vm3, %v3939_v29  ;;  %v3972_v29 = vld [vmem:[%s5421_s0 + $0x1a0] sm:$0xff]  }
  0x61   :  { %3554 = vmatprep.mubr.msk.bf16.mxu0 %vm4022_vm2, %v4020_v0  ;;  %3656 = vmatprep.mubr.msk.bf16.mxu1 %vm4022_vm2, %v4020_v0 }
  0x68   :  { %3555 = vmatmul.mubr.msk.bf16.gmra.mrb[48].mxu0 %vm199_vm3, %v3940_v30  ;;  %3657 = vmatmul.mubr.msk.bf16.gmra.mrb[48].mxu1 %vm199_vm3, %v3941_v31  ;;  %v3973_v30 = vld [vmem:[%s5421_s0 + $0x264] sm:$0xff]  }
  0x69   :  { %3558 = vmatprep.mubr.msk.bf16.mxu0 %vm4022_vm2, %v4020_v0  ;;  %3660 = vmatprep.mubr.msk.bf16.mxu1 %vm4022_vm2, %v4020_v0 }
  0x70   :  { %3559 = vmatmul.mubr.msk.bf16.gmra.mrb[52].mxu0 %vm199_vm3, %v3942_v32  ;;  %3661 = vmatmul.mubr.msk.bf16.gmra.mrb[52].mxu1 %vm199_vm3, %v3943_v33 }
  0x71   :  { %3562 = vmatprep.mubr.msk.bf16.mxu0 %vm4022_vm2, %v4020_v0  ;;  %3664 = vmatprep.mubr.msk.bf16.mxu1 %vm4022_vm2, %v4020_v0 }
  0x78   :  { %3563 = vmatmul.mubr.msk.bf16.gmra.mrb[56].mxu0 %vm199_vm3, %v3944_v34  ;;  %3665 = vmatmul.mubr.msk.bf16.gmra.mrb[56].mxu1 %vm199_vm3, %v3945_v35 }
  0x79   :  { %3566 = vmatprep.mubr.msk.bf16.mxu0 %vm4022_vm2, %v4020_v0  ;;  %3668 = vmatprep.mubr.msk.bf16.mxu1 %vm4022_vm2, %v4020_v0 }
  0x80   :  { %3567 = vmatmul.mubr.msk.bf16.gmra.mrb[60].mxu0 %vm199_vm3, %v3946_v36  ;;  %3669 = vmatmul.mubr.msk.bf16.gmra.mrb[60].mxu1 %vm199_vm3, %v3947_v37 }
  0x81   :  { %3570 = vmatprep.mubr.msk.bf16.mxu0 %vm4022_vm2, %v4020_v0  ;;  %3672 = vmatprep.mubr.msk.bf16.mxu1 %vm4022_vm2, %v4020_v0 }
  0x88   :  { %3571 = vmatmul.mubr.msk.bf16.gmra.mrb[64].mxu0 %vm199_vm3, %v3948_v38  ;;  %3673 = vmatmul.mubr.msk.bf16.gmra.mrb[64].mxu1 %vm199_vm3, %v3949_v39 }
  0x89   :  { %3574 = vmatprep.mubr.msk.bf16.mxu0 %vm4022_vm2, %v4020_v0  ;;  %3676 = vmatprep.mubr.msk.bf16.mxu1 %vm4022_vm2, %v4020_v0 }
  0x90   :  { %3575 = vmatmul.mubr.msk.bf16.gmra.mrb[68].mxu0 %vm199_vm3, %v3950_v40  ;;  %3677 = vmatmul.mubr.msk.bf16.gmra.mrb[68].mxu1 %vm199_vm3, %v3951_v41 }
  0x91   :  { %3578 = vmatprep.mubr.msk.bf16.mxu0 %vm4022_vm2, %v4020_v0  ;;  %3680 = vmatprep.mubr.msk.bf16.mxu1 %vm4022_vm2, %v4020_v0 }
  0x98   :  { %3579 = vmatmul.mubr.msk.bf16.gmra.mrb[72].mxu0 %vm199_vm3, %v3952_v42  ;;  %3681 = vmatmul.mubr.msk.bf16.gmra.mrb[72].mxu1 %vm199_vm3, %v3953_v43 }
  0x99   :  { %3582 = vmatprep.mubr.msk.bf16.mxu0 %vm4022_vm2, %v4020_v0  ;;  %3684 = vmatprep.mubr.msk.bf16.mxu1 %vm4022_vm2, %v4020_v0 }
  0xa0   :  { %3583 = vmatmul.mubr.msk.bf16.gmra.mrb[76].mxu0 %vm199_vm3, %v3954_v44  ;;  %3685 = vmatmul.mubr.msk.bf16.gmra.mrb[76].mxu1 %vm199_vm3, %v3955_v45 }
  0xa1   :  { %3586 = vmatprep.mubr.msk.bf16.mxu0 %vm4022_vm2, %v4020_v0  ;;  %3688 = vmatprep.mubr.msk.bf16.mxu1 %vm4022_vm2, %v4020_v0 }
  0xa8   :  { %3587 = vmatmul.mubr.msk.bf16.gmra.mrb[80].mxu0 %vm199_vm3, %v3956_v46  ;;  %3689 = vmatmul.mubr.msk.bf16.gmra.mrb[80].mxu1 %vm199_vm3, %v3957_v47 }
  0xa9   :  { %3590 = vmatprep.mubr.msk.bf16.mxu0 %vm4022_vm2, %v4020_v0  ;;  %3692 = vmatprep.mubr.msk.bf16.mxu1 %vm4022_vm2, %v4020_v0 }
  0xb0   :  { %3591 = vmatmul.mubr.msk.bf16.gmra.mrb[84].mxu0 %vm199_vm3, %v3958_v48  ;;  %3693 = vmatmul.mubr.msk.bf16.gmra.mrb[84].mxu1 %vm199_vm3, %v3959_v49 }
  0xb1   :  { %3594 = vmatprep.mubr.msk.bf16.mxu0 %vm4022_vm2, %v4020_v0  ;;  %3696 = vmatprep.mubr.msk.bf16.mxu1 %vm4022_vm2, %v4020_v0 }
  0xb8   :  { %3595 = vmatmul.mubr.msk.bf16.gmra.mrb[88].mxu0 %vm199_vm3, %v3960_v50  ;;  %3697 = vmatmul.mubr.msk.bf16.gmra.mrb[88].mxu1 %vm199_vm3, %v3961_v51 }
  0xb9   :  { %3598 = vmatprep.mubr.msk.bf16.mxu0 %vm4022_vm2, %v4020_v0  ;;  %3700 = vmatprep.mubr.msk.bf16.mxu1 %vm4022_vm2, %v4020_v0 }
  0xc0   :  { %3599 = vmatmul.mubr.msk.bf16.gmra.mrb[92].mxu0 %vm199_vm3, %v3962_v52  ;;  %3701 = vmatmul.mubr.msk.bf16.gmra.mrb[92].mxu1 %vm199_vm3, %v3963_v53  ;;  %v3974_v53 = vld [vmem:[%s5421_s0 + $0x1a8] sm:$0xff]  }
  0xc1   :  { %3602 = vmatprep.mubr.msk.bf16.mxu0 %vm4022_vm2, %v4020_v0  ;;  %3704 = vmatprep.mubr.msk.bf16.mxu1 %vm4022_vm2, %v4020_v0 }
  0xc8   :  { %3603 = vmatmul.mubr.msk.bf16.gmra.mrb[96].mxu0 %vm199_vm3, %v3964_v54  ;;  %3705 = vmatmul.mubr.msk.bf16.gmra.mrb[96].mxu1 %vm199_vm3, %v3965_v55  ;;  %v3975_v54 = vld [vmem:[%s5421_s0 + $0x26c] sm:$0xff]  }
  0xc9   :  { %3710 = vmatprep.mubr.msk.bf16.mxu0 %vm4022_vm2, %v4020_v0  ;;  %3812 = vmatprep.mubr.msk.bf16.mxu1 %vm4022_vm2, %v4020_v0 }
  0xd0   :  { %3711 = vmatmul.mubr.msk.bf16.vlgmr.msra.gmra.mrb[100].mxu0 %vm199_vm3, %v3966_v56  ;;  %3813 = vmatmul.mubr.msk.bf16.vlgmr.msra.gmra.mrb[100].mxu1 %vm199_vm3, %v3967_v57 }
  0xd1   :  { %3714 = vmatprep.mubr.msk.bf16.mxu0 %vm4022_vm2, %v4020_v0  ;;  %3816 = vmatprep.mubr.msk.bf16.mxu1 %vm4022_vm2, %v4020_v0 }
  0xd8   :  { %3715 = vmatmul.mubr.msk.bf16.gmra.mrb[104].mxu0 %vm199_vm3, %v3968_v58  ;;  %3817 = vmatmul.mubr.msk.bf16.gmra.mrb[104].mxu1 %vm199_vm3, %v3969_v59 }
  0xd9   :  { %3718 = vmatprep.mubr.msk.bf16.mxu0 %vm4022_vm2, %v4020_v0  ;;  %3820 = vmatprep.mubr.msk.bf16.mxu1 %vm4022_vm2, %v4020_v0 }
  0xdb   :  { %v316_v62 = vpop.f32.mrb[0].mxu0  ;;  %v955_v63 = vpop.f32.mrb[0].mxu1 }
  0xdc   :  { %v520_v1 = vmul.f32 %v4382_v60, %v316_v62  ;;  %v1153_v2 = vmul.f32 %v4382_v60, %v955_v63  ;;  %v3508_v3 = vpop.f32.mrb[1].mxu0  ;;  %v3610_v4 = vpop.f32.mrb[1].mxu1 }
  0xdd   :  { %v319_v7 = vpop.f32.mrb[2].mxu0  ;;  %v958_v8 = vpop.f32.mrb[2].mxu1 }
  0xde   :  { %v575_v9 = vadd.f32 %v4391_v61, %v520_v1  ;;  %v1202_v10 = vadd.f32 %v4391_v61, %v1153_v2  ;;  %v521_v11 = vmul.f32 %v4382_v60, %v319_v7  ;;  %v1154_v12 = vmul.f32 %v4382_v60, %v958_v8  ;;  %v3509_v13 = vpop.f32.mrb[3].mxu0  ;;  %v3611_v14 = vpop.f32.mrb[3].mxu1 }
  0xe0   :  { %v624_v15 = vmax.f32 %v575_v9, 0.0  ;;  %v1251_v16 = vmax.f32 %v1202_v10, 0.0  ;;  %v576_v17 = vadd.f32 %v4391_v61, %v521_v11  ;;  %v1203_v18 = vadd.f32 %v4391_v61, %v1154_v12  ;;  %3719 = vmatmul.mubr.msk.bf16.gmra.mrb[108].mxu0 %vm199_vm3, %v3970_v5  ;;  %3821 = vmatmul.mubr.msk.bf16.gmra.mrb[108].mxu1 %vm199_vm3, %v3971_v6 }
  0xe1   :  { %3722 = vmatprep.mubr.msk.bf16.mxu0 %vm4022_vm2, %v4020_v0  ;;  %3824 = vmatprep.mubr.msk.bf16.mxu1 %vm4022_vm2, %v4020_v0 }
  0xe2   :  { %v4413_v19 = vmax.f32 %v624_v15, %v1251_v16  ;;  %v625_v20 = vmax.f32 %v576_v17, 0.0  ;;  %v1252_v21 = vmax.f32 %v1203_v18, 0.0  ;;  %v3976_v16 = vld [vmem:[%s5421_s0 + $0x1b0] sm:$0xff]  }
  0xe3   :  { %v324_v22 = vpop.f32.mrb[4].mxu0  ;;  %v963_v23 = vpop.f32.mrb[4].mxu1  ;;  %v3977_v17 = vld [vmem:[%s5421_s0 + $0x274] sm:$0xff]  }
  0xe4   :  { %v4415_v24 = vmax.f32 %v625_v20, %v1252_v21  ;;  %v522_v25 = vmul.f32 %v4382_v60, %v324_v22  ;;  %v1155_v26 = vmul.f32 %v4382_v60, %v963_v23  ;;  %v3512_v27 = vpop.f32.mrb[5].mxu0  ;;  %v3614_v28 = vpop.f32.mrb[5].mxu1 }
  0xe5   :  { %v327_v31 = vpop.f32.mrb[6].mxu0  ;;  %v966_v32 = vpop.f32.mrb[6].mxu1 }
  0xe6   :  { %v577_v33 = vadd.f32 %v4391_v61, %v522_v25  ;;  %v1204_v34 = vadd.f32 %v4391_v61, %v1155_v26  ;;  %v523_v35 = vmul.f32 %v4382_v60, %v327_v31  ;;  %v1156_v36 = vmul.f32 %v4382_v60, %v966_v32  ;;  %v3513_v37 = vpop.f32.mrb[7].mxu0  ;;  %v3615_v38 = vpop.f32.mrb[7].mxu1 }
  0xe8   :  { %v626_v39 = vmax.f32 %v577_v33, 0.0  ;;  %v1253_v40 = vmax.f32 %v1204_v34, 0.0  ;;  %v578_v41 = vadd.f32 %v4391_v61, %v523_v35  ;;  %v1205_v42 = vadd.f32 %v4391_v61, %v1156_v36  ;;  %3723 = vmatmul.mubr.msk.bf16.gmra.mrb[112].mxu0 %vm199_vm3, %v3972_v29  ;;  %3825 = vmatmul.mubr.msk.bf16.gmra.mrb[112].mxu1 %vm199_vm3, %v3973_v30 }
  0xe9   :  { %3726 = vmatprep.mubr.msk.bf16.mxu0 %vm4022_vm2, %v4020_v0  ;;  %3828 = vmatprep.mubr.msk.bf16.mxu1 %vm4022_vm2, %v4020_v0 }
  0xea   :  { %v4437_v43 = vmax.f32 %v626_v39, %v1253_v40  ;;  %v627_v44 = vmax.f32 %v578_v41, 0.0  ;;  %v1254_v45 = vmax.f32 %v1205_v42, 0.0  ;;  %v3978_v42 = vld [vmem:[%s5421_s0 + $0x1b8] sm:$0xff]  }
  0xeb   :  { %v332_v46 = vpop.f32.mrb[8].mxu0  ;;  %v971_v47 = vpop.f32.mrb[8].mxu1 }
  0xec   :  { %v4439_v48 = vmax.f32 %v627_v44, %v1254_v45  ;;  %v524_v49 = vmul.f32 %v4382_v60, %v332_v46  ;;  %v1157_v50 = vmul.f32 %v4382_v60, %v971_v47  ;;  %v3516_v51 = vpop.f32.mrb[9].mxu0  ;;  %v3618_v52 = vpop.f32.mrb[9].mxu1  ;;  %v3979_v44 = vld [vmem:[%s5421_s0 + $0x27c] sm:$0xff]  }
  0xed   :  { %v335_v55 = vpop.f32.mrb[10].mxu0  ;;  %v974_v56 = vpop.f32.mrb[10].mxu1 }
  0xee   :  { %v579_v57 = vadd.f32 %v4391_v61, %v524_v49  ;;  %v1206_v58 = vadd.f32 %v4391_v61, %v1157_v50  ;;  %v525_v59 = vmul.f32 %v4382_v60, %v335_v55  ;;  %v1158_v62 = vmul.f32 %v4382_v60, %v974_v56  ;;  %v3517_v63 = vpop.f32.mrb[11].mxu0  ;;  %v3619_v1 = vpop.f32.mrb[11].mxu1 }
  0xf0   :  { %v628_v2 = vmax.f32 %v579_v57, 0.0  ;;  %v1255_v3 = vmax.f32 %v1206_v58, 0.0  ;;  %v580_v4 = vadd.f32 %v4391_v61, %v525_v59  ;;  %v1207_v5 = vadd.f32 %v4391_v61, %v1158_v62  ;;  %3727 = vmatmul.mubr.msk.bf16.gmra.mrb[116].mxu0 %vm199_vm3, %v3974_v53  ;;  %3829 = vmatmul.mubr.msk.bf16.gmra.mrb[116].mxu1 %vm199_vm3, %v3975_v54 }
  0xf1   :  { %3730 = vmatprep.mubr.msk.bf16.mxu0 %vm4022_vm2, %v4020_v0  ;;  %3832 = vmatprep.mubr.msk.bf16.mxu1 %vm4022_vm2, %v4020_v0 }
  0xf2   :  { %v4461_v6 = vmax.f32 %v628_v2, %v1255_v3  ;;  %v629_v7 = vmax.f32 %v580_v4, 0.0  ;;  %v1256_v8 = vmax.f32 %v1207_v5, 0.0 }
  0xf3   :  { %v340_v9 = vpop.f32.mrb[12].mxu0  ;;  %v979_v10 = vpop.f32.mrb[12].mxu1 }
  0xf4   :  { %v4463_v11 = vmax.f32 %v629_v7, %v1256_v8  ;;  %v526_v12 = vmul.f32 %v4382_v60, %v340_v9  ;;  %v1159_v13 = vmul.f32 %v4382_v60, %v979_v10  ;;  %v3520_v14 = vpop.f32.mrb[13].mxu0  ;;  %v3622_v15 = vpop.f32.mrb[13].mxu1  ;;  %v3980_v8 = vld [vmem:[%s5421_s0 + $0x1c0] sm:$0xff]  }
  0xf5   :  { %v343_v18 = vpop.f32.mrb[14].mxu0  ;;  %v982_v20 = vpop.f32.mrb[14].mxu1  ;;  %v3981_v9 = vld [vmem:[%s5421_s0 + $0x284] sm:$0xff]  }
  0xf6   :  { %v581_v21 = vadd.f32 %v4391_v61, %v526_v12  ;;  %v1208_v22 = vadd.f32 %v4391_v61, %v1159_v13  ;;  %v527_v23 = vmul.f32 %v4382_v60, %v343_v18  ;;  %v1160_v25 = vmul.f32 %v4382_v60, %v982_v20  ;;  %v3521_v26 = vpop.f32.mrb[15].mxu0  ;;  %v3623_v27 = vpop.f32.mrb[15].mxu1 }
  0xf8   :  { %v630_v28 = vmax.f32 %v581_v21, 0.0  ;;  %v1257_v29 = vmax.f32 %v1208_v22, 0.0  ;;  %v582_v30 = vadd.f32 %v4391_v61, %v527_v23  ;;  %v1209_v31 = vadd.f32 %v4391_v61, %v1160_v25  ;;  %3731 = vmatmul.mubr.msk.bf16.gmra.mrb[120].mxu0 %vm199_vm3, %v3976_v16  ;;  %3833 = vmatmul.mubr.msk.bf16.gmra.mrb[120].mxu1 %vm199_vm3, %v3977_v17 }
  0xf9   :  { %3734 = vmatprep.mubr.msk.bf16.mxu0 %vm4022_vm2, %v4020_v0  ;;  %3836 = vmatprep.mubr.msk.bf16.mxu1 %vm4022_vm2, %v4020_v0 }
  0xfa   :  { %v4485_v32 = vmax.f32 %v630_v28, %v1257_v29  ;;  %v631_v33 = vmax.f32 %v582_v30, 0.0  ;;  %v1258_v34 = vmax.f32 %v1209_v31, 0.0 }
  0xfb   :  { %v348_v35 = vpop.f32.mrb[16].mxu0  ;;  %v987_v36 = vpop.f32.mrb[16].mxu1 }
  0xfc   :  { %v4487_v37 = vmax.f32 %v631_v33, %v1258_v34  ;;  %v528_v38 = vmul.f32 %v4382_v60, %v348_v35  ;;  %v1161_v39 = vmul.f32 %v4382_v60, %v987_v36  ;;  %v3524_v40 = vpop.f32.mrb[17].mxu0  ;;  %v3626_v41 = vpop.f32.mrb[17].mxu1  ;;  %v3982_v36 = vld [vmem:[%s5421_s0 + $0x1c8] sm:$0xff]  }
  0xfd   :  { %v351_v45 = vpop.f32.mrb[18].mxu0  ;;  %v990_v46 = vpop.f32.mrb[18].mxu1 }
  0xfe   :  { %v583_v47 = vadd.f32 %v4391_v61, %v528_v38  ;;  %v1210_v49 = vadd.f32 %v4391_v61, %v1161_v39  ;;  %v529_v50 = vmul.f32 %v4382_v60, %v351_v45  ;;  %v1162_v51 = vmul.f32 %v4382_v60, %v990_v46  ;;  %v3525_v52 = vpop.f32.mrb[19].mxu0  ;;  %v3627_v53 = vpop.f32.mrb[19].mxu1  ;;  %v3983_v38 = vld [vmem:[%s5421_s0 + $0x28c] sm:$0xff]  }
 0x100   :  { %v632_v54 = vmax.f32 %v583_v47, 0.0  ;;  %v1259_v55 = vmax.f32 %v1210_v49, 0.0  ;;  %v584_v56 = vadd.f32 %v4391_v61, %v529_v50  ;;  %v1211_v57 = vadd.f32 %v4391_v61, %v1162_v51  ;;  %3735 = vmatmul.mubr.msk.bf16.gmra.mrb[124].mxu0 %vm199_vm3, %v3978_v42  ;;  %3837 = vmatmul.mubr.msk.bf16.gmra.mrb[124].mxu1 %vm199_vm3, %v3979_v44 }
 0x101   :  { %3738 = vmatprep.mubr.msk.bf16.mxu0 %vm4022_vm2, %v4020_v0  ;;  %3840 = vmatprep.mubr.msk.bf16.mxu1 %vm4022_vm2, %v4020_v0 }
 0x102   :  { %v4509_v58 = vmax.f32 %v632_v54, %v1259_v55  ;;  %v633_v59 = vmax.f32 %v584_v56, 0.0  ;;  %v1260_v62 = vmax.f32 %v1211_v57, 0.0 }
 0x103   :  { %v356_v63 = vpop.f32.mrb[20].mxu0  ;;  %v995_v1 = vpop.f32.mrb[20].mxu1 }
 0x104   :  { %v4511_v2 = vmax.f32 %v633_v59, %v1260_v62  ;;  %v530_v3 = vmul.f32 %v4382_v60, %v356_v63  ;;  %v1163_v4 = vmul.f32 %v4382_v60, %v995_v1  ;;  %v3528_v5 = vpop.f32.mrb[21].mxu0  ;;  %v3630_v7 = vpop.f32.mrb[21].mxu1 }
 0x105   :  { %v359_v10 = vpop.f32.mrb[22].mxu0  ;;  %v998_v12 = vpop.f32.mrb[22].mxu1  ;;  %v3985_v5 = vld [vmem:[%s5421_s0 + $0x294] sm:$0xff]  }
 0x106   :  { %v585_v13 = vadd.f32 %v4391_v61, %v530_v3  ;;  %v1212_v14 = vadd.f32 %v4391_v61, %v1163_v4  ;;  %v531_v15 = vmul.f32 %v4382_v60, %v359_v10  ;;  %v1164_v16 = vmul.f32 %v4382_v60, %v998_v12  ;;  %v3529_v17 = vpop.f32.mrb[23].mxu0  ;;  %v3631_v18 = vpop.f32.mrb[23].mxu1  ;;  %v3984_v4 = vld [vmem:[%s5421_s0 + $0x1d0] sm:$0xff]  }
 0x108   :  { %v634_v20 = vmax.f32 %v585_v13, 0.0  ;;  %v1261_v21 = vmax.f32 %v1212_v14, 0.0  ;;  %v586_v22 = vadd.f32 %v4391_v61, %v531_v15  ;;  %v1213_v23 = vadd.f32 %v4391_v61, %v1164_v16  ;;  %3739 = vmatmul.mubr.msk.bf16.gmra.mrb[128].mxu0 %vm199_vm3, %v3980_v8  ;;  %3841 = vmatmul.mubr.msk.bf16.gmra.mrb[128].mxu1 %vm199_vm3, %v3981_v9 }
 0x109   :  { %3742 = vmatprep.mubr.msk.bf16.mxu0 %vm4022_vm2, %v4020_v0  ;;  %3844 = vmatprep.mubr.msk.bf16.mxu1 %vm4022_vm2, %v4020_v0 }
 0x10a   :  { %v4533_v25 = vmax.f32 %v634_v20, %v1261_v21  ;;  %v635_v26 = vmax.f32 %v586_v22, 0.0  ;;  %v1262_v27 = vmax.f32 %v1213_v23, 0.0 }
 0x10b   :  { %v364_v28 = vpop.f32.mrb[24].mxu0  ;;  %v1003_v29 = vpop.f32.mrb[24].mxu1 }
 0x10c   :  { %v4535_v30 = vmax.f32 %v635_v26, %v1262_v27  ;;  %v532_v31 = vmul.f32 %v4382_v60, %v364_v28  ;;  %v1165_v33 = vmul.f32 %v4382_v60, %v1003_v29  ;;  %v3532_v34 = vpop.f32.mrb[25].mxu0  ;;  %v3634_v35 = vpop.f32.mrb[25].mxu1 }
 0x10d   :  { %v367_v39 = vpop.f32.mrb[26].mxu0  ;;  %v1006_v40 = vpop.f32.mrb[26].mxu1  ;;  %v3986_v35 = vld [vmem:[%s5421_s0 + $0x1d8] sm:$0xff]  }
 0x10e   :  { %v587_v41 = vadd.f32 %v4391_v61, %v532_v31  ;;  %v1214_v42 = vadd.f32 %v4391_v61, %v1165_v33  ;;  %v533_v44 = vmul.f32 %v4382_v60, %v367_v39  ;;  %v1166_v45 = vmul.f32 %v4382_v60, %v1006_v40  ;;  %v3533_v46 = vpop.f32.mrb[27].mxu0  ;;  %v3635_v47 = vpop.f32.mrb[27].mxu1 }
 0x110   :  { %v636_v49 = vmax.f32 %v587_v41, 0.0  ;;  %v1263_v50 = vmax.f32 %v1214_v42, 0.0  ;;  %v588_v51 = vadd.f32 %v4391_v61, %v533_v44  ;;  %v1215_v52 = vadd.f32 %v4391_v61, %v1166_v45  ;;  %3743 = vmatmul.mubr.msk.bf16.gmra.mrb[132].mxu0 %vm199_vm3, %v3982_v36  ;;  %3845 = vmatmul.mubr.msk.bf16.gmra.mrb[132].mxu1 %vm199_vm3, %v3983_v38  ;;  %v3987_v36 = vld [vmem:[%s5421_s0 + $0x29c] sm:$0xff]  }
 0x111   :  { %3746 = vmatprep.mubr.msk.bf16.mxu0 %vm4022_vm2, %v4020_v0  ;;  %3848 = vmatprep.mubr.msk.bf16.mxu1 %vm4022_vm2, %v4020_v0 }
 0x112   :  { %v4557_v53 = vmax.f32 %v636_v49, %v1263_v50  ;;  %v637_v54 = vmax.f32 %v588_v51, 0.0  ;;  %v1264_v55 = vmax.f32 %v1215_v52, 0.0 }
 0x113   :  { %v372_v56 = vpop.f32.mrb[28].mxu0  ;;  %v1011_v57 = vpop.f32.mrb[28].mxu1 }
 0x114   :  { %v4559_v59 = vmax.f32 %v637_v54, %v1264_v55  ;;  %v534_v62 = vmul.f32 %v4382_v60, %v372_v56  ;;  %v1167_v63 = vmul.f32 %v4382_v60, %v1011_v57  ;;  %v3536_v1 = vpop.f32.mrb[29].mxu0  ;;  %v3638_v3 = vpop.f32.mrb[29].mxu1 }
 0x115   :  { %v375_v7 = vpop.f32.mrb[30].mxu0  ;;  %v1014_v8 = vpop.f32.mrb[30].mxu1 }
 0x116   :  { %v589_v9 = vadd.f32 %v4391_v61, %v534_v62  ;;  %v1216_v10 = vadd.f32 %v4391_v61, %v1167_v63  ;;  %v535_v12 = vmul.f32 %v4382_v60, %v375_v7  ;;  %v1168_v13 = vmul.f32 %v4382_v60, %v1014_v8  ;;  %v3537_v14 = vpop.f32.mrb[31].mxu0  ;;  %v3639_v15 = vpop.f32.mrb[31].mxu1  ;;  %v3989_v7 = vld [vmem:[%s5421_s0 + $0x2a4] sm:$0xff]  }
 0x118   :  { %v638_v16 = vmax.f32 %v589_v9, 0.0  ;;  %v1265_v17 = vmax.f32 %v1216_v10, 0.0  ;;  %v590_v18 = vadd.f32 %v4391_v61, %v535_v12  ;;  %v1217_v20 = vadd.f32 %v4391_v61, %v1168_v13  ;;  %3747 = vmatmul.mubr.msk.bf16.gmra.mrb[136].mxu0 %vm199_vm3, %v3984_v4  ;;  %3849 = vmatmul.mubr.msk.bf16.gmra.mrb[136].mxu1 %vm199_vm3, %v3985_v5  ;;  %v3988_v5 = vld [vmem:[%s5421_s0 + $0x1e0] sm:$0xff]  }
 0x119   :  { %3750 = vmatprep.mubr.msk.bf16.mxu0 %vm4022_vm2, %v4020_v0  ;;  %3852 = vmatprep.mubr.msk.bf16.mxu1 %vm4022_vm2, %v4020_v0 }
 0x11a   :  { %v4581_v21 = vmax.f32 %v638_v16, %v1265_v17  ;;  %v639_v22 = vmax.f32 %v590_v18, 0.0  ;;  %v1266_v23 = vmax.f32 %v1217_v20, 0.0 }
 0x11b   :  { %v380_v26 = vpop.f32.mrb[32].mxu0  ;;  %v1019_v27 = vpop.f32.mrb[32].mxu1 }
 0x11c   :  { %v4583_v28 = vmax.f32 %v639_v22, %v1266_v23  ;;  %v536_v29 = vmul.f32 %v4382_v60, %v380_v26  ;;  %v1169_v31 = vmul.f32 %v4382_v60, %v1019_v27  ;;  %v3540_v33 = vpop.f32.mrb[33].mxu0  ;;  %v3642_v34 = vpop.f32.mrb[33].mxu1 }
 0x11d   :  { %v383_v38 = vpop.f32.mrb[34].mxu0  ;;  %v1022_v39 = vpop.f32.mrb[34].mxu1 }
 0x11e   :  { %v591_v40 = vadd.f32 %v4391_v61, %v536_v29  ;;  %v1218_v41 = vadd.f32 %v4391_v61, %v1169_v31  ;;  %v537_v42 = vmul.f32 %v4382_v60, %v383_v38  ;;  %v1170_v44 = vmul.f32 %v4382_v60, %v1022_v39  ;;  %v3541_v45 = vpop.f32.mrb[35].mxu0  ;;  %v3643_v46 = vpop.f32.mrb[35].mxu1  ;;  %v3990_v39 = vld [vmem:[%s5421_s0 + $0x1e8] sm:$0xff]  }
 0x120   :  { %v640_v47 = vmax.f32 %v591_v40, 0.0  ;;  %v1267_v49 = vmax.f32 %v1218_v41, 0.0  ;;  %v592_v50 = vadd.f32 %v4391_v61, %v537_v42  ;;  %v1219_v51 = vadd.f32 %v4391_v61, %v1170_v44  ;;  %3751 = vmatmul.mubr.msk.bf16.gmra.mrb[140].mxu0 %vm199_vm3, %v3986_v35  ;;  %3853 = vmatmul.mubr.msk.bf16.gmra.mrb[140].mxu1 %vm199_vm3, %v3987_v36  ;;  %v3991_v40 = vld [vmem:[%s5421_s0 + $0x2ac] sm:$0xff]  }
 0x121   :  { %3754 = vmatprep.mubr.msk.bf16.mxu0 %vm4022_vm2, %v4020_v0  ;;  %3856 = vmatprep.mubr.msk.bf16.mxu1 %vm4022_vm2, %v4020_v0 }
 0x122   :  { %v4605_v52 = vmax.f32 %v640_v47, %v1267_v49  ;;  %v641_v54 = vmax.f32 %v592_v50, 0.0  ;;  %v1268_v55 = vmax.f32 %v1219_v51, 0.0 }
 0x123   :  { %v388_v56 = vpop.f32.mrb[36].mxu0  ;;  %v1027_v57 = vpop.f32.mrb[36].mxu1 }
 0x124   :  { %v4607_v62 = vmax.f32 %v641_v54, %v1268_v55  ;;  %v538_v63 = vmul.f32 %v4382_v60, %v388_v56  ;;  %v1171_v1 = vmul.f32 %v4382_v60, %v1027_v57  ;;  %v3544_v3 = vpop.f32.mrb[37].mxu0  ;;  %v3646_v4 = vpop.f32.mrb[37].mxu1 }
 0x125   :  { %v391_v8 = vpop.f32.mrb[38].mxu0  ;;  %v1030_v9 = vpop.f32.mrb[38].mxu1 }
 0x126   :  { %v593_v10 = vadd.f32 %v4391_v61, %v538_v63  ;;  %v1220_v12 = vadd.f32 %v4391_v61, %v1171_v1  ;;  %v539_v13 = vmul.f32 %v4382_v60, %v391_v8  ;;  %v1172_v14 = vmul.f32 %v4382_v60, %v1030_v9  ;;  %v3545_v15 = vpop.f32.mrb[39].mxu0  ;;  %v3647_v16 = vpop.f32.mrb[39].mxu1 }
 0x128   :  { %v642_v17 = vmax.f32 %v593_v10, 0.0  ;;  %v1269_v18 = vmax.f32 %v1220_v12, 0.0  ;;  %v594_v20 = vadd.f32 %v4391_v61, %v539_v13  ;;  %v1221_v22 = vadd.f32 %v4391_v61, %v1172_v14  ;;  %3755 = vmatmul.mubr.msk.bf16.gmra.mrb[144].mxu0 %vm199_vm3, %v3988_v5  ;;  %3857 = vmatmul.mubr.msk.bf16.gmra.mrb[144].mxu1 %vm199_vm3, %v3989_v7  ;;  %v3992_v12 = vld [vmem:[%s5421_s0 + $0x1f0] sm:$0xff]  }
 0x129   :  { %3758 = vmatprep.mubr.msk.bf16.mxu0 %vm4022_vm2, %v4020_v0  ;;  %3860 = vmatprep.mubr.msk.bf16.mxu1 %vm4022_vm2, %v4020_v0  ;;  %v3993_v13 = vld [vmem:[%s5421_s0 + $0x2b4] sm:$0xff]  }
 0x12a   :  { %v4629_v23 = vmax.f32 %v642_v17, %v1269_v18  ;;  %v643_v26 = vmax.f32 %v594_v20, 0.0  ;;  %v1270_v27 = vmax.f32 %v1221_v22, 0.0 }
 0x12b   :  { %v396_v29 = vpop.f32.mrb[40].mxu0  ;;  %v1035_v31 = vpop.f32.mrb[40].mxu1 }
 0x12c   :  { %v4631_v33 = vmax.f32 %v643_v26, %v1270_v27  ;;  %v540_v34 = vmul.f32 %v4382_v60, %v396_v29  ;;  %v1173_v35 = vmul.f32 %v4382_v60, %v1035_v31  ;;  %v3548_v36 = vpop.f32.mrb[41].mxu0  ;;  %v3650_v38 = vpop.f32.mrb[41].mxu1 }
 0x12d   :  { %v399_v41 = vpop.f32.mrb[42].mxu0  ;;  %v1038_v42 = vpop.f32.mrb[42].mxu1 }
 0x12e   :  { %v595_v44 = vadd.f32 %v4391_v61, %v540_v34  ;;  %v1222_v45 = vadd.f32 %v4391_v61, %v1173_v35  ;;  %v541_v46 = vmul.f32 %v4382_v60, %v399_v41  ;;  %v1174_v47 = vmul.f32 %v4382_v60, %v1038_v42  ;;  %v3549_v49 = vpop.f32.mrb[43].mxu0  ;;  %v3651_v50 = vpop.f32.mrb[43].mxu1 }
 0x12f   :  { %v3995_v49 = vld [vmem:[%s5421_s0 + $0x2bc] sm:$0xff]  }
 0x130   :  { %v644_v51 = vmax.f32 %v595_v44, 0.0  ;;  %v1271_v54 = vmax.f32 %v1222_v45, 0.0  ;;  %v596_v55 = vadd.f32 %v4391_v61, %v541_v46  ;;  %v1223_v56 = vadd.f32 %v4391_v61, %v1174_v47  ;;  %3759 = vmatmul.mubr.msk.bf16.gmra.mrb[148].mxu0 %vm199_vm3, %v3990_v39  ;;  %3861 = vmatmul.mubr.msk.bf16.gmra.mrb[148].mxu1 %vm199_vm3, %v3991_v40  ;;  %v3994_v47 = vld [vmem:[%s5421_s0 + $0x1f8] sm:$0xff]  }
 0x131   :  { %3762 = vmatprep.mubr.msk.bf16.mxu0 %vm4022_vm2, %v4020_v0  ;;  %3864 = vmatprep.mubr.msk.bf16.mxu1 %vm4022_vm2, %v4020_v0 }
 0x132   :  { %v4653_v57 = vmax.f32 %v644_v51, %v1271_v54  ;;  %v645_v63 = vmax.f32 %v596_v55, 0.0  ;;  %v1272_v1 = vmax.f32 %v1223_v56, 0.0 }
 0x133   :  { %v404_v3 = vpop.f32.mrb[44].mxu0  ;;  %v1043_v4 = vpop.f32.mrb[44].mxu1 }
 0x134   :  { %v4655_v5 = vmax.f32 %v645_v63, %v1272_v1  ;;  %v542_v7 = vmul.f32 %v4382_v60, %v404_v3  ;;  %v1175_v8 = vmul.f32 %v4382_v60, %v1043_v4  ;;  %v3552_v9 = vpop.f32.mrb[45].mxu0  ;;  %v3654_v10 = vpop.f32.mrb[45].mxu1 }
 0x135   :  { %v407_v14 = vpop.f32.mrb[46].mxu0  ;;  %v1046_v15 = vpop.f32.mrb[46].mxu1 }
 0x136   :  { %v597_v16 = vadd.f32 %v4391_v61, %v542_v7  ;;  %v1224_v17 = vadd.f32 %v4391_v61, %v1175_v8  ;;  %v543_v18 = vmul.f32 %v4382_v60, %v407_v14  ;;  %v1176_v20 = vmul.f32 %v4382_v60, %v1046_v15  ;;  %v3553_v22 = vpop.f32.mrb[47].mxu0  ;;  %v3655_v26 = vpop.f32.mrb[47].mxu1 }
 0x137   :  { %v3996_v26 = vld [vmem:[%s5421_s0 + $0x200] sm:$0xff]  }
 0x138   :  { %v646_v27 = vmax.f32 %v597_v16, 0.0  ;;  %v1273_v29 = vmax.f32 %v1224_v17, 0.0  ;;  %v598_v31 = vadd.f32 %v4391_v61, %v543_v18  ;;  %v1225_v34 = vadd.f32 %v4391_v61, %v1176_v20  ;;  %3763 = vmatmul.mubr.msk.bf16.gmra.mrb[152].mxu0 %vm199_vm3, %v3992_v12  ;;  %3865 = vmatmul.mubr.msk.bf16.gmra.mrb[152].mxu1 %vm199_vm3, %v3993_v13 }
 0x139   :  { %3766 = vmatprep.mubr.msk.bf16.mxu0 %vm4022_vm2, %v4020_v0  ;;  %3868 = vmatprep.mubr.msk.bf16.mxu1 %vm4022_vm2, %v4020_v0 }
 0x13a   :  { %v4677_v35 = vmax.f32 %v646_v27, %v1273_v29  ;;  %v647_v36 = vmax.f32 %v598_v31, 0.0  ;;  %v1274_v38 = vmax.f32 %v1225_v34, 0.0  ;;  %v3997_v27 = vld [vmem:[%s5421_s0 + $0x2c4] sm:$0xff]  }
 0x13b   :  { %v412_v39 = vpop.f32.mrb[48].mxu0  ;;  %v1051_v40 = vpop.f32.mrb[48].mxu1 }
 0x13c   :  { %v4679_v41 = vmax.f32 %v647_v36, %v1274_v38  ;;  %v544_v42 = vmul.f32 %v4382_v60, %v412_v39  ;;  %v1177_v44 = vmul.f32 %v4382_v60, %v1051_v40  ;;  %v3556_v45 = vpop.f32.mrb[49].mxu0  ;;  %v3658_v46 = vpop.f32.mrb[49].mxu1 }
 0x13d   :  { %v415_v50 = vpop.f32.mrb[50].mxu0  ;;  %v1054_v51 = vpop.f32.mrb[50].mxu1 }
 0x13e   :  { %v599_v54 = vadd.f32 %v4391_v61, %v544_v42  ;;  %v1226_v55 = vadd.f32 %v4391_v61, %v1177_v44  ;;  %v545_v56 = vmul.f32 %v4382_v60, %v415_v50  ;;  %v1178_v63 = vmul.f32 %v4382_v60, %v1054_v51  ;;  %v3557_v1 = vpop.f32.mrb[51].mxu0  ;;  %v3659_v3 = vpop.f32.mrb[51].mxu1 }
 0x140   :  { %v648_v4 = vmax.f32 %v599_v54, 0.0  ;;  %v1275_v7 = vmax.f32 %v1226_v55, 0.0  ;;  %v600_v8 = vadd.f32 %v4391_v61, %v545_v56  ;;  %v1227_v9 = vadd.f32 %v4391_v61, %v1178_v63  ;;  %3767 = vmatmul.mubr.msk.bf16.gmra.mrb[156].mxu0 %vm199_vm3, %v3994_v47  ;;  %3869 = vmatmul.mubr.msk.bf16.gmra.mrb[156].mxu1 %vm199_vm3, %v3995_v49 }
 0x141   :  { %3770 = vmatprep.mubr.msk.bf16.mxu0 %vm4022_vm2, %v4020_v0  ;;  %3872 = vmatprep.mubr.msk.bf16.mxu1 %vm4022_vm2, %v4020_v0 }
 0x142   :  { %v4701_v10 = vmax.f32 %v648_v4, %v1275_v7  ;;  %v649_v12 = vmax.f32 %v600_v8, 0.0  ;;  %v1276_v13 = vmax.f32 %v1227_v9, 0.0  ;;  %v3998_v7 = vld [vmem:[%s5421_s0 + $0x208] sm:$0xff]  }
 0x143   :  { %v420_v14 = vpop.f32.mrb[52].mxu0  ;;  %v1059_v15 = vpop.f32.mrb[52].mxu1  ;;  %v3999_v8 = vld [vmem:[%s5421_s0 + $0x2cc] sm:$0xff]  }
 0x144   :  { %v4703_v16 = vmax.f32 %v649_v12, %v1276_v13  ;;  %v546_v17 = vmul.f32 %v4382_v60, %v420_v14  ;;  %v1179_v18 = vmul.f32 %v4382_v60, %v1059_v15  ;;  %v3560_v20 = vpop.f32.mrb[53].mxu0  ;;  %v3662_v22 = vpop.f32.mrb[53].mxu1 }
 0x145   :  { %v423_v29 = vpop.f32.mrb[54].mxu0  ;;  %v1062_v31 = vpop.f32.mrb[54].mxu1 }
 0x146   :  { %v601_v34 = vadd.f32 %v4391_v61, %v546_v17  ;;  %v1228_v36 = vadd.f32 %v4391_v61, %v1179_v18  ;;  %v547_v38 = vmul.f32 %v4382_v60, %v423_v29  ;;  %v1180_v39 = vmul.f32 %v4382_v60, %v1062_v31  ;;  %v3561_v40 = vpop.f32.mrb[55].mxu0  ;;  %v3663_v42 = vpop.f32.mrb[55].mxu1 }
 0x148   :  { %v650_v44 = vmax.f32 %v601_v34, 0.0  ;;  %v1277_v45 = vmax.f32 %v1228_v36, 0.0  ;;  %v602_v46 = vadd.f32 %v4391_v61, %v547_v38  ;;  %v1229_v47 = vadd.f32 %v4391_v61, %v1180_v39  ;;  %3771 = vmatmul.mubr.msk.bf16.gmra.mrb[160].mxu0 %vm199_vm3, %v3996_v26  ;;  %3873 = vmatmul.mubr.msk.bf16.gmra.mrb[160].mxu1 %vm199_vm3, %v3997_v27 }
 0x149   :  { %3774 = vmatprep.mubr.msk.bf16.mxu0 %vm4022_vm2, %v4020_v0  ;;  %3876 = vmatprep.mubr.msk.bf16.mxu1 %vm4022_vm2, %v4020_v0 }
 0x14a   :  { %v4725_v49 = vmax.f32 %v650_v44, %v1277_v45  ;;  %v651_v50 = vmax.f32 %v602_v46, 0.0  ;;  %v1278_v51 = vmax.f32 %v1229_v47, 0.0  ;;  %v4000_v47 = vld [vmem:[%s5421_s0 + $0x210] sm:$0xff]  }
 0x14b   :  { %v428_v54 = vpop.f32.mrb[56].mxu0  ;;  %v1067_v55 = vpop.f32.mrb[56].mxu1 }
 0x14c   :  { %v4727_v56 = vmax.f32 %v651_v50, %v1278_v51  ;;  %v548_v63 = vmul.f32 %v4382_v60, %v428_v54  ;;  %v1181_v1 = vmul.f32 %v4382_v60, %v1067_v55  ;;  %v3564_v3 = vpop.f32.mrb[57].mxu0  ;;  %v3666_v4 = vpop.f32.mrb[57].mxu1  ;;  %v4001_v50 = vld [vmem:[%s5421_s0 + $0x2d4] sm:$0xff]  }
 0x14d   :  { %v431_v9 = vpop.f32.mrb[58].mxu0  ;;  %v1070_v12 = vpop.f32.mrb[58].mxu1 }
 0x14e   :  { %v603_v13 = vadd.f32 %v4391_v61, %v548_v63  ;;  %v1230_v14 = vadd.f32 %v4391_v61, %v1181_v1  ;;  %v549_v15 = vmul.f32 %v4382_v60, %v431_v9  ;;  %v1182_v17 = vmul.f32 %v4382_v60, %v1070_v12  ;;  %v3565_v18 = vpop.f32.mrb[59].mxu0  ;;  %v3667_v20 = vpop.f32.mrb[59].mxu1 }
 0x150   :  { %v652_v22 = vmax.f32 %v603_v13, 0.0  ;;  %v1279_v26 = vmax.f32 %v1230_v14, 0.0  ;;  %v604_v27 = vadd.f32 %v4391_v61, %v549_v15  ;;  %v1231_v29 = vadd.f32 %v4391_v61, %v1182_v17  ;;  %3775 = vmatmul.mubr.msk.bf16.gmra.mrb[164].mxu0 %vm199_vm3, %v3998_v7  ;;  %3877 = vmatmul.mubr.msk.bf16.gmra.mrb[164].mxu1 %vm199_vm3, %v3999_v8 }
 0x151   :  { %3778 = vmatprep.mubr.msk.bf16.mxu0 %vm4022_vm2, %v4020_v0  ;;  %3880 = vmatprep.mubr.msk.bf16.mxu1 %vm4022_vm2, %v4020_v0 }
 0x152   :  { %v4749_v31 = vmax.f32 %v652_v22, %v1279_v26  ;;  %v653_v34 = vmax.f32 %v604_v27, 0.0  ;;  %v1280_v36 = vmax.f32 %v1231_v29, 0.0 }
 0x153   :  { %v436_v38 = vpop.f32.mrb[60].mxu0  ;;  %v1075_v39 = vpop.f32.mrb[60].mxu1 }
 0x154   :  { %v4751_v40 = vmax.f32 %v653_v34, %v1280_v36  ;;  %v550_v42 = vmul.f32 %v4382_v60, %v436_v38  ;;  %v1183_v44 = vmul.f32 %v4382_v60, %v1075_v39  ;;  %v3568_v45 = vpop.f32.mrb[61].mxu0  ;;  %v3670_v46 = vpop.f32.mrb[61].mxu1  ;;  %v4002_v36 = vld [vmem:[%s5421_s0 + $0x218] sm:$0xff]  }
 0x155   :  { %v439_v51 = vpop.f32.mrb[62].mxu0  ;;  %v1078_v54 = vpop.f32.mrb[62].mxu1  ;;  %v4003_v38 = vld [vmem:[%s5421_s0 + $0x2dc] sm:$0xff]  }
 0x156   :  { %v605_v55 = vadd.f32 %v4391_v61, %v550_v42  ;;  %v1232_v63 = vadd.f32 %v4391_v61, %v1183_v44  ;;  %v551_v1 = vmul.f32 %v4382_v60, %v439_v51  ;;  %v1184_v3 = vmul.f32 %v4382_v60, %v1078_v54  ;;  %v3569_v4 = vpop.f32.mrb[63].mxu0  ;;  %v3671_v7 = vpop.f32.mrb[63].mxu1 }
 0x158   :  { %v654_v8 = vmax.f32 %v605_v55, 0.0  ;;  %v1281_v9 = vmax.f32 %v1232_v63, 0.0  ;;  %v606_v12 = vadd.f32 %v4391_v61, %v551_v1  ;;  %v1233_v13 = vadd.f32 %v4391_v61, %v1184_v3  ;;  %3779 = vmatmul.mubr.msk.bf16.gmra.mrb[168].mxu0 %vm199_vm3, %v4000_v47  ;;  %3881 = vmatmul.mubr.msk.bf16.gmra.mrb[168].mxu1 %vm199_vm3, %v4001_v50 }
 0x159   :  { %3782 = vmatprep.mubr.msk.bf16.mxu0 %vm4022_vm2, %v4020_v0  ;;  %3884 = vmatprep.mubr.msk.bf16.mxu1 %vm4022_vm2, %v4020_v0 }
 0x15a   :  { %v4773_v14 = vmax.f32 %v654_v8, %v1281_v9  ;;  %v655_v15 = vmax.f32 %v606_v12, 0.0  ;;  %v1282_v17 = vmax.f32 %v1233_v13, 0.0 }
 0x15b   :  { %v444_v18 = vpop.f32.mrb[64].mxu0  ;;  %v1083_v20 = vpop.f32.mrb[64].mxu1 }
 0x15c   :  { %v4775_v22 = vmax.f32 %v655_v15, %v1282_v17  ;;  %v552_v26 = vmul.f32 %v4382_v60, %v444_v18  ;;  %v1185_v27 = vmul.f32 %v4382_v60, %v1083_v20  ;;  %v3572_v29 = vpop.f32.mrb[65].mxu0  ;;  %v3674_v34 = vpop.f32.mrb[65].mxu1  ;;  %v4004_v20 = vld [vmem:[%s5421_s0 + $0x220] sm:$0xff]  }
 0x15d   :  { %v447_v39 = vpop.f32.mrb[66].mxu0  ;;  %v1086_v42 = vpop.f32.mrb[66].mxu1 }
 0x15e   :  { %v607_v44 = vadd.f32 %v4391_v61, %v552_v26  ;;  %v1234_v45 = vadd.f32 %v4391_v61, %v1185_v27  ;;  %v553_v46 = vmul.f32 %v4382_v60, %v447_v39  ;;  %v1186_v47 = vmul.f32 %v4382_v60, %v1086_v42  ;;  %v3573_v50 = vpop.f32.mrb[67].mxu0  ;;  %v3675_v51 = vpop.f32.mrb[67].mxu1  ;;  %v4005_v26 = vld [vmem:[%s5421_s0 + $0x2e4] sm:$0xff]  }
 0x160   :  { %v656_v54 = vmax.f32 %v607_v44, 0.0  ;;  %v1283_v55 = vmax.f32 %v1234_v45, 0.0  ;;  %v608_v63 = vadd.f32 %v4391_v61, %v553_v46  ;;  %v1235_v1 = vadd.f32 %v4391_v61, %v1186_v47  ;;  %3783 = vmatmul.mubr.msk.bf16.gmra.mrb[172].mxu0 %vm199_vm3, %v4002_v36  ;;  %3885 = vmatmul.mubr.msk.bf16.gmra.mrb[172].mxu1 %vm199_vm3, %v4003_v38 }
 0x161   :  { %3786 = vmatprep.mubr.msk.bf16.mxu0 %vm4022_vm2, %v4020_v0  ;;  %3888 = vmatprep.mubr.msk.bf16.mxu1 %vm4022_vm2, %v4020_v0 }
 0x162   :  { %v4797_v3 = vmax.f32 %v656_v54, %v1283_v55  ;;  %v657_v4 = vmax.f32 %v608_v63, 0.0  ;;  %v1284_v7 = vmax.f32 %v1235_v1, 0.0 }
 0x163   :  { %v452_v8 = vpop.f32.mrb[68].mxu0  ;;  %v1091_v9 = vpop.f32.mrb[68].mxu1 }
 0x164   :  { %v4799_v12 = vmax.f32 %v657_v4, %v1284_v7  ;;  %v554_v13 = vmul.f32 %v4382_v60, %v452_v8  ;;  %v1187_v15 = vmul.f32 %v4382_v60, %v1091_v9  ;;  %v3576_v17 = vpop.f32.mrb[69].mxu0  ;;  %v3678_v18 = vpop.f32.mrb[69].mxu1 }
 0x165   :  { %v455_v27 = vpop.f32.mrb[70].mxu0  ;;  %v1094_v29 = vpop.f32.mrb[70].mxu1 }
 0x166   :  { %v609_v34 = vadd.f32 %v4391_v61, %v554_v13  ;;  %v1236_v36 = vadd.f32 %v4391_v61, %v1187_v15  ;;  %v555_v38 = vmul.f32 %v4382_v60, %v455_v27  ;;  %v1188_v39 = vmul.f32 %v4382_v60, %v1094_v29  ;;  %v3577_v42 = vpop.f32.mrb[71].mxu0  ;;  %v3679_v44 = vpop.f32.mrb[71].mxu1  ;;  %v4006_v13 = vld [vmem:[%s5421_s0 + $0x228] sm:$0xff]   ;;  %v4843_v27 = vld [vmem:[%s5422_s2] ss:$0 sm:$0xff] }
 0x167   :  { %v4007_v15 = vld [vmem:[%s5421_s0 + $0x2ec] sm:$0xff]  }
 0x168   :  { %v658_v45 = vmax.f32 %v609_v34, 0.0  ;;  %v1285_v46 = vmax.f32 %v1236_v36, 0.0  ;;  %v610_v47 = vadd.f32 %v4391_v61, %v555_v38  ;;  %v1237_v50 = vadd.f32 %v4391_v61, %v1188_v39  ;;  %3787 = vmatmul.mubr.msk.bf16.gmra.mrb[176].mxu0 %vm199_vm3, %v4004_v20  ;;  %3889 = vmatmul.mubr.msk.bf16.gmra.mrb[176].mxu1 %vm199_vm3, %v4005_v26  ;;  %v4836_v20 = vld [vmem:[%s5423_s3] ss:$0 sm:$0xff] }
 0x169   :  { %3790 = vmatprep.mubr.msk.bf16.mxu0 %vm4022_vm2, %v4020_v0  ;;  %3892 = vmatprep.mubr.msk.bf16.mxu1 %vm4022_vm2, %v4020_v0 }
 0x16a   :  { %v4821_v51 = vmax.f32 %v658_v45, %v1285_v46  ;;  %v659_v54 = vmax.f32 %v610_v47, 0.0  ;;  %v1286_v55 = vmax.f32 %v1237_v50, 0.0 }
 0x16b   :  { %v460_v63 = vpop.f32.mrb[72].mxu0  ;;  %v1099_v1 = vpop.f32.mrb[72].mxu1 }
 0x16c   :  { %v4823_v4 = vmax.f32 %v659_v54, %v1286_v55  ;;  %v556_v61 = vmul.f32 %v4382_v60, %v460_v63  ;;  %v1189_v7 = vmul.f32 %v4382_v60, %v1099_v1  ;;  %v3580_v8 = vpop.f32.mrb[73].mxu0  ;;  %v3682_v9 = vpop.f32.mrb[73].mxu1 }
 0x16d   :  { %v463_v17 = vpop.f32.mrb[74].mxu0  ;;  %v1102_v18 = vpop.f32.mrb[74].mxu1  ;;  %v4008_v9 = vld [vmem:[%s5421_s0 + $0x230] sm:$0xff]  }
 0x16e   :  { %v611_v26 = vadd.f32 %v4836_v20, %v556_v61  ;;  %v1238_v60 = vadd.f32 %v4836_v20, %v1189_v7  ;;  %v557_v29 = vmul.f32 %v4843_v27, %v463_v17  ;;  %v1190_v34 = vmul.f32 %v4843_v27, %v1102_v18  ;;  %v3581_v36 = vpop.f32.mrb[75].mxu0  ;;  %v3683_v38 = vpop.f32.mrb[75].mxu1 }
 0x170   :  { %v660_v39 = vmax.f32 %v611_v26, 0.0  ;;  %v1287_v42 = vmax.f32 %v1238_v60, 0.0  ;;  %v612_v44 = vadd.f32 %v4836_v20, %v557_v29  ;;  %v1239_v45 = vadd.f32 %v4836_v20, %v1190_v34  ;;  %3791 = vmatmul.mubr.msk.bf16.gmra.mrb[180].mxu0 %vm199_vm3, %v4006_v13  ;;  %3893 = vmatmul.mubr.msk.bf16.gmra.mrb[180].mxu1 %vm199_vm3, %v4007_v15  ;;  %v4009_v13 = vld [vmem:[%s5421_s0 + $0x2f4] sm:$0xff]  }
 0x171   :  { %3794 = vmatprep.mubr.msk.bf16.mxu0 %vm4022_vm2, %v4020_v0  ;;  %3896 = vmatprep.mubr.msk.bf16.mxu1 %vm4022_vm2, %v4020_v0 }
 0x172   :  { %v4855_v46 = vmax.f32 %v660_v39, %v1287_v42  ;;  %v661_v47 = vmax.f32 %v612_v44, 0.0  ;;  %v1288_v50 = vmax.f32 %v1239_v45, 0.0 }
 0x173   :  { %v468_v54 = vpop.f32.mrb[76].mxu0  ;;  %v1107_v55 = vpop.f32.mrb[76].mxu1 }
 0x174   :  { %v4857_v63 = vmax.f32 %v661_v47, %v1288_v50  ;;  %v558_v1 = vmul.f32 %v4843_v27, %v468_v54  ;;  %v1191_v61 = vmul.f32 %v4843_v27, %v1107_v55  ;;  %v3584_v7 = vpop.f32.mrb[77].mxu0  ;;  %v3686_v8 = vpop.f32.mrb[77].mxu1 }
 0x175   :  { %v471_v15 = vpop.f32.mrb[78].mxu0  ;;  %v1110_v17 = vpop.f32.mrb[78].mxu1 }
 0x176   :  { %v613_v18 = vadd.f32 %v4836_v20, %v558_v1  ;;  %v1240_v26 = vadd.f32 %v4836_v20, %v1191_v61  ;;  %v559_v60 = vmul.f32 %v4843_v27, %v471_v15  ;;  %v1192_v29 = vmul.f32 %v4843_v27, %v1110_v17  ;;  %v3585_v34 = vpop.f32.mrb[79].mxu0  ;;  %v3687_v36 = vpop.f32.mrb[79].mxu1  ;;  %v4011_v15 = vld [vmem:[%s5421_s0 + $0x2fc] sm:$0xff]  }
 0x178   :  { %v662_v38 = vmax.f32 %v613_v18, 0.0  ;;  %v1289_v39 = vmax.f32 %v1240_v26, 0.0  ;;  %v614_v42 = vadd.f32 %v4836_v20, %v559_v60  ;;  %v1241_v44 = vadd.f32 %v4836_v20, %v1192_v29  ;;  %3795 = vmatmul.mubr.msk.bf16.gmra.mrb[184].mxu0 %vm199_vm3, %v4008_v9  ;;  %3897 = vmatmul.mubr.msk.bf16.gmra.mrb[184].mxu1 %vm199_vm3, %v4009_v13  ;;  %v4010_v13 = vld [vmem:[%s5421_s0 + $0x238] sm:$0xff]  }
 0x179   :  { %3798 = vmatprep.mubr.msk.bf16.mxu0 %vm4022_vm2, %v4020_v0  ;;  %3900 = vmatprep.mubr.msk.bf16.mxu1 %vm4022_vm2, %v4020_v0 }
 0x17a   :  { %v4879_v45 = vmax.f32 %v662_v38, %v1289_v39  ;;  %v663_v47 = vmax.f32 %v614_v42, 0.0  ;;  %v1290_v50 = vmax.f32 %v1241_v44, 0.0 }
 0x17b   :  { %v476_v54 = vpop.f32.mrb[80].mxu0  ;;  %v1115_v55 = vpop.f32.mrb[80].mxu1 }
 0x17c   :  { %v4881_v1 = vmax.f32 %v663_v47, %v1290_v50  ;;  %v560_v61 = vmul.f32 %v4843_v27, %v476_v54  ;;  %v1193_v7 = vmul.f32 %v4843_v27, %v1115_v55  ;;  %v3588_v8 = vpop.f32.mrb[81].mxu0  ;;  %v3690_v9 = vpop.f32.mrb[81].mxu1 }
 0x17d   :  { %v479_v17 = vpop.f32.mrb[82].mxu0  ;;  %v1118_v18 = vpop.f32.mrb[82].mxu1 }
 0x17e   :  { %v615_v26 = vadd.f32 %v4836_v20, %v560_v61  ;;  %v1242_v60 = vadd.f32 %v4836_v20, %v1193_v7  ;;  %v561_v29 = vmul.f32 %v4843_v27, %v479_v17  ;;  %v1194_v34 = vmul.f32 %v4843_v27, %v1118_v18  ;;  %v3589_v36 = vpop.f32.mrb[83].mxu0  ;;  %v3691_v38 = vpop.f32.mrb[83].mxu1  ;;  %v4012_v18 = vld [vmem:[%s5421_s0 + $0x240] sm:$0xff]  }
 0x180   :  { %v664_v39 = vmax.f32 %v615_v26, 0.0  ;;  %v1291_v42 = vmax.f32 %v1242_v60, 0.0  ;;  %v616_v44 = vadd.f32 %v4836_v20, %v561_v29  ;;  %v1243_v47 = vadd.f32 %v4836_v20, %v1194_v34  ;;  %3799 = vmatmul.mubr.msk.bf16.gmra.mrb[188].mxu0 %vm199_vm3, %v4010_v13  ;;  %3901 = vmatmul.mubr.msk.bf16.gmra.mrb[188].mxu1 %vm199_vm3, %v4011_v15  ;;  %v4013_v26 = vld [vmem:[%s5421_s0 + $0x304] sm:$0xff]  }
 0x181   :  { %3802 = vmatprep.mubr.msk.bf16.mxu0 %vm4022_vm2, %v4020_v0  ;;  %3904 = vmatprep.mubr.msk.bf16.mxu1 %vm4022_vm2, %v4020_v0 }
 0x182   :  { %v4903_v50 = vmax.f32 %v664_v39, %v1291_v42  ;;  %v665_v54 = vmax.f32 %v616_v44, 0.0  ;;  %v1292_v55 = vmax.f32 %v1243_v47, 0.0 }
 0x183   :  { %v484_v61 = vpop.f32.mrb[84].mxu0  ;;  %v1123_v7 = vpop.f32.mrb[84].mxu1 }
 0x184   :  { %v4905_v8 = vmax.f32 %v665_v54, %v1292_v55  ;;  %v562_v9 = vmul.f32 %v4843_v27, %v484_v61  ;;  %v1195_v13 = vmul.f32 %v4843_v27, %v1123_v7  ;;  %v3592_v17 = vpop.f32.mrb[85].mxu0  ;;  %v3694_v15 = vpop.f32.mrb[85].mxu1 }
 0x185   :  { %v487_v60 = vpop.f32.mrb[86].mxu0  ;;  %v1126_v29 = vpop.f32.mrb[86].mxu1 }
 0x186   :  { %v617_v34 = vadd.f32 %v4836_v20, %v562_v9  ;;  %v1244_v36 = vadd.f32 %v4836_v20, %v1195_v13  ;;  %v563_v38 = vmul.f32 %v4843_v27, %v487_v60  ;;  %v1196_v39 = vmul.f32 %v4843_v27, %v1126_v29  ;;  %v3593_v42 = vpop.f32.mrb[87].mxu0  ;;  %v3695_v44 = vpop.f32.mrb[87].mxu1 }
 0x188   :  { %v666_v47 = vmax.f32 %v617_v34, 0.0  ;;  %v1293_v54 = vmax.f32 %v1244_v36, 0.0  ;;  %v618_v55 = vadd.f32 %v4836_v20, %v563_v38  ;;  %v1245_v61 = vadd.f32 %v4836_v20, %v1196_v39  ;;  %3803 = vmatmul.mubr.msk.bf16.gmra.mrb[192].mxu0 %vm199_vm3, %v4012_v18  ;;  %3905 = vmatmul.mubr.msk.bf16.gmra.mrb[192].mxu1 %vm199_vm3, %v4013_v26  ;;  %v4014_v36 = vld [vmem:[%s5421_s0 + $0x248] ss:$0 sps:$4 sm:$0xff]  }
 0x189   :  { %3806 = vmatprep.mubr.msk.bf16.mxu0 %vm4022_vm2, %v4020_v0  ;;  %3908 = vmatprep.mubr.msk.bf16.mxu1 %vm4022_vm2, %v4020_v0  ;;  %v4015_v0 = vld [vmem:[%s5421_s0 + $0x30c] ss:$0 sps:$4 sm:$0xff]  }
 0x18a   :  { %v4927_v7 = vmax.f32 %v666_v47, %v1293_v54  ;;  %v667_v9 = vmax.f32 %v618_v55, 0.0  ;;  %v1294_v13 = vmax.f32 %v1245_v61, 0.0 }
 0x18b   :  { %v492_v17 = vpop.f32.mrb[88].mxu0  ;;  %v1131_v15 = vpop.f32.mrb[88].mxu1 }
 0x18c   :  { %v4929_v60 = vmax.f32 %v667_v9, %v1294_v13  ;;  %v564_v29 = vmul.f32 %v4843_v27, %v492_v17  ;;  %v1197_v18 = vmul.f32 %v4843_v27, %v1131_v15  ;;  %v3596_v34 = vpop.f32.mrb[89].mxu0  ;;  %v3698_v26 = vpop.f32.mrb[89].mxu1 }
 0x18d   :  { %v495_v38 = vpop.f32.mrb[90].mxu0  ;;  %v1134_v39 = vpop.f32.mrb[90].mxu1 }
 0x18e   :  { %5425 = vst [vmem:[#allocation2_spill] sm:$0xff] %v4929_v60  ;;  %v619_v42 = vadd.f32 %v4836_v20, %v564_v29  ;;  %v1246_v44 = vadd.f32 %v4836_v20, %v1197_v18  ;;  %v565_v47 = vmul.f32 %v4843_v27, %v495_v38  ;;  %v1198_v54 = vmul.f32 %v4843_v27, %v1134_v39  ;;  %v3597_v55 = vpop.f32.mrb[91].mxu0  ;;  %v3699_v61 = vpop.f32.mrb[91].mxu1 }
 0x190   :  { %v668_v9 = vmax.f32 %v619_v42, 0.0  ;;  %v1295_v13 = vmax.f32 %v1246_v44, 0.0  ;;  %v620_v17 = vadd.f32 %v4836_v20, %v565_v47  ;;  %v1247_v15 = vadd.f32 %v4836_v20, %v1198_v54  ;;  %3807 = vmatmul.mubr.msk.bf16.gmra.mrb[196].mxu0 %vm199_vm3, %v4014_v36  ;;  %3909 = vmatmul.mubr.msk.bf16.gmra.mrb[196].mxu1 %vm199_vm3, %v4015_v0 }
 0x192   :  { %v4947_v34 = vmax.f32 %v668_v9, %v1295_v13  ;;  %v669_v29 = vmax.f32 %v620_v17, 0.0  ;;  %v1296_v18 = vmax.f32 %v1247_v15, 0.0 }
 0x193   :  { %v500_v26 = vpop.f32.mrb[92].mxu0  ;;  %v1139_v38 = vpop.f32.mrb[92].mxu1 }
 0x194   :  { %5426 = vst [vmem:[#allocation3_spill] sm:$0xff] %v4947_v34  ;;  %v4949_v60 = vmax.f32 %v669_v29, %v1296_v18  ;;  %v566_v39 = vmul.f32 %v4843_v27, %v500_v26  ;;  %v1199_v42 = vmul.f32 %v4843_v27, %v1139_v38  ;;  %v3600_v44 = vpop.f32.mrb[93].mxu0  ;;  %v3702_v47 = vpop.f32.mrb[93].mxu1 }
 0x195   :  { %v503_v55 = vpop.f32.mrb[94].mxu0  ;;  %v1142_v54 = vpop.f32.mrb[94].mxu1 }
 0x196   :  { %5427 = vst [vmem:[#allocation4_spill] sm:$0xff] %v4949_v60  ;;  %v621_v36 = vadd.f32 %v4836_v20, %v566_v39  ;;  %v1248_v0 = vadd.f32 %v4836_v20, %v1199_v42  ;;  %v567_v61 = vmul.f32 %v4843_v27, %v503_v55  ;;  %v1200_v9 = vmul.f32 %v4843_v27, %v1142_v54  ;;  %v3601_v13 = vpop.f32.mrb[95].mxu0  ;;  %v3703_v17 = vpop.f32.mrb[95].mxu1 }
 0x198   :  { %v670_v15 = vmax.f32 %v621_v36, 0.0  ;;  %v1297_v29 = vmax.f32 %v1248_v0, 0.0  ;;  %v622_v18 = vadd.f32 %v4836_v20, %v567_v61  ;;  %v1249_v26 = vadd.f32 %v4836_v20, %v1200_v9 }
 0x19a   :  { %v4959_v38 = vmax.f32 %v670_v15, %v1297_v29  ;;  %v671_v44 = vmax.f32 %v622_v18, 0.0  ;;  %v1298_v47 = vmax.f32 %v1249_v26, 0.0 }
 0x19b   :  { %v508_v60 = vpop.f32.mrb[96].mxu0  ;;  %v1147_v39 = vpop.f32.mrb[96].mxu1 }
 0x19c   :  { %5428 = vst [vmem:[#allocation5_spill] sm:$0xff] %v4959_v38  ;;  %v4961_v34 = vmax.f32 %v671_v44, %v1298_v47  ;;  %v568_v42 = vmul.f32 %v4843_v27, %v508_v60  ;;  %v1201_v55 = vmul.f32 %v4843_v27, %v1147_v39  ;;  %v3604_v54 = vpop.f32.mrb[97].mxu0  ;;  %v3706_v13 = vpop.f32.mrb[97].mxu1 }
 0x19d   :  { %v511_v36 = vpop.f32.mrb[98].mxu0  ;;  %v1150_v0 = vpop.f32.mrb[98].mxu1 }
 0x19e   :  { %5429 = vst [vmem:[#allocation6_spill] sm:$0xff] %v4961_v34  ;;  %v623_v61 = vadd.f32 %v4836_v20, %v568_v42  ;;  %v1250_v9 = vadd.f32 %v4836_v20, %v1201_v55  ;;  %v3605_v17 = vpop.f32.mrb[99].mxu0  ;;  %v3707_v15 = vpop.f32.mrb[99].mxu1 }
 0x1a0   :  { %v672_v29 = vmax.f32 %v623_v61, 0.0  ;;  %v1299_v18 = vmax.f32 %v1250_v9, 0.0 }
 0x1a2   :  { %v4967_v26 = vmax.f32 %v672_v29, %v1299_v18 }
 0x1a3   :  { %v1631_v44 = vpop.f32.mrb[100].mxu0  ;;  %v2258_v47 = vpop.f32.mrb[100].mxu1 }
 0x1a4   :  { %5430 = vst [vmem:[#allocation7_spill] sm:$0xff] %v4967_v26  ;;  %v1829_v60 = vmul.f32 %v4843_v27, %v1631_v44  ;;  %v2456_v39 = vmul.f32 %v4843_v27, %v2258_v47  ;;  %v3712_v54 = vpop.f32.mrb[101].mxu0  ;;  %v3814_v13 = vpop.f32.mrb[101].mxu1 }
 0x1a5   :  { %v1634_v36 = vpop.f32.mrb[102].mxu0  ;;  %v2261_v0 = vpop.f32.mrb[102].mxu1 }
 0x1a6   :  { %v1878_v42 = vadd.f32 %v4836_v20, %v1829_v60  ;;  %v2505_v55 = vadd.f32 %v4836_v20, %v2456_v39  ;;  %v1830_v17 = vmul.f32 %v4843_v27, %v1634_v36  ;;  %v2457_v61 = vmul.f32 %v4843_v27, %v2261_v0  ;;  %v3713_v9 = vpop.f32.mrb[103].mxu0  ;;  %v3815_v15 = vpop.f32.mrb[103].mxu1 }
 0x1a8   :  { %v1927_v29 = vmax.f32 %v1878_v42, 0.0  ;;  %v2554_v18 = vmax.f32 %v2505_v55, 0.0  ;;  %v1879_v44 = vadd.f32 %v4836_v20, %v1830_v17  ;;  %v2506_v47 = vadd.f32 %v4836_v20, %v2457_v61 }
 0x1aa   :  { %v2603_v54 = vmax.f32 %v1927_v29, %v2554_v18  ;;  %v1928_v13 = vmax.f32 %v1879_v44, 0.0  ;;  %v2555_v26 = vmax.f32 %v2506_v47, 0.0 }
 0x1ab   :  { %v1639_v34 = vpop.f32.mrb[104].mxu0  ;;  %v2266_v38 = vpop.f32.mrb[104].mxu1 }
 0x1ac   :  { %v2652_v60 = vmax.f32 %v4413_v19, %v2603_v54  ;;  %v2604_v39 = vmax.f32 %v1928_v13, %v2555_v26  ;;  %v1831_v36 = vmul.f32 %v4843_v27, %v1639_v34  ;;  %v2458_v0 = vmul.f32 %v4843_v27, %v2266_v38  ;;  %v3716_v9 = vpop.f32.mrb[105].mxu0  ;;  %v3818_v15 = vpop.f32.mrb[105].mxu1 }
 0x1ad   :  { %v1642_v42 = vpop.f32.mrb[106].mxu0  ;;  %v2269_v55 = vpop.f32.mrb[106].mxu1 }
 0x1ae   :  { %v3351_v17 = vpack.c.bf16 %v2652_v60, %v2652_v60  ;;  %v2653_v61 = vmax.f32 %v4415_v24, %v2604_v39  ;;  %v1880_v29 = vadd.f32 %v4836_v20, %v1831_v36  ;;  %v2507_v18 = vadd.f32 %v4836_v20, %v2458_v0  ;;  %v3717_v44 = vpop.f32.mrb[107].mxu0  ;;  %v3819_v47 = vpop.f32.mrb[107].mxu1 }
 0x1af   :  { %v1832_v19 = vmul.f32 %v4843_v27, %v1642_v42  ;;  %v2459_v34 = vmul.f32 %v4843_v27, %v2269_v55 }
 0x1b0   :  { %2899 = vst.msk [vmem:[%s5424_s4] sm:$0xf] %vm2898_vm4, %v3351_v17  ;;  %v3352_v38 = vpack.c.bf16 %v2653_v61, %v2653_v61  ;;  %v1929_v26 = vmax.f32 %v1880_v29, 0.0  ;;  %v2556_v54 = vmax.f32 %v2507_v18, 0.0 }
 0x1b1   :  { %v1881_v24 = vadd.f32 %v4836_v20, %v1832_v19  ;;  %v2508_v13 = vadd.f32 %v4836_v20, %v2459_v34 }
 0x1b2   :  { %2900 = vst.msk [vmem:[%s5424_s4 + $0x4] sm:$0xf] %vm2898_vm4, %v3352_v38  ;;  %v2605_v60 = vmax.f32 %v1929_v26, %v2556_v54 }
 0x1b3   :  { %v1930_v39 = vmax.f32 %v1881_v24, 0.0  ;;  %v2557_v36 = vmax.f32 %v2508_v13, 0.0  ;;  %v1647_v0 = vpop.f32.mrb[108].mxu0  ;;  %v2274_v9 = vpop.f32.mrb[108].mxu1 }
 0x1b4   :  { %v2654_v15 = vmax.f32 %v4437_v43, %v2605_v60  ;;  %v1833_v42 = vmul.f32 %v4843_v27, %v1647_v0  ;;  %v2460_v55 = vmul.f32 %v4843_v27, %v2274_v9  ;;  %v3720_v17 = vpop.f32.mrb[109].mxu0  ;;  %v3822_v61 = vpop.f32.mrb[109].mxu1 }
 0x1b5   :  { %v2606_v29 = vmax.f32 %v1930_v39, %v2557_v36  ;;  %v1650_v18 = vpop.f32.mrb[110].mxu0  ;;  %v2277_v44 = vpop.f32.mrb[110].mxu1 }
 0x1b6   :  { %v3353_v47 = vpack.c.bf16 %v2654_v15, %v2654_v15  ;;  %v1882_v19 = vadd.f32 %v4836_v20, %v1833_v42  ;;  %v2509_v34 = vadd.f32 %v4836_v20, %v2460_v55  ;;  %v1834_v38 = vmul.f32 %v4843_v27, %v1650_v18  ;;  %v3721_v26 = vpop.f32.mrb[111].mxu0  ;;  %v3823_v54 = vpop.f32.mrb[111].mxu1 }
 0x1b7   :  { %v2655_v43 = vmax.f32 %v4439_v48, %v2606_v29  ;;  %v2461_v24 = vmul.f32 %v4843_v27, %v2277_v44 }
 0x1b8   :  { %2901 = vst.msk [vmem:[%s5424_s4 + $0x8] sm:$0xf] %vm2898_vm4, %v3353_v47  ;;  %v1931_v13 = vmax.f32 %v1882_v19, 0.0  ;;  %v2558_v60 = vmax.f32 %v2509_v34, 0.0  ;;  %v1883_v39 = vadd.f32 %v4836_v20, %v1834_v38 }
 0x1b9   :  { %v3354_v36 = vpack.c.bf16 %v2655_v43, %v2655_v43  ;;  %v2510_v0 = vadd.f32 %v4836_v20, %v2461_v24 }
 0x1ba   :  { %v2607_v9 = vmax.f32 %v1931_v13, %v2558_v60  ;;  %v1932_v15 = vmax.f32 %v1883_v39, 0.0 }
 0x1bb   :  { %2902 = vst.msk [vmem:[%s5424_s4 + $0xc] sm:$0xf] %vm2898_vm4, %v3354_v36  ;;  %v2559_v48 = vmax.f32 %v2510_v0, 0.0  ;;  %v1655_v42 = vpop.f32.mrb[112].mxu0  ;;  %v2282_v55 = vpop.f32.mrb[112].mxu1 }
 0x1bc   :  { %v2656_v17 = vmax.f32 %v4461_v6, %v2607_v9  ;;  %v1835_v61 = vmul.f32 %v4843_v27, %v1655_v42  ;;  %v2462_v29 = vmul.f32 %v4843_v27, %v2282_v55  ;;  %v3724_v18 = vpop.f32.mrb[113].mxu0  ;;  %v3826_v44 = vpop.f32.mrb[113].mxu1 }
 0x1bd   :  { %v2608_v47 = vmax.f32 %v1932_v15, %v2559_v48  ;;  %v1658_v19 = vpop.f32.mrb[114].mxu0  ;;  %v2285_v34 = vpop.f32.mrb[114].mxu1 }
 0x1be   :  { %v3355_v38 = vpack.c.bf16 %v2656_v17, %v2656_v17  ;;  %v1884_v26 = vadd.f32 %v4836_v20, %v1835_v61  ;;  %v2511_v54 = vadd.f32 %v4836_v20, %v2462_v29  ;;  %v1836_v43 = vmul.f32 %v4843_v27, %v1658_v19  ;;  %v3725_v24 = vpop.f32.mrb[115].mxu0  ;;  %v3827_v13 = vpop.f32.mrb[115].mxu1 }
 0x1bf   :  { %v2657_v6 = vmax.f32 %v4463_v11, %v2608_v47  ;;  %v2463_v60 = vmul.f32 %v4843_v27, %v2285_v34 }
 0x1c0   :  { %2903 = vst.msk [vmem:[%s5424_s4 + $0x10] sm:$0xf] %vm2898_vm4, %v3355_v38  ;;  %v1933_v39 = vmax.f32 %v1884_v26, 0.0  ;;  %v2560_v36 = vmax.f32 %v2511_v54, 0.0  ;;  %v1885_v0 = vadd.f32 %v4836_v20, %v1836_v43 }
 0x1c1   :  { %v3356_v9 = vpack.c.bf16 %v2657_v6, %v2657_v6  ;;  %v2512_v15 = vadd.f32 %v4836_v20, %v2463_v60 }
 0x1c2   :  { %v2609_v48 = vmax.f32 %v1933_v39, %v2560_v36  ;;  %v1934_v42 = vmax.f32 %v1885_v0, 0.0 }
 0x1c3   :  { %2904 = vst.msk [vmem:[%s5424_s4 + $0x14] sm:$0xf] %vm2898_vm4, %v3356_v9  ;;  %v2561_v11 = vmax.f32 %v2512_v15, 0.0  ;;  %v1663_v55 = vpop.f32.mrb[116].mxu0  ;;  %v2290_v17 = vpop.f32.mrb[116].mxu1 }
 0x1c4   :  { %v2658_v61 = vmax.f32 %v4485_v32, %v2609_v48  ;;  %v1837_v29 = vmul.f32 %v4843_v27, %v1663_v55  ;;  %v2464_v18 = vmul.f32 %v4843_v27, %v2290_v17  ;;  %v3728_v44 = vpop.f32.mrb[117].mxu0  ;;  %v3830_v47 = vpop.f32.mrb[117].mxu1 }
 0x1c5   :  { %v2610_v19 = vmax.f32 %v1934_v42, %v2561_v11  ;;  %v1666_v34 = vpop.f32.mrb[118].mxu0  ;;  %v2293_v38 = vpop.f32.mrb[118].mxu1 }
 0x1c6   :  { %v3357_v26 = vpack.c.bf16 %v2658_v61, %v2658_v61  ;;  %v1886_v54 = vadd.f32 %v4836_v20, %v1837_v29  ;;  %v2513_v43 = vadd.f32 %v4836_v20, %v2464_v18  ;;  %v1838_v24 = vmul.f32 %v4843_v27, %v1666_v34  ;;  %v3729_v13 = vpop.f32.mrb[119].mxu0  ;;  %v3831_v6 = vpop.f32.mrb[119].mxu1 }
 0x1c7   :  { %v2659_v32 = vmax.f32 %v4487_v37, %v2610_v19  ;;  %v2465_v60 = vmul.f32 %v4843_v27, %v2293_v38 }
 0x1c8   :  { %2905 = vst.msk [vmem:[%s5424_s4 + $0x18] sm:$0xf] %vm2898_vm4, %v3357_v26  ;;  %v1935_v39 = vmax.f32 %v1886_v54, 0.0  ;;  %v2562_v36 = vmax.f32 %v2513_v43, 0.0  ;;  %v1887_v0 = vadd.f32 %v4836_v20, %v1838_v24 }
 0x1c9   :  { %v3358_v9 = vpack.c.bf16 %v2659_v32, %v2659_v32  ;;  %v2514_v15 = vadd.f32 %v4836_v20, %v2465_v60 }
 0x1ca   :  { %v2611_v48 = vmax.f32 %v1935_v39, %v2562_v36  ;;  %v1936_v42 = vmax.f32 %v1887_v0, 0.0 }
 0x1cb   :  { %2906 = vst.msk [vmem:[%s5424_s4 + $0x1c] sm:$0xf] %vm2898_vm4, %v3358_v9  ;;  %v2563_v37 = vmax.f32 %v2514_v15, 0.0  ;;  %v1671_v11 = vpop.f32.mrb[120].mxu0  ;;  %v2298_v55 = vpop.f32.mrb[120].mxu1 }
 0x1cc   :  { %v2660_v17 = vmax.f32 %v4509_v58, %v2611_v48  ;;  %v1839_v61 = vmul.f32 %v4843_v27, %v1671_v11  ;;  %v2466_v29 = vmul.f32 %v4843_v27, %v2298_v55  ;;  %v3732_v18 = vpop.f32.mrb[121].mxu0  ;;  %v3834_v44 = vpop.f32.mrb[121].mxu1 }
 0x1cd   :  { %v2612_v47 = vmax.f32 %v1936_v42, %v2563_v37  ;;  %v1674_v19 = vpop.f32.mrb[122].mxu0  ;;  %v2301_v34 = vpop.f32.mrb[122].mxu1 }
 0x1ce   :  { %v3359_v38 = vpack.c.bf16 %v2660_v17, %v2660_v17  ;;  %v1888_v26 = vadd.f32 %v4836_v20, %v1839_v61  ;;  %v2515_v54 = vadd.f32 %v4836_v20, %v2466_v29  ;;  %v1840_v43 = vmul.f32 %v4843_v27, %v1674_v19  ;;  %v3733_v24 = vpop.f32.mrb[123].mxu0  ;;  %v3835_v13 = vpop.f32.mrb[123].mxu1 }
 0x1cf   :  { %v2661_v58 = vmax.f32 %v4511_v2, %v2612_v47  ;;  %v2467_v6 = vmul.f32 %v4843_v27, %v2301_v34 }
 0x1d0   :  { %2907 = vst.msk [vmem:[%s5424_s4 + $0x20] sm:$0xf] %vm2898_vm4, %v3359_v38  ;;  %v1937_v32 = vmax.f32 %v1888_v26, 0.0  ;;  %v2564_v60 = vmax.f32 %v2515_v54, 0.0  ;;  %v1889_v39 = vadd.f32 %v4836_v20, %v1840_v43 }
 0x1d1   :  { %v3360_v36 = vpack.c.bf16 %v2661_v58, %v2661_v58  ;;  %v2516_v0 = vadd.f32 %v4836_v20, %v2467_v6 }
 0x1d2   :  { %v2613_v9 = vmax.f32 %v1937_v32, %v2564_v60  ;;  %v1938_v15 = vmax.f32 %v1889_v39, 0.0 }
 0x1d3   :  { %2908 = vst.msk [vmem:[%s5424_s4 + $0x24] sm:$0xf] %vm2898_vm4, %v3360_v36  ;;  %v2565_v2 = vmax.f32 %v2516_v0, 0.0  ;;  %v1679_v48 = vpop.f32.mrb[124].mxu0  ;;  %v2306_v42 = vpop.f32.mrb[124].mxu1 }
 0x1d4   :  { %v2662_v37 = vmax.f32 %v4533_v25, %v2613_v9  ;;  %v1841_v11 = vmul.f32 %v4843_v27, %v1679_v48  ;;  %v2468_v55 = vmul.f32 %v4843_v27, %v2306_v42  ;;  %v3736_v17 = vpop.f32.mrb[125].mxu0  ;;  %v3838_v61 = vpop.f32.mrb[125].mxu1 }
 0x1d5   :  { %v2614_v29 = vmax.f32 %v1938_v15, %v2565_v2  ;;  %v1682_v18 = vpop.f32.mrb[126].mxu0  ;;  %v2309_v44 = vpop.f32.mrb[126].mxu1 }
 0x1d6   :  { %v3361_v47 = vpack.c.bf16 %v2662_v37, %v2662_v37  ;;  %v1890_v19 = vadd.f32 %v4836_v20, %v1841_v11  ;;  %v2517_v34 = vadd.f32 %v4836_v20, %v2468_v55  ;;  %v1842_v38 = vmul.f32 %v4843_v27, %v1682_v18  ;;  %v3737_v26 = vpop.f32.mrb[127].mxu0  ;;  %v3839_v54 = vpop.f32.mrb[127].mxu1 }
 0x1d7   :  { %v2663_v25 = vmax.f32 %v4535_v30, %v2614_v29  ;;  %v2469_v43 = vmul.f32 %v4843_v27, %v2309_v44 }
 0x1d8   :  { %2909 = vst.msk [vmem:[%s5424_s4 + $0x28] sm:$0xf] %vm2898_vm4, %v3361_v47  ;;  %v1939_v24 = vmax.f32 %v1890_v19, 0.0  ;;  %v2566_v13 = vmax.f32 %v2517_v34, 0.0  ;;  %v1891_v58 = vadd.f32 %v4836_v20, %v1842_v38 }
 0x1d9   :  { %v3362_v6 = vpack.c.bf16 %v2663_v25, %v2663_v25  ;;  %v2518_v32 = vadd.f32 %v4836_v20, %v2469_v43 }
 0x1da   :  { %v2615_v60 = vmax.f32 %v1939_v24, %v2566_v13  ;;  %v1940_v39 = vmax.f32 %v1891_v58, 0.0 }
 0x1db   :  { %2910 = vst.msk [vmem:[%s5424_s4 + $0x2c] sm:$0xf] %vm2898_vm4, %v3362_v6  ;;  %v2567_v30 = vmax.f32 %v2518_v32, 0.0  ;;  %v1687_v36 = vpop.f32.mrb[128].mxu0  ;;  %v2314_v0 = vpop.f32.mrb[128].mxu1 }
 0x1dc   :  { %v2664_v9 = vmax.f32 %v4557_v53, %v2615_v60  ;;  %v1843_v15 = vmul.f32 %v4843_v27, %v1687_v36  ;;  %v2470_v2 = vmul.f32 %v4843_v27, %v2314_v0  ;;  %v3740_v48 = vpop.f32.mrb[129].mxu0  ;;  %v3842_v42 = vpop.f32.mrb[129].mxu1 }
 0x1dd   :  { %v2616_v37 = vmax.f32 %v1940_v39, %v2567_v30  ;;  %v1690_v11 = vpop.f32.mrb[130].mxu0  ;;  %v2317_v55 = vpop.f32.mrb[130].mxu1 }
 0x1de   :  { %v3363_v17 = vpack.c.bf16 %v2664_v9, %v2664_v9  ;;  %v1892_v61 = vadd.f32 %v4836_v20, %v1843_v15  ;;  %v2519_v29 = vadd.f32 %v4836_v20, %v2470_v2  ;;  %v1844_v18 = vmul.f32 %v4843_v27, %v1690_v11  ;;  %v3741_v44 = vpop.f32.mrb[131].mxu0  ;;  %v3843_v47 = vpop.f32.mrb[131].mxu1 }
 0x1df   :  { %v2665_v53 = vmax.f32 %v4559_v59, %v2616_v37  ;;  %v2471_v19 = vmul.f32 %v4843_v27, %v2317_v55 }
 0x1e0   :  { %2911 = vst.msk [vmem:[%s5424_s4 + $0x30] sm:$0xf] %vm2898_vm4, %v3363_v17  ;;  %v1941_v34 = vmax.f32 %v1892_v61, 0.0  ;;  %v2568_v38 = vmax.f32 %v2519_v29, 0.0  ;;  %v1893_v26 = vadd.f32 %v4836_v20, %v1844_v18 }
 0x1e1   :  { %v3364_v54 = vpack.c.bf16 %v2665_v53, %v2665_v53  ;;  %v2520_v25 = vadd.f32 %v4836_v20, %v2471_v19 }
 0x1e2   :  { %v2617_v43 = vmax.f32 %v1941_v34, %v2568_v38  ;;  %v1942_v24 = vmax.f32 %v1893_v26, 0.0 }
 0x1e3   :  { %2912 = vst.msk [vmem:[%s5424_s4 + $0x34] sm:$0xf] %vm2898_vm4, %v3364_v54  ;;  %v2569_v59 = vmax.f32 %v2520_v25, 0.0  ;;  %v1695_v13 = vpop.f32.mrb[132].mxu0  ;;  %v2322_v58 = vpop.f32.mrb[132].mxu1 }
 0x1e4   :  { %v2666_v6 = vmax.f32 %v4581_v21, %v2617_v43  ;;  %v1845_v32 = vmul.f32 %v4843_v27, %v1695_v13  ;;  %v2472_v60 = vmul.f32 %v4843_v27, %v2322_v58  ;;  %v3744_v39 = vpop.f32.mrb[133].mxu0  ;;  %v3846_v30 = vpop.f32.mrb[133].mxu1 }
 0x1e5   :  { %v2618_v36 = vmax.f32 %v1942_v24, %v2569_v59  ;;  %v1698_v0 = vpop.f32.mrb[134].mxu0  ;;  %v2325_v9 = vpop.f32.mrb[134].mxu1 }
 0x1e6   :  { %v3365_v15 = vpack.c.bf16 %v2666_v6, %v2666_v6  ;;  %v1894_v2 = vadd.f32 %v4836_v20, %v1845_v32  ;;  %v2521_v48 = vadd.f32 %v4836_v20, %v2472_v60  ;;  %v1846_v42 = vmul.f32 %v4843_v27, %v1698_v0  ;;  %v3745_v37 = vpop.f32.mrb[135].mxu0  ;;  %v3847_v11 = vpop.f32.mrb[135].mxu1 }
 0x1e7   :  { %v2667_v21 = vmax.f32 %v4583_v28, %v2618_v36  ;;  %v2473_v55 = vmul.f32 %v4843_v27, %v2325_v9 }
 0x1e8   :  { %2913 = vst.msk [vmem:[%s5424_s4 + $0x38] sm:$0xf] %vm2898_vm4, %v3365_v15  ;;  %v1943_v17 = vmax.f32 %v1894_v2, 0.0  ;;  %v2570_v61 = vmax.f32 %v2521_v48, 0.0  ;;  %v1895_v29 = vadd.f32 %v4836_v20, %v1846_v42 }
 0x1e9   :  { %v3366_v18 = vpack.c.bf16 %v2667_v21, %v2667_v21  ;;  %v2522_v44 = vadd.f32 %v4836_v20, %v2473_v55 }
 0x1ea   :  { %v2619_v47 = vmax.f32 %v1943_v17, %v2570_v61  ;;  %v1944_v53 = vmax.f32 %v1895_v29, 0.0 }
 0x1eb   :  { %2914 = vst.msk [vmem:[%s5424_s4 + $0x3c] sm:$0xf] %vm2898_vm4, %v3366_v18  ;;  %v2571_v28 = vmax.f32 %v2522_v44, 0.0  ;;  %v1703_v19 = vpop.f32.mrb[136].mxu0  ;;  %v2330_v34 = vpop.f32.mrb[136].mxu1 }
 0x1ec   :  { %v2668_v38 = vmax.f32 %v4605_v52, %v2619_v47  ;;  %v1847_v26 = vmul.f32 %v4843_v27, %v1703_v19  ;;  %v2474_v54 = vmul.f32 %v4843_v27, %v2330_v34  ;;  %v3748_v25 = vpop.f32.mrb[137].mxu0  ;;  %v3850_v43 = vpop.f32.mrb[137].mxu1 }
 0x1ed   :  { %v2620_v24 = vmax.f32 %v1944_v53, %v2571_v28  ;;  %v1706_v59 = vpop.f32.mrb[138].mxu0  ;;  %v2333_v13 = vpop.f32.mrb[138].mxu1 }
 0x1ee   :  { %v3367_v58 = vpack.c.bf16 %v2668_v38, %v2668_v38  ;;  %v1896_v6 = vadd.f32 %v4836_v20, %v1847_v26  ;;  %v2523_v32 = vadd.f32 %v4836_v20, %v2474_v54  ;;  %v1848_v60 = vmul.f32 %v4843_v27, %v1706_v59  ;;  %v3749_v39 = vpop.f32.mrb[139].mxu0  ;;  %v3851_v30 = vpop.f32.mrb[139].mxu1 }
 0x1ef   :  { %v2669_v52 = vmax.f32 %v4607_v62, %v2620_v24  ;;  %v2475_v36 = vmul.f32 %v4843_v27, %v2333_v13 }
 0x1f0   :  { %2915 = vst.msk [vmem:[%s5424_s4 + $0x40] sm:$0xf] %vm2898_vm4, %v3367_v58  ;;  %v1945_v0 = vmax.f32 %v1896_v6, 0.0  ;;  %v2572_v9 = vmax.f32 %v2523_v32, 0.0  ;;  %v1897_v15 = vadd.f32 %v4836_v20, %v1848_v60 }
 0x1f1   :  { %v3368_v2 = vpack.c.bf16 %v2669_v52, %v2669_v52  ;;  %v2524_v48 = vadd.f32 %v4836_v20, %v2475_v36 }
 0x1f2   :  { %v2621_v42 = vmax.f32 %v1945_v0, %v2572_v9  ;;  %v1946_v37 = vmax.f32 %v1897_v15, 0.0 }
 0x1f3   :  { %2916 = vst.msk [vmem:[%s5424_s4 + $0x44] sm:$0xf] %vm2898_vm4, %v3368_v2  ;;  %v2573_v62 = vmax.f32 %v2524_v48, 0.0  ;;  %v1711_v11 = vpop.f32.mrb[140].mxu0  ;;  %v2338_v21 = vpop.f32.mrb[140].mxu1 }
 0x1f4   :  { %v2670_v55 = vmax.f32 %v4629_v23, %v2621_v42  ;;  %v1849_v17 = vmul.f32 %v4843_v27, %v1711_v11  ;;  %v2476_v61 = vmul.f32 %v4843_v27, %v2338_v21  ;;  %v3752_v29 = vpop.f32.mrb[141].mxu0  ;;  %v3854_v18 = vpop.f32.mrb[141].mxu1 }
 0x1f5   :  { %v2622_v44 = vmax.f32 %v1946_v37, %v2573_v62  ;;  %v1714_v47 = vpop.f32.mrb[142].mxu0  ;;  %v2341_v53 = vpop.f32.mrb[142].mxu1 }
 0x1f6   :  { %v3369_v28 = vpack.c.bf16 %v2670_v55, %v2670_v55  ;;  %v1898_v19 = vadd.f32 %v4836_v20, %v1849_v17  ;;  %v2525_v34 = vadd.f32 %v4836_v20, %v2476_v61  ;;  %v1850_v38 = vmul.f32 %v4843_v27, %v1714_v47  ;;  %v3753_v26 = vpop.f32.mrb[143].mxu0  ;;  %v3855_v54 = vpop.f32.mrb[143].mxu1 }
 0x1f7   :  { %v2671_v23 = vmax.f32 %v4631_v33, %v2622_v44  ;;  %v2477_v25 = vmul.f32 %v4843_v27, %v2341_v53 }
 0x1f8   :  { %2917 = vst.msk [vmem:[%s5424_s4 + $0x48] sm:$0xf] %vm2898_vm4, %v3369_v28  ;;  %v1947_v43 = vmax.f32 %v1898_v19, 0.0  ;;  %v2574_v24 = vmax.f32 %v2525_v34, 0.0  ;;  %v1899_v59 = vadd.f32 %v4836_v20, %v1850_v38 }
 0x1f9   :  { %v3370_v13 = vpack.c.bf16 %v2671_v23, %v2671_v23  ;;  %v2526_v58 = vadd.f32 %v4836_v20, %v2477_v25 }
 0x1fa   :  { %v2623_v6 = vmax.f32 %v1947_v43, %v2574_v24  ;;  %v1948_v32 = vmax.f32 %v1899_v59, 0.0 }
 0x1fb   :  { %2918 = vst.msk [vmem:[%s5424_s4 + $0x4c] sm:$0xf] %vm2898_vm4, %v3370_v13  ;;  %v2575_v33 = vmax.f32 %v2526_v58, 0.0  ;;  %v1719_v60 = vpop.f32.mrb[144].mxu0  ;;  %v2346_v39 = vpop.f32.mrb[144].mxu1 }
 0x1fc   :  { %v2672_v30 = vmax.f32 %v4653_v57, %v2623_v6  ;;  %v1851_v52 = vmul.f32 %v4843_v27, %v1719_v60  ;;  %v2478_v36 = vmul.f32 %v4843_v27, %v2346_v39  ;;  %v3756_v0 = vpop.f32.mrb[145].mxu0  ;;  %v3858_v9 = vpop.f32.mrb[145].mxu1 }
 0x1fd   :  { %v2624_v15 = vmax.f32 %v1948_v32, %v2575_v33  ;;  %v1722_v2 = vpop.f32.mrb[146].mxu0  ;;  %v2349_v48 = vpop.f32.mrb[146].mxu1 }
 0x1fe   :  { %v3371_v42 = vpack.c.bf16 %v2672_v30, %v2672_v30  ;;  %v1900_v37 = vadd.f32 %v4836_v20, %v1851_v52  ;;  %v2527_v62 = vadd.f32 %v4836_v20, %v2478_v36  ;;  %v1852_v11 = vmul.f32 %v4843_v27, %v1722_v2  ;;  %v3757_v21 = vpop.f32.mrb[147].mxu0  ;;  %v3859_v55 = vpop.f32.mrb[147].mxu1  ;;  %v5190_v36 = vld [vmem:[%s5423_s3] ss:$0 sm:$0xff] }
 0x1ff   :  { %v2673_v57 = vmax.f32 %v4655_v5, %v2624_v15  ;;  %v2479_v17 = vmul.f32 %v4843_v27, %v2349_v48 }
 0x200   :  { %2919 = vst.msk [vmem:[%s5424_s4 + $0x50] sm:$0xf] %vm2898_vm4, %v3371_v42  ;;  %v1949_v61 = vmax.f32 %v1900_v37, 0.0  ;;  %v2576_v29 = vmax.f32 %v2527_v62, 0.0  ;;  %v1901_v18 = vadd.f32 %v4836_v20, %v1852_v11  ;;  %v5202_v37 = vld [vmem:[%s5422_s2] ss:$0 sm:$0xff] }
 0x201   :  { %v3372_v44 = vpack.c.bf16 %v2673_v57, %v2673_v57  ;;  %v2528_v47 = vadd.f32 %v4836_v20, %v2479_v17 }
 0x202   :  { %v2625_v53 = vmax.f32 %v1949_v61, %v2576_v29  ;;  %v1950_v28 = vmax.f32 %v1901_v18, 0.0 }
 0x203   :  { %2920 = vst.msk [vmem:[%s5424_s4 + $0x54] sm:$0xf] %vm2898_vm4, %v3372_v44  ;;  %v2577_v5 = vmax.f32 %v2528_v47, 0.0  ;;  %v1727_v19 = vpop.f32.mrb[148].mxu0  ;;  %v2354_v34 = vpop.f32.mrb[148].mxu1 }
 0x204   :  { %v2674_v38 = vmax.f32 %v4677_v35, %v2625_v53  ;;  %v1853_v26 = vmul.f32 %v4843_v27, %v1727_v19  ;;  %v2480_v54 = vmul.f32 %v4843_v27, %v2354_v34  ;;  %v3760_v23 = vpop.f32.mrb[149].mxu0  ;;  %v3862_v25 = vpop.f32.mrb[149].mxu1 }
 0x205   :  { %v2626_v43 = vmax.f32 %v1950_v28, %v2577_v5  ;;  %v1730_v24 = vpop.f32.mrb[150].mxu0  ;;  %v2357_v59 = vpop.f32.mrb[150].mxu1 }
 0x206   :  { %v3373_v13 = vpack.c.bf16 %v2674_v38, %v2674_v38  ;;  %v1902_v58 = vadd.f32 %v4836_v20, %v1853_v26  ;;  %v2529_v6 = vadd.f32 %v4836_v20, %v2480_v54  ;;  %v1854_v32 = vmul.f32 %v4843_v27, %v1730_v24  ;;  %v3761_v33 = vpop.f32.mrb[151].mxu0  ;;  %v3863_v60 = vpop.f32.mrb[151].mxu1 }
 0x207   :  { %v2675_v35 = vmax.f32 %v4679_v41, %v2626_v43  ;;  %v2481_v39 = vmul.f32 %v4843_v27, %v2357_v59 }
 0x208   :  { %2921 = vst.msk [vmem:[%s5424_s4 + $0x58] sm:$0xf] %vm2898_vm4, %v3373_v13  ;;  %v1951_v30 = vmax.f32 %v1902_v58, 0.0  ;;  %v2578_v52 = vmax.f32 %v2529_v6, 0.0  ;;  %v1903_v20 = vadd.f32 %v5190_v36, %v1854_v32 }
 0x209   :  { %v3374_v0 = vpack.c.bf16 %v2675_v35, %v2675_v35  ;;  %v2530_v9 = vadd.f32 %v5190_v36, %v2481_v39 }
 0x20a   :  { %v2627_v41 = vmax.f32 %v1951_v30, %v2578_v52  ;;  %v1952_v15 = vmax.f32 %v1903_v20, 0.0 }
 0x20b   :  { %2922 = vst.msk [vmem:[%s5424_s4 + $0x5c] sm:$0xf] %vm2898_vm4, %v3374_v0  ;;  %v2579_v27 = vmax.f32 %v2530_v9, 0.0  ;;  %v1735_v2 = vpop.f32.mrb[152].mxu0  ;;  %v2362_v48 = vpop.f32.mrb[152].mxu1 }
 0x20c   :  { %v2676_v42 = vmax.f32 %v4701_v10, %v2627_v41  ;;  %v1855_v62 = vmul.f32 %v5202_v37, %v1735_v2  ;;  %v2482_v11 = vmul.f32 %v5202_v37, %v2362_v48  ;;  %v3764_v21 = vpop.f32.mrb[153].mxu0  ;;  %v3866_v55 = vpop.f32.mrb[153].mxu1 }
 0x20d   :  { %v2628_v57 = vmax.f32 %v1952_v15, %v2579_v27  ;;  %v1738_v17 = vpop.f32.mrb[154].mxu0  ;;  %v2365_v61 = vpop.f32.mrb[154].mxu1 }
 0x20e   :  { %v3375_v29 = vpack.c.bf16 %v2676_v42, %v2676_v42  ;;  %v1904_v18 = vadd.f32 %v5190_v36, %v1855_v62  ;;  %v2531_v44 = vadd.f32 %v5190_v36, %v2482_v11  ;;  %v1856_v10 = vmul.f32 %v5202_v37, %v1738_v17  ;;  %v3765_v47 = vpop.f32.mrb[155].mxu0  ;;  %v3867_v53 = vpop.f32.mrb[155].mxu1 }
 0x20f   :  { %v2677_v28 = vmax.f32 %v4703_v16, %v2628_v57  ;;  %v2483_v5 = vmul.f32 %v5202_v37, %v2365_v61 }
 0x210   :  { %2923 = vst.msk [vmem:[%s5424_s4 + $0x60] sm:$0xf] %vm2898_vm4, %v3375_v29  ;;  %v1953_v19 = vmax.f32 %v1904_v18, 0.0  ;;  %v2580_v34 = vmax.f32 %v2531_v44, 0.0  ;;  %v1905_v38 = vadd.f32 %v5190_v36, %v1856_v10 }
 0x211   :  { %v3376_v26 = vpack.c.bf16 %v2677_v28, %v2677_v28  ;;  %v2532_v54 = vadd.f32 %v5190_v36, %v2483_v5 }
 0x212   :  { %v2629_v23 = vmax.f32 %v1953_v19, %v2580_v34  ;;  %v1954_v25 = vmax.f32 %v1905_v38, 0.0 }
 0x213   :  { %2924 = vst.msk [vmem:[%s5424_s4 + $0x64] sm:$0xf] %vm2898_vm4, %v3376_v26  ;;  %v2581_v16 = vmax.f32 %v2532_v54, 0.0  ;;  %v1743_v43 = vpop.f32.mrb[156].mxu0  ;;  %v2370_v24 = vpop.f32.mrb[156].mxu1 }
 0x214   :  { %v2678_v59 = vmax.f32 %v4725_v49, %v2629_v23  ;;  %v1857_v13 = vmul.f32 %v5202_v37, %v1743_v43  ;;  %v2484_v58 = vmul.f32 %v5202_v37, %v2370_v24  ;;  %v3768_v6 = vpop.f32.mrb[157].mxu0  ;;  %v3870_v32 = vpop.f32.mrb[157].mxu1 }
 0x215   :  { %v2630_v33 = vmax.f32 %v1954_v25, %v2581_v16  ;;  %v1746_v60 = vpop.f32.mrb[158].mxu0  ;;  %v2373_v35 = vpop.f32.mrb[158].mxu1 }
 0x216   :  { %v3377_v39 = vpack.c.bf16 %v2678_v59, %v2678_v59  ;;  %v1906_v30 = vadd.f32 %v5190_v36, %v1857_v13  ;;  %v2533_v52 = vadd.f32 %v5190_v36, %v2484_v58  ;;  %v1858_v20 = vmul.f32 %v5202_v37, %v1746_v60  ;;  %v3769_v0 = vpop.f32.mrb[159].mxu0  ;;  %v3871_v9 = vpop.f32.mrb[159].mxu1 }
 0x217   :  { %v2679_v49 = vmax.f32 %v4727_v56, %v2630_v33  ;;  %v2485_v41 = vmul.f32 %v5202_v37, %v2373_v35 }
 0x218   :  { %2925 = vst.msk [vmem:[%s5424_s4 + $0x68] sm:$0xf] %vm2898_vm4, %v3377_v39  ;;  %v1955_v15 = vmax.f32 %v1906_v30, 0.0  ;;  %v2582_v27 = vmax.f32 %v2533_v52, 0.0  ;;  %v1907_v2 = vadd.f32 %v5190_v36, %v1858_v20 }
 0x219   :  { %v3378_v48 = vpack.c.bf16 %v2679_v49, %v2679_v49  ;;  %v2534_v42 = vadd.f32 %v5190_v36, %v2485_v41 }
 0x21a   :  { %v2631_v62 = vmax.f32 %v1955_v15, %v2582_v27  ;;  %v1956_v11 = vmax.f32 %v1907_v2, 0.0 }
 0x21b   :  { %2926 = vst.msk [vmem:[%s5424_s4 + $0x6c] sm:$0xf] %vm2898_vm4, %v3378_v48  ;;  %v2583_v56 = vmax.f32 %v2534_v42, 0.0  ;;  %v1751_v21 = vpop.f32.mrb[160].mxu0  ;;  %v2378_v55 = vpop.f32.mrb[160].mxu1 }
 0x21c   :  { %v2680_v57 = vmax.f32 %v4749_v31, %v2631_v62  ;;  %v1859_v17 = vmul.f32 %v5202_v37, %v1751_v21  ;;  %v2486_v61 = vmul.f32 %v5202_v37, %v2378_v55  ;;  %v3772_v29 = vpop.f32.mrb[161].mxu0  ;;  %v3874_v18 = vpop.f32.mrb[161].mxu1 }
 0x21d   :  { %v2632_v44 = vmax.f32 %v1956_v11, %v2583_v56  ;;  %v1754_v10 = vpop.f32.mrb[162].mxu0  ;;  %v2381_v47 = vpop.f32.mrb[162].mxu1 }
 0x21e   :  { %v3379_v53 = vpack.c.bf16 %v2680_v57, %v2680_v57  ;;  %v1908_v28 = vadd.f32 %v5190_v36, %v1859_v17  ;;  %v2535_v5 = vadd.f32 %v5190_v36, %v2486_v61  ;;  %v1860_v19 = vmul.f32 %v5202_v37, %v1754_v10  ;;  %v3773_v34 = vpop.f32.mrb[163].mxu0  ;;  %v3875_v38 = vpop.f32.mrb[163].mxu1 }
 0x21f   :  { %v2681_v31 = vmax.f32 %v4751_v40, %v2632_v44  ;;  %v2487_v26 = vmul.f32 %v5202_v37, %v2381_v47 }
 0x220   :  { %2927 = vst.msk [vmem:[%s5424_s4 + $0x70] sm:$0xf] %vm2898_vm4, %v3379_v53  ;;  %v1957_v54 = vmax.f32 %v1908_v28, 0.0  ;;  %v2584_v23 = vmax.f32 %v2535_v5, 0.0  ;;  %v1909_v25 = vadd.f32 %v5190_v36, %v1860_v19 }
 0x221   :  { %v3380_v16 = vpack.c.bf16 %v2681_v31, %v2681_v31  ;;  %v2536_v43 = vadd.f32 %v5190_v36, %v2487_v26 }
 0x222   :  { %v2633_v24 = vmax.f32 %v1957_v54, %v2584_v23  ;;  %v1958_v59 = vmax.f32 %v1909_v25, 0.0 }
 0x223   :  { %2928 = vst.msk [vmem:[%s5424_s4 + $0x74] sm:$0xf] %vm2898_vm4, %v3380_v16  ;;  %v2585_v40 = vmax.f32 %v2536_v43, 0.0  ;;  %v1759_v13 = vpop.f32.mrb[164].mxu0  ;;  %v2386_v58 = vpop.f32.mrb[164].mxu1 }
 0x224   :  { %v2682_v6 = vmax.f32 %v4773_v14, %v2633_v24  ;;  %v1861_v32 = vmul.f32 %v5202_v37, %v1759_v13  ;;  %v2488_v33 = vmul.f32 %v5202_v37, %v2386_v58  ;;  %v3776_v60 = vpop.f32.mrb[165].mxu0  ;;  %v3878_v35 = vpop.f32.mrb[165].mxu1 }
 0x225   :  { %v2634_v39 = vmax.f32 %v1958_v59, %v2585_v40  ;;  %v1762_v30 = vpop.f32.mrb[166].mxu0  ;;  %v2389_v52 = vpop.f32.mrb[166].mxu1 }
 0x226   :  { %v3381_v20 = vpack.c.bf16 %v2682_v6, %v2682_v6  ;;  %v1910_v0 = vadd.f32 %v5190_v36, %v1861_v32  ;;  %v2537_v9 = vadd.f32 %v5190_v36, %v2488_v33  ;;  %v1862_v49 = vmul.f32 %v5202_v37, %v1762_v30  ;;  %v3777_v41 = vpop.f32.mrb[167].mxu0  ;;  %v3879_v15 = vpop.f32.mrb[167].mxu1 }
 0x227   :  { %v2683_v14 = vmax.f32 %v4775_v22, %v2634_v39  ;;  %v2489_v27 = vmul.f32 %v5202_v37, %v2389_v52 }
 0x228   :  { %2929 = vst.msk [vmem:[%s5424_s4 + $0x78] sm:$0xf] %vm2898_vm4, %v3381_v20  ;;  %v1959_v2 = vmax.f32 %v1910_v0, 0.0  ;;  %v2586_v48 = vmax.f32 %v2537_v9, 0.0  ;;  %v1911_v42 = vadd.f32 %v5190_v36, %v1862_v49 }
 0x229   :  { %v3382_v62 = vpack.c.bf16 %v2683_v14, %v2683_v14  ;;  %v2538_v11 = vadd.f32 %v5190_v36, %v2489_v27 }
 0x22a   :  { %v2635_v56 = vmax.f32 %v1959_v2, %v2586_v48  ;;  %v1960_v21 = vmax.f32 %v1911_v42, 0.0 }
 0x22b   :  { %2930 = vst.msk [vmem:[%s5424_s4 + $0x7c] sm:$0xf] %vm2898_vm4, %v3382_v62  ;;  %v2587_v22 = vmax.f32 %v2538_v11, 0.0  ;;  %v1767_v55 = vpop.f32.mrb[168].mxu0  ;;  %v2394_v57 = vpop.f32.mrb[168].mxu1 }
 0x22c   :  { %v2684_v17 = vmax.f32 %v4797_v3, %v2635_v56  ;;  %v1863_v61 = vmul.f32 %v5202_v37, %v1767_v55  ;;  %v2490_v29 = vmul.f32 %v5202_v37, %v2394_v57  ;;  %v3780_v18 = vpop.f32.mrb[169].mxu0  ;;  %v3882_v44 = vpop.f32.mrb[169].mxu1 }
 0x22d   :  { %v2636_v10 = vmax.f32 %v1960_v21, %v2587_v22  ;;  %v1770_v47 = vpop.f32.mrb[170].mxu0  ;;  %v2397_v53 = vpop.f32.mrb[170].mxu1 }
 0x22e   :  { %v3383_v28 = vpack.c.bf16 %v2684_v17, %v2684_v17  ;;  %v1912_v5 = vadd.f32 %v5190_v36, %v1863_v61  ;;  %v2539_v19 = vadd.f32 %v5190_v36, %v2490_v29  ;;  %v1864_v34 = vmul.f32 %v5202_v37, %v1770_v47  ;;  %v3781_v38 = vpop.f32.mrb[171].mxu0  ;;  %v3883_v31 = vpop.f32.mrb[171].mxu1 }
 0x22f   :  { %v2685_v3 = vmax.f32 %v4799_v12, %v2636_v10  ;;  %v2491_v26 = vmul.f32 %v5202_v37, %v2397_v53 }
 0x230   :  { %2931 = vst.msk [vmem:[%s5424_s4 + $0x80] sm:$0xf] %vm2898_vm4, %v3383_v28  ;;  %v1961_v54 = vmax.f32 %v1912_v5, 0.0  ;;  %v2588_v23 = vmax.f32 %v2539_v19, 0.0  ;;  %v1913_v25 = vadd.f32 %v5190_v36, %v1864_v34 }
 0x231   :  { %v3384_v16 = vpack.c.bf16 %v2685_v3, %v2685_v3  ;;  %v2540_v43 = vadd.f32 %v5190_v36, %v2491_v26 }
 0x232   :  { %v2637_v24 = vmax.f32 %v1961_v54, %v2588_v23  ;;  %v1962_v59 = vmax.f32 %v1913_v25, 0.0 }
 0x233   :  { %2932 = vst.msk [vmem:[%s5424_s4 + $0x84] sm:$0xf] %vm2898_vm4, %v3384_v16  ;;  %v2589_v12 = vmax.f32 %v2540_v43, 0.0  ;;  %v1775_v40 = vpop.f32.mrb[172].mxu0  ;;  %v2402_v13 = vpop.f32.mrb[172].mxu1 }
 0x234   :  { %v2686_v58 = vmax.f32 %v4821_v51, %v2637_v24  ;;  %v1865_v6 = vmul.f32 %v5202_v37, %v1775_v40  ;;  %v2492_v32 = vmul.f32 %v5202_v37, %v2402_v13  ;;  %v3784_v33 = vpop.f32.mrb[173].mxu0  ;;  %v3886_v60 = vpop.f32.mrb[173].mxu1 }
 0x235   :  { %v2638_v35 = vmax.f32 %v1962_v59, %v2589_v12  ;;  %v1778_v39 = vpop.f32.mrb[174].mxu0  ;;  %v2405_v30 = vpop.f32.mrb[174].mxu1 }
 0x236   :  { %v3385_v52 = vpack.c.bf16 %v2686_v58, %v2686_v58  ;;  %v1914_v20 = vadd.f32 %v5190_v36, %v1865_v6  ;;  %v2541_v0 = vadd.f32 %v5190_v36, %v2492_v32  ;;  %v1866_v9 = vmul.f32 %v5202_v37, %v1778_v39  ;;  %v3785_v49 = vpop.f32.mrb[175].mxu0  ;;  %v3887_v41 = vpop.f32.mrb[175].mxu1 }
 0x237   :  { %v2687_v51 = vmax.f32 %v4823_v4, %v2638_v35  ;;  %v2493_v15 = vmul.f32 %v5202_v37, %v2405_v30 }
 0x238   :  { %2933 = vst.msk [vmem:[%s5424_s4 + $0x88] sm:$0xf] %vm2898_vm4, %v3385_v52  ;;  %v1963_v14 = vmax.f32 %v1914_v20, 0.0  ;;  %v2590_v27 = vmax.f32 %v2541_v0, 0.0  ;;  %v1915_v2 = vadd.f32 %v5190_v36, %v1866_v9 }
 0x239   :  { %v3386_v48 = vpack.c.bf16 %v2687_v51, %v2687_v51  ;;  %v2542_v42 = vadd.f32 %v5190_v36, %v2493_v15 }
 0x23a   :  { %v2639_v62 = vmax.f32 %v1963_v14, %v2590_v27  ;;  %v1964_v11 = vmax.f32 %v1915_v2, 0.0 }
 0x23b   :  { %2934 = vst.msk [vmem:[%s5424_s4 + $0x8c] sm:$0xf] %vm2898_vm4, %v3386_v48  ;;  %v2591_v4 = vmax.f32 %v2542_v42, 0.0  ;;  %v1783_v56 = vpop.f32.mrb[176].mxu0  ;;  %v2410_v21 = vpop.f32.mrb[176].mxu1 }
 0x23c   :  { %v2688_v22 = vmax.f32 %v4855_v46, %v2639_v62  ;;  %v1867_v55 = vmul.f32 %v5202_v37, %v1783_v56  ;;  %v2494_v57 = vmul.f32 %v5202_v37, %v2410_v21  ;;  %v3788_v17 = vpop.f32.mrb[177].mxu0  ;;  %v3890_v61 = vpop.f32.mrb[177].mxu1 }
 0x23d   :  { %v2640_v29 = vmax.f32 %v1964_v11, %v2591_v4  ;;  %v1786_v18 = vpop.f32.mrb[178].mxu0  ;;  %v2413_v44 = vpop.f32.mrb[178].mxu1 }
 0x23e   :  { %v3387_v10 = vpack.c.bf16 %v2688_v22, %v2688_v22  ;;  %v1916_v47 = vadd.f32 %v5190_v36, %v1867_v55  ;;  %v2543_v53 = vadd.f32 %v5190_v36, %v2494_v57  ;;  %v1868_v28 = vmul.f32 %v5202_v37, %v1786_v18  ;;  %v3789_v5 = vpop.f32.mrb[179].mxu0  ;;  %v3891_v19 = vpop.f32.mrb[179].mxu1 }
 0x23f   :  { %v2689_v46 = vmax.f32 %v4857_v63, %v2640_v29  ;;  %v2495_v34 = vmul.f32 %v5202_v37, %v2413_v44 }
 0x240   :  { %2935 = vst.msk [vmem:[%s5424_s4 + $0x90] sm:$0xf] %vm2898_vm4, %v3387_v10  ;;  %v1965_v38 = vmax.f32 %v1916_v47, 0.0  ;;  %v2592_v31 = vmax.f32 %v2543_v53, 0.0  ;;  %v1917_v3 = vadd.f32 %v5190_v36, %v1868_v28 }
 0x241   :  { %v3388_v26 = vpack.c.bf16 %v2689_v46, %v2689_v46  ;;  %v2544_v54 = vadd.f32 %v5190_v36, %v2495_v34 }
 0x242   :  { %v2641_v23 = vmax.f32 %v1965_v38, %v2592_v31  ;;  %v1966_v25 = vmax.f32 %v1917_v3, 0.0 }
 0x243   :  { %2936 = vst.msk [vmem:[%s5424_s4 + $0x94] sm:$0xf] %vm2898_vm4, %v3388_v26  ;;  %v2593_v63 = vmax.f32 %v2544_v54, 0.0  ;;  %v1791_v16 = vpop.f32.mrb[180].mxu0  ;;  %v2418_v43 = vpop.f32.mrb[180].mxu1 }
 0x244   :  { %v2690_v24 = vmax.f32 %v4879_v45, %v2641_v23  ;;  %v1869_v59 = vmul.f32 %v5202_v37, %v1791_v16  ;;  %v2496_v12 = vmul.f32 %v5202_v37, %v2418_v43  ;;  %v3792_v40 = vpop.f32.mrb[181].mxu0  ;;  %v3894_v13 = vpop.f32.mrb[181].mxu1 }
 0x245   :  { %v2642_v58 = vmax.f32 %v1966_v25, %v2593_v63  ;;  %v1794_v6 = vpop.f32.mrb[182].mxu0  ;;  %v2421_v32 = vpop.f32.mrb[182].mxu1 }
 0x246   :  { %v3389_v33 = vpack.c.bf16 %v2690_v24, %v2690_v24  ;;  %v1918_v60 = vadd.f32 %v5190_v36, %v1869_v59  ;;  %v2545_v35 = vadd.f32 %v5190_v36, %v2496_v12  ;;  %v1870_v39 = vmul.f32 %v5202_v37, %v1794_v6  ;;  %v3793_v30 = vpop.f32.mrb[183].mxu0  ;;  %v3895_v52 = vpop.f32.mrb[183].mxu1 }
 0x247   :  { %v2691_v45 = vmax.f32 %v4881_v1, %v2642_v58  ;;  %v2497_v20 = vmul.f32 %v5202_v37, %v2421_v32  ;;  %v5431_v58 = vld [vmem:[#allocation2_spill] sm:$0xff] }
 0x248   :  { %2937 = vst.msk [vmem:[%s5424_s4 + $0x98] sm:$0xf] %vm2898_vm4, %v3389_v33  ;;  %v1967_v0 = vmax.f32 %v1918_v60, 0.0  ;;  %v2594_v9 = vmax.f32 %v2545_v35, 0.0  ;;  %v1919_v49 = vadd.f32 %v5190_v36, %v1870_v39 }
 0x249   :  { %v3390_v41 = vpack.c.bf16 %v2691_v45, %v2691_v45  ;;  %v2546_v51 = vadd.f32 %v5190_v36, %v2497_v20 }
 0x24a   :  { %v2643_v15 = vmax.f32 %v1967_v0, %v2594_v9  ;;  %v1968_v14 = vmax.f32 %v1919_v49, 0.0  ;;  %v5432_v9 = vld [vmem:[#allocation3_spill] sm:$0xff] }
 0x24b   :  { %2938 = vst.msk [vmem:[%s5424_s4 + $0x9c] sm:$0xf] %vm2898_vm4, %v3390_v41  ;;  %v2595_v1 = vmax.f32 %v2546_v51, 0.0  ;;  %v1799_v27 = vpop.f32.mrb[184].mxu0  ;;  %v2426_v2 = vpop.f32.mrb[184].mxu1 }
 0x24c   :  { %v2692_v48 = vmax.f32 %v4903_v50, %v2643_v15  ;;  %v1871_v42 = vmul.f32 %v5202_v37, %v1799_v27  ;;  %v2498_v62 = vmul.f32 %v5202_v37, %v2426_v2  ;;  %v3796_v11 = vpop.f32.mrb[185].mxu0  ;;  %v3898_v4 = vpop.f32.mrb[185].mxu1 }
 0x24d   :  { %v2644_v56 = vmax.f32 %v1968_v14, %v2595_v1  ;;  %v1802_v21 = vpop.f32.mrb[186].mxu0  ;;  %v2429_v22 = vpop.f32.mrb[186].mxu1 }
 0x24e   :  { %v3391_v55 = vpack.c.bf16 %v2692_v48, %v2692_v48  ;;  %v1920_v57 = vadd.f32 %v5190_v36, %v1871_v42  ;;  %v2547_v17 = vadd.f32 %v5190_v36, %v2498_v62  ;;  %v1872_v61 = vmul.f32 %v5202_v37, %v1802_v21  ;;  %v3797_v29 = vpop.f32.mrb[187].mxu0  ;;  %v3899_v18 = vpop.f32.mrb[187].mxu1  ;;  %v5433_v21 = vld [vmem:[#allocation4_spill] sm:$0xff] }
 0x24f   :  { %v2693_v50 = vmax.f32 %v4905_v8, %v2644_v56  ;;  %v2499_v44 = vmul.f32 %v5202_v37, %v2429_v22 }
 0x250   :  { %2939 = vst.msk [vmem:[%s5424_s4 + $0xa0] sm:$0xf] %vm2898_vm4, %v3391_v55  ;;  %v1969_v10 = vmax.f32 %v1920_v57, 0.0  ;;  %v2596_v47 = vmax.f32 %v2547_v17, 0.0  ;;  %v1921_v53 = vadd.f32 %v5190_v36, %v1872_v61 }
 0x251   :  { %v3392_v28 = vpack.c.bf16 %v2693_v50, %v2693_v50  ;;  %v2548_v5 = vadd.f32 %v5190_v36, %v2499_v44 }
 0x252   :  { %v2645_v19 = vmax.f32 %v1969_v10, %v2596_v47  ;;  %v1970_v46 = vmax.f32 %v1921_v53, 0.0 }
 0x253   :  { %2940 = vst.msk [vmem:[%s5424_s4 + $0xa4] sm:$0xf] %vm2898_vm4, %v3392_v28  ;;  %v2597_v8 = vmax.f32 %v2548_v5, 0.0  ;;  %v1807_v34 = vpop.f32.mrb[188].mxu0  ;;  %v2434_v38 = vpop.f32.mrb[188].mxu1  ;;  %v5434_v28 = vld [vmem:[#allocation5_spill] sm:$0xff] }
 0x254   :  { %v2694_v31 = vmax.f32 %v4927_v7, %v2645_v19  ;;  %v1873_v3 = vmul.f32 %v5202_v37, %v1807_v34  ;;  %v2500_v26 = vmul.f32 %v5202_v37, %v2434_v38  ;;  %v3800_v54 = vpop.f32.mrb[189].mxu0  ;;  %v3902_v23 = vpop.f32.mrb[189].mxu1 }
 0x255   :  { %v2646_v25 = vmax.f32 %v1970_v46, %v2597_v8  ;;  %v1810_v63 = vpop.f32.mrb[190].mxu0  ;;  %v2437_v16 = vpop.f32.mrb[190].mxu1 }
 0x256   :  { %v3393_v43 = vpack.c.bf16 %v2694_v31, %v2694_v31  ;;  %v1922_v24 = vadd.f32 %v5190_v36, %v1873_v3  ;;  %v2549_v59 = vadd.f32 %v5190_v36, %v2500_v26  ;;  %v1874_v12 = vmul.f32 %v5202_v37, %v1810_v63  ;;  %v3801_v40 = vpop.f32.mrb[191].mxu0  ;;  %v3903_v13 = vpop.f32.mrb[191].mxu1 }
 0x257   :  { %v2695_v7 = vmax.f32 %v5431_v58, %v2646_v25  ;;  %v2501_v6 = vmul.f32 %v5202_v37, %v2437_v16  ;;  %v5435_v16 = vld [vmem:[#allocation6_spill] sm:$0xff]  ;;  %v5436_v40 = vld [vmem:[#allocation7_spill] sm:$0xff] }
 0x258   :  { %2941 = vst.msk [vmem:[%s5424_s4 + $0xa8] sm:$0xf] %vm2898_vm4, %v3393_v43  ;;  %v1971_v32 = vmax.f32 %v1922_v24, 0.0  ;;  %v2598_v33 = vmax.f32 %v2549_v59, 0.0  ;;  %v1923_v60 = vadd.f32 %v5190_v36, %v1874_v12 }
 0x259   :  { %v3394_v35 = vpack.c.bf16 %v2695_v7, %v2695_v7  ;;  %v2550_v39 = vadd.f32 %v5190_v36, %v2501_v6 }
 0x25a   :  { %v2647_v30 = vmax.f32 %v1971_v32, %v2598_v33  ;;  %v1972_v52 = vmax.f32 %v1923_v60, 0.0 }
 0x25b   :  { %2942 = vst.msk [vmem:[%s5424_s4 + $0xac] sm:$0xf] %vm2898_vm4, %v3394_v35  ;;  %v2599_v45 = vmax.f32 %v2550_v39, 0.0  ;;  %v1815_v20 = vpop.f32.mrb[192].mxu0  ;;  %v2442_v0 = vpop.f32.mrb[192].mxu1 }
 0x25c   :  { %v2696_v49 = vmax.f32 %v5432_v9, %v2647_v30  ;;  %v1875_v41 = vmul.f32 %v5202_v37, %v1815_v20  ;;  %v2502_v51 = vmul.f32 %v5202_v37, %v2442_v0  ;;  %v3804_v15 = vpop.f32.mrb[193].mxu0  ;;  %v3906_v14 = vpop.f32.mrb[193].mxu1 }
 0x25d   :  { %v2648_v1 = vmax.f32 %v1972_v52, %v2599_v45  ;;  %v1818_v27 = vpop.f32.mrb[194].mxu0  ;;  %v2445_v2 = vpop.f32.mrb[194].mxu1 }
 0x25e   :  { %v3395_v48 = vpack.c.bf16 %v2696_v49, %v2696_v49  ;;  %v1924_v42 = vadd.f32 %v5190_v36, %v1875_v41  ;;  %v2551_v62 = vadd.f32 %v5190_v36, %v2502_v51  ;;  %v1876_v11 = vmul.f32 %v5202_v37, %v1818_v27  ;;  %v3805_v4 = vpop.f32.mrb[195].mxu0  ;;  %v3907_v56 = vpop.f32.mrb[195].mxu1 }
 0x25f   :  { %v2697_v22 = vmax.f32 %v5433_v21, %v2648_v1  ;;  %v2503_v55 = vmul.f32 %v5202_v37, %v2445_v2 }
 0x260   :  { %2943 = vst.msk [vmem:[%s5424_s4 + $0xb0] sm:$0xf] %vm2898_vm4, %v3395_v48  ;;  %v1973_v57 = vmax.f32 %v1924_v42, 0.0  ;;  %v2600_v17 = vmax.f32 %v2551_v62, 0.0  ;;  %v1925_v61 = vadd.f32 %v5190_v36, %v1876_v11 }
 0x261   :  { %v3396_v29 = vpack.c.bf16 %v2697_v22, %v2697_v22  ;;  %v2552_v18 = vadd.f32 %v5190_v36, %v2503_v55 }
 0x262   :  { %v2649_v50 = vmax.f32 %v1973_v57, %v2600_v17  ;;  %v1974_v44 = vmax.f32 %v1925_v61, 0.0 }
 0x263   :  { %2944 = vst.msk [vmem:[%s5424_s4 + $0xb4] sm:$0xf] %vm2898_vm4, %v3396_v29  ;;  %v2601_v10 = vmax.f32 %v2552_v18, 0.0  ;;  %v1823_v47 = vpop.f32.mrb[196].mxu0  ;;  %v2450_v53 = vpop.f32.mrb[196].mxu1 }
 0x264   :  { %v2698_v5 = vmax.f32 %v5434_v28, %v2649_v50  ;;  %v1877_v19 = vmul.f32 %v5202_v37, %v1823_v47  ;;  %v2504_v46 = vmul.f32 %v5202_v37, %v2450_v53  ;;  %v3808_v8 = vpop.f32.mrb[197].mxu0  ;;  %v3910_v34 = vpop.f32.mrb[197].mxu1 }
 0x265   :  { %v2650_v38 = vmax.f32 %v1974_v44, %v2601_v10  ;;  %v1826_v31 = vpop.f32.mrb[198].mxu0  ;;  %v2453_v3 = vpop.f32.mrb[198].mxu1 }
 0x266   :  { %v3397_v26 = vpack.c.bf16 %v2698_v5, %v2698_v5  ;;  %v1926_v54 = vadd.f32 %v5190_v36, %v1877_v19  ;;  %v2553_v23 = vadd.f32 %v5190_v36, %v2504_v46  ;;  %v3809_v25 = vpop.f32.mrb[199].mxu0  ;;  %v3911_v63 = vpop.f32.mrb[199].mxu1 }
 0x267   :  { %v2699_v43 = vmax.f32 %v5435_v16, %v2650_v38 }
 0x268   :  { %2945 = vst.msk [vmem:[%s5424_s4 + $0xb8] sm:$0xf] %vm2898_vm4, %v3397_v26  ;;  %v1975_v37 = vmax.f32 %v1926_v54, 0.0  ;;  %v2602_v24 = vmax.f32 %v2553_v23, 0.0 }
 0x269   :  { %v3398_v59 = vpack.c.bf16 %v2699_v43, %v2699_v43 }
 0x26a   :  { %v2651_v12 = vmax.f32 %v1975_v37, %v2602_v24 }
 0x26b   :  { %2946 = vst.msk [vmem:[%s5424_s4 + $0xbc] sm:$0xf] %vm2898_vm4, %v3398_v59 }
 0x26c   :  { %v2700_v36 = vmax.f32 %v5436_v40, %v2651_v12 }
 0x26e   :  { %v3399_v13 = vpack.c.bf16 %v2700_v36, %v2700_v36 }
 0x270   :  { %2947 = vst.msk [vmem:[%s5424_s4 + $0xc0] sm:$0xf] %vm2898_vm4, %v3399_v13 }

// kernel: cnn_forward.5
= control target key start
LH: loop header
LB: loop body
LE: loop exit
PB: predicated region body
PF: predicated region fallthrough
CT: control target
= control target key end

     0   :  { %v2502_v0 = vmov 0.0   ;;  %vm2503_vm0 = vmmov 0   ;;  %vm290_vm1 = vcmask 261120   ;;  %vm1720_vm2 = vcmask 519168   ;;  %s3367_s1 = inlined_call_operand.vmem [shape: bf16[288,64], index: 1, kind: input, shape index: {}]   ;;  %s3368_s0 = inlined_call_operand.vmem [shape: bf16[4,104,288], index: 0, kind: input, shape index: {}]   ;;  %s3369_s2 = inlined_call_operand.vmem [shape: f32[1,64], index: 2, kind: input, shape index: {}]   ;;  %s3370_s3 = inlined_call_operand.vmem [shape: f32[1,64], index: 3, kind: input, shape index: {}]   ;;  %s3371_s4 = inlined_call_operand.vmem [shape: bf16[104,64], index: 4, kind: output, shape index: {}]  }
   0x1   :  { %2242 = vmatprep.subr.bf16.mxu1 %v2502_v0  ;;  %v2533_v1 = vld [vmem:[%s3367_s1 + $0x40] sm:$0xff]   ;;  %2246 = vmatprep.mubr.msk.bf16.mxu1 %vm2503_vm0, %v2502_v0  ;;  %v2552_v4 = vld [vmem:[%s3367_s1 + $0x48] sm:$0xff]   ;;  %v2574_v8 = vld [vmem:[%s3367_s1 + $0x50] sm:$0xff]  }
   0x2   :  { %v2540_v2 = vld [vmem:[%s3367_s1 + $0x80] sm:$0xff]   ;;  %1974 = vmatprep.subr.bf16.mxu0 %v2533_v1  ;;  %v2559_v5 = vld [vmem:[%s3367_s1 + $0x88] sm:$0xff]   ;;  %v2580_v9 = vld [vmem:[%s3367_s1 + $0x10] sm:$0xff]  }
   0x3   :  { %v2546_v3 = vld [vmem:[%s3367_s1] sm:$0xff]   ;;  %2243 = vmatpush3.bf16.msra.mxu1 %v2540_v2  ;;  %v2565_v6 = vld [vmem:[%s3367_s1 + $0x8] sm:$0xff]   ;;  %v2587_v10 = vld [vmem:[%s3367_s1 + $0x58] sm:$0xff]  }
   0x4   :  { %1975 = vmatpush3.bf16.msra.mxu0 %v2546_v3  ;;  %2244 = vmatprep.subr.bf16.mxu1 %v2502_v0  ;;  %v2382_v7 = vld [vmem:[%s3368_s0 + $0x8] ss:$12 sps:$4 sm:$0xff]   ;;  %v2597_v11 = vld [vmem:[%s3367_s1 + $0x18] sm:$0xff]   ;;  %v2604_v12 = vld [vmem:[%s3367_s1 + $0x60] sm:$0xff]  }
   0x5   :  { %1976 = vmatprep.subr.bf16.mxu0 %v2552_v4  ;;  %v2387_v13 = vld [vmem:[%s3368_s0 + $0x20] ss:$12 sps:$4 sm:$0xff]   ;;  %v2392_v17 = vld [vmem:[%s3368_s0 + $0x38] ss:$12 sps:$4 sm:$0xff]   ;;  %v2641_v18 = vld [vmem:[%s3367_s1 + $0x70] sm:$0xff]  }
   0x6   :  { %v2614_v14 = vld [vmem:[%s3367_s1 + $0x20] sm:$0xff]   ;;  %v2621_v15 = vld [vmem:[%s3367_s1 + $0x68] sm:$0xff]   ;;  %v2651_v20 = vld [vmem:[%s3367_s1 + $0x30] sm:$0xff]  }
   0x7   :  { %2245 = vmatpush3.bf16.msra.mxu1 %v2559_v5  ;;  %v2627_v16 = vld [vmem:[%s3367_s1 + $0x28] sm:$0xff]   ;;  %v2399_v19 = vld [vmem:[%s3368_s0 + $0x4] ss:$12 sps:$4 sm:$0xff]   ;;  %v2657_v21 = vld [vmem:[%s3367_s1 + $0x78] sm:$0xff]  }
   0x8   :  { %1977 = vmatpush3.bf16.msra.mxu0 %v2565_v6  ;;  %2041 = vmatprep.subr.bf16.mxu1 %v2533_v1  ;;  %v2668_v22 = vld [vmem:[%s3367_s1 + $0x38] sm:$0xff]   ;;  %v2397_v24 = vld [vmem:[%s3368_s0] ss:$12 sps:$4 sm:$0xff]   ;;  %v2403_v26 = vld [vmem:[%s3368_s0 + $0x68] ss:$12 sps:$4 sm:$0xff]  }
   0x9   :  { %1978 = vmatprep.subr.bf16.mxu0 %v2574_v8  ;;  %344 = vmatprep.mubr.bf16.mxu0 %v2399_v19  ;;  %v2400_v23 = vld [vmem:[%s3368_s0 + $0x50] ss:$12 sps:$4 sm:$0xff]   ;;  %v2404_v27 = vld [vmem:[%s3368_s0 + $0x18] ss:$12 sps:$4 sm:$0xff]   ;;  %v2405_v28 = vld [vmem:[%s3368_s0 + $0x34] ss:$12 sps:$4 sm:$0xff]  }
   0xa   :  { %2247 = vmatmul.mubr.msk.bf16.vlgmr.msra.gmra.mrb[0].mxu1 %vm290_vm1, %v2382_v7  ;;  %v2401_v25 = vld [vmem:[%s3368_s0 + $0x1c] ss:$12 sps:$4 sm:$0xff]   ;;  %v2407_v29 = vld [vmem:[%s3368_s0 + $0x80] ss:$12 sps:$4 sm:$0xff]   ;;  %v2411_v32 = vld [vmem:[%s3368_s0 + $0x98] ss:$0 sps:$4 sm:$0xff]  }
   0xb   :  { %2250 = vmatprep.mubr.msk.bf16.mxu1 %vm2503_vm0, %v2502_v0  ;;  %2042 = vmatpush3.bf16.msra.mxu1 %v2546_v3  ;;  %v2408_v30 = vld [vmem:[%s3368_s0 + $0x30] ss:$12 sps:$4 sm:$0xff]   ;;  %v2409_v31 = vld [vmem:[%s3368_s0 + $0x4c] ss:$12 sps:$4 sm:$0xff]   ;;  %v2412_v33 = vld [vmem:[%s3368_s0 + $0x48] ss:$12 sps:$4 sm:$0xff]  }
   0xc   :  { %1979 = vmatpush3.bf16.msra.mxu0 %v2580_v9  ;;  %2043 = vmatprep.subr.bf16.mxu1 %v2552_v4  ;;  %v2415_v34 = vld [vmem:[%s3368_s0 + $0xa0] ss:$12 sps:$4 sm:$0xff]   ;;  %v2416_v35 = vld [vmem:[%s3368_s0 + $0x64] ss:$12 sps:$4 sm:$0xff]   ;;  %v2413_v36 = vld [vmem:[%s3368_s0 + $0x9c] ss:$12 sps:$4 sm:$0xff]  }
   0xd   :  { %1980 = vmatprep.subr.bf16.mxu0 %v2587_v10  ;;  %v2418_v37 = vld [vmem:[%s3368_s0 + $0x60] ss:$12 sps:$4 sm:$0xff]   ;;  %v2419_v38 = vld [vmem:[%s3368_s0 + $0xb8] ss:$12 sps:$4 sm:$0xff]   ;;  %v2421_v39 = vld [vmem:[%s3368_s0 + $0x7c] ss:$12 sps:$4 sm:$0xff]  }
   0xe   :  { %v2423_v40 = vld [vmem:[%s3368_s0 + $0xb4] ss:$12 sps:$4 sm:$0xff]   ;;  %v2424_v42 = vld [vmem:[%s3368_s0 + $0x78] ss:$12 sps:$4 sm:$0xff]   ;;  %v2425_v43 = vld [vmem:[%s3368_s0 + $0xd0] ss:$12 sps:$4 sm:$0xff]  }
   0xf   :  { %2044 = vmatpush3.bf16.msra.mxu1 %v2565_v6  ;;  %v80_v41 = vld [vmem:[%s3368_s0 + $0x90] sm:$0xff]  ;;  %v2428_v45 = vld [vmem:[%s3368_s0 + $0xcc] ss:$12 sps:$4 sm:$0xff]   ;;  %v2436_v51 = vld [vmem:[%s3368_s0 + $0xfc] ss:$12 sps:$4 sm:$0xff]  }
  0x10   :  { %1981 = vmatpush3.bf16.msra.mxu0 %v2597_v11  ;;  %2045 = vmatprep.subr.bf16.mxu1 %v2574_v8  ;;  %v1757_v44 = vcombine.high %v80_v41, %v80_v41  ;;  %v1756_v46 = vcombine.low %v80_v41, %v80_v41  ;;  %v2430_v47 = vld [vmem:[%s3368_s0 + $0xe8] ss:$12 sps:$4 sm:$0xff]   ;;  %v2432_v48 = vld [vmem:[%s3368_s0 + $0xe4] ss:$12 sps:$4 sm:$0xff]   ;;  %v2434_v50 = vld [vmem:[%s3368_s0 + $0x100] ss:$12 sps:$4 sm:$0xff]  }
  0x11   :  { %1982 = vmatprep.subr.bf16.mxu0 %v2604_v12  ;;  %v2433_v49 = vld [vmem:[%s3368_s0 + $0xa4] ss:$12 sps:$4 sm:$0xff]   ;;  %v2437_v52 = vld [vmem:[%s3368_s0 + $0xbc] ss:$12 sps:$4 sm:$0xff]   ;;  %v2440_v55 = vld [vmem:[%s3368_s0 + $0x114] ss:$12 sps:$4 sm:$0xff]  }
  0x12   :  { %2251 = vmatmul.mubr.msk.bf16.gmra.mrb[4].mxu1 %vm290_vm1, %v2387_v13  ;;  %v2438_v53 = vld [vmem:[%s3368_s0 + $0x118] ss:$12 sps:$4 sm:$0xff]   ;;  %v1810_v54 = vld [vmem:[%s3368_s0 + $0x12c] sm:$0xff]  ;;  %v2441_v56 = vld [vmem:[%s3368_s0 + $0xd4] ss:$12 sps:$4 sm:$0xff]  }
  0x13   :  { %2254 = vmatprep.mubr.msk.bf16.mxu1 %vm2503_vm0, %v2502_v0  ;;  %2046 = vmatpush3.bf16.msra.mxu1 %v2580_v9  ;;  %v1831_v57 = vcombine.high %v1810_v54, %v1810_v54  ;;  %v1830_v58 = vcombine.low %v1810_v54, %v1810_v54  ;;  %v2444_v59 = vld [vmem:[%s3368_s0 + $0xec] ss:$12 sps:$4 sm:$0xff]   ;;  %v2447_v60 = vld [vmem:[%s3368_s0 + $0x13c] ss:$12 sps:$4 sm:$0xff]   ;;  %v2448_v62 = vld [vmem:[%s3368_s0 + $0x104] ss:$12 sps:$4 sm:$0xff]  }
  0x14   :  { %1983 = vmatpush3.bf16.msra.mxu0 %v2614_v14  ;;  %2047 = vmatprep.subr.bf16.mxu1 %v2587_v10  ;;  %v2445_v61 = vld [vmem:[%s3368_s0 + $0x138] ss:$12 sps:$4 sm:$0xff]   ;;  %v2449_v63 = vld [vmem:[%s3368_s0 + $0x154] ss:$12 sps:$4 sm:$0xff]   ;;  %v2452_v7 = vld [vmem:[%s3368_s0 + $0x11c] ss:$12 sps:$4 sm:$0xff]  }
  0x15   :  { %1984 = vmatprep.subr.bf16.mxu0 %v2621_v15  ;;  %v2453_v13 = vld [vmem:[%s3368_s0 + $0x16c] ss:$12 sps:$4 sm:$0xff]  }
  0x17   :  { %2048 = vmatpush3.bf16.msra.mxu1 %v2597_v11 }
  0x18   :  { %1985 = vmatpush3.bf16.msra.mxu0 %v2627_v16  ;;  %2049 = vmatprep.subr.bf16.mxu1 %v2604_v12 }
  0x19   :  { %1986 = vmatprep.subr.bf16.mxu0 %v2641_v18 }
  0x1a   :  { %2255 = vmatmul.mubr.msk.bf16.gmra.mrb[8].mxu1 %vm290_vm1, %v2392_v17  ;;  %v2468_v17 = vld [vmem:[%s3368_s0 + $0x170] ss:$12 sps:$4 sm:$0xff]  }
  0x1b   :  { %2258 = vmatprep.mubr.msk.bf16.mxu1 %vm2503_vm0, %v2502_v0  ;;  %2050 = vmatpush3.bf16.msra.mxu1 %v2614_v14 }
  0x1c   :  { %1987 = vmatpush3.bf16.msra.mxu0 %v2651_v20  ;;  %2051 = vmatprep.subr.bf16.mxu1 %v2621_v15 }
  0x1d   :  { %1988 = vmatprep.subr.bf16.mxu0 %v2657_v21 }
  0x1f   :  { %2052 = vmatpush3.bf16.msra.mxu1 %v2627_v16 }
  0x20   :  { %1989 = vmatpush3.bf16.msra.mxu0 %v2668_v22  ;;  %2053 = vmatprep.subr.bf16.mxu1 %v2641_v18 }
  0x21   :  { %2274 = vmatprep.subr.bf16.mxu0 %v2502_v0 }
  0x22   :  { %2259 = vmatmul.mubr.msk.bf16.gmra.mrb[12].mxu1 %vm290_vm1, %v2400_v23  ;;  %v2475_v23 = vld [vmem:[%s3368_s0 + $0x1a0] ss:$12 sps:$4 sm:$0xff]  }
  0x23   :  { %345 = vmatmul.mubr.bf16.vlgmr.msra.gmra.mrb[0].mxu0 %v2397_v24  ;;  %2262 = vmatprep.mubr.msk.bf16.mxu1 %vm2503_vm0, %v2502_v0  ;;  %v2476_v24 = vld [vmem:[%s3368_s0 + $0x1f0] ss:$12 sps:$4 sm:$0xff]  }
  0x24   :  { %2275 = vmatpush3.bf16.msra.mxu0 %v2540_v2  ;;  %352 = vmatprep.mubr.bf16.mxu0 %v2401_v25  ;;  %v2478_v25 = vld [vmem:[%s3368_s0 + $0x1ec] ss:$12 sps:$4 sm:$0xff]  }
  0x25   :  { %2054 = vmatpush3.bf16.msra.mxu1 %v2651_v20  ;;  %2276 = vmatprep.subr.bf16.mxu0 %v2502_v0 }
  0x26   :  { %2055 = vmatprep.subr.bf16.mxu1 %v2657_v21 }
  0x28   :  { %2277 = vmatpush3.bf16.msra.mxu0 %v2559_v5 }
  0x29   :  { %2056 = vmatpush3.bf16.msra.mxu1 %v2668_v22  ;;  %2306 = vmatprep.subr.bf16.mxu0 %v2502_v0 }
  0x2a   :  { %2263 = vmatmul.mubr.msk.bf16.gmra.mrb[16].mxu1 %vm290_vm1, %v2403_v26  ;;  %2108 = vmatprep.subr.bf16.mxu1 %v2533_v1  ;;  %v2479_v26 = vld [vmem:[%s3368_s0 + $0x1b8] ss:$12 sps:$4 sm:$0xff]  }
  0x2b   :  { %353 = vmatmul.mubr.bf16.gmra.mrb[4].mxu0 %v2404_v27  ;;  %2266 = vmatprep.mubr.msk.bf16.mxu1 %vm2503_vm0, %v2502_v0  ;;  %v2480_v27 = vld [vmem:[%s3368_s0 + $0x208] ss:$12 sps:$4 sm:$0xff]  }
  0x2c   :  { %360 = vmatprep.mubr.bf16.mxu0 %v2405_v28  ;;  %v2483_v28 = vld [vmem:[%s3368_s0 + $0x1d0] ss:$0 sps:$4 sm:$0xff]  }
  0x32   :  { %2267 = vmatmul.mubr.msk.bf16.gmra.mrb[20].mxu1 %vm290_vm1, %v2407_v29  ;;  %v2484_v29 = vld [vmem:[%s3368_s0 + $0x220] ss:$12 sps:$4 sm:$0xff]  }
  0x33   :  { %361 = vmatmul.mubr.bf16.gmra.mrb[8].mxu0 %v2408_v30  ;;  %2270 = vmatprep.mubr.msk.bf16.mxu1 %vm2503_vm0, %v2502_v0  ;;  %v2487_v30 = vld [vmem:[%s3368_s0 + $0x1dc] ss:$12 sps:$4 sm:$0xff]  }
  0x34   :  { %368 = vmatprep.mubr.bf16.mxu0 %v2409_v31  ;;  %v2488_v31 = vld [vmem:[%s3368_s0 + $0x238] ss:$12 sps:$4 sm:$0xff]  }
  0x3a   :  { %2271 = vmatmul.mubr.msk.bf16.gmra.mrb[24].mxu1 %vm290_vm1, %v2411_v32  ;;  %v2490_v32 = vld [vmem:[%s3368_s0 + $0x234] ss:$12 sps:$4 sm:$0xff]  }
  0x3b   :  { %369 = vmatmul.mubr.bf16.gmra.mrb[12].mxu0 %v2412_v33  ;;  %719 = vmatprep.mubr.bf16.mxu1 %v2415_v34  ;;  %v2491_v33 = vld [vmem:[%s3368_s0 + $0x1f4] ss:$12 sps:$4 sm:$0xff]   ;;  %v2492_v34 = vld [vmem:[%s3368_s0 + $0x250] ss:$12 sps:$4 sm:$0xff]  }
  0x3c   :  { %376 = vmatprep.mubr.bf16.mxu0 %v2416_v35  ;;  %v1918_v35 = vld [vmem:[%s3368_s0 + $0x264] sm:$0xff] }
  0x42   :  { %720 = vmatmul.mubr.bf16.vlgmr.msra.gmra.mrb[28].mxu1 %v2413_v36  ;;  %v2494_v36 = vld [vmem:[%s3368_s0 + $0x24c] ss:$12 sps:$4 sm:$0xff]  }
  0x43   :  { %377 = vmatmul.mubr.bf16.gmra.mrb[16].mxu0 %v2418_v37  ;;  %727 = vmatprep.mubr.bf16.mxu1 %v2419_v38  ;;  %v2495_v37 = vld [vmem:[%s3368_s0 + $0x20c] ss:$12 sps:$4 sm:$0xff]   ;;  %v1939_v38 = vcombine.high %v1918_v35, %v1918_v35 }
  0x44   :  { %384 = vmatprep.mubr.bf16.mxu0 %v2421_v39  ;;  %2109 = vmatpush3.bf16.msra.mxu1 %v2546_v3 }
  0x45   :  { %2110 = vmatprep.subr.bf16.mxu1 %v2552_v4 }
  0x48   :  { %2111 = vmatpush3.bf16.msra.mxu1 %v2565_v6 }
  0x49   :  { %2112 = vmatprep.subr.bf16.mxu1 %v2574_v8 }
  0x4a   :  { %728 = vmatmul.mubr.bf16.gmra.mrb[32].mxu1 %v2423_v40  ;;  %v1938_v40 = vcombine.low %v1918_v35, %v1918_v35 }
  0x4b   :  { %385 = vmatmul.mubr.bf16.gmra.mrb[20].mxu0 %v2424_v42  ;;  %735 = vmatprep.mubr.bf16.mxu1 %v2425_v43  ;;  %v2498_v42 = vld [vmem:[%s3368_s0 + $0x224] ss:$12 sps:$4 sm:$0xff]  }
  0x4c   :  { %392 = vmatprep.mubr.bf16.mxu0 %v1757_v44  ;;  %2113 = vmatpush3.bf16.msra.mxu1 %v2580_v9 }
  0x4d   :  { %2114 = vmatprep.subr.bf16.mxu1 %v2587_v10 }
  0x50   :  { %2115 = vmatpush3.bf16.msra.mxu1 %v2597_v11 }
  0x51   :  { %2116 = vmatprep.subr.bf16.mxu1 %v2604_v12 }
  0x52   :  { %736 = vmatmul.mubr.bf16.gmra.mrb[36].mxu1 %v2428_v45 }
  0x53   :  { %393 = vmatmul.mubr.bf16.gmra.mrb[24].mxu0 %v1756_v46  ;;  %743 = vmatprep.mubr.bf16.mxu1 %v2430_v47  ;;  %v2499_v46 = vld [vmem:[%s3368_s0 + $0x26c] ss:$0 sps:$4 sm:$0xff]  }
  0x54   :  { %2278 = vmatprep.mubr.msk.bf16.mxu0 %vm2503_vm0, %v2502_v0  ;;  %2117 = vmatpush3.bf16.msra.mxu1 %v2614_v14 }
  0x55   :  { %2118 = vmatprep.subr.bf16.mxu1 %v2621_v15 }
  0x58   :  { %2119 = vmatpush3.bf16.msra.mxu1 %v2627_v16 }
  0x59   :  { %2120 = vmatprep.subr.bf16.mxu1 %v2641_v18 }
  0x5a   :  { %744 = vmatmul.mubr.bf16.gmra.mrb[40].mxu1 %v2432_v48  ;;  %v2500_v48 = vld [vmem:[%s3368_s0 + $0x23c] ss:$12 sps:$4 sm:$0xff]  }
  0x5b   :  { %2279 = vmatmul.mubr.msk.bf16.vlgmr.msra.gmra.mrb[28].mxu0 %vm290_vm1, %v2433_v49  ;;  %751 = vmatprep.mubr.bf16.mxu1 %v2434_v50 }
  0x5c   :  { %2307 = vmatpush3.bf16.msra.mxu0 %v2540_v2  ;;  %2282 = vmatprep.mubr.msk.bf16.mxu0 %vm2503_vm0, %v2502_v0 }
  0x5d   :  { %2121 = vmatpush3.bf16.msra.mxu1 %v2651_v20  ;;  %2308 = vmatprep.subr.bf16.mxu0 %v2502_v0 }
  0x5e   :  { %2122 = vmatprep.subr.bf16.mxu1 %v2657_v21 }
  0x60   :  { %2309 = vmatpush3.bf16.msra.mxu0 %v2559_v5 }
  0x61   :  { %2123 = vmatpush3.bf16.msra.mxu1 %v2668_v22  ;;  %2338 = vmatprep.subr.bf16.mxu0 %v2502_v0 }
  0x62   :  { %752 = vmatmul.mubr.bf16.gmra.mrb[44].mxu1 %v2436_v51  ;;  %2175 = vmatprep.subr.bf16.mxu1 %v2533_v1  ;;  %v2451_v1 = vld [vmem:[%s3368_s0 + $0x150] ss:$12 sps:$4 sm:$0xff]  }
  0x63   :  { %2283 = vmatmul.mubr.msk.bf16.gmra.mrb[32].mxu0 %vm290_vm1, %v2437_v52  ;;  %759 = vmatprep.mubr.bf16.mxu1 %v2438_v53  ;;  %v2501_v53 = vld [vmem:[%s3368_s0 + $0x254] ss:$12 sps:$4 sm:$0xff]  }
  0x64   :  { %2286 = vmatprep.mubr.msk.bf16.mxu0 %vm2503_vm0, %v2502_v0 }
  0x6a   :  { %760 = vmatmul.mubr.bf16.gmra.mrb[48].mxu1 %v2440_v55 }
  0x6b   :  { %2287 = vmatmul.mubr.msk.bf16.gmra.mrb[36].mxu0 %vm290_vm1, %v2441_v56  ;;  %767 = vmatprep.mubr.bf16.mxu1 %v1831_v57 }
  0x6c   :  { %2290 = vmatprep.mubr.msk.bf16.mxu0 %vm2503_vm0, %v2502_v0 }
  0x72   :  { %768 = vmatmul.mubr.bf16.gmra.mrb[52].mxu1 %v1830_v58 }
  0x73   :  { %2291 = vmatmul.mubr.msk.bf16.gmra.mrb[40].mxu0 %vm290_vm1, %v2444_v59  ;;  %1095 = vmatprep.mubr.bf16.mxu1 %v2447_v60 }
  0x74   :  { %2294 = vmatprep.mubr.msk.bf16.mxu0 %vm2503_vm0, %v2502_v0 }
  0x7a   :  { %1096 = vmatmul.mubr.bf16.vlgmr.msra.gmra.mrb[56].mxu1 %v2445_v61 }
  0x7b   :  { %2295 = vmatmul.mubr.msk.bf16.gmra.mrb[44].mxu0 %vm290_vm1, %v2448_v62  ;;  %1103 = vmatprep.mubr.bf16.mxu1 %v2449_v63 }
  0x7c   :  { %2298 = vmatprep.mubr.msk.bf16.mxu0 %vm2503_vm0, %v2502_v0  ;;  %2176 = vmatpush3.bf16.msra.mxu1 %v2546_v3  ;;  %v2455_v3 = vld [vmem:[%s3368_s0 + $0x168] ss:$12 sps:$4 sm:$0xff]  }
  0x7d   :  { %2177 = vmatprep.subr.bf16.mxu1 %v2552_v4  ;;  %v2456_v4 = vld [vmem:[%s3368_s0 + $0x134] ss:$0 sps:$4 sm:$0xff]  }
  0x80   :  { %2178 = vmatpush3.bf16.msra.mxu1 %v2565_v6  ;;  %v2457_v6 = vld [vmem:[%s3368_s0 + $0x184] ss:$12 sps:$4 sm:$0xff]  }
  0x81   :  { %2179 = vmatprep.subr.bf16.mxu1 %v2574_v8  ;;  %v2459_v8 = vld [vmem:[%s3368_s0 + $0x180] ss:$12 sps:$4 sm:$0xff]  }
  0x82   :  { %1104 = vmatmul.mubr.bf16.gmra.mrb[60].mxu1 %v2451_v1 }
  0x83   :  { %2299 = vmatmul.mubr.msk.bf16.gmra.mrb[48].mxu0 %vm290_vm1, %v2452_v7  ;;  %1111 = vmatprep.mubr.bf16.mxu1 %v2453_v13 }
  0x84   :  { %2302 = vmatprep.mubr.msk.bf16.mxu0 %vm2503_vm0, %v2502_v0  ;;  %2180 = vmatpush3.bf16.msra.mxu1 %v2580_v9  ;;  %v2460_v9 = vld [vmem:[%s3368_s0 + $0x140] ss:$12 sps:$4 sm:$0xff]  }
  0x85   :  { %2181 = vmatprep.subr.bf16.mxu1 %v2587_v10  ;;  %v2461_v10 = vld [vmem:[%s3368_s0 + $0x19c] ss:$12 sps:$4 sm:$0xff]  }
  0x88   :  { %2182 = vmatpush3.bf16.msra.mxu1 %v2597_v11  ;;  %v2463_v11 = vld [vmem:[%s3368_s0 + $0x198] ss:$12 sps:$4 sm:$0xff]  }
  0x89   :  { %2183 = vmatprep.subr.bf16.mxu1 %v2604_v12  ;;  %v2464_v12 = vld [vmem:[%s3368_s0 + $0x158] ss:$12 sps:$4 sm:$0xff]  }
  0x8a   :  { %1112 = vmatmul.mubr.bf16.gmra.mrb[64].mxu1 %v2455_v3 }
  0x8b   :  { %2303 = vmatmul.mubr.msk.bf16.gmra.mrb[52].mxu0 %vm290_vm1, %v2456_v4  ;;  %1119 = vmatprep.mubr.bf16.mxu1 %v2457_v6 }
  0x8c   :  { %2310 = vmatprep.mubr.msk.bf16.mxu0 %vm2503_vm0, %v2502_v0  ;;  %2184 = vmatpush3.bf16.msra.mxu1 %v2614_v14  ;;  %v2465_v14 = vld [vmem:[%s3368_s0 + $0x1b4] ss:$12 sps:$4 sm:$0xff]  }
  0x8d   :  { %2185 = vmatprep.subr.bf16.mxu1 %v2621_v15  ;;  %v1864_v15 = vld [vmem:[%s3368_s0 + $0x1c8] sm:$0xff] }
  0x8e   :  { %v1884_v19 = vcombine.low %v1864_v15, %v1864_v15 }
  0x90   :  { %2186 = vmatpush3.bf16.msra.mxu1 %v2627_v16  ;;  %v2467_v16 = vld [vmem:[%s3368_s0 + $0x1b0] ss:$12 sps:$4 sm:$0xff]  }
  0x91   :  { %2187 = vmatprep.subr.bf16.mxu1 %v2641_v18  ;;  %v1885_v18 = vcombine.high %v1864_v15, %v1864_v15 }
  0x92   :  { %1120 = vmatmul.mubr.bf16.gmra.mrb[68].mxu1 %v2459_v8 }
  0x93   :  { %2311 = vmatmul.mubr.msk.bf16.vlgmr.msra.gmra.mrb[56].mxu0 %vm290_vm1, %v2460_v9  ;;  %1127 = vmatprep.mubr.bf16.mxu1 %v2461_v10 }
  0x94   :  { %2339 = vmatpush3.bf16.msra.mxu0 %v2540_v2  ;;  %2314 = vmatprep.mubr.msk.bf16.mxu0 %vm2503_vm0, %v2502_v0 }
  0x95   :  { %2188 = vmatpush3.bf16.msra.mxu1 %v2651_v20  ;;  %2340 = vmatprep.subr.bf16.mxu0 %v2502_v0  ;;  %v2471_v20 = vld [vmem:[%s3368_s0 + $0x188] ss:$12 sps:$4 sm:$0xff]  }
  0x96   :  { %2189 = vmatprep.subr.bf16.mxu1 %v2657_v21  ;;  %v2474_v21 = vld [vmem:[%s3368_s0 + $0x1d8] ss:$12 sps:$4 sm:$0xff]  }
  0x98   :  { %2341 = vmatpush3.bf16.msra.mxu0 %v2559_v5 }
  0x99   :  { %2190 = vmatpush3.bf16.msra.mxu1 %v2668_v22  ;;  %v2472_v22 = vld [vmem:[%s3368_s0 + $0x1d4] ss:$12 sps:$4 sm:$0xff]  }
  0x9a   :  { %1128 = vmatmul.mubr.bf16.gmra.mrb[72].mxu1 %v2463_v11  ;;  %2370 = vmatprep.subr.bf16.mxu1 %v2502_v0 }
  0x9b   :  { %2315 = vmatmul.mubr.msk.bf16.gmra.mrb[60].mxu0 %vm290_vm1, %v2464_v12  ;;  %1135 = vmatprep.mubr.bf16.mxu1 %v2465_v14 }
  0x9c   :  { %2318 = vmatprep.mubr.msk.bf16.mxu0 %vm2503_vm0, %v2502_v0 }
  0xa2   :  { %1136 = vmatmul.mubr.bf16.gmra.mrb[76].mxu1 %v2467_v16 }
  0xa3   :  { %2319 = vmatmul.mubr.msk.bf16.gmra.mrb[64].mxu0 %vm290_vm1, %v2468_v17  ;;  %1143 = vmatprep.mubr.bf16.mxu1 %v1885_v18 }
  0xa4   :  { %2322 = vmatprep.mubr.msk.bf16.mxu0 %vm2503_vm0, %v2502_v0 }
  0xaa   :  { %1144 = vmatmul.mubr.bf16.gmra.mrb[80].mxu1 %v1884_v19 }
  0xab   :  { %2323 = vmatmul.mubr.msk.bf16.gmra.mrb[68].mxu0 %vm290_vm1, %v2471_v20  ;;  %1458 = vmatprep.mubr.bf16.mxu1 %v2474_v21 }
  0xac   :  { %2326 = vmatprep.mubr.msk.bf16.mxu0 %vm2503_vm0, %v2502_v0 }
  0xb2   :  { %1459 = vmatmul.mubr.bf16.vlgmr.msra.gmra.mrb[84].mxu1 %v2472_v22 }
  0xb3   :  { %2327 = vmatmul.mubr.msk.bf16.gmra.mrb[72].mxu0 %vm290_vm1, %v2475_v23  ;;  %1466 = vmatprep.mubr.bf16.mxu1 %v2476_v24 }
  0xb4   :  { %2330 = vmatprep.mubr.msk.bf16.mxu0 %vm2503_vm0, %v2502_v0  ;;  %2372 = vmatpush3.bf16.msra.mxu1 %v2540_v2  ;;  %v2482_v2 = vld [vmem:[%s3368_s0 + $0x204] ss:$12 sps:$4 sm:$0xff]  }
  0xb5   :  { %2371 = vmatprep.subr.bf16.mxu1 %v2502_v0 }
  0xb8   :  { %2373 = vmatpush3.bf16.msra.mxu1 %v2559_v5  ;;  %v2486_v5 = vld [vmem:[%s3368_s0 + $0x21c] ss:$12 sps:$4 sm:$0xff]  }
  0xba   :  { %1467 = vmatmul.mubr.bf16.gmra.mrb[88].mxu1 %v2478_v25 }
  0xbb   :  { %2331 = vmatmul.mubr.msk.bf16.gmra.mrb[76].mxu0 %vm290_vm1, %v2479_v26  ;;  %1474 = vmatprep.mubr.bf16.mxu1 %v2480_v27 }
  0xbc   :  { %2334 = vmatprep.mubr.msk.bf16.mxu0 %vm2503_vm0, %v2502_v0 }
  0xc2   :  { %1475 = vmatmul.mubr.bf16.gmra.mrb[92].mxu1 %v2482_v2 }
  0xc3   :  { %2335 = vmatmul.mubr.msk.bf16.gmra.mrb[80].mxu0 %vm290_vm1, %v2483_v28  ;;  %1482 = vmatprep.mubr.bf16.mxu1 %v2484_v29 }
  0xc4   :  { %2342 = vmatprep.mubr.msk.bf16.mxu0 %vm2503_vm0, %v2502_v0 }
  0xca   :  { %1483 = vmatmul.mubr.bf16.gmra.mrb[96].mxu1 %v2486_v5 }
  0xcb   :  { %2343 = vmatmul.mubr.msk.bf16.vlgmr.msra.gmra.mrb[84].mxu0 %vm290_vm1, %v2487_v30  ;;  %1490 = vmatprep.mubr.bf16.mxu1 %v2488_v31 }
  0xcc   :  { %2346 = vmatprep.mubr.msk.bf16.mxu0 %vm2503_vm0, %v2502_v0 }
  0xd2   :  { %1491 = vmatmul.mubr.bf16.gmra.mrb[100].mxu1 %v2490_v32 }
  0xd3   :  { %2347 = vmatmul.mubr.msk.bf16.gmra.mrb[88].mxu0 %vm290_vm1, %v2491_v33  ;;  %1498 = vmatprep.mubr.bf16.mxu1 %v2492_v34 }
  0xd4   :  { %2350 = vmatprep.mubr.msk.bf16.mxu0 %vm2503_vm0, %v2502_v0 }
  0xda   :  { %1499 = vmatmul.mubr.bf16.gmra.mrb[104].mxu1 %v2494_v36 }
  0xdb   :  { %2351 = vmatmul.mubr.msk.bf16.gmra.mrb[92].mxu0 %vm290_vm1, %v2495_v37  ;;  %1506 = vmatprep.mubr.bf16.mxu1 %v1939_v38 }
  0xdc   :  { %2354 = vmatprep.mubr.msk.bf16.mxu0 %vm2503_vm0, %v2502_v0 }
  0xdd   :  { %v434_v39 = vpop.f32.mrb[0].mxu1 }
  0xde   :  { %v2248_v41 = vpop.f32.mrb[1].mxu1 }
  0xdf   :  { %v437_v43 = vpop.f32.mrb[2].mxu1 }
  0xe0   :  { %v2249_v44 = vpop.f32.mrb[3].mxu1 }
  0xe2   :  { %1507 = vmatmul.mubr.bf16.gmra.mrb[108].mxu1 %v1938_v40 }
  0xe3   :  { %2355 = vmatmul.mubr.msk.bf16.gmra.mrb[96].mxu0 %vm290_vm1, %v2498_v42  ;;  %2366 = vmatprep.mubr.msk.bf16.mxu1 %vm2503_vm0, %v2502_v0 }
  0xe4   :  { %2358 = vmatprep.mubr.msk.bf16.mxu0 %vm2503_vm0, %v2502_v0 }
  0xe5   :  { %v442_v45 = vpop.f32.mrb[4].mxu1 }
  0xe6   :  { %v2252_v47 = vpop.f32.mrb[5].mxu1 }
  0xe7   :  { %v445_v49 = vpop.f32.mrb[6].mxu1 }
  0xe8   :  { %v2253_v50 = vpop.f32.mrb[7].mxu1 }
  0xea   :  { %2367 = vmatmul.mubr.msk.bf16.vlgmr.msra.gmra.mrb[112].mxu1 %vm290_vm1, %v2499_v46 }
  0xeb   :  { %2359 = vmatmul.mubr.msk.bf16.gmra.mrb[100].mxu0 %vm290_vm1, %v2500_v48 }
  0xec   :  { %2362 = vmatprep.mubr.msk.bf16.mxu0 %vm2503_vm0, %v2502_v0 }
  0xed   :  { %v450_v51 = vpop.f32.mrb[8].mxu1 }
  0xee   :  { %v2256_v52 = vpop.f32.mrb[9].mxu1 }
  0xef   :  { %v453_v54 = vpop.f32.mrb[10].mxu1 }
  0xf0   :  { %v2257_v55 = vpop.f32.mrb[11].mxu1 }
  0xf3   :  { %2363 = vmatmul.mubr.msk.bf16.gmra.mrb[104].mxu0 %vm290_vm1, %v2501_v53 }
  0xf5   :  { %v458_v56 = vpop.f32.mrb[12].mxu1 }
  0xf6   :  { %v1990_v57 = vpop.f32.mrb[0].mxu0  ;;  %v2260_v58 = vpop.f32.mrb[13].mxu1 }
  0xf7   :  { %v1991_v59 = vpop.f32.mrb[1].mxu0  ;;  %v461_v60 = vpop.f32.mrb[14].mxu1 }
  0xf8   :  { %v1992_v61 = vadd.f32 %v1991_v59, %v1990_v57  ;;  %v1993_v62 = vpop.f32.mrb[2].mxu0  ;;  %v2261_v63 = vpop.f32.mrb[15].mxu1 }
  0xf9   :  { %v1994_v1 = vpop.f32.mrb[3].mxu0 }
  0xfa   :  { %v3027_v0 = vadd.f32 %v1992_v61, %v434_v39  ;;  %v1995_v7 = vadd.f32 %v1994_v1, %v1993_v62 }
  0xfc   :  { %v3029_v13 = vadd.f32 %v1995_v7, %v437_v43 }
  0xfd   :  { %v466_v3 = vpop.f32.mrb[16].mxu1 }
  0xfe   :  { %v1996_v4 = vpop.f32.mrb[4].mxu0  ;;  %v2264_v6 = vpop.f32.mrb[17].mxu1 }
  0xff   :  { %v1997_v8 = vpop.f32.mrb[5].mxu0  ;;  %v469_v9 = vpop.f32.mrb[18].mxu1 }
 0x100   :  { %v1998_v10 = vadd.f32 %v1997_v8, %v1996_v4  ;;  %v1999_v11 = vpop.f32.mrb[6].mxu0  ;;  %v2265_v12 = vpop.f32.mrb[19].mxu1 }
 0x101   :  { %v2000_v14 = vpop.f32.mrb[7].mxu0 }
 0x102   :  { %v3031_v15 = vadd.f32 %v1998_v10, %v442_v45  ;;  %v2001_v16 = vadd.f32 %v2000_v14, %v1999_v11 }
 0x104   :  { %v3033_v17 = vadd.f32 %v2001_v16, %v445_v49 }
 0x105   :  { %v474_v18 = vpop.f32.mrb[20].mxu1 }
 0x106   :  { %v2002_v19 = vpop.f32.mrb[8].mxu0  ;;  %v2268_v20 = vpop.f32.mrb[21].mxu1 }
 0x107   :  { %v2003_v21 = vpop.f32.mrb[9].mxu0  ;;  %v477_v22 = vpop.f32.mrb[22].mxu1 }
 0x108   :  { %v2004_v23 = vadd.f32 %v2003_v21, %v2002_v19  ;;  %v2005_v24 = vpop.f32.mrb[10].mxu0  ;;  %v2269_v25 = vpop.f32.mrb[23].mxu1 }
 0x109   :  { %v2006_v26 = vpop.f32.mrb[11].mxu0  ;;  %v3067_v25 = vld [vmem:[%s3370_s3] ss:$0 sm:$0xff] }
 0x10a   :  { %v3035_v27 = vadd.f32 %v2004_v23, %v450_v51  ;;  %v2007_v2 = vadd.f32 %v2006_v26, %v2005_v24 }
 0x10c   :  { %v3037_v28 = vadd.f32 %v2007_v2, %v453_v54 }
 0x10d   :  { %v482_v29 = vpop.f32.mrb[24].mxu1 }
 0x10e   :  { %v2008_v5 = vpop.f32.mrb[12].mxu0  ;;  %v2272_v30 = vpop.f32.mrb[25].mxu1 }
 0x10f   :  { %v2009_v31 = vpop.f32.mrb[13].mxu0  ;;  %v485_v32 = vpop.f32.mrb[26].mxu1 }
 0x110   :  { %v2010_v33 = vadd.f32 %v2009_v31, %v2008_v5  ;;  %v2011_v34 = vpop.f32.mrb[14].mxu0  ;;  %v2273_v35 = vpop.f32.mrb[27].mxu1 }
 0x111   :  { %v2012_v36 = vpop.f32.mrb[15].mxu0 }
 0x112   :  { %v3039_v37 = vadd.f32 %v2010_v33, %v458_v56  ;;  %v2013_v38 = vadd.f32 %v2012_v36, %v2011_v34 }
 0x114   :  { %v3041_v39 = vadd.f32 %v2013_v38, %v461_v60 }
 0x115   :  { %v2057_v40 = vpop.f32.mrb[28].mxu1 }
 0x116   :  { %v2014_v41 = vpop.f32.mrb[16].mxu0  ;;  %v2058_v42 = vpop.f32.mrb[29].mxu1 }
 0x117   :  { %v2015_v43 = vpop.f32.mrb[17].mxu0  ;;  %v2059_v44 = vadd.f32 %v2058_v42, %v2057_v40  ;;  %v2060_v45 = vpop.f32.mrb[30].mxu1 }
 0x118   :  { %v2016_v46 = vadd.f32 %v2015_v43, %v2014_v41  ;;  %v2017_v47 = vpop.f32.mrb[18].mxu0  ;;  %v2061_v48 = vpop.f32.mrb[31].mxu1 }
 0x119   :  { %v2018_v49 = vpop.f32.mrb[19].mxu0  ;;  %v2062_v50 = vadd.f32 %v2061_v48, %v2060_v45 }
 0x11a   :  { %v3043_v51 = vadd.f32 %v2016_v46, %v466_v3  ;;  %v2019_v52 = vadd.f32 %v2018_v49, %v2017_v47 }
 0x11c   :  { %v3045_v53 = vadd.f32 %v2019_v52, %v469_v9 }
 0x11d   :  { %v2063_v54 = vpop.f32.mrb[32].mxu1 }
 0x11e   :  { %v2020_v55 = vpop.f32.mrb[20].mxu0  ;;  %v2064_v56 = vpop.f32.mrb[33].mxu1 }
 0x11f   :  { %v2021_v57 = vpop.f32.mrb[21].mxu0  ;;  %v2065_v58 = vadd.f32 %v2064_v56, %v2063_v54  ;;  %v2066_v59 = vpop.f32.mrb[34].mxu1 }
 0x120   :  { %v2022_v60 = vadd.f32 %v2021_v57, %v2020_v55  ;;  %v2023_v61 = vpop.f32.mrb[22].mxu0  ;;  %v2067_v62 = vpop.f32.mrb[35].mxu1 }
 0x121   :  { %v2024_v63 = vpop.f32.mrb[23].mxu0  ;;  %v2068_v1 = vadd.f32 %v2067_v62, %v2066_v59 }
 0x122   :  { %v3047_v7 = vadd.f32 %v2022_v60, %v474_v18  ;;  %v2025_v4 = vadd.f32 %v2024_v63, %v2023_v61  ;;  %v3058_v18 = vld [vmem:[%s3369_s2] ss:$0 sm:$0xff] }
 0x123   :  { %v494_v23 = vmul.f32 %v3058_v18, %v3027_v0  ;;  %v495_v26 = vmul.f32 %v3058_v18, %v3029_v13  ;;  %v496_v43 = vmul.f32 %v3058_v18, %v3031_v15  ;;  %v497_v49 = vmul.f32 %v3058_v18, %v3033_v17 }
 0x124   :  { %v3049_v6 = vadd.f32 %v2025_v4, %v477_v22 }
 0x125   :  { %v2069_v3 = vpop.f32.mrb[36].mxu1  ;;  %v513_v0 = vadd.f32 %v3067_v25, %v494_v23  ;;  %v514_v41 = vadd.f32 %v3067_v25, %v495_v26  ;;  %v515_v15 = vadd.f32 %v3067_v25, %v496_v43 }
 0x126   :  { %v2026_v8 = vpop.f32.mrb[24].mxu0  ;;  %v2070_v9 = vpop.f32.mrb[37].mxu1 }
 0x127   :  { %v2027_v10 = vpop.f32.mrb[25].mxu0  ;;  %v3051_v11 = vadd.f32 %v2070_v9, %v2069_v3  ;;  %v2072_v12 = vpop.f32.mrb[38].mxu1  ;;  %v527_v48 = vmax.f32 %v514_v41, 0.0  ;;  %v516_v9 = vadd.f32 %v3067_v25, %v497_v49 }
 0x128   :  { %v2028_v14 = vadd.f32 %v2027_v10, %v2026_v8  ;;  %v2029_v16 = vpop.f32.mrb[26].mxu0  ;;  %v2073_v19 = vpop.f32.mrb[39].mxu1 }
 0x129   :  { %v2030_v20 = vpop.f32.mrb[27].mxu0  ;;  %v3053_v21 = vadd.f32 %v2073_v19, %v2072_v12  ;;  %v498_v12 = vmul.f32 %v3058_v18, %v3035_v27  ;;  %v529_v23 = vmax.f32 %v516_v9, 0.0 }
 0x12a   :  { %v3060_v22 = vadd.f32 %v2028_v14, %v482_v29  ;;  %v528_v14 = vmax.f32 %v515_v15, 0.0 }
 0x12d   :  { %v2075_v24 = vpop.f32.mrb[40].mxu1 }
 0x12e   :  { %v809_v2 = vpop.f32.mrb[28].mxu0  ;;  %v2076_v5 = vpop.f32.mrb[41].mxu1 }
 0x12f   :  { %v810_v30 = vadd.f32 %v2059_v44, %v809_v2  ;;  %v2280_v31 = vpop.f32.mrb[29].mxu0  ;;  %v3071_v32 = vadd.f32 %v2076_v5, %v2075_v24  ;;  %v2078_v29 = vpop.f32.mrb[42].mxu1  ;;  %v526_v44 = vmax.f32 %v513_v0, 0.0 }
 0x130   :  { %v812_v33 = vpop.f32.mrb[30].mxu0  ;;  %v2079_v34 = vpop.f32.mrb[43].mxu1 }
 0x131   :  { %v863_v35 = vmul.f32 %v3058_v18, %v810_v30  ;;  %v813_v36 = vadd.f32 %v2062_v50, %v812_v33  ;;  %v2281_v38 = vpop.f32.mrb[31].mxu0  ;;  %v3075_v40 = vadd.f32 %v2079_v34, %v2078_v29  ;;  %v517_v33 = vadd.f32 %v3067_v25, %v498_v12 }
 0x133   :  { %v876_v13 = vadd.f32 %v3067_v25, %v863_v35  ;;  %v864_v42 = vmul.f32 %v3058_v18, %v813_v36  ;;  %v530_v43 = vmax.f32 %v517_v33, 0.0 }
 0x135   :  { %v889_v45 = vmax.f32 %v876_v13, 0.0  ;;  %v877_v46 = vadd.f32 %v3067_v25, %v864_v42  ;;  %v2081_v47 = vpop.f32.mrb[44].mxu1 }
 0x136   :  { %v817_v50 = vpop.f32.mrb[32].mxu0  ;;  %v2082_v52 = vpop.f32.mrb[45].mxu1 }
 0x137   :  { %v3085_v54 = vmax.f32 %v526_v44, %v889_v45  ;;  %v890_v55 = vmax.f32 %v877_v46, 0.0  ;;  %v818_v56 = vadd.f32 %v2065_v58, %v817_v50  ;;  %v2284_v57 = vpop.f32.mrb[33].mxu0  ;;  %v3087_v59 = vadd.f32 %v2082_v52, %v2081_v47  ;;  %v2084_v60 = vpop.f32.mrb[46].mxu1 }
 0x138   :  { %v820_v61 = vpop.f32.mrb[34].mxu0  ;;  %v2085_v62 = vpop.f32.mrb[47].mxu1  ;;  %v500_v44 = vmul.f32 %v3058_v18, %v3039_v37 }
 0x139   :  { %v3090_v63 = vmax.f32 %v527_v48, %v890_v55  ;;  %v865_v4 = vmul.f32 %v3058_v18, %v818_v56  ;;  %v821_v3 = vadd.f32 %v2068_v1, %v820_v61  ;;  %v2285_v17 = vpop.f32.mrb[35].mxu0  ;;  %v3093_v8 = vadd.f32 %v2085_v62, %v2084_v60 }
 0x13a   :  { %v499_v1 = vmul.f32 %v3058_v18, %v3037_v28  ;;  %v519_v62 = vadd.f32 %v3067_v25, %v500_v44 }
 0x13b   :  { %v878_v58 = vadd.f32 %v3067_v25, %v865_v4  ;;  %v866_v10 = vmul.f32 %v3058_v18, %v821_v3 }
 0x13c   :  { %v518_v13 = vadd.f32 %v3067_v25, %v499_v1  ;;  %v532_v12 = vmax.f32 %v519_v62, 0.0 }
 0x13d   :  { %v891_v16 = vmax.f32 %v878_v58, 0.0  ;;  %v879_v19 = vadd.f32 %v3067_v25, %v866_v10  ;;  %v2087_v20 = vpop.f32.mrb[48].mxu1  ;;  %v502_v10 = vmul.f32 %v3058_v18, %v3043_v51 }
 0x13e   :  { %v825_v24 = vpop.f32.mrb[36].mxu0  ;;  %v2088_v26 = vpop.f32.mrb[49].mxu1  ;;  %v531_v48 = vmax.f32 %v518_v13, 0.0 }
 0x13f   :  { %v3103_v2 = vmax.f32 %v528_v14, %v891_v16  ;;  %v892_v5 = vmax.f32 %v879_v19, 0.0  ;;  %v826_v30 = vadd.f32 %v3051_v11, %v825_v24  ;;  %v2288_v31 = vpop.f32.mrb[37].mxu0  ;;  %v3106_v29 = vadd.f32 %v2088_v26, %v2087_v20  ;;  %v2090_v27 = vpop.f32.mrb[50].mxu1 }
 0x140   :  { %v828_v34 = vpop.f32.mrb[38].mxu0  ;;  %v2091_v0 = vpop.f32.mrb[51].mxu1 }
 0x141   :  { %v3109_v35 = vmax.f32 %v529_v23, %v892_v5  ;;  %v867_v36 = vmul.f32 %v3058_v18, %v826_v30  ;;  %v829_v28 = vadd.f32 %v3053_v21, %v828_v34  ;;  %v2289_v38 = vpop.f32.mrb[39].mxu0  ;;  %v3113_v41 = vadd.f32 %v2091_v0, %v2090_v27 }
 0x142   :  { %v501_v21 = vmul.f32 %v3058_v18, %v3041_v39  ;;  %v503_v23 = vmul.f32 %v3058_v18, %v3045_v53  ;;  %v521_v27 = vadd.f32 %v3067_v25, %v502_v10  ;;  %v506_v10 = vmul.f32 %v3058_v18, %v3060_v22 }
 0x143   :  { %v880_v11 = vadd.f32 %v3067_v25, %v867_v36  ;;  %v868_v42 = vmul.f32 %v3058_v18, %v829_v28 }
 0x144   :  { %v520_v9 = vadd.f32 %v3067_v25, %v501_v21  ;;  %v522_v13 = vadd.f32 %v3067_v25, %v503_v23 }
 0x145   :  { %v893_v45 = vmax.f32 %v880_v11, 0.0  ;;  %v881_v46 = vadd.f32 %v3067_v25, %v868_v42  ;;  %v2093_v47 = vpop.f32.mrb[52].mxu1  ;;  %v504_v42 = vmul.f32 %v3058_v18, %v3047_v7 }
 0x146   :  { %v833_v49 = vpop.f32.mrb[40].mxu0  ;;  %v2094_v50 = vpop.f32.mrb[53].mxu1  ;;  %v533_v20 = vmax.f32 %v520_v9, 0.0 }
 0x147   :  { %v3123_v52 = vmax.f32 %v530_v43, %v893_v45  ;;  %v894_v55 = vmax.f32 %v881_v46, 0.0  ;;  %v834_v56 = vadd.f32 %v3071_v32, %v833_v49  ;;  %v2292_v57 = vpop.f32.mrb[41].mxu0  ;;  %v3126_v60 = vadd.f32 %v2094_v50, %v2093_v47  ;;  %v2096_v15 = vpop.f32.mrb[54].mxu1 }
 0x148   :  { %v836_v37 = vpop.f32.mrb[42].mxu0  ;;  %v2097_v61 = vpop.f32.mrb[55].mxu1  ;;  %v534_v43 = vmax.f32 %v521_v27, 0.0  ;;  %v535_v47 = vmax.f32 %v522_v13, 0.0  ;;  %v523_v7 = vadd.f32 %v3067_v25, %v504_v42 }
 0x149   :  { %v3129_v4 = vmax.f32 %v531_v48, %v894_v55  ;;  %v869_v3 = vmul.f32 %v3058_v18, %v834_v56  ;;  %v837_v39 = vadd.f32 %v3075_v40, %v836_v37  ;;  %v2293_v17 = vpop.f32.mrb[43].mxu0 }
 0x14b   :  { %v882_v58 = vadd.f32 %v3067_v25, %v869_v3  ;;  %v870_v32 = vmul.f32 %v3058_v18, %v837_v39 }
 0x14d   :  { %v895_v14 = vmax.f32 %v882_v58, 0.0  ;;  %v883_v16 = vadd.f32 %v3067_v25, %v870_v32  ;;  %v2124_v19 = vpop.f32.mrb[56].mxu1  ;;  %v536_v32 = vmax.f32 %v523_v7, 0.0 }
 0x14e   :  { %v841_v40 = vpop.f32.mrb[44].mxu0  ;;  %v2125_v1 = vpop.f32.mrb[57].mxu1 }
 0x14f   :  { %v3141_v24 = vmax.f32 %v532_v12, %v895_v14  ;;  %v896_v26 = vmax.f32 %v883_v16, 0.0  ;;  %v842_v5 = vadd.f32 %v3087_v59, %v841_v40  ;;  %v2296_v30 = vpop.f32.mrb[45].mxu0  ;;  %v3144_v31 = vadd.f32 %v2125_v1, %v2124_v19  ;;  %v2127_v51 = vpop.f32.mrb[58].mxu1 }
 0x150   :  { %v844_v33 = vpop.f32.mrb[46].mxu0  ;;  %v2128_v34 = vpop.f32.mrb[59].mxu1 }
 0x151   :  { %v3147_v0 = vmax.f32 %v533_v20, %v896_v26  ;;  %v871_v36 = vmul.f32 %v3058_v18, %v842_v5  ;;  %v845_v53 = vadd.f32 %v3093_v8, %v844_v33  ;;  %v2297_v28 = vpop.f32.mrb[47].mxu0  ;;  %v3151_v38 = vadd.f32 %v2128_v34, %v2127_v51 }
 0x152   :  { %v505_v8 = vmul.f32 %v3058_v18, %v3049_v6  ;;  %v525_v33 = vadd.f32 %v3067_v25, %v506_v10 }
 0x153   :  { %v884_v59 = vadd.f32 %v3067_v25, %v871_v36  ;;  %v872_v11 = vmul.f32 %v3058_v18, %v845_v53 }
 0x154   :  { %v524_v9 = vadd.f32 %v3067_v25, %v505_v8  ;;  %v538_v13 = vmax.f32 %v525_v33, 0.0 }
 0x155   :  { %v897_v44 = vmax.f32 %v884_v59, 0.0  ;;  %v885_v45 = vadd.f32 %v3067_v25, %v872_v11  ;;  %v2130_v46 = vpop.f32.mrb[60].mxu1 }
 0x156   :  { %v849_v48 = vpop.f32.mrb[48].mxu0  ;;  %v2131_v21 = vpop.f32.mrb[61].mxu1  ;;  %v537_v19 = vmax.f32 %v524_v9, 0.0 }
 0x157   :  { %v3161_v49 = vmax.f32 %v534_v43, %v897_v44  ;;  %v898_v50 = vmax.f32 %v885_v45, 0.0  ;;  %v850_v55 = vadd.f32 %v3106_v29, %v849_v48  ;;  %v2300_v56 = vpop.f32.mrb[49].mxu0  ;;  %v2132_v57 = vadd.f32 %v2131_v21, %v2130_v46  ;;  %v2133_v15 = vpop.f32.mrb[62].mxu1 }
 0x158   :  { %v852_v37 = vpop.f32.mrb[50].mxu0  ;;  %v2134_v61 = vpop.f32.mrb[63].mxu1 }
 0x159   :  { %v3165_v62 = vmax.f32 %v535_v47, %v898_v50  ;;  %v873_v3 = vmul.f32 %v3058_v18, %v850_v55  ;;  %v853_v6 = vadd.f32 %v3113_v41, %v852_v37  ;;  %v2301_v39 = vpop.f32.mrb[51].mxu0  ;;  %v2135_v17 = vadd.f32 %v2134_v61, %v2133_v15 }
 0x15b   :  { %v886_v58 = vadd.f32 %v3067_v25, %v873_v3  ;;  %v874_v29 = vmul.f32 %v3058_v18, %v853_v6 }
 0x15d   :  { %v899_v12 = vmax.f32 %v886_v58, 0.0  ;;  %v887_v14 = vadd.f32 %v3067_v25, %v874_v29  ;;  %v2136_v16 = vpop.f32.mrb[64].mxu1 }
 0x15e   :  { %v857_v20 = vpop.f32.mrb[52].mxu0  ;;  %v2137_v23 = vpop.f32.mrb[65].mxu1 }
 0x15f   :  { %v3175_v41 = vmax.f32 %v536_v32, %v899_v12  ;;  %v900_v40 = vmax.f32 %v887_v14, 0.0  ;;  %v858_v1 = vadd.f32 %v3126_v60, %v857_v20  ;;  %v2304_v26 = vpop.f32.mrb[53].mxu0  ;;  %v2138_v5 = vadd.f32 %v2137_v23, %v2136_v16  ;;  %v2139_v30 = vpop.f32.mrb[66].mxu1 }
 0x160   :  { %v860_v51 = vpop.f32.mrb[54].mxu0  ;;  %v2140_v27 = vpop.f32.mrb[67].mxu1 }
 0x161   :  { %v3179_v22 = vmax.f32 %v537_v19, %v900_v40  ;;  %v875_v34 = vmul.f32 %v3058_v18, %v858_v1  ;;  %v2305_v36 = vpop.f32.mrb[55].mxu0  ;;  %v2141_v53 = vadd.f32 %v2140_v27, %v2139_v30 }
 0x163   :  { %v888_v28 = vadd.f32 %v3067_v25, %v875_v34 }
 0x165   :  { %v901_v59 = vmax.f32 %v888_v28, 0.0  ;;  %v2142_v11 = vpop.f32.mrb[68].mxu1 }
 0x166   :  { %v1185_v42 = vpop.f32.mrb[56].mxu0  ;;  %v2143_v60 = vpop.f32.mrb[69].mxu1 }
 0x167   :  { %v3183_v43 = vmax.f32 %v538_v13, %v901_v59  ;;  %v3186_v44 = vadd.f32 %v3144_v31, %v1185_v42  ;;  %v2312_v45 = vpop.f32.mrb[57].mxu0  ;;  %v2144_v46 = vadd.f32 %v2143_v60, %v2142_v11  ;;  %v2145_v47 = vpop.f32.mrb[70].mxu1 }
 0x168   :  { %v1188_v8 = vpop.f32.mrb[58].mxu0  ;;  %v2146_v48 = vpop.f32.mrb[71].mxu1 }
 0x169   :  { %v3189_v21 = vadd.f32 %v3151_v38, %v1188_v8  ;;  %v2313_v50 = vpop.f32.mrb[59].mxu0  ;;  %v2147_v55 = vadd.f32 %v2146_v48, %v2145_v47 }
 0x16d   :  { %v2148_v56 = vpop.f32.mrb[72].mxu1 }
 0x16e   :  { %v1193_v15 = vpop.f32.mrb[60].mxu0  ;;  %v2149_v7 = vpop.f32.mrb[73].mxu1 }
 0x16f   :  { %v3191_v37 = vadd.f32 %v2132_v57, %v1193_v15  ;;  %v2316_v61 = vpop.f32.mrb[61].mxu0  ;;  %v2150_v3 = vadd.f32 %v2149_v7, %v2148_v56  ;;  %v2151_v6 = vpop.f32.mrb[74].mxu1 }
 0x170   :  { %v1196_v31 = vpop.f32.mrb[62].mxu0  ;;  %v2152_v39 = vpop.f32.mrb[75].mxu1 }
 0x171   :  { %v3193_v9 = vadd.f32 %v2135_v17, %v1196_v31  ;;  %v2317_v58 = vpop.f32.mrb[63].mxu0  ;;  %v2153_v29 = vadd.f32 %v2152_v39, %v2151_v6 }
 0x175   :  { %v2154_v32 = vpop.f32.mrb[76].mxu1 }
 0x176   :  { %v1201_v10 = vpop.f32.mrb[64].mxu0  ;;  %v2155_v38 = vpop.f32.mrb[77].mxu1 }
 0x177   :  { %v3195_v12 = vadd.f32 %v2138_v5, %v1201_v10  ;;  %v2320_v14 = vpop.f32.mrb[65].mxu0  ;;  %v2156_v16 = vadd.f32 %v2155_v38, %v2154_v32  ;;  %v2157_v19 = vpop.f32.mrb[78].mxu1 }
 0x178   :  { %v1204_v20 = vpop.f32.mrb[66].mxu0  ;;  %v2158_v57 = vpop.f32.mrb[79].mxu1 }
 0x179   :  { %v3197_v23 = vadd.f32 %v2141_v53, %v1204_v20  ;;  %v2321_v40 = vpop.f32.mrb[67].mxu0  ;;  %v2159_v1 = vadd.f32 %v2158_v57, %v2157_v19 }
 0x17d   :  { %v2160_v26 = vpop.f32.mrb[80].mxu1 }
 0x17e   :  { %v1209_v30 = vpop.f32.mrb[68].mxu0  ;;  %v2161_v17 = vpop.f32.mrb[81].mxu1 }
 0x17f   :  { %v3199_v51 = vadd.f32 %v2144_v46, %v1209_v30  ;;  %v2324_v27 = vpop.f32.mrb[69].mxu0  ;;  %v2162_v33 = vadd.f32 %v2161_v17, %v2160_v26  ;;  %v2163_v34 = vpop.f32.mrb[82].mxu1 }
 0x180   :  { %v1212_v36 = vpop.f32.mrb[70].mxu0  ;;  %v2164_v5 = vpop.f32.mrb[83].mxu1 }
 0x181   :  { %v3201_v28 = vadd.f32 %v2147_v55, %v1212_v36  ;;  %v2325_v13 = vpop.f32.mrb[71].mxu0  ;;  %v1240_v36 = vmul.f32 %v3058_v18, %v3189_v21 }
 0x185   :  { %v2191_v59 = vpop.f32.mrb[84].mxu1 }
 0x186   :  { %v1217_v11 = vpop.f32.mrb[72].mxu0  ;;  %v2192_v42 = vpop.f32.mrb[85].mxu1 }
 0x187   :  { %v3203_v53 = vadd.f32 %v2150_v3, %v1217_v11  ;;  %v2328_v60 = vpop.f32.mrb[73].mxu0  ;;  %v2193_v45 = vadd.f32 %v2192_v42, %v2191_v59  ;;  %v2194_v47 = vpop.f32.mrb[86].mxu1 }
 0x188   :  { %v1220_v8 = vpop.f32.mrb[74].mxu0  ;;  %v2195_v48 = vpop.f32.mrb[87].mxu1 }
 0x189   :  { %v3205_v46 = vadd.f32 %v2153_v29, %v1220_v8  ;;  %v2329_v50 = vpop.f32.mrb[75].mxu0  ;;  %v2196_v56 = vadd.f32 %v2195_v48, %v2194_v47 }
 0x18d   :  { %v2197_v15 = vpop.f32.mrb[88].mxu1 }
 0x18e   :  { %v1225_v7 = vpop.f32.mrb[76].mxu0  ;;  %v2198_v61 = vpop.f32.mrb[89].mxu1 }
 0x18f   :  { %v3207_v55 = vadd.f32 %v2156_v16, %v1225_v7  ;;  %v2332_v6 = vpop.f32.mrb[77].mxu0  ;;  %v2199_v31 = vadd.f32 %v2198_v61, %v2197_v15  ;;  %v2200_v39 = vpop.f32.mrb[90].mxu1  ;;  %v1253_v7 = vadd.f32 %v3067_v25, %v1240_v36  ;;  %v1241_v61 = vmul.f32 %v3058_v18, %v3191_v37 }
 0x190   :  { %v1228_v58 = vpop.f32.mrb[78].mxu0  ;;  %v2201_v3 = vpop.f32.mrb[91].mxu1 }
 0x191   :  { %v3209_v32 = vadd.f32 %v2159_v1, %v1228_v58  ;;  %v2333_v10 = vpop.f32.mrb[79].mxu0  ;;  %v2202_v38 = vadd.f32 %v2201_v3, %v2200_v39  ;;  %v1239_v1 = vmul.f32 %v3058_v18, %v3186_v44  ;;  %v1254_v37 = vadd.f32 %v3067_v25, %v1241_v61 }
 0x192   :  { %v1266_v10 = vmax.f32 %v1253_v7, 0.0 }
 0x193   :  { %v1252_v8 = vadd.f32 %v3067_v25, %v1239_v1 }
 0x195   :  { %v2203_v14 = vpop.f32.mrb[92].mxu1  ;;  %v1265_v6 = vmax.f32 %v1252_v8, 0.0 }
 0x196   :  { %v1233_v19 = vpop.f32.mrb[80].mxu0  ;;  %v2204_v29 = vpop.f32.mrb[93].mxu1 }
 0x197   :  { %v3211_v20 = vadd.f32 %v2162_v33, %v1233_v19  ;;  %v2336_v57 = vpop.f32.mrb[81].mxu0  ;;  %v3213_v40 = vadd.f32 %v2204_v29, %v2203_v14  ;;  %v2206_v26 = vpop.f32.mrb[94].mxu1 }
 0x198   :  { %v1236_v16 = vpop.f32.mrb[82].mxu0  ;;  %v2207_v30 = vpop.f32.mrb[95].mxu1 }
 0x199   :  { %v2337_v17 = vpop.f32.mrb[83].mxu0  ;;  %v3215_v27 = vadd.f32 %v2207_v30, %v2206_v26 }
 0x19d   :  { %v2209_v34 = vpop.f32.mrb[96].mxu1 }
 0x19e   :  { %v1548_v5 = vpop.f32.mrb[84].mxu0  ;;  %v2210_v13 = vpop.f32.mrb[97].mxu1 }
 0x19f   :  { %v1549_v33 = vadd.f32 %v2193_v45, %v1548_v5  ;;  %v2344_v59 = vpop.f32.mrb[85].mxu0  ;;  %v3221_v11 = vadd.f32 %v2210_v13, %v2209_v34  ;;  %v2212_v42 = vpop.f32.mrb[98].mxu1 }
 0x1a0   :  { %v1551_v60 = vpop.f32.mrb[86].mxu0  ;;  %v2213_v47 = vpop.f32.mrb[99].mxu1 }
 0x1a1   :  { %v1602_v48 = vmul.f32 %v3058_v18, %v1549_v33  ;;  %v1552_v50 = vadd.f32 %v2196_v56, %v1551_v60  ;;  %v2345_v15 = vpop.f32.mrb[87].mxu0  ;;  %v3225_v44 = vadd.f32 %v2213_v47, %v2212_v42  ;;  %v1242_v56 = vmul.f32 %v3058_v18, %v3193_v9 }
 0x1a3   :  { %v1615_v21 = vadd.f32 %v3067_v25, %v1602_v48  ;;  %v1603_v45 = vmul.f32 %v3058_v18, %v1552_v50  ;;  %v1255_v59 = vadd.f32 %v3067_v25, %v1242_v56  ;;  %v1267_v48 = vmax.f32 %v1254_v37, 0.0 }
 0x1a5   :  { %v1628_v39 = vmax.f32 %v1615_v21, 0.0  ;;  %v1616_v58 = vadd.f32 %v3067_v25, %v1603_v45  ;;  %v2215_v3 = vpop.f32.mrb[100].mxu1  ;;  %v1268_v21 = vmax.f32 %v1255_v59, 0.0 }
 0x1a6   :  { %v1556_v14 = vpop.f32.mrb[88].mxu0  ;;  %v2216_v19 = vpop.f32.mrb[101].mxu1 }
 0x1a7   :  { %v1641_v29 = vmax.f32 %v1265_v6, %v1628_v39  ;;  %v1629_v57 = vmax.f32 %v1616_v58, 0.0  ;;  %v1557_v26 = vadd.f32 %v2199_v31, %v1556_v14  ;;  %v2348_v16 = vpop.f32.mrb[89].mxu0  ;;  %v3235_v30 = vadd.f32 %v2216_v19, %v2215_v3  ;;  %v2218_v17 = vpop.f32.mrb[102].mxu1 }
 0x1a8   :  { %v1559_v1 = vpop.f32.mrb[90].mxu0  ;;  %v2219_v34 = vpop.f32.mrb[103].mxu1 }
 0x1a9   :  { %v1654_v36 = vmax.f32 %v3085_v54, %v1641_v29  ;;  %v1642_v5 = vmax.f32 %v1266_v10, %v1629_v57  ;;  %v1604_v13 = vmul.f32 %v3058_v18, %v1557_v26  ;;  %v1560_v33 = vadd.f32 %v2202_v38, %v1559_v1  ;;  %v2349_v9 = vpop.f32.mrb[91].mxu0 }
 0x1aa   :  { %v3241_v42 = vadd.f32 %v2219_v34, %v2218_v17  ;;  %v1243_v54 = vmul.f32 %v3058_v18, %v3195_v12 }
 0x1ab   :  { %v1961_v31 = vpack.c.bf16 %v1654_v36, %v1654_v36  ;;  %v1655_v60 = vmax.f32 %v3090_v63, %v1642_v5  ;;  %v1617_v47 = vadd.f32 %v3067_v25, %v1604_v13  ;;  %v1605_v8 = vmul.f32 %v3058_v18, %v1560_v33 }
 0x1ac   :  { %v1244_v63 = vmul.f32 %v3058_v18, %v3197_v23  ;;  %v1256_v56 = vadd.f32 %v3067_v25, %v1243_v54 }
 0x1ad   :  { %1721 = vst.msk [vmem:[%s3371_s4] sm:$0xf] %vm1720_vm2, %v1961_v31  ;;  %v1962_v38 = vpack.c.bf16 %v1655_v60, %v1655_v60  ;;  %v1630_v50 = vmax.f32 %v1617_v47, 0.0  ;;  %v1618_v15 = vadd.f32 %v3067_v25, %v1605_v8  ;;  %v2221_v7 = vpop.f32.mrb[104].mxu1 }
 0x1ae   :  { %v1564_v45 = vpop.f32.mrb[92].mxu0  ;;  %v2222_v61 = vpop.f32.mrb[105].mxu1  ;;  %v1257_v17 = vadd.f32 %v3067_v25, %v1244_v63  ;;  %v1269_v5 = vmax.f32 %v1256_v56, 0.0 }
 0x1af   :  { %1722 = vst.msk [vmem:[%s3371_s4 + $0x4] sm:$0xf] %vm1720_vm2, %v1962_v38  ;;  %v1643_v12 = vmax.f32 %v1267_v48, %v1630_v50  ;;  %v1631_v6 = vmax.f32 %v1618_v15, 0.0  ;;  %v1565_v39 = vadd.f32 %v3213_v40, %v1564_v45  ;;  %v2352_v58 = vpop.f32.mrb[93].mxu0  ;;  %v3260_v3 = vadd.f32 %v2222_v61, %v2221_v7  ;;  %v2224_v10 = vpop.f32.mrb[106].mxu1 }
 0x1b0   :  { %v1567_v14 = vpop.f32.mrb[94].mxu0  ;;  %v2225_v19 = vpop.f32.mrb[107].mxu1  ;;  %v1270_v59 = vmax.f32 %v1257_v17, 0.0 }
 0x1b1   :  { %v1656_v23 = vmax.f32 %v3103_v2, %v1643_v12  ;;  %v1644_v29 = vmax.f32 %v1268_v21, %v1631_v6  ;;  %v1606_v57 = vmul.f32 %v3058_v18, %v1565_v39  ;;  %v1568_v26 = vadd.f32 %v3215_v27, %v1567_v14  ;;  %v2353_v16 = vpop.f32.mrb[95].mxu0 }
 0x1b2   :  { %v3267_v37 = vadd.f32 %v2225_v19, %v2224_v10  ;;  %v1245_v2 = vmul.f32 %v3058_v18, %v3199_v51  ;;  %v1247_v10 = vmul.f32 %v3058_v18, %v3203_v53 }
 0x1b3   :  { %v1963_v40 = vpack.c.bf16 %v1656_v23, %v1656_v23  ;;  %v1657_v1 = vmax.f32 %v3109_v35, %v1644_v29  ;;  %v1619_v34 = vadd.f32 %v3067_v25, %v1606_v57  ;;  %v1607_v36 = vmul.f32 %v3058_v18, %v1568_v26 }
 0x1b4   :  { %v1246_v35 = vmul.f32 %v3058_v18, %v3201_v28  ;;  %v1258_v50 = vadd.f32 %v3067_v25, %v1245_v2  ;;  %v1248_v23 = vmul.f32 %v3058_v18, %v3205_v46 }
 0x1b5   :  { %1723 = vst.msk [vmem:[%s3371_s4 + $0x8] sm:$0xf] %vm1720_vm2, %v1963_v40  ;;  %v1964_v27 = vpack.c.bf16 %v1657_v1, %v1657_v1  ;;  %v1632_v13 = vmax.f32 %v1619_v34, 0.0  ;;  %v1620_v33 = vadd.f32 %v3067_v25, %v1607_v36  ;;  %v2227_v9 = vpop.f32.mrb[108].mxu1  ;;  %v1260_v34 = vadd.f32 %v3067_v25, %v1247_v10 }
 0x1b6   :  { %v1572_v31 = vpop.f32.mrb[96].mxu0  ;;  %v2228_v60 = vpop.f32.mrb[109].mxu1  ;;  %v1259_v12 = vadd.f32 %v3067_v25, %v1246_v35  ;;  %v1271_v56 = vmax.f32 %v1258_v50, 0.0 }
 0x1b7   :  { %1724 = vst.msk [vmem:[%s3371_s4 + $0xc] sm:$0xf] %vm1720_vm2, %v1964_v27  ;;  %v1645_v51 = vmax.f32 %v1269_v5, %v1632_v13  ;;  %v1633_v47 = vmax.f32 %v1620_v33, 0.0  ;;  %v1573_v8 = vadd.f32 %v3221_v11, %v1572_v31  ;;  %v2356_v54 = vpop.f32.mrb[97].mxu0  ;;  %v2229_v48 = vadd.f32 %v2228_v60, %v2227_v9  ;;  %v2230_v38 = vpop.f32.mrb[110].mxu1 }
 0x1b8   :  { %v1575_v15 = vpop.f32.mrb[98].mxu0  ;;  %v2231_v7 = vpop.f32.mrb[111].mxu1  ;;  %v1272_v26 = vmax.f32 %v1259_v12, 0.0 }
 0x1b9   :  { %v1658_v28 = vmax.f32 %v3123_v52, %v1645_v51  ;;  %v1646_v21 = vmax.f32 %v1270_v59, %v1633_v47  ;;  %v1608_v63 = vmul.f32 %v3058_v18, %v1573_v8  ;;  %v1576_v45 = vadd.f32 %v3225_v44, %v1575_v15  ;;  %v2357_v61 = vpop.f32.mrb[99].mxu0 }
 0x1ba   :  { %v1251_v52 = vmul.f32 %v3058_v18, %v3211_v20 }
 0x1bb   :  { %v1965_v6 = vpack.c.bf16 %v1658_v28, %v1658_v28  ;;  %v1659_v11 = vmax.f32 %v3129_v4, %v1646_v21  ;;  %v1621_v39 = vadd.f32 %v3067_v25, %v1608_v63  ;;  %v1609_v58 = vmul.f32 %v3058_v18, %v1576_v45 }
 0x1bc   :  { %v1264_v36 = vadd.f32 %v3067_v25, %v1251_v52 }
 0x1bd   :  { %1725 = vst.msk [vmem:[%s3371_s4 + $0x10] sm:$0xf] %vm1720_vm2, %v1965_v6  ;;  %v1966_v44 = vpack.c.bf16 %v1659_v11, %v1659_v11  ;;  %v1634_v14 = vmax.f32 %v1621_v39, 0.0  ;;  %v1622_v4 = vadd.f32 %v3067_v25, %v1609_v58  ;;  %v1596_v19 = vpop.f32.mrb[112].mxu1 }
 0x1be   :  { %v1597_v29 = vadd.f32 %v2229_v48, %v1596_v19  ;;  %v1580_v57 = vpop.f32.mrb[100].mxu0  ;;  %v2368_v53 = vpop.f32.mrb[113].mxu1  ;;  %v1277_v8 = vmax.f32 %v1264_v36, 0.0  ;;  %v1273_v48 = vmax.f32 %v1260_v34, 0.0 }
 0x1bf   :  { %1726 = vst.msk [vmem:[%s3371_s4 + $0x14] sm:$0xf] %vm1720_vm2, %v1966_v44  ;;  %v1647_v20 = vmax.f32 %v1271_v56, %v1634_v14  ;;  %v1635_v16 = vmax.f32 %v1622_v4, 0.0  ;;  %v1581_v17 = vadd.f32 %v3235_v30, %v1580_v57  ;;  %v2360_v40 = vpop.f32.mrb[101].mxu0  ;;  %v1599_v1 = vpop.f32.mrb[114].mxu1  ;;  %v1261_v30 = vadd.f32 %v3067_v25, %v1248_v23 }
 0x1c0   :  { %v1614_v46 = vmul.f32 %v3058_v18, %v1597_v29  ;;  %v1583_v2 = vpop.f32.mrb[102].mxu0  ;;  %v2369_v5 = vpop.f32.mrb[115].mxu1 }
 0x1c1   :  { %v1660_v27 = vmax.f32 %v3141_v24, %v1647_v20  ;;  %v1648_v13 = vmax.f32 %v1272_v26, %v1635_v16  ;;  %v1610_v33 = vmul.f32 %v3058_v18, %v1581_v17  ;;  %v1584_v9 = vadd.f32 %v3241_v42, %v1583_v2  ;;  %v2361_v59 = vpop.f32.mrb[103].mxu0 }
 0x1c2   :  { %v1627_v35 = vadd.f32 %v3067_v25, %v1614_v46  ;;  %v1249_v24 = vmul.f32 %v3058_v18, %v3207_v55  ;;  %v1274_v28 = vmax.f32 %v1261_v30, 0.0 }
 0x1c3   :  { %v1967_v31 = vpack.c.bf16 %v1660_v27, %v1660_v27  ;;  %v1661_v60 = vmax.f32 %v3147_v0, %v1648_v13  ;;  %v1623_v51 = vadd.f32 %v3067_v25, %v1610_v33  ;;  %v1611_v47 = vmul.f32 %v3058_v18, %v1584_v9 }
 0x1c4   :  { %v1640_v54 = vmax.f32 %v1627_v35, 0.0  ;;  %v1250_v0 = vmul.f32 %v3058_v18, %v3209_v32  ;;  %v1262_v61 = vadd.f32 %v3067_v25, %v1249_v24 }
 0x1c5   :  { %1727 = vst.msk [vmem:[%s3371_s4 + $0x18] sm:$0xf] %vm1720_vm2, %v1967_v31  ;;  %v1968_v42 = vpack.c.bf16 %v1661_v60, %v1661_v60  ;;  %v1636_v38 = vmax.f32 %v1623_v51, 0.0  ;;  %v1624_v50 = vadd.f32 %v3067_v25, %v1611_v47 }
 0x1c6   :  { %v1653_v15 = vmax.f32 %v1277_v8, %v1640_v54  ;;  %v1588_v7 = vpop.f32.mrb[104].mxu0  ;;  %v1263_v52 = vadd.f32 %v3067_v25, %v1250_v0 }
 0x1c7   :  { %1728 = vst.msk [vmem:[%s3371_s4 + $0x1c] sm:$0xf] %vm1720_vm2, %v1968_v42  ;;  %v1649_v55 = vmax.f32 %v1273_v48, %v1636_v38  ;;  %v1637_v21 = vmax.f32 %v1624_v50, 0.0  ;;  %v1589_v63 = vadd.f32 %v3260_v3, %v1588_v7  ;;  %v2364_v45 = vpop.f32.mrb[105].mxu0 }
 0x1c8   :  { %v1666_v12 = vmax.f32 %v3183_v43, %v1653_v15  ;;  %v1591_v6 = vpop.f32.mrb[106].mxu0 }
 0x1c9   :  { %v1662_v32 = vmax.f32 %v3161_v49, %v1649_v55  ;;  %v1650_v11 = vmax.f32 %v1274_v28, %v1637_v21  ;;  %v1612_v39 = vmul.f32 %v3058_v18, %v1589_v63  ;;  %v1592_v58 = vadd.f32 %v3267_v37, %v1591_v6  ;;  %v2365_v10 = vpop.f32.mrb[107].mxu0 }
 0x1ca   :  { %v1973_v56 = vpack.c.bf16 %v1666_v12, %v1666_v12  ;;  %v1275_v49 = vmax.f32 %v1262_v61, 0.0 }
 0x1cb   :  { %v1969_v44 = vpack.c.bf16 %v1662_v32, %v1662_v32  ;;  %v1663_v3 = vmax.f32 %v3165_v62, %v1650_v11  ;;  %v1625_v14 = vadd.f32 %v3067_v25, %v1612_v39  ;;  %v1613_v4 = vmul.f32 %v3058_v18, %v1592_v58 }
 0x1cc   :  { %1733 = vst.msk [vmem:[%s3371_s4 + $0x30] sm:$0xf] %vm1720_vm2, %v1973_v56  ;;  %v1276_v62 = vmax.f32 %v1263_v52, 0.0 }
 0x1cd   :  { %1729 = vst.msk [vmem:[%s3371_s4 + $0x20] sm:$0xf] %vm1720_vm2, %v1969_v44  ;;  %v1970_v43 = vpack.c.bf16 %v1663_v3, %v1663_v3  ;;  %v1638_v37 = vmax.f32 %v1625_v14, 0.0  ;;  %v1626_v19 = vadd.f32 %v3067_v25, %v1613_v4 }
 0x1cf   :  { %1730 = vst.msk [vmem:[%s3371_s4 + $0x24] sm:$0xf] %vm1720_vm2, %v1970_v43  ;;  %v1651_v18 = vmax.f32 %v1275_v49, %v1638_v37  ;;  %v1639_v23 = vmax.f32 %v1626_v19, 0.0 }
 0x1d1   :  { %v1664_v29 = vmax.f32 %v3175_v41, %v1651_v18  ;;  %v1652_v57 = vmax.f32 %v1276_v62, %v1639_v23 }
 0x1d3   :  { %v1971_v53 = vpack.c.bf16 %v1664_v29, %v1664_v29  ;;  %v1665_v26 = vmax.f32 %v3179_v22, %v1652_v57 }
 0x1d5   :  { %1731 = vst.msk [vmem:[%s3371_s4 + $0x28] sm:$0xf] %vm1720_vm2, %v1971_v53  ;;  %v1972_v25 = vpack.c.bf16 %v1665_v26, %v1665_v26 }
 0x1d7   :  { %1732 = vst.msk [vmem:[%s3371_s4 + $0x2c] sm:$0xf] %vm1720_vm2, %v1972_v25 }

// kernel: cnn_forward.6
= control target key start
LH: loop header
LB: loop body
LE: loop exit
PB: predicated region body
PF: predicated region fallthrough
CT: control target
= control target key end

     0   :  { %vm359_vm0 = vcmask 523264   ;;  %s2215_s1 = inlined_call_operand.vmem [shape: bf16[576,128], index: 1, kind: input, shape index: {}]   ;;  %s2216_s0 = inlined_call_operand.vmem [shape: bf16[4,24,576], index: 0, kind: input, shape index: {}]   ;;  %s2217_s2 = inlined_call_operand.vmem [shape: f32[1,128], index: 2, kind: input, shape index: {}]   ;;  %s2218_s3 = inlined_call_operand.vmem [shape: f32[1,128], index: 3, kind: input, shape index: {}]   ;;  %s2219_s4 = inlined_call_operand.vmem [shape: bf16[24,128], index: 4, kind: output, shape index: {}]  }
   0x1   :  { %v1725_v0 = vld [vmem:[%s2215_s1 + $0x40] sm:$0xff]   ;;  %v1748_v4 = vld [vmem:[%s2215_s1 + $0x48] sm:$0xff]   ;;  %v1772_v8 = vld [vmem:[%s2215_s1 + $0x50] sm:$0xff]  }
   0x2   :  { %v1730_v1 = vld [vmem:[%s2215_s1 + $0xc0] sm:$0xff]   ;;  %1317 = vmatprep.subr.bf16.mxu0 %v1725_v0  ;;  %v1754_v5 = vld [vmem:[%s2215_s1 + $0xc8] sm:$0xff]   ;;  %v1778_v9 = vld [vmem:[%s2215_s1 + $0xd0] sm:$0xff]  }
   0x3   :  { %v1736_v2 = vld [vmem:[%s2215_s1] sm:$0xff]   ;;  %1345 = vmatprep.subr.bf16.mxu1 %v1730_v1  ;;  %v1760_v6 = vld [vmem:[%s2215_s1 + $0x8] sm:$0xff]   ;;  %v1784_v10 = vld [vmem:[%s2215_s1 + $0x10] sm:$0xff]  }
   0x4   :  { %v1742_v3 = vld [vmem:[%s2215_s1 + $0x80] sm:$0xff]   ;;  %1318 = vmatpush3.bf16.msra.mxu0 %v1736_v2  ;;  %v1766_v7 = vld [vmem:[%s2215_s1 + $0x88] sm:$0xff]   ;;  %v1790_v11 = vld [vmem:[%s2215_s1 + $0x90] sm:$0xff]  }
   0x5   :  { %1346 = vmatpush3.bf16.msra.mxu1 %v1742_v3  ;;  %1319 = vmatprep.subr.bf16.mxu0 %v1748_v4  ;;  %v1796_v12 = vld [vmem:[%s2215_s1 + $0x58] sm:$0xff]   ;;  %v1820_v16 = vld [vmem:[%s2215_s1 + $0x60] sm:$0xff]   ;;  %v1844_v20 = vld [vmem:[%s2215_s1 + $0x68] sm:$0xff]  }
   0x6   :  { %1347 = vmatprep.subr.bf16.mxu1 %v1754_v5  ;;  %v1802_v13 = vld [vmem:[%s2215_s1 + $0xd8] sm:$0xff]   ;;  %v1826_v17 = vld [vmem:[%s2215_s1 + $0xe0] sm:$0xff]   ;;  %v1850_v21 = vld [vmem:[%s2215_s1 + $0xe8] sm:$0xff]  }
   0x7   :  { %v1808_v14 = vld [vmem:[%s2215_s1 + $0x18] sm:$0xff]   ;;  %v1832_v18 = vld [vmem:[%s2215_s1 + $0x20] sm:$0xff]   ;;  %v1856_v22 = vld [vmem:[%s2215_s1 + $0x28] sm:$0xff]  }
   0x8   :  { %1320 = vmatpush3.bf16.msra.mxu0 %v1760_v6  ;;  %v1814_v15 = vld [vmem:[%s2215_s1 + $0x98] sm:$0xff]   ;;  %v1838_v19 = vld [vmem:[%s2215_s1 + $0xa0] sm:$0xff]   ;;  %v1862_v23 = vld [vmem:[%s2215_s1 + $0xa8] sm:$0xff]  }
   0x9   :  { %1348 = vmatpush3.bf16.msra.mxu1 %v1766_v7  ;;  %1321 = vmatprep.subr.bf16.mxu0 %v1772_v8  ;;  %v1868_v24 = vld [vmem:[%s2215_s1 + $0x70] sm:$0xff]   ;;  %v1892_v28 = vld [vmem:[%s2215_s1 + $0x78] sm:$0xff]   ;;  %v1650_v35 = vld [vmem:[%s2216_s0 + $0xc] ss:$20 sps:$4 sm:$0xff]  }
   0xa   :  { %1349 = vmatprep.subr.bf16.mxu1 %v1778_v9  ;;  %v1874_v25 = vld [vmem:[%s2215_s1 + $0xf0] sm:$0xff]   ;;  %v1898_v29 = vld [vmem:[%s2215_s1 + $0xf8] sm:$0xff]   ;;  %v1930_v36 = vld [vmem:[%s2215_s1 + $0x100] sm:$0xff]   ;;  %446 = vmatprep.mubr.bf16.mxu1 %v1650_v35 }
   0xb   :  { %v1880_v26 = vld [vmem:[%s2215_s1 + $0x30] sm:$0xff]   ;;  %v1904_v30 = vld [vmem:[%s2215_s1 + $0x38] sm:$0xff]   ;;  %v1935_v37 = vld [vmem:[%s2215_s1 + $0x108] sm:$0xff]  }
   0xc   :  { %1322 = vmatpush3.bf16.msra.mxu0 %v1784_v10  ;;  %v1886_v27 = vld [vmem:[%s2215_s1 + $0xb0] sm:$0xff]   ;;  %v1910_v31 = vld [vmem:[%s2215_s1 + $0xb8] sm:$0xff]   ;;  %v98_v38 = vld [vmem:[%s2216_s0 + $0x28] sm:$0xff] }
   0xd   :  { %1350 = vmatpush3.bf16.msra.mxu1 %v1790_v11  ;;  %1323 = vmatprep.subr.bf16.mxu0 %v1796_v12  ;;  %v1645_v32 = vld [vmem:[%s2216_s0] ss:$20 sps:$4 sm:$0xff]   ;;  %v1647_v33 = vld [vmem:[%s2216_s0 + $0x4] ss:$20 sps:$4 sm:$0xff]   ;;  %v1648_v34 = vld [vmem:[%s2216_s0 + $0x8] ss:$20 sps:$4 sm:$0xff]   ;;  %v1199_v39 = vcombine.high %v98_v38, %v98_v38  ;;  %v1198_v43 = vcombine.low %v98_v38, %v98_v38 }
   0xe   :  { %1351 = vmatprep.subr.bf16.mxu1 %v1802_v13  ;;  %398 = vmatprep.mubr.bf16.mxu0 %v1647_v33  ;;  %v99_v40 = vld [vmem:[%s2216_s0 + $0x30] sm:$0xff]  ;;  %v1963_v46 = vld [vmem:[%s2215_s1 + $0x118] sm:$0xff]   ;;  %v1249_v51 = vld [vmem:[%s2216_s0 + $0x64] sm:$0xff] }
   0xf   :  { %v1201_v41 = vcombine.high %v99_v40, %v99_v40  ;;  %v1951_v42 = vld [vmem:[%s2215_s1 + $0x110] sm:$0xff]   ;;  %v1200_v44 = vcombine.low %v99_v40, %v99_v40  ;;  %v1660_v48 = vld [vmem:[%s2216_s0 + $0x38] ss:$0 sps:$4 sm:$0xff]   ;;  %v1668_v49 = vld [vmem:[%s2216_s0 + $0x48] ss:$20 sps:$4 sm:$0xff]   ;;  %v1258_v52 = vcombine.high %v1249_v51, %v1249_v51  ;;  %v1257_v53 = vcombine.low %v1249_v51, %v1249_v51 }
  0x10   :  { %1324 = vmatpush3.bf16.msra.mxu0 %v1808_v14  ;;  %v1659_v45 = vld [vmem:[%s2216_s0 + $0x10] ss:$20 sps:$4 sm:$0xff]   ;;  %v1663_v47 = vld [vmem:[%s2216_s0 + $0x40] ss:$20 sps:$4 sm:$0xff]   ;;  %v1673_v63 = vld [vmem:[%s2216_s0 + $0x78] ss:$20 sps:$4 sm:$0xff]  }
  0x11   :  { %1352 = vmatpush3.bf16.msra.mxu1 %v1814_v15  ;;  %1325 = vmatprep.subr.bf16.mxu0 %v1820_v16  ;;  %v1661_v50 = vld [vmem:[%s2216_s0 + $0x3c] ss:$20 sps:$4 sm:$0xff]   ;;  %v1669_v54 = vld [vmem:[%s2216_s0 + $0x4c] ss:$20 sps:$4 sm:$0xff]   ;;  %v1666_v55 = vld [vmem:[%s2216_s0 + $0x44] ss:$20 sps:$4 sm:$0xff]  }
  0x12   :  { %1353 = vmatprep.subr.bf16.mxu1 %v1826_v17  ;;  %v1670_v56 = vld [vmem:[%s2216_s0 + $0x74] ss:$0 sps:$4 sm:$0xff]   ;;  %v1250_v57 = vld [vmem:[%s2216_s0 + $0x6c] sm:$0xff]  ;;  %v1678_v59 = vld [vmem:[%s2216_s0 + $0x84] ss:$20 sps:$4 sm:$0xff]  }
  0x13   :  { %v1260_v58 = vcombine.high %v1250_v57, %v1250_v57  ;;  %v1259_v60 = vcombine.low %v1250_v57, %v1250_v57  ;;  %v1675_v61 = vld [vmem:[%s2216_s0 + $0x7c] ss:$20 sps:$4 sm:$0xff]   ;;  %v1270_v62 = vld [vmem:[%s2216_s0 + $0xa0] sm:$0xff]  ;;  %v1271_v33 = vld [vmem:[%s2216_s0 + $0xa8] sm:$0xff] }
  0x14   :  { %1326 = vmatpush3.bf16.msra.mxu0 %v1832_v18  ;;  %v1281_v35 = vcombine.high %v1271_v33, %v1271_v33  ;;  %v1278_v38 = vcombine.low %v1270_v62, %v1270_v62 }
  0x15   :  { %1354 = vmatpush3.bf16.msra.mxu1 %v1838_v19  ;;  %1327 = vmatprep.subr.bf16.mxu0 %v1844_v20 }
  0x16   :  { %1355 = vmatprep.subr.bf16.mxu1 %v1850_v21 }
  0x18   :  { %1328 = vmatpush3.bf16.msra.mxu0 %v1856_v22 }
  0x19   :  { %1356 = vmatpush3.bf16.msra.mxu1 %v1862_v23  ;;  %1329 = vmatprep.subr.bf16.mxu0 %v1868_v24 }
  0x1a   :  { %1357 = vmatprep.subr.bf16.mxu1 %v1874_v25 }
  0x1c   :  { %1330 = vmatpush3.bf16.msra.mxu0 %v1880_v26 }
  0x1d   :  { %1358 = vmatpush3.bf16.msra.mxu1 %v1886_v27  ;;  %1331 = vmatprep.subr.bf16.mxu0 %v1892_v28 }
  0x1e   :  { %1359 = vmatprep.subr.bf16.mxu1 %v1898_v29 }
  0x20   :  { %1332 = vmatpush3.bf16.msra.mxu0 %v1904_v30 }
  0x21   :  { %1360 = vmatpush3.bf16.msra.mxu1 %v1910_v31  ;;  %1565 = vmatprep.subr.bf16.mxu0 %v1930_v36 }
  0x22   :  { %1379 = vmatprep.subr.bf16.mxu1 %v1725_v0 }
  0x23   :  { %399 = vmatmul.mubr.bf16.vlgmr.msra.gmra.mrb[0].mxu0 %v1645_v32  ;;  %v1676_v32 = vld [vmem:[%s2216_s0 + $0x80] ss:$20 sps:$4 sm:$0xff]  }
  0x24   :  { %447 = vmatmul.mubr.bf16.vlgmr.msra.gmra.mrb[0].mxu1 %v1648_v34  ;;  %1566 = vmatpush3.bf16.msra.mxu0 %v1930_v36  ;;  %v1279_v34 = vcombine.high %v1270_v62, %v1270_v62 }
  0x25   :  { %1380 = vmatpush3.bf16.msra.mxu1 %v1736_v2  ;;  %1567 = vmatprep.subr.bf16.mxu0 %v1935_v37 }
  0x26   :  { %1381 = vmatprep.subr.bf16.mxu1 %v1748_v4  ;;  %406 = vmatprep.mubr.bf16.mxu0 %v1199_v39  ;;  %v1280_v39 = vcombine.low %v1271_v33, %v1271_v33  ;;  %v2169_v33 = vld [vmem:[%s2217_s2] ss:$0 sm:$0xff] }
  0x27   :  { %454 = vmatprep.mubr.bf16.mxu1 %v1201_v41 }
  0x28   :  { %1568 = vmatpush3.bf16.msra.mxu0 %v1935_v37 }
  0x29   :  { %1382 = vmatpush3.bf16.msra.mxu1 %v1760_v6  ;;  %1569 = vmatprep.subr.bf16.mxu0 %v1951_v42 }
  0x2a   :  { %1383 = vmatprep.subr.bf16.mxu1 %v1772_v8 }
  0x2b   :  { %407 = vmatmul.mubr.bf16.gmra.mrb[4].mxu0 %v1198_v43 }
  0x2c   :  { %455 = vmatmul.mubr.bf16.gmra.mrb[4].mxu1 %v1200_v44  ;;  %1573 = vmatprep.mubr.msk.bf16.mxu0 %vm359_vm0, %v1659_v45 }
  0x2d   :  { %1570 = vmatpush3.bf16.msra.mxu0 %v1951_v42  ;;  %1384 = vmatpush3.bf16.msra.mxu1 %v1784_v10 }
  0x2e   :  { %1571 = vmatprep.subr.bf16.mxu0 %v1963_v46  ;;  %1385 = vmatprep.subr.bf16.mxu1 %v1796_v12 }
  0x2f   :  { %621 = vmatprep.mubr.bf16.mxu1 %v1663_v47 }
  0x31   :  { %1572 = vmatpush3.bf16.msra.mxu0 %v1963_v46  ;;  %1386 = vmatpush3.bf16.msra.mxu1 %v1808_v14 }
  0x32   :  { %1387 = vmatprep.subr.bf16.mxu1 %v1820_v16  ;;  %1407 = vmatprep.subr.bf16.mxu0 %v1730_v1 }
  0x34   :  { %1574 = vmatmul.mubr.msk.bf16.vlgmr.msra.gmra.mrb[8].mxu0 %vm359_vm0, %v1660_v48 }
  0x35   :  { %1388 = vmatpush3.bf16.msra.mxu1 %v1832_v18  ;;  %1408 = vmatpush3.bf16.msra.mxu0 %v1742_v3 }
  0x36   :  { %1389 = vmatprep.subr.bf16.mxu1 %v1844_v20  ;;  %1409 = vmatprep.subr.bf16.mxu0 %v1754_v5 }
  0x37   :  { %669 = vmatprep.mubr.bf16.mxu0 %v1668_v49 }
  0x39   :  { %1390 = vmatpush3.bf16.msra.mxu1 %v1856_v22  ;;  %1410 = vmatpush3.bf16.msra.mxu0 %v1766_v7 }
  0x3a   :  { %1391 = vmatprep.subr.bf16.mxu1 %v1868_v24  ;;  %1411 = vmatprep.subr.bf16.mxu0 %v1778_v9 }
  0x3d   :  { %1392 = vmatpush3.bf16.msra.mxu1 %v1880_v26  ;;  %1412 = vmatpush3.bf16.msra.mxu0 %v1790_v11 }
  0x3e   :  { %1393 = vmatprep.subr.bf16.mxu1 %v1892_v28  ;;  %1413 = vmatprep.subr.bf16.mxu0 %v1802_v13 }
  0x41   :  { %1394 = vmatpush3.bf16.msra.mxu1 %v1904_v30  ;;  %1414 = vmatpush3.bf16.msra.mxu0 %v1814_v15 }
  0x42   :  { %1415 = vmatprep.subr.bf16.mxu0 %v1826_v17  ;;  %1577 = vmatprep.subr.bf16.mxu1 %v1930_v36 }
  0x44   :  { %622 = vmatmul.mubr.bf16.vlgmr.msra.gmra.mrb[8].mxu1 %v1661_v50 }
  0x45   :  { %1416 = vmatpush3.bf16.msra.mxu0 %v1838_v19  ;;  %1578 = vmatpush3.bf16.msra.mxu1 %v1930_v36 }
  0x46   :  { %1417 = vmatprep.subr.bf16.mxu0 %v1850_v21  ;;  %1579 = vmatprep.subr.bf16.mxu1 %v1935_v37 }
  0x47   :  { %629 = vmatprep.mubr.bf16.mxu1 %v1258_v52 }
  0x49   :  { %1418 = vmatpush3.bf16.msra.mxu0 %v1862_v23  ;;  %1580 = vmatpush3.bf16.msra.mxu1 %v1935_v37 }
  0x4a   :  { %1419 = vmatprep.subr.bf16.mxu0 %v1874_v25  ;;  %1581 = vmatprep.subr.bf16.mxu1 %v1951_v42 }
  0x4c   :  { %630 = vmatmul.mubr.bf16.gmra.mrb[12].mxu1 %v1257_v53 }
  0x4d   :  { %1420 = vmatpush3.bf16.msra.mxu0 %v1886_v27  ;;  %1582 = vmatpush3.bf16.msra.mxu1 %v1951_v42 }
  0x4e   :  { %1421 = vmatprep.subr.bf16.mxu0 %v1898_v29  ;;  %1583 = vmatprep.subr.bf16.mxu1 %v1963_v46 }
  0x4f   :  { %1585 = vmatprep.mubr.msk.bf16.mxu1 %vm359_vm0, %v1669_v54 }
  0x51   :  { %1422 = vmatpush3.bf16.msra.mxu0 %v1910_v31  ;;  %1584 = vmatpush3.bf16.msra.mxu1 %v1963_v46 }
  0x52   :  { %1441 = vmatprep.subr.bf16.mxu0 %v1725_v0  ;;  %1469 = vmatprep.subr.bf16.mxu1 %v1730_v1 }
  0x54   :  { %670 = vmatmul.mubr.bf16.vlgmr.msra.gmra.mrb[12].mxu0 %v1666_v55  ;;  %1586 = vmatmul.mubr.msk.bf16.vlgmr.msra.gmra.mrb[16].mxu1 %vm359_vm0, %v1670_v56 }
  0x55   :  { %1442 = vmatpush3.bf16.msra.mxu0 %v1736_v2  ;;  %1470 = vmatpush3.bf16.msra.mxu1 %v1742_v3 }
  0x56   :  { %1443 = vmatprep.subr.bf16.mxu0 %v1748_v4  ;;  %1471 = vmatprep.subr.bf16.mxu1 %v1754_v5 }
  0x57   :  { %677 = vmatprep.mubr.bf16.mxu0 %v1260_v58  ;;  %883 = vmatprep.mubr.bf16.mxu1 %v1678_v59 }
  0x59   :  { %1444 = vmatpush3.bf16.msra.mxu0 %v1760_v6  ;;  %1472 = vmatpush3.bf16.msra.mxu1 %v1766_v7 }
  0x5a   :  { %1445 = vmatprep.subr.bf16.mxu0 %v1772_v8  ;;  %1473 = vmatprep.subr.bf16.mxu1 %v1778_v9 }
  0x5c   :  { %678 = vmatmul.mubr.bf16.gmra.mrb[16].mxu0 %v1259_v60 }
  0x5d   :  { %1446 = vmatpush3.bf16.msra.mxu0 %v1784_v10  ;;  %1474 = vmatpush3.bf16.msra.mxu1 %v1790_v11 }
  0x5e   :  { %1447 = vmatprep.subr.bf16.mxu0 %v1796_v12  ;;  %1475 = vmatprep.subr.bf16.mxu1 %v1802_v13 }
  0x5f   :  { %835 = vmatprep.mubr.bf16.mxu0 %v1675_v61 }
  0x61   :  { %1448 = vmatpush3.bf16.msra.mxu0 %v1808_v14  ;;  %1476 = vmatpush3.bf16.msra.mxu1 %v1814_v15 }
  0x62   :  { %1449 = vmatprep.subr.bf16.mxu0 %v1820_v16  ;;  %1477 = vmatprep.subr.bf16.mxu1 %v1826_v17 }
  0x65   :  { %1450 = vmatpush3.bf16.msra.mxu0 %v1832_v18  ;;  %1478 = vmatpush3.bf16.msra.mxu1 %v1838_v19 }
  0x66   :  { %1451 = vmatprep.subr.bf16.mxu0 %v1844_v20  ;;  %1479 = vmatprep.subr.bf16.mxu1 %v1850_v21 }
  0x69   :  { %1452 = vmatpush3.bf16.msra.mxu0 %v1856_v22  ;;  %1480 = vmatpush3.bf16.msra.mxu1 %v1862_v23 }
  0x6a   :  { %1453 = vmatprep.subr.bf16.mxu0 %v1868_v24  ;;  %1481 = vmatprep.subr.bf16.mxu1 %v1874_v25 }
  0x6d   :  { %1454 = vmatpush3.bf16.msra.mxu0 %v1880_v26  ;;  %1482 = vmatpush3.bf16.msra.mxu1 %v1886_v27 }
  0x6e   :  { %1455 = vmatprep.subr.bf16.mxu0 %v1892_v28  ;;  %1483 = vmatprep.subr.bf16.mxu1 %v1898_v29 }
  0x71   :  { %1456 = vmatpush3.bf16.msra.mxu0 %v1904_v30  ;;  %1484 = vmatpush3.bf16.msra.mxu1 %v1910_v31 }
  0x72   :  { %1589 = vmatprep.subr.bf16.mxu0 %v1930_v36  ;;  %1503 = vmatprep.subr.bf16.mxu1 %v1725_v0  ;;  %v1683_v0 = vld [vmem:[%s2216_s0 + $0x88] ss:$20 sps:$4 sm:$0xff]  }
  0x74   :  { %836 = vmatmul.mubr.bf16.vlgmr.msra.gmra.mrb[20].mxu0 %v1673_v63  ;;  %884 = vmatmul.mubr.bf16.vlgmr.msra.gmra.mrb[20].mxu1 %v1676_v32 }
  0x75   :  { %1590 = vmatpush3.bf16.msra.mxu0 %v1930_v36  ;;  %1504 = vmatpush3.bf16.msra.mxu1 %v1736_v2  ;;  %v1687_v2 = vld [vmem:[%s2216_s0 + $0xb8] ss:$20 sps:$4 sm:$0xff]  }
  0x76   :  { %1591 = vmatprep.subr.bf16.mxu0 %v1935_v37  ;;  %843 = vmatprep.mubr.bf16.mxu0 %v1279_v34 }
  0x77   :  { %891 = vmatprep.mubr.bf16.mxu1 %v1281_v35  ;;  %1505 = vmatprep.subr.bf16.mxu1 %v1748_v4  ;;  %v1684_v4 = vld [vmem:[%s2216_s0 + $0xb0] ss:$0 sps:$4 sm:$0xff]  }
  0x79   :  { %1592 = vmatpush3.bf16.msra.mxu0 %v1935_v37  ;;  %1506 = vmatpush3.bf16.msra.mxu1 %v1760_v6  ;;  %v1692_v6 = vld [vmem:[%s2216_s0 + $0xc0] ss:$20 sps:$4 sm:$0xff]  }
  0x7a   :  { %1593 = vmatprep.subr.bf16.mxu0 %v1951_v42  ;;  %1507 = vmatprep.subr.bf16.mxu1 %v1772_v8  ;;  %v1693_v8 = vld [vmem:[%s2216_s0 + $0xc4] ss:$20 sps:$4 sm:$0xff]  }
  0x7c   :  { %844 = vmatmul.mubr.bf16.gmra.mrb[24].mxu0 %v1278_v38  ;;  %892 = vmatmul.mubr.bf16.gmra.mrb[24].mxu1 %v1280_v39 }
  0x7d   :  { %1594 = vmatpush3.bf16.msra.mxu0 %v1951_v42  ;;  %1508 = vmatpush3.bf16.msra.mxu1 %v1784_v10  ;;  %v1690_v10 = vld [vmem:[%s2216_s0 + $0xbc] ss:$20 sps:$4 sm:$0xff]  }
  0x7e   :  { %1595 = vmatprep.subr.bf16.mxu0 %v1963_v46  ;;  %1597 = vmatprep.mubr.msk.bf16.mxu0 %vm359_vm0, %v1683_v0 }
  0x7f   :  { %1509 = vmatprep.subr.bf16.mxu1 %v1796_v12  ;;  %1046 = vmatprep.mubr.bf16.mxu1 %v1687_v2 }
  0x81   :  { %1596 = vmatpush3.bf16.msra.mxu0 %v1963_v46  ;;  %1510 = vmatpush3.bf16.msra.mxu1 %v1808_v14 }
  0x82   :  { %1531 = vmatprep.subr.bf16.mxu0 %v1730_v1  ;;  %1511 = vmatprep.subr.bf16.mxu1 %v1820_v16  ;;  %v1685_v1 = vld [vmem:[%s2216_s0 + $0xb4] ss:$20 sps:$4 sm:$0xff]  }
  0x84   :  { %1598 = vmatmul.mubr.msk.bf16.vlgmr.msra.gmra.mrb[28].mxu0 %vm359_vm0, %v1684_v4 }
  0x85   :  { %1532 = vmatpush3.bf16.msra.mxu0 %v1742_v3  ;;  %1512 = vmatpush3.bf16.msra.mxu1 %v1832_v18  ;;  %v1291_v3 = vld [vmem:[%s2216_s0 + $0xdc] sm:$0xff] }
  0x86   :  { %1533 = vmatprep.subr.bf16.mxu0 %v1754_v5  ;;  %1513 = vmatprep.subr.bf16.mxu1 %v1844_v20  ;;  %v1300_v5 = vcombine.high %v1291_v3, %v1291_v3 }
  0x87   :  { %1094 = vmatprep.mubr.bf16.mxu0 %v1692_v6 }
  0x89   :  { %1534 = vmatpush3.bf16.msra.mxu0 %v1766_v7  ;;  %1514 = vmatpush3.bf16.msra.mxu1 %v1856_v22  ;;  %v1299_v7 = vcombine.low %v1291_v3, %v1291_v3 }
  0x8a   :  { %1535 = vmatprep.subr.bf16.mxu0 %v1778_v9  ;;  %1515 = vmatprep.subr.bf16.mxu1 %v1868_v24  ;;  %v1292_v9 = vld [vmem:[%s2216_s0 + $0xe4] sm:$0xff] }
  0x8b   :  { %v1302_v12 = vcombine.high %v1292_v9, %v1292_v9 }
  0x8d   :  { %1536 = vmatpush3.bf16.msra.mxu0 %v1790_v11  ;;  %1516 = vmatpush3.bf16.msra.mxu1 %v1880_v26  ;;  %v1694_v11 = vld [vmem:[%s2216_s0 + $0xec] ss:$0 sps:$4 sm:$0xff]  }
  0x8e   :  { %1537 = vmatprep.subr.bf16.mxu0 %v1802_v13  ;;  %1517 = vmatprep.subr.bf16.mxu1 %v1892_v28  ;;  %v1301_v13 = vcombine.low %v1292_v9, %v1292_v9 }
  0x91   :  { %1538 = vmatpush3.bf16.msra.mxu0 %v1814_v15  ;;  %1518 = vmatpush3.bf16.msra.mxu1 %v1904_v30 }
  0x92   :  { %1539 = vmatprep.subr.bf16.mxu0 %v1826_v17  ;;  %1601 = vmatprep.subr.bf16.mxu1 %v1930_v36 }
  0x94   :  { %1047 = vmatmul.mubr.bf16.vlgmr.msra.gmra.mrb[28].mxu1 %v1685_v1 }
  0x95   :  { %1540 = vmatpush3.bf16.msra.mxu0 %v1838_v19  ;;  %1602 = vmatpush3.bf16.msra.mxu1 %v1930_v36 }
  0x96   :  { %1541 = vmatprep.subr.bf16.mxu0 %v1850_v21  ;;  %1603 = vmatprep.subr.bf16.mxu1 %v1935_v37 }
  0x97   :  { %1054 = vmatprep.mubr.bf16.mxu1 %v1300_v5  ;;  %v2175_v5 = vld [vmem:[%s2218_s3] ss:$0 sm:$0xff] }
  0x99   :  { %1542 = vmatpush3.bf16.msra.mxu0 %v1862_v23  ;;  %1604 = vmatpush3.bf16.msra.mxu1 %v1935_v37 }
  0x9a   :  { %1543 = vmatprep.subr.bf16.mxu0 %v1874_v25  ;;  %1605 = vmatprep.subr.bf16.mxu1 %v1951_v42 }
  0x9c   :  { %1055 = vmatmul.mubr.bf16.gmra.mrb[32].mxu1 %v1299_v7 }
  0x9d   :  { %1544 = vmatpush3.bf16.msra.mxu0 %v1886_v27  ;;  %1606 = vmatpush3.bf16.msra.mxu1 %v1951_v42 }
  0x9e   :  { %1545 = vmatprep.subr.bf16.mxu0 %v1898_v29  ;;  %1607 = vmatprep.subr.bf16.mxu1 %v1963_v46 }
  0x9f   :  { %1609 = vmatprep.mubr.msk.bf16.mxu1 %vm359_vm0, %v1693_v8 }
  0xa1   :  { %1546 = vmatpush3.bf16.msra.mxu0 %v1910_v31  ;;  %1608 = vmatpush3.bf16.msra.mxu1 %v1963_v46 }
  0xa4   :  { %1095 = vmatmul.mubr.bf16.vlgmr.msra.gmra.mrb[32].mxu0 %v1690_v10  ;;  %1610 = vmatmul.mubr.msk.bf16.vlgmr.msra.gmra.mrb[36].mxu1 %vm359_vm0, %v1694_v11 }
  0xa5   :  { %1102 = vmatprep.mubr.bf16.mxu0 %v1302_v12 }
  0xac   :  { %1103 = vmatmul.mubr.bf16.gmra.mrb[36].mxu0 %v1301_v13 }
  0xf6   :  { %v1333_v14 = vpop.f32.mrb[0].mxu0 }
  0xf7   :  { %v1361_v15 = vpop.f32.mrb[0].mxu1  ;;  %v1334_v16 = vpop.f32.mrb[1].mxu0 }
  0xf8   :  { %v1335_v17 = vadd.f32 %v1334_v16, %v1333_v14  ;;  %v1362_v18 = vpop.f32.mrb[1].mxu1  ;;  %v1336_v19 = vpop.f32.mrb[2].mxu0 }
  0xf9   :  { %v1363_v20 = vadd.f32 %v1362_v18, %v1361_v15  ;;  %v1364_v21 = vpop.f32.mrb[2].mxu1  ;;  %v1337_v22 = vpop.f32.mrb[3].mxu0 }
  0xfa   :  { %v1338_v23 = vadd.f32 %v1337_v22, %v1336_v19  ;;  %v1365_v24 = vpop.f32.mrb[3].mxu1 }
  0xfb   :  { %v1366_v25 = vadd.f32 %v1365_v24, %v1364_v21  ;;  %v449_v26 = vadd.f32 %v1363_v20, %v1335_v17 }
  0xfd   :  { %v452_v27 = vadd.f32 %v1366_v25, %v1338_v23 }
  0xfe   :  { %v1339_v28 = vpop.f32.mrb[4].mxu0 }
  0xff   :  { %v1367_v29 = vpop.f32.mrb[4].mxu1  ;;  %v1340_v30 = vpop.f32.mrb[5].mxu0 }
 0x100   :  { %v1341_v31 = vadd.f32 %v1340_v30, %v1339_v28  ;;  %v1368_v36 = vpop.f32.mrb[5].mxu1  ;;  %v1342_v37 = vpop.f32.mrb[6].mxu0 }
 0x101   :  { %v1369_v40 = vadd.f32 %v1368_v36, %v1367_v29  ;;  %v1343_v41 = vpop.f32.mrb[7].mxu0  ;;  %v1370_v42 = vpop.f32.mrb[6].mxu1 }
 0x102   :  { %v1371_v43 = vpop.f32.mrb[7].mxu1 }
 0x103   :  { %v457_v44 = vadd.f32 %v1369_v40, %v1341_v31 }
 0x107   :  { %v1575_v45 = vpop.f32.mrb[8].mxu0 }
 0x108   :  { %v505_v46 = vadd.f32 %v1575_v45, %v457_v44  ;;  %v496_v47 = vpop.f32.mrb[9].mxu0 }
 0x109   :  { %v497_v48 = vadd.f32 %v496_v47, %v449_v26  ;;  %v1576_v49 = vpop.f32.mrb[10].mxu0 }
 0x10a   :  { %v499_v50 = vpop.f32.mrb[11].mxu0  ;;  %v518_v20 = vmul.f32 %v2169_v33, %v505_v46 }
 0x10b   :  { %v500_v51 = vadd.f32 %v499_v50, %v452_v27  ;;  %v516_v6 = vmul.f32 %v2169_v33, %v497_v48 }
 0x10c   :  { %v527_v30 = vadd.f32 %v2175_v5, %v518_v20 }
 0x10d   :  { %v517_v7 = vmul.f32 %v2169_v33, %v500_v51  ;;  %v525_v10 = vadd.f32 %v2175_v5, %v516_v6 }
 0x10e   :  { %v530_v40 = vmax.f32 %v527_v30, 0.0 }
 0x10f   :  { %v526_v15 = vadd.f32 %v2175_v5, %v517_v7  ;;  %v528_v22 = vmax.f32 %v525_v10, 0.0 }
 0x111   :  { %v529_v26 = vmax.f32 %v526_v15, 0.0 }
 0x117   :  { %v1395_v52 = vpop.f32.mrb[8].mxu1 }
 0x118   :  { %v1396_v53 = vpop.f32.mrb[9].mxu1 }
 0x119   :  { %v1397_v54 = vadd.f32 %v1396_v53, %v1395_v52  ;;  %v1398_v55 = vpop.f32.mrb[10].mxu1 }
 0x11a   :  { %v1399_v56 = vpop.f32.mrb[11].mxu1 }
 0x11b   :  { %v1400_v57 = vadd.f32 %v1399_v56, %v1398_v55 }
 0x11f   :  { %v1401_v58 = vpop.f32.mrb[12].mxu1 }
 0x120   :  { %v1402_v59 = vpop.f32.mrb[13].mxu1 }
 0x121   :  { %v1403_v60 = vadd.f32 %v1402_v59, %v1401_v58  ;;  %v1404_v61 = vpop.f32.mrb[14].mxu1 }
 0x122   :  { %v1405_v62 = vpop.f32.mrb[15].mxu1 }
 0x127   :  { %v1423_v63 = vpop.f32.mrb[12].mxu0  ;;  %v1587_v32 = vpop.f32.mrb[16].mxu1 }
 0x128   :  { %v1424_v34 = vpop.f32.mrb[13].mxu0  ;;  %v719_v35 = vpop.f32.mrb[17].mxu1 }
 0x129   :  { %v1425_v38 = vadd.f32 %v1424_v34, %v1423_v63  ;;  %v1426_v39 = vpop.f32.mrb[14].mxu0  ;;  %v1588_v0 = vpop.f32.mrb[18].mxu1 }
 0x12a   :  { %v1427_v2 = vpop.f32.mrb[15].mxu0  ;;  %v722_v4 = vpop.f32.mrb[19].mxu1 }
 0x12b   :  { %v1428_v1 = vadd.f32 %v1427_v2, %v1426_v39  ;;  %v672_v3 = vadd.f32 %v1425_v38, %v1397_v54 }
 0x12d   :  { %v720_v8 = vadd.f32 %v719_v35, %v672_v3  ;;  %v675_v9 = vadd.f32 %v1428_v1, %v1400_v57 }
 0x12f   :  { %v733_v11 = vmul.f32 %v2169_v33, %v720_v8  ;;  %v723_v12 = vadd.f32 %v722_v4, %v675_v9  ;;  %v1429_v13 = vpop.f32.mrb[16].mxu0 }
 0x130   :  { %v1430_v14 = vpop.f32.mrb[17].mxu0 }
 0x131   :  { %v736_v16 = vadd.f32 %v2175_v5, %v733_v11  ;;  %v734_v17 = vmul.f32 %v2169_v33, %v723_v12  ;;  %v1431_v18 = vadd.f32 %v1430_v14, %v1429_v13  ;;  %v1432_v19 = vpop.f32.mrb[18].mxu0 }
 0x132   :  { %v1433_v21 = vpop.f32.mrb[19].mxu0 }
 0x133   :  { %v739_v23 = vmax.f32 %v736_v16, 0.0  ;;  %v737_v24 = vadd.f32 %v2175_v5, %v734_v17  ;;  %v680_v25 = vadd.f32 %v1431_v18, %v1403_v60 }
 0x135   :  { %v2185_v27 = vmax.f32 %v528_v22, %v739_v23  ;;  %v740_v28 = vmax.f32 %v737_v24, 0.0  ;;  %v728_v29 = vadd.f32 %v1587_v32, %v680_v25 }
 0x137   :  { %v2188_v31 = vmax.f32 %v529_v26, %v740_v28  ;;  %v735_v36 = vmul.f32 %v2169_v33, %v728_v29 }
 0x139   :  { %v738_v37 = vadd.f32 %v2175_v5, %v735_v36 }
 0x13b   :  { %v741_v41 = vmax.f32 %v738_v37, 0.0 }
 0x13d   :  { %v2192_v42 = vmax.f32 %v530_v40, %v741_v41 }
 0x147   :  { %v1457_v43 = vpop.f32.mrb[20].mxu0  ;;  %v1485_v44 = vpop.f32.mrb[20].mxu1 }
 0x148   :  { %v1458_v45 = vpop.f32.mrb[21].mxu0  ;;  %v1486_v46 = vpop.f32.mrb[21].mxu1 }
 0x149   :  { %v1459_v47 = vadd.f32 %v1458_v45, %v1457_v43  ;;  %v1487_v48 = vadd.f32 %v1486_v46, %v1485_v44  ;;  %v1460_v49 = vpop.f32.mrb[22].mxu0  ;;  %v1488_v50 = vpop.f32.mrb[22].mxu1 }
 0x14a   :  { %v1461_v51 = vpop.f32.mrb[23].mxu0  ;;  %v1489_v52 = vpop.f32.mrb[23].mxu1 }
 0x14b   :  { %v1462_v53 = vadd.f32 %v1461_v51, %v1460_v49  ;;  %v1490_v54 = vadd.f32 %v1489_v52, %v1488_v50  ;;  %v886_v55 = vadd.f32 %v1487_v48, %v1459_v47 }
 0x14d   :  { %v889_v56 = vadd.f32 %v1490_v54, %v1462_v53 }
 0x14f   :  { %v1463_v57 = vpop.f32.mrb[24].mxu0  ;;  %v1491_v58 = vpop.f32.mrb[24].mxu1 }
 0x150   :  { %v1464_v59 = vpop.f32.mrb[25].mxu0  ;;  %v1492_v60 = vpop.f32.mrb[25].mxu1 }
 0x151   :  { %v1465_v61 = vadd.f32 %v1464_v59, %v1463_v57  ;;  %v1493_v62 = vadd.f32 %v1492_v60, %v1491_v58  ;;  %v1466_v63 = vpop.f32.mrb[26].mxu0  ;;  %v1494_v32 = vpop.f32.mrb[26].mxu1 }
 0x152   :  { %v1467_v34 = vpop.f32.mrb[27].mxu0  ;;  %v1495_v35 = vpop.f32.mrb[27].mxu1 }
 0x153   :  { %v894_v38 = vadd.f32 %v1493_v62, %v1465_v61 }
 0x157   :  { %v1599_v39 = vpop.f32.mrb[28].mxu0 }
 0x158   :  { %v942_v0 = vadd.f32 %v1599_v39, %v894_v38  ;;  %v933_v2 = vpop.f32.mrb[29].mxu0 }
 0x159   :  { %v934_v4 = vadd.f32 %v933_v2, %v886_v55  ;;  %v1600_v6 = vpop.f32.mrb[30].mxu0 }
 0x15a   :  { %v936_v1 = vpop.f32.mrb[31].mxu0  ;;  %v949_v52 = vmul.f32 %v2169_v33, %v942_v0 }
 0x15b   :  { %v937_v3 = vadd.f32 %v936_v1, %v889_v56  ;;  %v947_v28 = vmul.f32 %v2169_v33, %v934_v4 }
 0x15c   :  { %v952_v62 = vadd.f32 %v2175_v5, %v949_v52 }
 0x15d   :  { %v948_v36 = vmul.f32 %v2169_v33, %v937_v3  ;;  %v950_v41 = vadd.f32 %v2175_v5, %v947_v28 }
 0x15e   :  { %v955_v39 = vmax.f32 %v952_v62, 0.0 }
 0x15f   :  { %v951_v47 = vadd.f32 %v2175_v5, %v948_v36  ;;  %v953_v54 = vmax.f32 %v950_v41, 0.0 }
 0x161   :  { %v954_v58 = vmax.f32 %v951_v47, 0.0 }
 0x167   :  { %v1519_v7 = vpop.f32.mrb[28].mxu1 }
 0x168   :  { %v1520_v8 = vpop.f32.mrb[29].mxu1 }
 0x169   :  { %v1521_v9 = vadd.f32 %v1520_v8, %v1519_v7  ;;  %v1522_v10 = vpop.f32.mrb[30].mxu1 }
 0x16a   :  { %v1523_v11 = vpop.f32.mrb[31].mxu1 }
 0x16b   :  { %v1524_v12 = vadd.f32 %v1523_v11, %v1522_v10 }
 0x16f   :  { %v1525_v13 = vpop.f32.mrb[32].mxu1 }
 0x170   :  { %v1526_v14 = vpop.f32.mrb[33].mxu1 }
 0x171   :  { %v1527_v15 = vadd.f32 %v1526_v14, %v1525_v13  ;;  %v1528_v16 = vpop.f32.mrb[34].mxu1 }
 0x172   :  { %v1529_v17 = vpop.f32.mrb[35].mxu1 }
 0x177   :  { %v1547_v18 = vpop.f32.mrb[32].mxu0  ;;  %v1611_v19 = vpop.f32.mrb[36].mxu1 }
 0x178   :  { %v1548_v20 = vpop.f32.mrb[33].mxu0  ;;  %v1144_v21 = vpop.f32.mrb[37].mxu1 }
 0x179   :  { %v1549_v22 = vadd.f32 %v1548_v20, %v1547_v18  ;;  %v1550_v23 = vpop.f32.mrb[34].mxu0  ;;  %v1612_v24 = vpop.f32.mrb[38].mxu1 }
 0x17a   :  { %v1551_v25 = vpop.f32.mrb[35].mxu0  ;;  %v1147_v26 = vpop.f32.mrb[39].mxu1 }
 0x17b   :  { %v1552_v29 = vadd.f32 %v1551_v25, %v1550_v23  ;;  %v1097_v30 = vadd.f32 %v1549_v22, %v1521_v9 }
 0x17d   :  { %v1145_v37 = vadd.f32 %v1144_v21, %v1097_v30  ;;  %v1100_v40 = vadd.f32 %v1552_v29, %v1524_v12 }
 0x17f   :  { %v1158_v43 = vmul.f32 %v2169_v33, %v1145_v37  ;;  %v1148_v44 = vadd.f32 %v1147_v26, %v1100_v40  ;;  %v1553_v45 = vpop.f32.mrb[36].mxu0 }
 0x180   :  { %v1554_v46 = vpop.f32.mrb[37].mxu0 }
 0x181   :  { %v1161_v48 = vadd.f32 %v2175_v5, %v1158_v43  ;;  %v1159_v49 = vmul.f32 %v2169_v33, %v1148_v44  ;;  %v1555_v50 = vadd.f32 %v1554_v46, %v1553_v45  ;;  %v1556_v51 = vpop.f32.mrb[38].mxu0 }
 0x182   :  { %v1557_v53 = vpop.f32.mrb[39].mxu0 }
 0x183   :  { %v1164_v55 = vmax.f32 %v1161_v48, 0.0  ;;  %v1162_v56 = vadd.f32 %v2175_v5, %v1159_v49  ;;  %v1105_v57 = vadd.f32 %v1555_v50, %v1527_v15 }
 0x185   :  { %v1167_v59 = vmax.f32 %v953_v54, %v1164_v55  ;;  %v1165_v60 = vmax.f32 %v1162_v56, 0.0  ;;  %v1153_v61 = vadd.f32 %v1611_v19, %v1105_v57 }
 0x187   :  { %v1170_v63 = vmax.f32 %v2185_v27, %v1167_v59  ;;  %v1168_v32 = vmax.f32 %v954_v58, %v1165_v60  ;;  %v1160_v34 = vmul.f32 %v2169_v33, %v1153_v61 }
 0x189   :  { %v1171_v35 = vmax.f32 %v2188_v31, %v1168_v32  ;;  %v1163_v38 = vadd.f32 %v2175_v5, %v1160_v34 }
 0x18b   :  { %v1315_v0 = vpack.c.bf16 %v1171_v35, %v1170_v63  ;;  %v1166_v2 = vmax.f32 %v1163_v38, 0.0 }
 0x18d   :  { %1316 = vst [vmem:[%s2219_s4] sm:$0xff] %v1315_v0   ;;  %v1169_v4 = vmax.f32 %v955_v39, %v1166_v2 }
 0x18f   :  { %v1172_v6 = vmax.f32 %v2192_v42, %v1169_v4 }
 0x191   :  { %v1311_v1 = vpack.c.bf16 %v1172_v6, %v1172_v6 }
 0x193   :  { %1188 = vst [vmem:[%s2219_s4 + $0x8] sm:$0xf] %v1311_v1 }

// kernel: cnn_forward.7
= control target key start
LH: loop header
LB: loop body
LE: loop exit
PB: predicated region body
PF: predicated region fallthrough
CT: control target
= control target key end

     0   :  { %vm2569_vm0 = vcmask 80896   ;;  %s4492_s1 = inlined_call_operand.vmem [shape: bf16[1152,512], index: 1, kind: input, shape index: {}]   ;;  %s4493_s0 = inlined_call_operand.vmem [shape: bf16[8,1152], index: 0, kind: input, shape index: {}]   ;;  %s4494_s3 = inlined_call_operand.vmem [shape: bf16[512,10], index: 3, kind: input, shape index: {}]   ;;  %s4495_s2 = inlined_call_operand.vmem [shape: f32[1,512], index: 2, kind: input, shape index: {}]   ;;  %s4496_s4 = inlined_call_operand.vmem [shape: f32[1,10], index: 4, kind: input, shape index: {}]   ;;  %s4497_s5 = inlined_call_operand.vmem [shape: f32[8,10], index: 5, kind: output, shape index: {}]  }
   0x1   :  { %v2986_v0 = vld [vmem:[%s4492_s1 + $0x4] ss:$16 sps:$4 sm:$0xff]   ;;  %v2988_v1 = vld [vmem:[%s4492_s1 + $0xc] ss:$16 sps:$4 sm:$0xff]   ;;  %v2990_v2 = vld [vmem:[%s4492_s1] ss:$16 sps:$4 sm:$0xff]  }
   0x2   :  { %1808 = vmatprep.subr.bf16.mxu0 %v2986_v0  ;;  %v2991_v3 = vld [vmem:[%s4492_s1 + $0x8] ss:$16 sps:$4 sm:$0xff]   ;;  %2013 = vmatprep.subr.bf16.mxu1 %v2988_v1  ;;  %v2992_v4 = vld [vmem:[%s4492_s1 + $0x24] ss:$16 sps:$4 sm:$0xff]   ;;  %v2994_v5 = vld [vmem:[%s4492_s1 + $0x2c] ss:$16 sps:$4 sm:$0xff]  }
   0x3   :  { %1809 = vmatpush1.bf16.msra.mxu0 %v2990_v2  ;;  %2014 = vmatpush1.bf16.msra.mxu1 %v2991_v3  ;;  %v2996_v6 = vld [vmem:[%s4492_s1 + $0x20] ss:$16 sps:$4 sm:$0xff]   ;;  %v2997_v7 = vld [vmem:[%s4492_s1 + $0x28] ss:$16 sps:$4 sm:$0xff]   ;;  %v2998_v8 = vld [vmem:[%s4492_s1 + $0x44] ss:$16 sps:$4 sm:$0xff]  }
   0x4   :  { %1810 = vmatprep.subr.bf16.mxu0 %v2992_v4  ;;  %2015 = vmatprep.subr.bf16.mxu1 %v2994_v5  ;;  %v3000_v9 = vld [vmem:[%s4492_s1 + $0x4c] ss:$16 sps:$4 sm:$0xff]   ;;  %v3002_v10 = vld [vmem:[%s4492_s1 + $0x40] ss:$16 sps:$4 sm:$0xff]   ;;  %v3003_v11 = vld [vmem:[%s4492_s1 + $0x48] ss:$16 sps:$4 sm:$0xff]  }
   0x5   :  { %v3004_v12 = vld [vmem:[%s4492_s1 + $0x64] ss:$16 sps:$4 sm:$0xff]   ;;  %v3006_v13 = vld [vmem:[%s4492_s1 + $0x6c] ss:$16 sps:$4 sm:$0xff]   ;;  %v3008_v14 = vld [vmem:[%s4492_s1 + $0x60] ss:$16 sps:$4 sm:$0xff]  }
   0x6   :  { %v3009_v15 = vld [vmem:[%s4492_s1 + $0x68] ss:$16 sps:$4 sm:$0xff]   ;;  %v3010_v16 = vld [vmem:[%s4492_s1 + $0x84] ss:$16 sps:$4 sm:$0xff]   ;;  %v3012_v17 = vld [vmem:[%s4492_s1 + $0x8c] ss:$16 sps:$4 sm:$0xff]  }
   0x7   :  { %1811 = vmatpush1.bf16.msra.mxu0 %v2996_v6  ;;  %2016 = vmatpush1.bf16.msra.mxu1 %v2997_v7  ;;  %v3014_v18 = vld [vmem:[%s4492_s1 + $0x80] ss:$16 sps:$4 sm:$0xff]   ;;  %v3015_v19 = vld [vmem:[%s4492_s1 + $0x88] ss:$16 sps:$4 sm:$0xff]   ;;  %v3016_v20 = vld [vmem:[%s4492_s1 + $0xa4] ss:$16 sps:$4 sm:$0xff]  }
   0x8   :  { %1812 = vmatprep.subr.bf16.mxu0 %v2998_v8  ;;  %2017 = vmatprep.subr.bf16.mxu1 %v3000_v9  ;;  %v3018_v21 = vld [vmem:[%s4492_s1 + $0xac] ss:$16 sps:$4 sm:$0xff]   ;;  %v3020_v22 = vld [vmem:[%s4492_s1 + $0xa0] ss:$16 sps:$4 sm:$0xff]   ;;  %v3021_v23 = vld [vmem:[%s4492_s1 + $0xa8] ss:$16 sps:$4 sm:$0xff]  }
   0x9   :  { %v3022_v24 = vld [vmem:[%s4492_s1 + $0xc4] ss:$16 sps:$4 sm:$0xff]   ;;  %v3024_v25 = vld [vmem:[%s4492_s1 + $0xcc] ss:$16 sps:$4 sm:$0xff]   ;;  %v3026_v26 = vld [vmem:[%s4492_s1 + $0xc0] ss:$16 sps:$4 sm:$0xff]  }
   0xa   :  { %v3027_v27 = vld [vmem:[%s4492_s1 + $0xc8] ss:$16 sps:$4 sm:$0xff]   ;;  %v3028_v28 = vld [vmem:[%s4492_s1 + $0xe4] ss:$16 sps:$4 sm:$0xff]   ;;  %v3030_v29 = vld [vmem:[%s4492_s1 + $0xec] ss:$16 sps:$4 sm:$0xff]  }
   0xb   :  { %1813 = vmatpush1.bf16.msra.mxu0 %v3002_v10  ;;  %2018 = vmatpush1.bf16.msra.mxu1 %v3003_v11  ;;  %v3032_v30 = vld [vmem:[%s4492_s1 + $0xe0] ss:$16 sps:$4 sm:$0xff]   ;;  %v3033_v31 = vld [vmem:[%s4492_s1 + $0xe8] ss:$16 sps:$4 sm:$0xff]   ;;  %v3034_v32 = vld [vmem:[%s4492_s1 + $0x104] ss:$16 sps:$4 sm:$0xff]  }
   0xc   :  { %1814 = vmatprep.subr.bf16.mxu0 %v3004_v12  ;;  %2019 = vmatprep.subr.bf16.mxu1 %v3006_v13  ;;  %v3036_v33 = vld [vmem:[%s4492_s1 + $0x10c] ss:$16 sps:$4 sm:$0xff]   ;;  %v3038_v34 = vld [vmem:[%s4492_s1 + $0x100] ss:$16 sps:$4 sm:$0xff]   ;;  %v3039_v35 = vld [vmem:[%s4492_s1 + $0x108] ss:$16 sps:$4 sm:$0xff]  }
   0xd   :  { %v3040_v36 = vld [vmem:[%s4492_s1 + $0x124] ss:$16 sps:$4 sm:$0xff]   ;;  %v3042_v37 = vld [vmem:[%s4492_s1 + $0x12c] ss:$16 sps:$4 sm:$0xff]   ;;  %v3044_v38 = vld [vmem:[%s4492_s1 + $0x120] ss:$16 sps:$4 sm:$0xff]  }
   0xe   :  { %v3045_v39 = vld [vmem:[%s4492_s1 + $0x128] ss:$16 sps:$4 sm:$0xff]   ;;  %v3046_v40 = vld [vmem:[%s4492_s1 + $0x144] ss:$16 sps:$4 sm:$0xff]   ;;  %v3048_v41 = vld [vmem:[%s4492_s1 + $0x14c] ss:$16 sps:$4 sm:$0xff]  }
   0xf   :  { %1815 = vmatpush1.bf16.msra.mxu0 %v3008_v14  ;;  %2020 = vmatpush1.bf16.msra.mxu1 %v3009_v15  ;;  %v3050_v42 = vld [vmem:[%s4492_s1 + $0x140] ss:$16 sps:$4 sm:$0xff]   ;;  %v3051_v43 = vld [vmem:[%s4492_s1 + $0x148] ss:$16 sps:$4 sm:$0xff]   ;;  %v3052_v44 = vld [vmem:[%s4492_s1 + $0x164] ss:$16 sps:$4 sm:$0xff]  }
  0x10   :  { %1816 = vmatprep.subr.bf16.mxu0 %v3010_v16  ;;  %2021 = vmatprep.subr.bf16.mxu1 %v3012_v17  ;;  %v3054_v45 = vld [vmem:[%s4492_s1 + $0x16c] ss:$16 sps:$4 sm:$0xff]   ;;  %v21_v46 = vld [vmem:[%s4493_s0] sm:$0xff]  ;;  %v3057_v49 = vld [vmem:[%s4492_s1 + $0x168] ss:$16 sps:$4 sm:$0xff]  }
  0x11   :  { %v3056_v47 = vld [vmem:[%s4492_s1 + $0x160] ss:$16 sps:$4 sm:$0xff]   ;;  %v2576_v48 = vcombine.high %v21_v46, %v21_v46  ;;  %v3058_v50 = vld [vmem:[%s4492_s1 + $0x184] ss:$16 sps:$4 sm:$0xff]   ;;  %v3060_v51 = vld [vmem:[%s4492_s1 + $0x18c] ss:$16 sps:$4 sm:$0xff]   ;;  %v2575_v4 = vcombine.low %v21_v46, %v21_v46 }
  0x12   :  { %v3062_v52 = vld [vmem:[%s4492_s1 + $0x180] ss:$16 sps:$4 sm:$0xff]   ;;  %v3063_v53 = vld [vmem:[%s4492_s1 + $0x188] ss:$16 sps:$4 sm:$0xff]   ;;  %v3064_v54 = vld [vmem:[%s4492_s1 + $0x1a4] ss:$16 sps:$4 sm:$0xff]  }
  0x13   :  { %1817 = vmatpush1.bf16.msra.mxu0 %v3014_v18  ;;  %2022 = vmatpush1.bf16.msra.mxu1 %v3015_v19  ;;  %v3066_v55 = vld [vmem:[%s4492_s1 + $0x1ac] ss:$16 sps:$4 sm:$0xff]   ;;  %v3068_v56 = vld [vmem:[%s4492_s1 + $0x1a0] ss:$16 sps:$4 sm:$0xff]   ;;  %v3069_v57 = vld [vmem:[%s4492_s1 + $0x1a8] ss:$16 sps:$4 sm:$0xff]  }
  0x14   :  { %1818 = vmatprep.subr.bf16.mxu0 %v3016_v20  ;;  %2023 = vmatprep.subr.bf16.mxu1 %v3018_v21  ;;  %v3070_v58 = vld [vmem:[%s4492_s1 + $0x1c4] ss:$16 sps:$4 sm:$0xff]   ;;  %v3072_v59 = vld [vmem:[%s4492_s1 + $0x1cc] ss:$16 sps:$4 sm:$0xff]   ;;  %v3074_v60 = vld [vmem:[%s4492_s1 + $0x1c0] ss:$16 sps:$4 sm:$0xff]  }
  0x15   :  { %1840 = vmatprep.mubr.bf16.mxu0 %v2576_v48  ;;  %2045 = vmatprep.mubr.bf16.mxu1 %v2576_v48  ;;  %v3075_v61 = vld [vmem:[%s4492_s1 + $0x1c8] ss:$16 sps:$4 sm:$0xff]   ;;  %v3076_v62 = vld [vmem:[%s4492_s1 + $0x1e4] ss:$16 sps:$4 sm:$0xff]   ;;  %v3078_v63 = vld [vmem:[%s4492_s1 + $0x1ec] ss:$16 sps:$4 sm:$0xff]  }
  0x16   :  { %v3080_v0 = vld [vmem:[%s4492_s1 + $0x1e0] ss:$16 sps:$4 sm:$0xff]   ;;  %v3081_v1 = vld [vmem:[%s4492_s1 + $0x1e8] ss:$16 sps:$4 sm:$0xff]   ;;  %v3086_v2 = vld [vmem:[%s4492_s1 + $0x204] ss:$16 sps:$4 sm:$0xff]  }
  0x17   :  { %1819 = vmatpush1.bf16.msra.mxu0 %v3020_v22  ;;  %2024 = vmatpush1.bf16.msra.mxu1 %v3021_v23  ;;  %v3089_v3 = vld [vmem:[%s4492_s1 + $0x20c] ss:$16 sps:$4 sm:$0xff]   ;;  %v3084_v5 = vld [vmem:[%s4492_s1 + $0x200] ss:$16 sps:$4 sm:$0xff]   ;;  %v3087_v6 = vld [vmem:[%s4492_s1 + $0x208] ss:$16 sps:$4 sm:$0xff]  }
  0x18   :  { %1820 = vmatprep.subr.bf16.mxu0 %v3022_v24  ;;  %2025 = vmatprep.subr.bf16.mxu1 %v3024_v25  ;;  %v3092_v7 = vld [vmem:[%s4492_s1 + $0x224] ss:$16 sps:$4 sm:$0xff]   ;;  %v3095_v8 = vld [vmem:[%s4492_s1 + $0x22c] ss:$16 sps:$4 sm:$0xff]   ;;  %v3090_v9 = vld [vmem:[%s4492_s1 + $0x220] ss:$16 sps:$4 sm:$0xff]  }
  0x19   :  { %v3093_v10 = vld [vmem:[%s4492_s1 + $0x228] ss:$16 sps:$4 sm:$0xff]   ;;  %v3098_v11 = vld [vmem:[%s4492_s1 + $0x244] ss:$16 sps:$4 sm:$0xff]   ;;  %v3101_v12 = vld [vmem:[%s4492_s1 + $0x24c] ss:$16 sps:$4 sm:$0xff]  }
  0x1a   :  { %v3096_v13 = vld [vmem:[%s4492_s1 + $0x240] ss:$16 sps:$4 sm:$0xff]   ;;  %v3099_v14 = vld [vmem:[%s4492_s1 + $0x248] ss:$16 sps:$4 sm:$0xff]   ;;  %v3104_v15 = vld [vmem:[%s4492_s1 + $0x264] ss:$16 sps:$4 sm:$0xff]  }
  0x1b   :  { %1821 = vmatpush1.bf16.msra.mxu0 %v3026_v26  ;;  %2026 = vmatpush1.bf16.msra.mxu1 %v3027_v27  ;;  %v3107_v16 = vld [vmem:[%s4492_s1 + $0x26c] ss:$16 sps:$4 sm:$0xff]   ;;  %v3102_v17 = vld [vmem:[%s4492_s1 + $0x260] ss:$16 sps:$4 sm:$0xff]   ;;  %v3105_v18 = vld [vmem:[%s4492_s1 + $0x268] ss:$16 sps:$4 sm:$0xff]  }
  0x1c   :  { %1822 = vmatprep.subr.bf16.mxu0 %v3028_v28  ;;  %2027 = vmatprep.subr.bf16.mxu1 %v3030_v29  ;;  %v3110_v19 = vld [vmem:[%s4492_s1 + $0x284] ss:$16 sps:$4 sm:$0xff]   ;;  %v3113_v20 = vld [vmem:[%s4492_s1 + $0x28c] ss:$16 sps:$4 sm:$0xff]   ;;  %v3108_v21 = vld [vmem:[%s4492_s1 + $0x280] ss:$16 sps:$4 sm:$0xff]  }
  0x1d   :  { %v3111_v22 = vld [vmem:[%s4492_s1 + $0x288] ss:$16 sps:$4 sm:$0xff]   ;;  %v3116_v23 = vld [vmem:[%s4492_s1 + $0x2a4] ss:$16 sps:$4 sm:$0xff]   ;;  %v3119_v24 = vld [vmem:[%s4492_s1 + $0x2ac] ss:$16 sps:$4 sm:$0xff]  }
  0x1e   :  { %v3114_v25 = vld [vmem:[%s4492_s1 + $0x2a0] ss:$16 sps:$4 sm:$0xff]   ;;  %v3117_v26 = vld [vmem:[%s4492_s1 + $0x2a8] ss:$16 sps:$4 sm:$0xff]   ;;  %v3122_v27 = vld [vmem:[%s4492_s1 + $0x2c4] ss:$16 sps:$4 sm:$0xff]  }
  0x1f   :  { %1823 = vmatpush1.bf16.msra.mxu0 %v3032_v30  ;;  %2028 = vmatpush1.bf16.msra.mxu1 %v3033_v31  ;;  %v3125_v28 = vld [vmem:[%s4492_s1 + $0x2cc] ss:$16 sps:$4 sm:$0xff]   ;;  %v3120_v31 = vld [vmem:[%s4492_s1 + $0x2c0] ss:$16 sps:$4 sm:$0xff]   ;;  %v3147_v48 = vld [vmem:[%s4492_s1 + $0x348] ss:$16 sps:$4 sm:$0xff]  }
  0x20   :  { %1824 = vmatprep.subr.bf16.mxu0 %v3034_v32  ;;  %2029 = vmatprep.subr.bf16.mxu1 %v3036_v33  ;;  %v3766_v29 = vld [vmem:[%s4493_s0 + $0x8] sm:$0xff]  ;;  %v3128_v33 = vld [vmem:[%s4492_s1 + $0x2e4] ss:$16 sps:$4 sm:$0xff]  }
  0x21   :  { %v2578_v30 = vcombine.high %v3766_v29, %v3766_v29  ;;  %v3123_v32 = vld [vmem:[%s4492_s1 + $0x2c8] ss:$16 sps:$4 sm:$0xff]   ;;  %v3149_v46 = vld [vmem:[%s4492_s1 + $0x34c] ss:$16 sps:$4 sm:$0xff]  }
  0x23   :  { %1825 = vmatpush1.bf16.msra.mxu0 %v3038_v34  ;;  %2030 = vmatpush1.bf16.msra.mxu1 %v3039_v35  ;;  %v3131_v34 = vld [vmem:[%s4492_s1 + $0x2ec] ss:$16 sps:$4 sm:$0xff]   ;;  %v3126_v35 = vld [vmem:[%s4492_s1 + $0x2e0] ss:$16 sps:$4 sm:$0xff]  }
  0x24   :  { %1826 = vmatprep.subr.bf16.mxu0 %v3040_v36  ;;  %2031 = vmatprep.subr.bf16.mxu1 %v3042_v37  ;;  %v3129_v36 = vld [vmem:[%s4492_s1 + $0x2e8] ss:$16 sps:$4 sm:$0xff]   ;;  %v3134_v37 = vld [vmem:[%s4492_s1 + $0x304] ss:$16 sps:$4 sm:$0xff]  }
  0x27   :  { %1827 = vmatpush1.bf16.msra.mxu0 %v3044_v38  ;;  %2032 = vmatpush1.bf16.msra.mxu1 %v3045_v39  ;;  %v3137_v38 = vld [vmem:[%s4492_s1 + $0x30c] ss:$16 sps:$4 sm:$0xff]   ;;  %v3132_v39 = vld [vmem:[%s4492_s1 + $0x300] ss:$16 sps:$4 sm:$0xff]  }
  0x28   :  { %1828 = vmatprep.subr.bf16.mxu0 %v3046_v40  ;;  %2033 = vmatprep.subr.bf16.mxu1 %v3048_v41  ;;  %v3135_v40 = vld [vmem:[%s4492_s1 + $0x308] ss:$16 sps:$4 sm:$0xff]   ;;  %v3140_v41 = vld [vmem:[%s4492_s1 + $0x324] ss:$16 sps:$4 sm:$0xff]  }
  0x2b   :  { %1829 = vmatpush1.bf16.msra.mxu0 %v3050_v42  ;;  %2034 = vmatpush1.bf16.msra.mxu1 %v3051_v43  ;;  %v3143_v42 = vld [vmem:[%s4492_s1 + $0x32c] ss:$16 sps:$4 sm:$0xff]   ;;  %v3138_v43 = vld [vmem:[%s4492_s1 + $0x320] ss:$16 sps:$4 sm:$0xff]  }
  0x2c   :  { %1830 = vmatprep.subr.bf16.mxu0 %v3052_v44  ;;  %2035 = vmatprep.subr.bf16.mxu1 %v3054_v45  ;;  %v3141_v44 = vld [vmem:[%s4492_s1 + $0x328] ss:$16 sps:$4 sm:$0xff]   ;;  %v3146_v45 = vld [vmem:[%s4492_s1 + $0x344] ss:$16 sps:$4 sm:$0xff]  }
  0x2f   :  { %1831 = vmatpush1.bf16.msra.mxu0 %v3056_v47  ;;  %2036 = vmatpush1.bf16.msra.mxu1 %v3057_v49  ;;  %v3144_v47 = vld [vmem:[%s4492_s1 + $0x340] ss:$16 sps:$4 sm:$0xff]   ;;  %v3152_v49 = vld [vmem:[%s4492_s1 + $0x364] ss:$16 sps:$4 sm:$0xff]  }
  0x30   :  { %1832 = vmatprep.subr.bf16.mxu0 %v3058_v50  ;;  %2037 = vmatprep.subr.bf16.mxu1 %v3060_v51  ;;  %v3155_v50 = vld [vmem:[%s4492_s1 + $0x36c] ss:$16 sps:$4 sm:$0xff]   ;;  %v3150_v51 = vld [vmem:[%s4492_s1 + $0x360] ss:$16 sps:$4 sm:$0xff]  }
  0x33   :  { %1833 = vmatpush1.bf16.msra.mxu0 %v3062_v52  ;;  %2038 = vmatpush1.bf16.msra.mxu1 %v3063_v53  ;;  %v3153_v52 = vld [vmem:[%s4492_s1 + $0x368] ss:$16 sps:$4 sm:$0xff]   ;;  %v3158_v53 = vld [vmem:[%s4492_s1 + $0x384] ss:$16 sps:$4 sm:$0xff]  }
  0x34   :  { %1834 = vmatprep.subr.bf16.mxu0 %v3064_v54  ;;  %2039 = vmatprep.subr.bf16.mxu1 %v3066_v55  ;;  %v3161_v54 = vld [vmem:[%s4492_s1 + $0x38c] ss:$16 sps:$4 sm:$0xff]   ;;  %v3156_v55 = vld [vmem:[%s4492_s1 + $0x380] ss:$16 sps:$4 sm:$0xff]  }
  0x37   :  { %1835 = vmatpush1.bf16.msra.mxu0 %v3068_v56  ;;  %2040 = vmatpush1.bf16.msra.mxu1 %v3069_v57  ;;  %v3159_v56 = vld [vmem:[%s4492_s1 + $0x388] ss:$16 sps:$4 sm:$0xff]   ;;  %v3164_v57 = vld [vmem:[%s4492_s1 + $0x3a4] ss:$16 sps:$4 sm:$0xff]  }
  0x38   :  { %1836 = vmatprep.subr.bf16.mxu0 %v3070_v58  ;;  %2041 = vmatprep.subr.bf16.mxu1 %v3072_v59  ;;  %v3167_v58 = vld [vmem:[%s4492_s1 + $0x3ac] ss:$16 sps:$4 sm:$0xff]   ;;  %v3162_v59 = vld [vmem:[%s4492_s1 + $0x3a0] ss:$16 sps:$4 sm:$0xff]  }
  0x3b   :  { %1837 = vmatpush1.bf16.msra.mxu0 %v3074_v60  ;;  %2042 = vmatpush1.bf16.msra.mxu1 %v3075_v61  ;;  %v3165_v60 = vld [vmem:[%s4492_s1 + $0x3a8] ss:$16 sps:$4 sm:$0xff]   ;;  %v3170_v61 = vld [vmem:[%s4492_s1 + $0x3c4] ss:$16 sps:$4 sm:$0xff]  }
  0x3c   :  { %1838 = vmatprep.subr.bf16.mxu0 %v3076_v62  ;;  %2043 = vmatprep.subr.bf16.mxu1 %v3078_v63  ;;  %v3173_v62 = vld [vmem:[%s4492_s1 + $0x3cc] ss:$16 sps:$4 sm:$0xff]   ;;  %v3168_v63 = vld [vmem:[%s4492_s1 + $0x3c0] ss:$16 sps:$4 sm:$0xff]  }
  0x3f   :  { %1839 = vmatpush1.bf16.msra.mxu0 %v3080_v0  ;;  %2044 = vmatpush1.bf16.msra.mxu1 %v3081_v1  ;;  %v3171_v0 = vld [vmem:[%s4492_s1 + $0x3c8] ss:$16 sps:$4 sm:$0xff]   ;;  %v3176_v1 = vld [vmem:[%s4492_s1 + $0x3e4] ss:$16 sps:$4 sm:$0xff]  }
  0x40   :  { %1849 = vmatprep.subr.bf16.mxu0 %v3086_v2  ;;  %2054 = vmatprep.subr.bf16.mxu1 %v3089_v3  ;;  %v3179_v2 = vld [vmem:[%s4492_s1 + $0x3ec] ss:$16 sps:$4 sm:$0xff]   ;;  %v3174_v3 = vld [vmem:[%s4492_s1 + $0x3e0] ss:$16 sps:$4 sm:$0xff]  }
  0x42   :  { %1841 = vmatmul.mubr.bf16.vlgmr.msra.gmra.mrb[0].mxu0 %v2575_v4  ;;  %2046 = vmatmul.mubr.bf16.vlgmr.msra.gmra.mrb[0].mxu1 %v2575_v4  ;;  %v3177_v4 = vld [vmem:[%s4492_s1 + $0x3e8] ss:$16 sps:$4 sm:$0xff]  }
  0x43   :  { %1850 = vmatpush1.bf16.msra.mxu0 %v3084_v5  ;;  %2055 = vmatpush1.bf16.msra.mxu1 %v3087_v6  ;;  %v3184_v5 = vld [vmem:[%s4492_s1 + $0x404] ss:$16 sps:$4 sm:$0xff]   ;;  %v3187_v6 = vld [vmem:[%s4492_s1 + $0x40c] ss:$16 sps:$4 sm:$0xff]  }
  0x44   :  { %1851 = vmatprep.subr.bf16.mxu0 %v3092_v7  ;;  %2056 = vmatprep.subr.bf16.mxu1 %v3095_v8  ;;  %v2577_v7 = vcombine.low %v3766_v29, %v3766_v29  ;;  %v3182_v8 = vld [vmem:[%s4492_s1 + $0x400] ss:$16 sps:$4 sm:$0xff]   ;;  %v3217_v29 = vld [vmem:[%s4492_s1 + $0x4ac] ss:$16 sps:$4 sm:$0xff]  }
  0x45   :  { %1881 = vmatprep.mubr.bf16.mxu0 %v2578_v30  ;;  %2086 = vmatprep.mubr.bf16.mxu1 %v2578_v30  ;;  %v3212_v30 = vld [vmem:[%s4492_s1 + $0x4a0] ss:$16 sps:$4 sm:$0xff]  }
  0x47   :  { %1852 = vmatpush1.bf16.msra.mxu0 %v3090_v9  ;;  %2057 = vmatpush1.bf16.msra.mxu1 %v3093_v10  ;;  %v3185_v9 = vld [vmem:[%s4492_s1 + $0x408] ss:$16 sps:$4 sm:$0xff]   ;;  %v3190_v10 = vld [vmem:[%s4492_s1 + $0x424] ss:$16 sps:$4 sm:$0xff]  }
  0x48   :  { %1853 = vmatprep.subr.bf16.mxu0 %v3098_v11  ;;  %2058 = vmatprep.subr.bf16.mxu1 %v3101_v12  ;;  %v3904_v11 = vld [vmem:[%s4493_s0 + $0x10] sm:$0xff]  ;;  %v3193_v12 = vld [vmem:[%s4492_s1 + $0x42c] ss:$16 sps:$4 sm:$0xff]  }
  0x4b   :  { %1854 = vmatpush1.bf16.msra.mxu0 %v3096_v13  ;;  %2059 = vmatpush1.bf16.msra.mxu1 %v3099_v14  ;;  %v2580_v13 = vcombine.high %v3904_v11, %v3904_v11  ;;  %v3188_v14 = vld [vmem:[%s4492_s1 + $0x420] ss:$16 sps:$4 sm:$0xff]  }
  0x4c   :  { %1855 = vmatprep.subr.bf16.mxu0 %v3104_v15  ;;  %2060 = vmatprep.subr.bf16.mxu1 %v3107_v16  ;;  %v3191_v15 = vld [vmem:[%s4492_s1 + $0x428] ss:$16 sps:$4 sm:$0xff]   ;;  %v3196_v16 = vld [vmem:[%s4492_s1 + $0x444] ss:$16 sps:$4 sm:$0xff]  }
  0x4f   :  { %1856 = vmatpush1.bf16.msra.mxu0 %v3102_v17  ;;  %2061 = vmatpush1.bf16.msra.mxu1 %v3105_v18  ;;  %v3199_v17 = vld [vmem:[%s4492_s1 + $0x44c] ss:$16 sps:$4 sm:$0xff]   ;;  %v3194_v18 = vld [vmem:[%s4492_s1 + $0x440] ss:$16 sps:$4 sm:$0xff]  }
  0x50   :  { %1857 = vmatprep.subr.bf16.mxu0 %v3110_v19  ;;  %2062 = vmatprep.subr.bf16.mxu1 %v3113_v20  ;;  %v3197_v19 = vld [vmem:[%s4492_s1 + $0x448] ss:$16 sps:$4 sm:$0xff]   ;;  %v3202_v20 = vld [vmem:[%s4492_s1 + $0x464] ss:$16 sps:$4 sm:$0xff]  }
  0x53   :  { %1858 = vmatpush1.bf16.msra.mxu0 %v3108_v21  ;;  %2063 = vmatpush1.bf16.msra.mxu1 %v3111_v22  ;;  %v3205_v21 = vld [vmem:[%s4492_s1 + $0x46c] ss:$16 sps:$4 sm:$0xff]   ;;  %v3200_v22 = vld [vmem:[%s4492_s1 + $0x460] ss:$16 sps:$4 sm:$0xff]  }
  0x54   :  { %1859 = vmatprep.subr.bf16.mxu0 %v3116_v23  ;;  %2064 = vmatprep.subr.bf16.mxu1 %v3119_v24  ;;  %v3203_v23 = vld [vmem:[%s4492_s1 + $0x468] ss:$16 sps:$4 sm:$0xff]   ;;  %v3208_v24 = vld [vmem:[%s4492_s1 + $0x484] ss:$16 sps:$4 sm:$0xff]  }
  0x57   :  { %1860 = vmatpush1.bf16.msra.mxu0 %v3114_v25  ;;  %2065 = vmatpush1.bf16.msra.mxu1 %v3117_v26  ;;  %v3211_v25 = vld [vmem:[%s4492_s1 + $0x48c] ss:$16 sps:$4 sm:$0xff]   ;;  %v3206_v26 = vld [vmem:[%s4492_s1 + $0x480] ss:$16 sps:$4 sm:$0xff]  }
  0x58   :  { %1861 = vmatprep.subr.bf16.mxu0 %v3122_v27  ;;  %2066 = vmatprep.subr.bf16.mxu1 %v3125_v28  ;;  %v3209_v27 = vld [vmem:[%s4492_s1 + $0x488] ss:$16 sps:$4 sm:$0xff]   ;;  %v3214_v28 = vld [vmem:[%s4492_s1 + $0x4a4] ss:$16 sps:$4 sm:$0xff]  }
  0x5b   :  { %1862 = vmatpush1.bf16.msra.mxu0 %v3120_v31  ;;  %2067 = vmatpush1.bf16.msra.mxu1 %v3123_v32  ;;  %v3215_v31 = vld [vmem:[%s4492_s1 + $0x4a8] ss:$16 sps:$4 sm:$0xff]   ;;  %v3220_v32 = vld [vmem:[%s4492_s1 + $0x4c4] ss:$16 sps:$4 sm:$0xff]  }
  0x5c   :  { %1863 = vmatprep.subr.bf16.mxu0 %v3128_v33  ;;  %2068 = vmatprep.subr.bf16.mxu1 %v3131_v34  ;;  %v3223_v33 = vld [vmem:[%s4492_s1 + $0x4cc] ss:$16 sps:$4 sm:$0xff]   ;;  %v3218_v34 = vld [vmem:[%s4492_s1 + $0x4c0] ss:$16 sps:$4 sm:$0xff]  }
  0x5f   :  { %1864 = vmatpush1.bf16.msra.mxu0 %v3126_v35  ;;  %2069 = vmatpush1.bf16.msra.mxu1 %v3129_v36  ;;  %v3221_v35 = vld [vmem:[%s4492_s1 + $0x4c8] ss:$16 sps:$4 sm:$0xff]   ;;  %v3226_v36 = vld [vmem:[%s4492_s1 + $0x4e4] ss:$16 sps:$4 sm:$0xff]  }
  0x60   :  { %1865 = vmatprep.subr.bf16.mxu0 %v3134_v37  ;;  %2070 = vmatprep.subr.bf16.mxu1 %v3137_v38  ;;  %v3229_v37 = vld [vmem:[%s4492_s1 + $0x4ec] ss:$16 sps:$4 sm:$0xff]   ;;  %v3224_v38 = vld [vmem:[%s4492_s1 + $0x4e0] ss:$16 sps:$4 sm:$0xff]  }
  0x63   :  { %1866 = vmatpush1.bf16.msra.mxu0 %v3132_v39  ;;  %2071 = vmatpush1.bf16.msra.mxu1 %v3135_v40  ;;  %v3227_v39 = vld [vmem:[%s4492_s1 + $0x4e8] ss:$16 sps:$4 sm:$0xff]   ;;  %v3232_v40 = vld [vmem:[%s4492_s1 + $0x504] ss:$16 sps:$4 sm:$0xff]  }
  0x64   :  { %1867 = vmatprep.subr.bf16.mxu0 %v3140_v41  ;;  %2072 = vmatprep.subr.bf16.mxu1 %v3143_v42  ;;  %v3235_v41 = vld [vmem:[%s4492_s1 + $0x50c] ss:$16 sps:$4 sm:$0xff]   ;;  %v3230_v42 = vld [vmem:[%s4492_s1 + $0x500] ss:$16 sps:$4 sm:$0xff]  }
  0x67   :  { %1868 = vmatpush1.bf16.msra.mxu0 %v3138_v43  ;;  %2073 = vmatpush1.bf16.msra.mxu1 %v3141_v44  ;;  %v3233_v43 = vld [vmem:[%s4492_s1 + $0x508] ss:$16 sps:$4 sm:$0xff]   ;;  %v3238_v44 = vld [vmem:[%s4492_s1 + $0x524] ss:$16 sps:$4 sm:$0xff]  }
  0x68   :  { %1869 = vmatprep.subr.bf16.mxu0 %v3146_v45  ;;  %2074 = vmatprep.subr.bf16.mxu1 %v3149_v46  ;;  %v3241_v45 = vld [vmem:[%s4492_s1 + $0x52c] ss:$16 sps:$4 sm:$0xff]   ;;  %v3236_v46 = vld [vmem:[%s4492_s1 + $0x520] ss:$16 sps:$4 sm:$0xff]  }
  0x6b   :  { %1870 = vmatpush1.bf16.msra.mxu0 %v3144_v47  ;;  %2075 = vmatpush1.bf16.msra.mxu1 %v3147_v48  ;;  %v3239_v47 = vld [vmem:[%s4492_s1 + $0x528] ss:$16 sps:$4 sm:$0xff]   ;;  %v3244_v48 = vld [vmem:[%s4492_s1 + $0x544] ss:$16 sps:$4 sm:$0xff]  }
  0x6c   :  { %1871 = vmatprep.subr.bf16.mxu0 %v3152_v49  ;;  %2076 = vmatprep.subr.bf16.mxu1 %v3155_v50  ;;  %v3247_v49 = vld [vmem:[%s4492_s1 + $0x54c] ss:$16 sps:$4 sm:$0xff]   ;;  %v3242_v50 = vld [vmem:[%s4492_s1 + $0x540] ss:$16 sps:$4 sm:$0xff]  }
  0x6f   :  { %1872 = vmatpush1.bf16.msra.mxu0 %v3150_v51  ;;  %2077 = vmatpush1.bf16.msra.mxu1 %v3153_v52  ;;  %v3245_v51 = vld [vmem:[%s4492_s1 + $0x548] ss:$16 sps:$4 sm:$0xff]   ;;  %v3250_v52 = vld [vmem:[%s4492_s1 + $0x564] ss:$16 sps:$4 sm:$0xff]  }
  0x70   :  { %1873 = vmatprep.subr.bf16.mxu0 %v3158_v53  ;;  %2078 = vmatprep.subr.bf16.mxu1 %v3161_v54  ;;  %v3253_v53 = vld [vmem:[%s4492_s1 + $0x56c] ss:$16 sps:$4 sm:$0xff]   ;;  %v3248_v54 = vld [vmem:[%s4492_s1 + $0x560] ss:$16 sps:$4 sm:$0xff]  }
  0x73   :  { %1874 = vmatpush1.bf16.msra.mxu0 %v3156_v55  ;;  %2079 = vmatpush1.bf16.msra.mxu1 %v3159_v56  ;;  %v3251_v55 = vld [vmem:[%s4492_s1 + $0x568] ss:$16 sps:$4 sm:$0xff]   ;;  %v3256_v56 = vld [vmem:[%s4492_s1 + $0x584] ss:$16 sps:$4 sm:$0xff]  }
  0x74   :  { %1875 = vmatprep.subr.bf16.mxu0 %v3164_v57  ;;  %2080 = vmatprep.subr.bf16.mxu1 %v3167_v58  ;;  %v3259_v57 = vld [vmem:[%s4492_s1 + $0x58c] ss:$16 sps:$4 sm:$0xff]   ;;  %v3254_v58 = vld [vmem:[%s4492_s1 + $0x580] ss:$16 sps:$4 sm:$0xff]  }
  0x77   :  { %1876 = vmatpush1.bf16.msra.mxu0 %v3162_v59  ;;  %2081 = vmatpush1.bf16.msra.mxu1 %v3165_v60  ;;  %v3257_v59 = vld [vmem:[%s4492_s1 + $0x588] ss:$16 sps:$4 sm:$0xff]   ;;  %v3262_v60 = vld [vmem:[%s4492_s1 + $0x5a4] ss:$16 sps:$4 sm:$0xff]  }
  0x78   :  { %1877 = vmatprep.subr.bf16.mxu0 %v3170_v61  ;;  %2082 = vmatprep.subr.bf16.mxu1 %v3173_v62  ;;  %v3265_v61 = vld [vmem:[%s4492_s1 + $0x5ac] ss:$16 sps:$4 sm:$0xff]   ;;  %v3260_v62 = vld [vmem:[%s4492_s1 + $0x5a0] ss:$16 sps:$4 sm:$0xff]  }
  0x7b   :  { %1878 = vmatpush1.bf16.msra.mxu0 %v3168_v63  ;;  %2083 = vmatpush1.bf16.msra.mxu1 %v3171_v0  ;;  %v3263_v63 = vld [vmem:[%s4492_s1 + $0x5a8] ss:$16 sps:$4 sm:$0xff]   ;;  %v3268_v0 = vld [vmem:[%s4492_s1 + $0x5c4] ss:$16 sps:$4 sm:$0xff]  }
  0x7c   :  { %1879 = vmatprep.subr.bf16.mxu0 %v3176_v1  ;;  %2084 = vmatprep.subr.bf16.mxu1 %v3179_v2  ;;  %v3271_v1 = vld [vmem:[%s4492_s1 + $0x5cc] ss:$16 sps:$4 sm:$0xff]   ;;  %v3266_v2 = vld [vmem:[%s4492_s1 + $0x5c0] ss:$16 sps:$4 sm:$0xff]  }
  0x7f   :  { %1880 = vmatpush1.bf16.msra.mxu0 %v3174_v3  ;;  %2085 = vmatpush1.bf16.msra.mxu1 %v3177_v4  ;;  %v3269_v3 = vld [vmem:[%s4492_s1 + $0x5c8] ss:$16 sps:$4 sm:$0xff]   ;;  %v3274_v4 = vld [vmem:[%s4492_s1 + $0x5e4] ss:$16 sps:$4 sm:$0xff]  }
  0x80   :  { %1890 = vmatprep.subr.bf16.mxu0 %v3184_v5  ;;  %2095 = vmatprep.subr.bf16.mxu1 %v3187_v6  ;;  %v3277_v5 = vld [vmem:[%s4492_s1 + $0x5ec] ss:$16 sps:$4 sm:$0xff]   ;;  %v3272_v6 = vld [vmem:[%s4492_s1 + $0x5e0] ss:$16 sps:$4 sm:$0xff]  }
  0x82   :  { %1882 = vmatmul.mubr.bf16.vlgmr.msra.gmra.mrb[0].mxu0 %v2577_v7  ;;  %2087 = vmatmul.mubr.bf16.vlgmr.msra.gmra.mrb[0].mxu1 %v2577_v7  ;;  %v3275_v7 = vld [vmem:[%s4492_s1 + $0x5e8] ss:$16 sps:$4 sm:$0xff]  }
  0x83   :  { %1891 = vmatpush1.bf16.msra.mxu0 %v3182_v8  ;;  %2096 = vmatpush1.bf16.msra.mxu1 %v3185_v9  ;;  %v3282_v8 = vld [vmem:[%s4492_s1 + $0x604] ss:$16 sps:$4 sm:$0xff]   ;;  %v3285_v9 = vld [vmem:[%s4492_s1 + $0x60c] ss:$16 sps:$4 sm:$0xff]  }
  0x84   :  { %1892 = vmatprep.subr.bf16.mxu0 %v3190_v10  ;;  %2097 = vmatprep.subr.bf16.mxu1 %v3193_v12  ;;  %v2579_v10 = vcombine.low %v3904_v11, %v3904_v11  ;;  %v3280_v12 = vld [vmem:[%s4492_s1 + $0x600] ss:$16 sps:$4 sm:$0xff]   ;;  %v3288_v11 = vld [vmem:[%s4492_s1 + $0x624] ss:$16 sps:$4 sm:$0xff]  }
  0x85   :  { %1922 = vmatprep.mubr.bf16.mxu0 %v2580_v13  ;;  %2127 = vmatprep.mubr.bf16.mxu1 %v2580_v13  ;;  %v4099_v13 = vld [vmem:[%s4493_s0 + $0x18] sm:$0xff] }
  0x87   :  { %1893 = vmatpush1.bf16.msra.mxu0 %v3188_v14  ;;  %2098 = vmatpush1.bf16.msra.mxu1 %v3191_v15  ;;  %v3283_v14 = vld [vmem:[%s4492_s1 + $0x608] ss:$16 sps:$4 sm:$0xff]   ;;  %v3291_v15 = vld [vmem:[%s4492_s1 + $0x62c] ss:$16 sps:$4 sm:$0xff]  }
  0x88   :  { %1894 = vmatprep.subr.bf16.mxu0 %v3196_v16  ;;  %2099 = vmatprep.subr.bf16.mxu1 %v3199_v17  ;;  %v3286_v16 = vld [vmem:[%s4492_s1 + $0x620] ss:$16 sps:$4 sm:$0xff]   ;;  %v2582_v17 = vcombine.high %v4099_v13, %v4099_v13 }
  0x8b   :  { %1895 = vmatpush1.bf16.msra.mxu0 %v3194_v18  ;;  %2100 = vmatpush1.bf16.msra.mxu1 %v3197_v19  ;;  %v3289_v18 = vld [vmem:[%s4492_s1 + $0x628] ss:$16 sps:$4 sm:$0xff]   ;;  %v3294_v19 = vld [vmem:[%s4492_s1 + $0x644] ss:$16 sps:$4 sm:$0xff]  }
  0x8c   :  { %1896 = vmatprep.subr.bf16.mxu0 %v3202_v20  ;;  %2101 = vmatprep.subr.bf16.mxu1 %v3205_v21  ;;  %v3297_v20 = vld [vmem:[%s4492_s1 + $0x64c] ss:$16 sps:$4 sm:$0xff]   ;;  %v3292_v21 = vld [vmem:[%s4492_s1 + $0x640] ss:$16 sps:$4 sm:$0xff]  }
  0x8f   :  { %1897 = vmatpush1.bf16.msra.mxu0 %v3200_v22  ;;  %2102 = vmatpush1.bf16.msra.mxu1 %v3203_v23  ;;  %v3295_v22 = vld [vmem:[%s4492_s1 + $0x648] ss:$16 sps:$4 sm:$0xff]   ;;  %v3300_v23 = vld [vmem:[%s4492_s1 + $0x664] ss:$16 sps:$4 sm:$0xff]  }
  0x90   :  { %1898 = vmatprep.subr.bf16.mxu0 %v3208_v24  ;;  %2103 = vmatprep.subr.bf16.mxu1 %v3211_v25  ;;  %v3303_v24 = vld [vmem:[%s4492_s1 + $0x66c] ss:$16 sps:$4 sm:$0xff]   ;;  %v3298_v25 = vld [vmem:[%s4492_s1 + $0x660] ss:$16 sps:$4 sm:$0xff]  }
  0x93   :  { %1899 = vmatpush1.bf16.msra.mxu0 %v3206_v26  ;;  %2104 = vmatpush1.bf16.msra.mxu1 %v3209_v27  ;;  %v3301_v26 = vld [vmem:[%s4492_s1 + $0x668] ss:$16 sps:$4 sm:$0xff]   ;;  %v3306_v27 = vld [vmem:[%s4492_s1 + $0x684] ss:$16 sps:$4 sm:$0xff]  }
  0x94   :  { %1900 = vmatprep.subr.bf16.mxu0 %v3214_v28  ;;  %2105 = vmatprep.subr.bf16.mxu1 %v3217_v29  ;;  %v3309_v28 = vld [vmem:[%s4492_s1 + $0x68c] ss:$16 sps:$4 sm:$0xff]   ;;  %v3304_v29 = vld [vmem:[%s4492_s1 + $0x680] ss:$16 sps:$4 sm:$0xff]  }
  0x97   :  { %1901 = vmatpush1.bf16.msra.mxu0 %v3212_v30  ;;  %2106 = vmatpush1.bf16.msra.mxu1 %v3215_v31  ;;  %v3307_v30 = vld [vmem:[%s4492_s1 + $0x688] ss:$16 sps:$4 sm:$0xff]   ;;  %v3312_v31 = vld [vmem:[%s4492_s1 + $0x6a4] ss:$16 sps:$4 sm:$0xff]  }
  0x98   :  { %1902 = vmatprep.subr.bf16.mxu0 %v3220_v32  ;;  %2107 = vmatprep.subr.bf16.mxu1 %v3223_v33  ;;  %v3315_v32 = vld [vmem:[%s4492_s1 + $0x6ac] ss:$16 sps:$4 sm:$0xff]   ;;  %v3310_v33 = vld [vmem:[%s4492_s1 + $0x6a0] ss:$16 sps:$4 sm:$0xff]  }
  0x9b   :  { %1903 = vmatpush1.bf16.msra.mxu0 %v3218_v34  ;;  %2108 = vmatpush1.bf16.msra.mxu1 %v3221_v35  ;;  %v3313_v34 = vld [vmem:[%s4492_s1 + $0x6a8] ss:$16 sps:$4 sm:$0xff]   ;;  %v3318_v35 = vld [vmem:[%s4492_s1 + $0x6c4] ss:$16 sps:$4 sm:$0xff]  }
  0x9c   :  { %1904 = vmatprep.subr.bf16.mxu0 %v3226_v36  ;;  %2109 = vmatprep.subr.bf16.mxu1 %v3229_v37  ;;  %v3321_v36 = vld [vmem:[%s4492_s1 + $0x6cc] ss:$16 sps:$4 sm:$0xff]   ;;  %v3316_v37 = vld [vmem:[%s4492_s1 + $0x6c0] ss:$16 sps:$4 sm:$0xff]  }
  0x9f   :  { %1905 = vmatpush1.bf16.msra.mxu0 %v3224_v38  ;;  %2110 = vmatpush1.bf16.msra.mxu1 %v3227_v39  ;;  %v3319_v38 = vld [vmem:[%s4492_s1 + $0x6c8] ss:$16 sps:$4 sm:$0xff]   ;;  %v3324_v39 = vld [vmem:[%s4492_s1 + $0x6e4] ss:$16 sps:$4 sm:$0xff]  }
  0xa0   :  { %1906 = vmatprep.subr.bf16.mxu0 %v3232_v40  ;;  %2111 = vmatprep.subr.bf16.mxu1 %v3235_v41  ;;  %v3327_v40 = vld [vmem:[%s4492_s1 + $0x6ec] ss:$16 sps:$4 sm:$0xff]   ;;  %v3322_v41 = vld [vmem:[%s4492_s1 + $0x6e0] ss:$16 sps:$4 sm:$0xff]  }
  0xa3   :  { %1907 = vmatpush1.bf16.msra.mxu0 %v3230_v42  ;;  %2112 = vmatpush1.bf16.msra.mxu1 %v3233_v43  ;;  %v3325_v42 = vld [vmem:[%s4492_s1 + $0x6e8] ss:$16 sps:$4 sm:$0xff]   ;;  %v3330_v43 = vld [vmem:[%s4492_s1 + $0x704] ss:$16 sps:$4 sm:$0xff]  }
  0xa4   :  { %1908 = vmatprep.subr.bf16.mxu0 %v3238_v44  ;;  %2113 = vmatprep.subr.bf16.mxu1 %v3241_v45  ;;  %v3333_v44 = vld [vmem:[%s4492_s1 + $0x70c] ss:$16 sps:$4 sm:$0xff]   ;;  %v3328_v45 = vld [vmem:[%s4492_s1 + $0x700] ss:$16 sps:$4 sm:$0xff]  }
  0xa7   :  { %1909 = vmatpush1.bf16.msra.mxu0 %v3236_v46  ;;  %2114 = vmatpush1.bf16.msra.mxu1 %v3239_v47  ;;  %v3331_v46 = vld [vmem:[%s4492_s1 + $0x708] ss:$16 sps:$4 sm:$0xff]   ;;  %v3336_v47 = vld [vmem:[%s4492_s1 + $0x724] ss:$16 sps:$4 sm:$0xff]  }
  0xa8   :  { %1910 = vmatprep.subr.bf16.mxu0 %v3244_v48  ;;  %2115 = vmatprep.subr.bf16.mxu1 %v3247_v49  ;;  %v3339_v48 = vld [vmem:[%s4492_s1 + $0x72c] ss:$16 sps:$4 sm:$0xff]   ;;  %v3334_v49 = vld [vmem:[%s4492_s1 + $0x720] ss:$16 sps:$4 sm:$0xff]  }
  0xab   :  { %1911 = vmatpush1.bf16.msra.mxu0 %v3242_v50  ;;  %2116 = vmatpush1.bf16.msra.mxu1 %v3245_v51  ;;  %v3337_v50 = vld [vmem:[%s4492_s1 + $0x728] ss:$16 sps:$4 sm:$0xff]   ;;  %v3342_v51 = vld [vmem:[%s4492_s1 + $0x744] ss:$16 sps:$4 sm:$0xff]  }
  0xac   :  { %1912 = vmatprep.subr.bf16.mxu0 %v3250_v52  ;;  %2117 = vmatprep.subr.bf16.mxu1 %v3253_v53  ;;  %v3345_v52 = vld [vmem:[%s4492_s1 + $0x74c] ss:$16 sps:$4 sm:$0xff]   ;;  %v3340_v53 = vld [vmem:[%s4492_s1 + $0x740] ss:$16 sps:$4 sm:$0xff]  }
  0xaf   :  { %1913 = vmatpush1.bf16.msra.mxu0 %v3248_v54  ;;  %2118 = vmatpush1.bf16.msra.mxu1 %v3251_v55  ;;  %v3343_v54 = vld [vmem:[%s4492_s1 + $0x748] ss:$16 sps:$4 sm:$0xff]   ;;  %v3348_v55 = vld [vmem:[%s4492_s1 + $0x764] ss:$16 sps:$4 sm:$0xff]  }
  0xb0   :  { %1914 = vmatprep.subr.bf16.mxu0 %v3256_v56  ;;  %2119 = vmatprep.subr.bf16.mxu1 %v3259_v57  ;;  %v3351_v56 = vld [vmem:[%s4492_s1 + $0x76c] ss:$16 sps:$4 sm:$0xff]   ;;  %v3346_v57 = vld [vmem:[%s4492_s1 + $0x760] ss:$16 sps:$4 sm:$0xff]  }
  0xb3   :  { %1915 = vmatpush1.bf16.msra.mxu0 %v3254_v58  ;;  %2120 = vmatpush1.bf16.msra.mxu1 %v3257_v59  ;;  %v3349_v58 = vld [vmem:[%s4492_s1 + $0x768] ss:$16 sps:$4 sm:$0xff]   ;;  %v3354_v59 = vld [vmem:[%s4492_s1 + $0x784] ss:$16 sps:$4 sm:$0xff]  }
  0xb4   :  { %1916 = vmatprep.subr.bf16.mxu0 %v3262_v60  ;;  %2121 = vmatprep.subr.bf16.mxu1 %v3265_v61  ;;  %v3357_v60 = vld [vmem:[%s4492_s1 + $0x78c] ss:$16 sps:$4 sm:$0xff]   ;;  %v3352_v61 = vld [vmem:[%s4492_s1 + $0x780] ss:$16 sps:$4 sm:$0xff]  }
  0xb7   :  { %1917 = vmatpush1.bf16.msra.mxu0 %v3260_v62  ;;  %2122 = vmatpush1.bf16.msra.mxu1 %v3263_v63  ;;  %v3355_v62 = vld [vmem:[%s4492_s1 + $0x788] ss:$16 sps:$4 sm:$0xff]   ;;  %v3360_v63 = vld [vmem:[%s4492_s1 + $0x7a4] ss:$16 sps:$4 sm:$0xff]  }
  0xb8   :  { %1918 = vmatprep.subr.bf16.mxu0 %v3268_v0  ;;  %2123 = vmatprep.subr.bf16.mxu1 %v3271_v1  ;;  %v3363_v0 = vld [vmem:[%s4492_s1 + $0x7ac] ss:$16 sps:$4 sm:$0xff]   ;;  %v3358_v1 = vld [vmem:[%s4492_s1 + $0x7a0] ss:$16 sps:$4 sm:$0xff]  }
  0xbb   :  { %1919 = vmatpush1.bf16.msra.mxu0 %v3266_v2  ;;  %2124 = vmatpush1.bf16.msra.mxu1 %v3269_v3  ;;  %v3361_v2 = vld [vmem:[%s4492_s1 + $0x7a8] ss:$16 sps:$4 sm:$0xff]   ;;  %v3366_v3 = vld [vmem:[%s4492_s1 + $0x7c4] ss:$16 sps:$4 sm:$0xff]  }
  0xbc   :  { %1920 = vmatprep.subr.bf16.mxu0 %v3274_v4  ;;  %2125 = vmatprep.subr.bf16.mxu1 %v3277_v5  ;;  %v3369_v4 = vld [vmem:[%s4492_s1 + $0x7cc] ss:$16 sps:$4 sm:$0xff]   ;;  %v3364_v5 = vld [vmem:[%s4492_s1 + $0x7c0] ss:$16 sps:$4 sm:$0xff]  }
  0xbf   :  { %1921 = vmatpush1.bf16.msra.mxu0 %v3272_v6  ;;  %2126 = vmatpush1.bf16.msra.mxu1 %v3275_v7  ;;  %v3367_v6 = vld [vmem:[%s4492_s1 + $0x7c8] ss:$16 sps:$4 sm:$0xff]   ;;  %v3372_v7 = vld [vmem:[%s4492_s1 + $0x7e4] ss:$16 sps:$4 sm:$0xff]  }
  0xc0   :  { %1931 = vmatprep.subr.bf16.mxu0 %v3282_v8  ;;  %2136 = vmatprep.subr.bf16.mxu1 %v3285_v9  ;;  %v3375_v8 = vld [vmem:[%s4492_s1 + $0x7ec] ss:$16 sps:$4 sm:$0xff]   ;;  %v3370_v9 = vld [vmem:[%s4492_s1 + $0x7e0] ss:$16 sps:$4 sm:$0xff]  }
  0xc2   :  { %1923 = vmatmul.mubr.bf16.vlgmr.msra.gmra.mrb[0].mxu0 %v2579_v10  ;;  %2128 = vmatmul.mubr.bf16.vlgmr.msra.gmra.mrb[0].mxu1 %v2579_v10  ;;  %v3373_v10 = vld [vmem:[%s4492_s1 + $0x7e8] ss:$16 sps:$4 sm:$0xff]  }
  0xc3   :  { %1932 = vmatpush1.bf16.msra.mxu0 %v3280_v12  ;;  %2137 = vmatpush1.bf16.msra.mxu1 %v3283_v14  ;;  %v3380_v12 = vld [vmem:[%s4492_s1 + $0x804] ss:$16 sps:$4 sm:$0xff]   ;;  %v3383_v14 = vld [vmem:[%s4492_s1 + $0x80c] ss:$16 sps:$4 sm:$0xff]  }
  0xc4   :  { %1933 = vmatprep.subr.bf16.mxu0 %v3288_v11  ;;  %2138 = vmatprep.subr.bf16.mxu1 %v3291_v15  ;;  %v2581_v11 = vcombine.low %v4099_v13, %v4099_v13  ;;  %v3378_v15 = vld [vmem:[%s4492_s1 + $0x800] ss:$16 sps:$4 sm:$0xff]   ;;  %v3389_v13 = vld [vmem:[%s4492_s1 + $0x82c] ss:$16 sps:$4 sm:$0xff]  }
  0xc5   :  { %1963 = vmatprep.mubr.bf16.mxu0 %v2582_v17  ;;  %2168 = vmatprep.mubr.bf16.mxu1 %v2582_v17  ;;  %v3386_v17 = vld [vmem:[%s4492_s1 + $0x824] ss:$16 sps:$4 sm:$0xff]  }
  0xc7   :  { %1934 = vmatpush1.bf16.msra.mxu0 %v3286_v16  ;;  %2139 = vmatpush1.bf16.msra.mxu1 %v3289_v18  ;;  %v3381_v16 = vld [vmem:[%s4492_s1 + $0x808] ss:$16 sps:$4 sm:$0xff]   ;;  %v3384_v18 = vld [vmem:[%s4492_s1 + $0x820] ss:$16 sps:$4 sm:$0xff]  }
  0xc8   :  { %1935 = vmatprep.subr.bf16.mxu0 %v3294_v19  ;;  %2140 = vmatprep.subr.bf16.mxu1 %v3297_v20  ;;  %v3387_v19 = vld [vmem:[%s4492_s1 + $0x828] ss:$16 sps:$4 sm:$0xff]   ;;  %v3392_v20 = vld [vmem:[%s4492_s1 + $0x844] ss:$16 sps:$4 sm:$0xff]  }
  0xcb   :  { %1936 = vmatpush1.bf16.msra.mxu0 %v3292_v21  ;;  %2141 = vmatpush1.bf16.msra.mxu1 %v3295_v22  ;;  %v3395_v21 = vld [vmem:[%s4492_s1 + $0x84c] ss:$16 sps:$4 sm:$0xff]   ;;  %v3459_v22 = vmov 0  }
  0xcc   :  { %1937 = vmatprep.subr.bf16.mxu0 %v3300_v23  ;;  %2142 = vmatprep.subr.bf16.mxu1 %v3303_v24  ;;  %v3390_v23 = vld [vmem:[%s4492_s1 + $0x840] ss:$16 sps:$4 sm:$0xff]   ;;  %v3393_v24 = vld [vmem:[%s4492_s1 + $0x848] ss:$16 sps:$4 sm:$0xff]  }
  0xcf   :  { %1938 = vmatpush1.bf16.msra.mxu0 %v3298_v25  ;;  %2143 = vmatpush1.bf16.msra.mxu1 %v3301_v26  ;;  %v3398_v25 = vld [vmem:[%s4492_s1 + $0x864] ss:$16 sps:$4 sm:$0xff]   ;;  %v3401_v26 = vld [vmem:[%s4492_s1 + $0x86c] ss:$16 sps:$4 sm:$0xff]  }
  0xd0   :  { %1939 = vmatprep.subr.bf16.mxu0 %v3306_v27  ;;  %2144 = vmatprep.subr.bf16.mxu1 %v3309_v28  ;;  %v3396_v27 = vld [vmem:[%s4492_s1 + $0x860] ss:$16 sps:$4 sm:$0xff]   ;;  %v3399_v28 = vld [vmem:[%s4492_s1 + $0x868] ss:$16 sps:$4 sm:$0xff]  }
  0xd3   :  { %1940 = vmatpush1.bf16.msra.mxu0 %v3304_v29  ;;  %2145 = vmatpush1.bf16.msra.mxu1 %v3307_v30  ;;  %v3404_v29 = vld [vmem:[%s4492_s1 + $0x884] ss:$16 sps:$4 sm:$0xff]   ;;  %v3407_v30 = vld [vmem:[%s4492_s1 + $0x88c] ss:$16 sps:$4 sm:$0xff]  }
  0xd4   :  { %1941 = vmatprep.subr.bf16.mxu0 %v3312_v31  ;;  %2146 = vmatprep.subr.bf16.mxu1 %v3315_v32  ;;  %v3402_v31 = vld [vmem:[%s4492_s1 + $0x880] ss:$16 sps:$4 sm:$0xff]   ;;  %v3405_v32 = vld [vmem:[%s4492_s1 + $0x888] ss:$16 sps:$4 sm:$0xff]  }
  0xd7   :  { %1942 = vmatpush1.bf16.msra.mxu0 %v3310_v33  ;;  %2147 = vmatpush1.bf16.msra.mxu1 %v3313_v34  ;;  %v3410_v33 = vld [vmem:[%s4492_s1 + $0x8a4] ss:$16 sps:$4 sm:$0xff]   ;;  %v3413_v34 = vld [vmem:[%s4492_s1 + $0x8ac] ss:$16 sps:$4 sm:$0xff]  }
  0xd8   :  { %1943 = vmatprep.subr.bf16.mxu0 %v3318_v35  ;;  %2148 = vmatprep.subr.bf16.mxu1 %v3321_v36  ;;  %v3408_v35 = vld [vmem:[%s4492_s1 + $0x8a0] ss:$16 sps:$4 sm:$0xff]   ;;  %v3411_v36 = vld [vmem:[%s4492_s1 + $0x8a8] ss:$16 sps:$4 sm:$0xff]  }
  0xdb   :  { %1944 = vmatpush1.bf16.msra.mxu0 %v3316_v37  ;;  %2149 = vmatpush1.bf16.msra.mxu1 %v3319_v38  ;;  %v3416_v37 = vld [vmem:[%s4492_s1 + $0x8c4] ss:$16 sps:$4 sm:$0xff]   ;;  %v3419_v38 = vld [vmem:[%s4492_s1 + $0x8cc] ss:$16 sps:$4 sm:$0xff]  }
  0xdc   :  { %1945 = vmatprep.subr.bf16.mxu0 %v3324_v39  ;;  %2150 = vmatprep.subr.bf16.mxu1 %v3327_v40  ;;  %v3414_v39 = vld [vmem:[%s4492_s1 + $0x8c0] ss:$16 sps:$4 sm:$0xff]   ;;  %v3417_v40 = vld [vmem:[%s4492_s1 + $0x8c8] ss:$16 sps:$4 sm:$0xff]  }
  0xdf   :  { %1946 = vmatpush1.bf16.msra.mxu0 %v3322_v41  ;;  %2151 = vmatpush1.bf16.msra.mxu1 %v3325_v42  ;;  %v3422_v41 = vld [vmem:[%s4492_s1 + $0x8e4] ss:$16 sps:$4 sm:$0xff]   ;;  %v3425_v42 = vld [vmem:[%s4492_s1 + $0x8ec] ss:$16 sps:$4 sm:$0xff]  }
  0xe0   :  { %1947 = vmatprep.subr.bf16.mxu0 %v3330_v43  ;;  %2152 = vmatprep.subr.bf16.mxu1 %v3333_v44  ;;  %v3420_v43 = vld [vmem:[%s4492_s1 + $0x8e0] ss:$16 sps:$4 sm:$0xff]   ;;  %v3423_v44 = vld [vmem:[%s4492_s1 + $0x8e8] ss:$16 sps:$4 sm:$0xff]  }
  0xe3   :  { %1948 = vmatpush1.bf16.msra.mxu0 %v3328_v45  ;;  %2153 = vmatpush1.bf16.msra.mxu1 %v3331_v46  ;;  %v3427_v45 = vld [vmem:[%s4494_s3 + $0x40] sm:$0xff]  }
  0xe4   :  { %1949 = vmatprep.subr.bf16.mxu0 %v3336_v47  ;;  %2154 = vmatprep.subr.bf16.mxu1 %v3339_v48  ;;  %v3428_v46 = vld [vmem:[%s4494_s3 + $0xc0] sm:$0xff]  }
  0xe5   :  { %v3426_v47 = vld [vmem:[%s4493_s0 + $0x20] ss:$0 sps:$4 sm:$0xff]  }
  0xe6   :  { %v3429_v48 = vld [vmem:[%s4494_s3] sm:$0xff]  }
  0xe7   :  { %1950 = vmatpush1.bf16.msra.mxu0 %v3334_v49  ;;  %2155 = vmatpush1.bf16.msra.mxu1 %v3337_v50  ;;  %v3430_v49 = vld [vmem:[%s4494_s3 + $0x80] sm:$0xff]   ;;  %v3431_v50 = vld [vmem:[%s4494_s3 + $0x48] sm:$0xff]  }
  0xe8   :  { %1951 = vmatprep.subr.bf16.mxu0 %v3342_v51  ;;  %2156 = vmatprep.subr.bf16.mxu1 %v3345_v52  ;;  %v3432_v51 = vld [vmem:[%s4494_s3 + $0xc8] sm:$0xff]  }
  0xe9   :  { %v3433_v52 = vld [vmem:[%s4494_s3 + $0x8] sm:$0xff]  }
  0xeb   :  { %1952 = vmatpush1.bf16.msra.mxu0 %v3340_v53  ;;  %2157 = vmatpush1.bf16.msra.mxu1 %v3343_v54  ;;  %v3434_v53 = vld [vmem:[%s4494_s3 + $0x88] sm:$0xff]   ;;  %v3435_v54 = vld [vmem:[%s4494_s3 + $0x50] sm:$0xff]  }
  0xec   :  { %1953 = vmatprep.subr.bf16.mxu0 %v3348_v55  ;;  %2158 = vmatprep.subr.bf16.mxu1 %v3351_v56  ;;  %v3436_v55 = vld [vmem:[%s4494_s3 + $0xd0] sm:$0xff]  }
  0xed   :  { %v3437_v56 = vld [vmem:[%s4494_s3 + $0x10] sm:$0xff]  }
  0xef   :  { %1954 = vmatpush1.bf16.msra.mxu0 %v3346_v57  ;;  %2159 = vmatpush1.bf16.msra.mxu1 %v3349_v58  ;;  %v3438_v57 = vld [vmem:[%s4494_s3 + $0x90] sm:$0xff]   ;;  %v3439_v58 = vld [vmem:[%s4494_s3 + $0x58] sm:$0xff]  }
  0xf0   :  { %1955 = vmatprep.subr.bf16.mxu0 %v3354_v59  ;;  %2160 = vmatprep.subr.bf16.mxu1 %v3357_v60  ;;  %v3440_v59 = vld [vmem:[%s4494_s3 + $0xd8] sm:$0xff]  }
  0xf1   :  { %v3441_v60 = vld [vmem:[%s4494_s3 + $0x18] sm:$0xff]  }
  0xf3   :  { %1956 = vmatpush1.bf16.msra.mxu0 %v3352_v61  ;;  %2161 = vmatpush1.bf16.msra.mxu1 %v3355_v62  ;;  %v3442_v61 = vld [vmem:[%s4494_s3 + $0x98] sm:$0xff]   ;;  %v3443_v62 = vld [vmem:[%s4494_s3 + $0x60] sm:$0xff]  }
  0xf4   :  { %1957 = vmatprep.subr.bf16.mxu0 %v3360_v63  ;;  %2162 = vmatprep.subr.bf16.mxu1 %v3363_v0  ;;  %v3444_v63 = vld [vmem:[%s4494_s3 + $0xe0] sm:$0xff]  }
  0xf5   :  { %v3445_v0 = vld [vmem:[%s4494_s3 + $0x20] sm:$0xff]  }
  0xf7   :  { %1958 = vmatpush1.bf16.msra.mxu0 %v3358_v1  ;;  %2163 = vmatpush1.bf16.msra.mxu1 %v3361_v2  ;;  %v3446_v1 = vld [vmem:[%s4494_s3 + $0xa0] sm:$0xff]   ;;  %v3447_v2 = vld [vmem:[%s4494_s3 + $0x68] sm:$0xff]  }
  0xf8   :  { %1959 = vmatprep.subr.bf16.mxu0 %v3366_v3  ;;  %2164 = vmatprep.subr.bf16.mxu1 %v3369_v4  ;;  %v3448_v3 = vld [vmem:[%s4494_s3 + $0xe8] sm:$0xff]  }
  0xf9   :  { %v3449_v4 = vld [vmem:[%s4494_s3 + $0x28] sm:$0xff]  }
  0xfb   :  { %1960 = vmatpush1.bf16.msra.mxu0 %v3364_v5  ;;  %2165 = vmatpush1.bf16.msra.mxu1 %v3367_v6  ;;  %v3450_v5 = vld [vmem:[%s4494_s3 + $0xa8] sm:$0xff]   ;;  %v3451_v6 = vld [vmem:[%s4494_s3 + $0x70] sm:$0xff]  }
  0xfc   :  { %1961 = vmatprep.subr.bf16.mxu0 %v3372_v7  ;;  %2166 = vmatprep.subr.bf16.mxu1 %v3375_v8  ;;  %v3452_v7 = vld [vmem:[%s4494_s3 + $0xf0] sm:$0xff]  }
  0xfd   :  { %v3453_v8 = vld [vmem:[%s4494_s3 + $0x30] sm:$0xff]  }
  0xff   :  { %1962 = vmatpush1.bf16.msra.mxu0 %v3370_v9  ;;  %2167 = vmatpush1.bf16.msra.mxu1 %v3373_v10  ;;  %v3454_v9 = vld [vmem:[%s4494_s3 + $0xb0] sm:$0xff]   ;;  %v3455_v10 = vld [vmem:[%s4494_s3 + $0x78] sm:$0xff]  }
 0x100   :  { %1972 = vmatprep.subr.bf16.mxu0 %v3380_v12  ;;  %2177 = vmatprep.subr.bf16.mxu1 %v3383_v14  ;;  %v3456_v12 = vld [vmem:[%s4494_s3 + $0xf8] sm:$0xff]  }
 0x101   :  { %v3457_v14 = vld [vmem:[%s4494_s3 + $0x38] sm:$0xff]  }
 0x102   :  { %1964 = vmatmul.mubr.bf16.vlgmr.msra.gmra.mrb[0].mxu0 %v2581_v11  ;;  %2169 = vmatmul.mubr.bf16.vlgmr.msra.gmra.mrb[0].mxu1 %v2581_v11  ;;  %v3458_v11 = vld [vmem:[%s4494_s3 + $0xb8] sm:$0xff]  }
 0x103   :  { %1973 = vmatpush1.bf16.msra.mxu0 %v3378_v15  ;;  %2178 = vmatpush1.bf16.msra.mxu1 %v3381_v16  ;;  %v316_v15 = vlaneseq }
 0x104   :  { %1974 = vmatprep.subr.bf16.mxu0 %v3386_v17  ;;  %2179 = vmatprep.subr.bf16.mxu1 %v3389_v13 }
 0x105   :  { %2004 = vmatprep.mubr.bf16.mxu0 %v3459_v22  ;;  %2209 = vmatprep.mubr.bf16.mxu1 %v3459_v22  ;;  %v317_v16 = vshrl.u32 %v316_v15, 7 }
 0x107   :  { %1975 = vmatpush1.bf16.msra.mxu0 %v3384_v18  ;;  %2180 = vmatpush1.bf16.msra.mxu1 %v3387_v19  ;;  %v318_v17 = vsub.s32 0, %v317_v16  ;;  %v326_v13 = vsub.s32 2, %v317_v16  ;;  %v314_v18 = vld [vmem:[%s4495_s2] sm:$0xf]  ;;  %v322_v19 = vsub.s32 1, %v317_v16 }
 0x108   :  { %1976 = vmatprep.subr.bf16.mxu0 %v3392_v20  ;;  %2181 = vmatprep.subr.bf16.mxu1 %v3395_v21  ;;  %v330_v20 = vsub.s32 3, %v317_v16 }
 0x109   :  { %v319_v21 = vrot.slane %v314_v18, %v318_v17  ;;  %v327_v22 = vrot.slane %v314_v18, %v326_v13 }
 0x10b   :  { %1977 = vmatpush1.bf16.msra.mxu0 %v3390_v23  ;;  %2182 = vmatpush1.bf16.msra.mxu1 %v3393_v24  ;;  %v323_v23 = vrot.slane %v314_v18, %v322_v19  ;;  %v331_v24 = vrot.slane %v314_v18, %v330_v20 }
 0x10c   :  { %1978 = vmatprep.subr.bf16.mxu0 %v3398_v25  ;;  %2183 = vmatprep.subr.bf16.mxu1 %v3401_v26 }
 0x10f   :  { %1979 = vmatpush1.bf16.msra.mxu0 %v3396_v27  ;;  %2184 = vmatpush1.bf16.msra.mxu1 %v3399_v28 }
 0x110   :  { %1980 = vmatprep.subr.bf16.mxu0 %v3404_v29  ;;  %2185 = vmatprep.subr.bf16.mxu1 %v3407_v30 }
 0x113   :  { %1981 = vmatpush1.bf16.msra.mxu0 %v3402_v31  ;;  %2186 = vmatpush1.bf16.msra.mxu1 %v3405_v32 }
 0x114   :  { %1982 = vmatprep.subr.bf16.mxu0 %v3410_v33  ;;  %2187 = vmatprep.subr.bf16.mxu1 %v3413_v34 }
 0x117   :  { %1983 = vmatpush1.bf16.msra.mxu0 %v3408_v35  ;;  %2188 = vmatpush1.bf16.msra.mxu1 %v3411_v36 }
 0x118   :  { %1984 = vmatprep.subr.bf16.mxu0 %v3416_v37  ;;  %2189 = vmatprep.subr.bf16.mxu1 %v3419_v38 }
 0x11b   :  { %1985 = vmatpush1.bf16.msra.mxu0 %v3414_v39  ;;  %2190 = vmatpush1.bf16.msra.mxu1 %v3417_v40 }
 0x11c   :  { %1986 = vmatprep.subr.bf16.mxu0 %v3422_v41  ;;  %2191 = vmatprep.subr.bf16.mxu1 %v3425_v42 }
 0x11f   :  { %1987 = vmatpush1.bf16.msra.mxu0 %v3420_v43  ;;  %2192 = vmatpush1.bf16.msra.mxu1 %v3423_v44 }
 0x120   :  { %2905 = vmatprep.subr.bf16.mxu0 %v3427_v45  ;;  %2927 = vmatprep.subr.bf16.mxu1 %v3428_v46 }
 0x122   :  { %2005 = vmatmul.mubr.bf16.vlgmr.msra.gmra.mrb[0].mxu0 %v3426_v47  ;;  %2210 = vmatmul.mubr.bf16.vlgmr.msra.gmra.mrb[0].mxu1 %v3426_v47  ;;  %v2872_v47 = vld [vmem:[%s4496_s4] ss:$0 sm:$0xff] }
 0x123   :  { %2906 = vmatpush3.bf16.msra.mxu0 %v3429_v48  ;;  %2928 = vmatpush3.bf16.msra.mxu1 %v3430_v49 }
 0x124   :  { %2907 = vmatprep.subr.bf16.mxu0 %v3431_v50  ;;  %2929 = vmatprep.subr.bf16.mxu1 %v3432_v51 }
 0x127   :  { %2908 = vmatpush3.bf16.msra.mxu0 %v3433_v52  ;;  %2930 = vmatpush3.bf16.msra.mxu1 %v3434_v53 }
 0x128   :  { %2909 = vmatprep.subr.bf16.mxu0 %v3435_v54  ;;  %2931 = vmatprep.subr.bf16.mxu1 %v3436_v55 }
 0x12b   :  { %2910 = vmatpush3.bf16.msra.mxu0 %v3437_v56  ;;  %2932 = vmatpush3.bf16.msra.mxu1 %v3438_v57 }
 0x12c   :  { %2911 = vmatprep.subr.bf16.mxu0 %v3439_v58  ;;  %2933 = vmatprep.subr.bf16.mxu1 %v3440_v59 }
 0x12f   :  { %2912 = vmatpush3.bf16.msra.mxu0 %v3441_v60  ;;  %2934 = vmatpush3.bf16.msra.mxu1 %v3442_v61 }
 0x130   :  { %2913 = vmatprep.subr.bf16.mxu0 %v3443_v62  ;;  %2935 = vmatprep.subr.bf16.mxu1 %v3444_v63 }
 0x133   :  { %2914 = vmatpush3.bf16.msra.mxu0 %v3445_v0  ;;  %2936 = vmatpush3.bf16.msra.mxu1 %v3446_v1 }
 0x134   :  { %2915 = vmatprep.subr.bf16.mxu0 %v3447_v2  ;;  %2937 = vmatprep.subr.bf16.mxu1 %v3448_v3 }
 0x137   :  { %2916 = vmatpush3.bf16.msra.mxu0 %v3449_v4  ;;  %2938 = vmatpush3.bf16.msra.mxu1 %v3450_v5 }
 0x138   :  { %2917 = vmatprep.subr.bf16.mxu0 %v3451_v6  ;;  %2939 = vmatprep.subr.bf16.mxu1 %v3452_v7 }
 0x13b   :  { %2918 = vmatpush3.bf16.msra.mxu0 %v3453_v8  ;;  %2940 = vmatpush3.bf16.msra.mxu1 %v3454_v9 }
 0x13c   :  { %2919 = vmatprep.subr.bf16.mxu0 %v3455_v10  ;;  %2941 = vmatprep.subr.bf16.mxu1 %v3456_v12 }
 0x13f   :  { %2920 = vmatpush3.bf16.msra.mxu0 %v3457_v14  ;;  %2942 = vmatpush3.bf16.msra.mxu1 %v3458_v11 }
 0x1f5   :  { %v2006_v25 = vpop.f32.mrb[0].mxu0  ;;  %v2211_v26 = vpop.f32.mrb[0].mxu1 }
 0x1f6   :  { %v2949_v27 = vadd.f32 %v2006_v25, %v319_v21  ;;  %v2951_v28 = vadd.f32 %v2211_v26, %v327_v22  ;;  %v2008_v29 = vpop.f32.mrb[1].mxu0  ;;  %v2213_v30 = vpop.f32.mrb[1].mxu1 }
 0x1f7   :  { %v2950_v31 = vadd.f32 %v2008_v29, %v323_v23  ;;  %v2952_v32 = vadd.f32 %v2213_v30, %v331_v24  ;;  %v2010_v33 = vpop.f32.mrb[2].mxu0  ;;  %v2215_v34 = vpop.f32.mrb[2].mxu1 }
 0x1f8   :  { %v2218_v35 = vmax.f32 %v2949_v27, 0.0  ;;  %v2220_v36 = vmax.f32 %v2951_v28, 0.0  ;;  %v2011_v37 = vpop.f32.mrb[3].mxu0  ;;  %v2216_v38 = vpop.f32.mrb[3].mxu1 }
 0x1f9   :  { %v2219_v39 = vmax.f32 %v2950_v31, 0.0  ;;  %v2221_v40 = vmax.f32 %v2952_v32, 0.0 }
 0x1fa   :  { %v2222_v43 = vpack.c.bf16 %v2218_v35, %v2218_v35  ;;  %v2224_v44 = vpack.c.bf16 %v2220_v36, %v2220_v36 }
 0x1fb   :  { %v2223_v41 = vpack.c.bf16 %v2219_v39, %v2219_v39  ;;  %v2225_v42 = vpack.c.bf16 %v2221_v40, %v2221_v40 }
 0x1fd   :  { %2521 = vmatprep.mubr.bf16.mxu0 %v2223_v41  ;;  %2561 = vmatprep.mubr.bf16.mxu1 %v2225_v42 }
 0x1fe   :  { %2522 = vmatmul.mubr.bf16.vlgmr.msra.gmra.mrb[4].mxu0 %v2222_v43  ;;  %2562 = vmatmul.mubr.bf16.vlgmr.msra.gmra.mrb[4].mxu1 %v2224_v44 }
 0x2d1   :  { %v2921_v45 = vpop.f32.mrb[4].mxu0  ;;  %v2943_v46 = vpop.f32.mrb[4].mxu1 }
 0x2d2   :  { %v2922_v48 = vpop.f32.mrb[5].mxu0  ;;  %v2944_v49 = vpop.f32.mrb[5].mxu1 }
 0x2d3   :  { %v2923_v50 = vadd.f32 %v2922_v48, %v2921_v45  ;;  %v2945_v51 = vadd.f32 %v2944_v49, %v2943_v46  ;;  %v2924_v52 = vpop.f32.mrb[6].mxu0  ;;  %v2946_v53 = vpop.f32.mrb[6].mxu1 }
 0x2d4   :  { %v2925_v54 = vpop.f32.mrb[7].mxu0  ;;  %v2947_v55 = vpop.f32.mrb[7].mxu1 }
 0x2d5   :  { %v2524_v56 = vadd.f32 %v2923_v50, %v2872_v47 }
 0x2d7   :  { %v2564_v57 = vadd.f32 %v2945_v51, %v2524_v56 }
 0x2d9   :  { %2570 = vst.msk [vmem:[%s4497_s5] sm:$0xff] %vm2569_vm0, %v2564_v57 }

</bundles_post_ra>
